<compile_context>
chip_gen: v7x
topology: tpu7x:2x2x1
jax: 0.10.0
libtpu: 0.0.40
codegen_flags: <defaults>
</compile_context>

<pallas_src>
import math
import functools

import jax
import jax.numpy as jnp
from jax.experimental import pallas as pl
from jax.experimental.pallas import tpu as pltpu


# ----------------------------- model config ---------------------------------
INPUT_DIM = 50      # src vocab size
OUTPUT_DIM = 50     # trg vocab size
HID_DIM = 32
N_LAYERS = 2
N_HEADS = 4
PF_DIM = 64
HEAD_DIM = HID_DIM // N_HEADS
MAX_LEN = 200
EMB_ROWS = 128      # embedding tables zero-padded to a lane-aligned row count
SRC_PAD_IDX = 0
TRG_PAD_IDX = 0

BATCH = 2
SRC_SEQ = 8
TRG_SEQ = 8


# ----------------------------- kernel helpers --------------------------------
def _layer_norm(x, g, b, eps=1e-5):
    # PyTorch LayerNorm: biased variance over the last dim, default eps=1e-5.
    mu = jnp.mean(x, axis=-1, keepdims=True)
    var = jnp.mean((x - mu) ** 2, axis=-1, keepdims=True)
    return (x - mu) * jax.lax.rsqrt(var + eps) * g + b


def _mha(xq, xkv, wq, bq, wk, wvo, b_attn, add_mask, n_heads):
    """Multi-head attention with head-major, pre-folded weights.

    wq, wk: (nh, H, hd)  (1/sqrt(hd) folded into wq and bq)
    bq:     (nh, 1, hd)
    wvo:    (nh, H, H)   (= Wv_h @ Wo_h, output projection pre-folded)
    b_attn: (1, H)       (= bo + bv @ Wo; exact since softmax rows sum to 1)
    add_mask: (Q, K) additive bias (0 keep / -1e10 drop), encodes batch
              block-diagonal structure + key padding (+ causal for decoder).
    Returns (attn_out (Q, H), probs (nh, Q, K)).
    """
    f32 = jnp.float32
    qh = jnp.stack([jnp.dot(xq, wq[h], preferred_element_type=f32) + bq[h]
                    for h in range(n_heads)], axis=0)            # (nh, Q, hd)
    kh = jnp.stack([jnp.dot(xkv, wk[h], preferred_element_type=f32)
                    for h in range(n_heads)], axis=0)            # (nh, K, hd)
    voh = jnp.stack([jnp.dot(xkv, wvo[h], preferred_element_type=f32)
                     for h in range(n_heads)], axis=0)           # (nh, K, H)

    e = jnp.einsum('hqd,hkd->hqk', qh, kh, preferred_element_type=f32)
    e = e + add_mask[None, :, :]
    e = e - jnp.max(e, axis=-1, keepdims=True)
    p = jnp.exp(e)
    p = p * pl.reciprocal(jnp.sum(p, axis=-1, keepdims=True), approx=True)

    ctx = jnp.einsum('hqk,hkd->hqd', p, voh, preferred_element_type=f32)  # (nh, Q, H)
    out = ctx[0]
    for h in range(1, n_heads):
        out = out + ctx[h]
    return out + b_attn, p


# ----------------------------- the fused kernel -------------------------------
def seq2seq_kernel(src_col_ref, trg_col_ref,
                   enc_mask_ref, dec_mask_ref, cross_mask_ref,
                   e_tok_ref, e_pos_ref, d_tok_ref, d_pos_ref,
                   e_wq_ref, e_bq_ref, e_wk_ref, e_wvo_ref,
                   e_w1_ref, e_b1_ref, e_w2_ref, e_vec_ref,
                   d_wq_ref, d_bq_ref, d_wk_ref, d_wvo_ref,
                   d_w1_ref, d_b1_ref, d_w2_ref, d_vec_ref,
                   w_out_ref, b_out_ref,
                   out_ref, attn_ref,
                   *, n_layers, n_heads, emb_rows):
    f32 = jnp.float32
    bs_s = src_col_ref.shape[0]                   # B * src_len
    bs_t = trg_col_ref.shape[0]                   # B * trg_len

    # ---- encoder: token + positional embedding (one-hot MXU gather) ----------
    src_oh = jnp.where(
        jax.lax.broadcasted_iota(jnp.int32, (bs_s, emb_rows), 1) == src_col_ref[...],
        1.0, 0.0)
    x = jnp.dot(src_oh, e_tok_ref[...], preferred_element_type=f32) + e_pos_ref[...]

    enc_mask = enc_mask_ref[...]
    for l in range(n_layers):                     # static unroll
        hv = e_vec_ref[l]                         # (6,H): b_attn, ln1_g, ln1_b, b2, ln2_g, ln2_b
        attn, _ = _mha(x, x, e_wq_ref[l], e_bq_ref[l], e_wk_ref[l], e_wvo_ref[l],
                       hv[0:1, :], enc_mask, n_heads)
        y = _layer_norm(x + attn, hv[1:2, :], hv[2:3, :])
        f = jnp.maximum(
            jnp.dot(y, e_w1_ref[l], preferred_element_type=f32) + e_b1_ref[l], 0.0)
        f = jnp.dot(f, e_w2_ref[l], preferred_element_type=f32) + hv[3:4, :]
        x = _layer_norm(y + f, hv[4:5, :], hv[5:6, :])
    enc_src = x

    # ---- decoder: embedding, masked self-attn, cross-attn, FFN ---------------
    trg_oh = jnp.where(
        jax.lax.broadcasted_iota(jnp.int32, (bs_t, emb_rows), 1) == trg_col_ref[...],
        1.0, 0.0)
    t = jnp.dot(trg_oh, d_tok_ref[...], preferred_element_type=f32) + d_pos_ref[...]

    dec_mask = dec_mask_ref[...]
    cross_mask = cross_mask_ref[...]
    p_cross = None
    for l in range(n_layers):
        hv = d_vec_ref[l]                         # (9,H)
        sa, _ = _mha(t, t, d_wq_ref[2 * l], d_bq_ref[2 * l], d_wk_ref[2 * l],
                     d_wvo_ref[2 * l], hv[0:1, :], dec_mask, n_heads)
        t = _layer_norm(t + sa, hv[1:2, :], hv[2:3, :])
        ca, p_cross = _mha(t, enc_src, d_wq_ref[2 * l + 1], d_bq_ref[2 * l + 1],
                           d_wk_ref[2 * l + 1], d_wvo_ref[2 * l + 1],
                           hv[3:4, :], cross_mask, n_heads)
        t = _layer_norm(t + ca, hv[4:5, :], hv[5:6, :])
        f = jnp.maximum(
            jnp.dot(t, d_w1_ref[l], preferred_element_type=f32) + d_b1_ref[l], 0.0)
        f = jnp.dot(f, d_w2_ref[l], preferred_element_type=f32) + hv[6:7, :]
        t = _layer_norm(t + f, hv[7:8, :], hv[8:9, :])

    # ---- fc_out + returned attention map (last decoder layer, cross-attn) ----
    out_ref[...] = jnp.dot(t, w_out_ref[...], preferred_element_type=f32) + b_out_ref[...]
    attn_ref[...] = p_cross


# ----------------------------- jitted forward ---------------------------------
@jax.jit
def seq2seq_forward(src, trg, params):
    """src: (B,Ss) int32, trg: (B,St) int32 -> (output (B,St,OUTPUT_DIM),
    attention (B,N_HEADS,St,Ss)).  Mirrors Seq2Seq.forward in eval mode."""
    (e_tok_s, e_pos_tab, d_tok_s, d_pos_tab,
     e_wq, e_bq, e_wk, e_wvo, e_w1, e_b1, e_w2, e_vec,
     d_wq, d_bq, d_wk, d_wvo, d_w1, d_b1, d_w2, d_vec,
     w_out, b_out) = params
    B, Ss = src.shape
    St = trg.shape[1]
    f32 = jnp.float32

    # make_src_mask / make_trg_mask as flattened additive biases; the kron(eye)
    # block-diagonal term restricts attention to the same batch element under
    # the row-major (b, s) flattening used everywhere below.
    same_ss = jnp.kron(jnp.eye(B, dtype=f32), jnp.ones((Ss, Ss), f32))
    same_tt = jnp.kron(jnp.eye(B, dtype=f32), jnp.ones((St, St), f32))
    same_ts = jnp.kron(jnp.eye(B, dtype=f32), jnp.ones((St, Ss), f32))
    src_keep = (src.reshape(1, B * Ss) != SRC_PAD_IDX).astype(f32)
    trg_keep = (trg.reshape(1, B * St) != TRG_PAD_IDX).astype(f32)
    causal = jnp.tile(jnp.tril(jnp.ones((St, St), f32)), (B, B))
    to_bias = lambda keep: (keep - 1.0) * jnp.float32(1e10)
    enc_mask = to_bias(same_ss * src_keep)                     # (B*Ss, B*Ss)
    dec_mask = to_bias(same_tt * trg_keep * causal)            # (B*St, B*St)
    cross_mask = to_bias(same_ts * src_keep)                   # (B*St, B*Ss)

    src_col = src.reshape(B * Ss, 1).astype(jnp.int32)
    trg_col = trg.reshape(B * St, 1).astype(jnp.int32)
    e_pos = jnp.tile(e_pos_tab[:Ss], (B, 1))                   # (B*Ss, H)
    d_pos = jnp.tile(d_pos_tab[:St], (B, 1))                   # (B*St, H)

    inputs = (src_col, trg_col, enc_mask, dec_mask, cross_mask,
              e_tok_s, e_pos, d_tok_s, d_pos,
              e_wq, e_bq, e_wk, e_wvo, e_w1, e_b1, e_w2, e_vec,
              d_wq, d_bq, d_wk, d_wvo, d_w1, d_b1, d_w2, d_vec,
              w_out, b_out)

    kernel = functools.partial(seq2seq_kernel, n_layers=N_LAYERS, n_heads=N_HEADS,
                               emb_rows=EMB_ROWS)
    vmem = lambda: pl.BlockSpec(memory_space=pltpu.MemorySpace.VMEM)

    out2d, p_flat = pl.pallas_call(
        kernel,
        out_shape=(jax.ShapeDtypeStruct((B * St, OUTPUT_DIM), jnp.float32),
                   jax.ShapeDtypeStruct((N_HEADS, B * St, B * Ss), jnp.float32)),
        in_specs=[vmem() for _ in inputs],
        out_specs=(vmem(), vmem()),
    )(*inputs)

    output = out2d.reshape(B, St, OUTPUT_DIM)
    idx = jnp.arange(B)
    # pull the per-batch diagonal blocks out of the flattened cross-attention map
    attention = p_flat.reshape(N_HEADS, B, St, B, Ss)[:, idx, :, idx, :]  # (B, nh, St, Ss)
    return output, attention


# ----------------------------- parameter setup --------------------------------
def init_params(key):
    kit = iter(jax.random.split(key, 256))

    def lin(din, dout):
        w = 0.05 * jax.random.normal(next(kit), (din, dout), jnp.float32)
        b = 0.01 * jax.random.normal(next(kit), (1, dout), jnp.float32)
        return w, b

    def attn():
        wq, bq = lin(HID_DIM, HID_DIM)
        wk, bk = lin(HID_DIM, HID_DIM)
        wv, bv = lin(HID_DIM, HID_DIM)
        wo, bo = lin(HID_DIM, HID_DIM)
        return dict(wq=wq, bq=bq, wk=wk, bk=bk, wv=wv, bv=bv, wo=wo, bo=bo)

    def ln():
        return jnp.ones((1, HID_DIM), jnp.float32), jnp.zeros((1, HID_DIM), jnp.float32)

    enc_layers, dec_layers = [], []
    for _ in range(N_LAYERS):
        w1, b1 = lin(HID_DIM, PF_DIM)
        w2, b2 = lin(PF_DIM, HID_DIM)
        g1, be1 = ln(); g2, be2 = ln()
        enc_layers.append(dict(attn=attn(), w1=w1, b1=b1, w2=w2, b2=b2,
                               ln1_g=g1, ln1_b=be1, ln2_g=g2, ln2_b=be2))
    for _ in range(N_LAYERS):
        w1, b1 = lin(HID_DIM, PF_DIM)
        w2, b2 = lin(PF_DIM, HID_DIM)
        gs, bs = ln(); gc, bc = ln(); gf, bf = ln()
        dec_layers.append(dict(self_attn=attn(), cross_attn=attn(),
                               w1=w1, b1=b1, w2=w2, b2=b2,
                               ln_sa_g=gs, ln_sa_b=bs, ln_ca_g=gc, ln_ca_b=bc,
                               ln_ff_g=gf, ln_ff_b=bf))

    enc_tok = 0.05 * jax.random.normal(next(kit), (INPUT_DIM, HID_DIM), jnp.float32)
    enc_pos = 0.05 * jax.random.normal(next(kit), (MAX_LEN, HID_DIM), jnp.float32)
    dec_tok = 0.05 * jax.random.normal(next(kit), (OUTPUT_DIM, HID_DIM), jnp.float32)
    dec_pos = 0.05 * jax.random.normal(next(kit), (MAX_LEN, HID_DIM), jnp.float32)
    w_out, b_out = lin(HID_DIM, OUTPUT_DIM)
    return dict(enc_layers=enc_layers, dec_layers=dec_layers,
                enc_tok=enc_tok, enc_pos=enc_pos, dec_tok=dec_tok, dec_pos=dec_pos,
                w_out=w_out, b_out=b_out)


def _pad_rows(tab, rows):
    pad = jnp.zeros((rows - tab.shape[0], tab.shape[1]), tab.dtype)
    return jnp.concatenate([tab, pad], axis=0)


def pack_params(p):
    """Fold constants and repack into few, head-major, stacked arrays."""
    emb_scale = math.sqrt(HID_DIM)

    def pack_attn(a):
        inv = 1.0 / math.sqrt(HEAD_DIM)
        wq = (a['wq'] * inv).reshape(HID_DIM, N_HEADS, HEAD_DIM).transpose(1, 0, 2)
        bq = (a['bq'] * inv).reshape(N_HEADS, 1, HEAD_DIM)
        wk = a['wk'].reshape(HID_DIM, N_HEADS, HEAD_DIM).transpose(1, 0, 2)
        wvo = jnp.einsum('ehd,hdo->heo',
                         a['wv'].reshape(HID_DIM, N_HEADS, HEAD_DIM),
                         a['wo'].reshape(N_HEADS, HEAD_DIM, HID_DIM))     # (nh, H, H)
        b_attn = a['bo'] + a['bv'] @ a['wo']                              # (1, H)
        return wq, bq, wk, wvo, b_attn

    e_wq, e_bq, e_wk, e_wvo, e_vec = [], [], [], [], []
    e_w1, e_b1, e_w2 = [], [], []
    for l in p['enc_layers']:
        wq, bq, wk, wvo, battn = pack_attn(l['attn'])
        e_wq.append(wq); e_bq.append(bq); e_wk.append(wk); e_wvo.append(wvo)
        e_w1.append(l['w1']); e_b1.append(l['b1']); e_w2.append(l['w2'])
        e_vec.append(jnp.concatenate([battn, l['ln1_g'], l['ln1_b'],
                                      l['b2'], l['ln2_g'], l['ln2_b']], axis=0))

    d_wq, d_bq, d_wk, d_wvo, d_vec = [], [], [], [], []
    d_w1, d_b1, d_w2 = [], [], []
    for l in p['dec_layers']:
        swq, sbq, swk, swvo, sbattn = pack_attn(l['self_attn'])
        cwq, cbq, cwk, cwvo, cbattn = pack_attn(l['cross_attn'])
        d_wq += [swq, cwq]; d_bq += [sbq, cbq]
        d_wk += [swk, cwk]; d_wvo += [swvo, cwvo]
        d_w1.append(l['w1']); d_b1.append(l['b1']); d_w2.append(l['w2'])
        d_vec.append(jnp.concatenate([sbattn, l['ln_sa_g'], l['ln_sa_b'],
                                      cbattn, l['ln_ca_g'], l['ln_ca_b'],
                                      l['b2'], l['ln_ff_g'], l['ln_ff_b']], axis=0))

    return (
        _pad_rows(p['enc_tok'] * emb_scale, EMB_ROWS), p['enc_pos'],
        _pad_rows(p['dec_tok'] * emb_scale, EMB_ROWS), p['dec_pos'],
        jnp.stack(e_wq), jnp.stack(e_bq), jnp.stack(e_wk), jnp.stack(e_wvo),
        jnp.stack(e_w1), jnp.stack(e_b1), jnp.stack(e_w2), jnp.stack(e_vec),
        jnp.stack(d_wq), jnp.stack(d_bq), jnp.stack(d_wk), jnp.stack(d_wvo),
        jnp.stack(d_w1), jnp.stack(d_b1), jnp.stack(d_w2), jnp.stack(d_vec),
        p['w_out'], p['b_out'])


# ----------------------------- main -------------------------------------------
if __name__ == "__main__":
    key = jax.random.PRNGKey(0)
    k_src, k_trg, k_param = jax.random.split(key, 3)

    src = jax.random.randint(k_src, (BATCH, SRC_SEQ), 1, INPUT_DIM, dtype=jnp.int32)
    trg = jax.random.randint(k_trg, (BATCH, TRG_SEQ), 1, OUTPUT_DIM, dtype=jnp.int32)
    # pad the tail of the second example so make_src_mask / make_trg_mask matter
    src = src.at[1, SRC_SEQ - 2:].set(SRC_PAD_IDX)
    trg = trg.at[1, TRG_SEQ - 3:].set(TRG_PAD_IDX)

    params = pack_params(init_params(k_param))

    output, attention = seq2seq_forward(src, trg, params)
    output, attention = jax.block_until_ready((output, attention))

    assert output.shape == (BATCH, TRG_SEQ, OUTPUT_DIM)
    assert attention.shape == (BATCH, N_HEADS, TRG_SEQ, SRC_SEQ)
    assert bool(jnp.all(jnp.isfinite(output)))
    assert bool(jnp.all(jnp.isfinite(attention)))
    print("KERNEL_OK")
</pallas_src>

<mosaic_0001>
module attributes {stable_mosaic.version = 11 : i64} {
  func.func @seq2seq_kernel(%arg0: memref<16x1xi32, #tpu.memory_space<vmem>>, %arg1: memref<16x1xi32, #tpu.memory_space<vmem>>, %arg2: memref<16x16xf32, #tpu.memory_space<vmem>>, %arg3: memref<16x16xf32, #tpu.memory_space<vmem>>, %arg4: memref<16x16xf32, #tpu.memory_space<vmem>>, %arg5: memref<128x32xf32, #tpu.memory_space<vmem>>, %arg6: memref<16x32xf32, #tpu.memory_space<vmem>>, %arg7: memref<128x32xf32, #tpu.memory_space<vmem>>, %arg8: memref<16x32xf32, #tpu.memory_space<vmem>>, %arg9: memref<2x4x32x8xf32, #tpu.memory_space<vmem>>, %arg10: memref<2x4x1x8xf32, #tpu.memory_space<vmem>>, %arg11: memref<2x4x32x8xf32, #tpu.memory_space<vmem>>, %arg12: memref<2x4x32x32xf32, #tpu.memory_space<vmem>>, %arg13: memref<2x32x64xf32, #tpu.memory_space<vmem>>, %arg14: memref<2x1x64xf32, #tpu.memory_space<vmem>>, %arg15: memref<2x64x32xf32, #tpu.memory_space<vmem>>, %arg16: memref<2x6x32xf32, #tpu.memory_space<vmem>>, %arg17: memref<4x4x32x8xf32, #tpu.memory_space<vmem>>, %arg18: memref<4x4x1x8xf32, #tpu.memory_space<vmem>>, %arg19: memref<4x4x32x8xf32, #tpu.memory_space<vmem>>, %arg20: memref<4x4x32x32xf32, #tpu.memory_space<vmem>>, %arg21: memref<2x32x64xf32, #tpu.memory_space<vmem>>, %arg22: memref<2x1x64xf32, #tpu.memory_space<vmem>>, %arg23: memref<2x64x32xf32, #tpu.memory_space<vmem>>, %arg24: memref<2x9x32xf32, #tpu.memory_space<vmem>>, %arg25: memref<32x50xf32, #tpu.memory_space<vmem>>, %arg26: memref<1x50xf32, #tpu.memory_space<vmem>>, %arg27: memref<16x50xf32, #tpu.memory_space<vmem>>, %arg28: memref<4x16x16xf32, #tpu.memory_space<vmem>>) attributes {dimension_semantics = [], scalar_prefetch = 0 : i64, scratch_operands = 0 : i64, tpu.core_type = #tpu.core_type<tc>} {
    %0 = tpu.iota {dimensions = array<i32: 1>} : vector<16x128xi32>
    %c0 = arith.constant 0 : index
    %c0_0 = arith.constant 0 : index
    %1 = vector.load %arg0[%c0, %c0_0] : memref<16x1xi32, #tpu.memory_space<vmem>>, vector<16x1xi32>
    %2 = vector.broadcast %1 : vector<16x1xi32> to vector<16x128xi32>
    %3 = arith.cmpi eq, %0, %2 : vector<16x128xi32>
    %cst = arith.constant 1.000000e+00 : f32
    %cst_1 = arith.constant 0.000000e+00 : f32
    %4 = vector.broadcast %cst : f32 to vector<16x128xf32>
    %5 = vector.broadcast %cst_1 : f32 to vector<16x128xf32>
    %6 = arith.select %3, %4, %5 : vector<16x128xi1>, vector<16x128xf32>
    %c0_2 = arith.constant 0 : index
    %c0_3 = arith.constant 0 : index
    %7 = vector.load %arg5[%c0_2, %c0_3] : memref<128x32xf32, #tpu.memory_space<vmem>>, vector<128x32xf32>
    %cst_4 = arith.constant dense<0.000000e+00> : vector<16x32xf32>
    %8 = tpu.matmul %6, %7, %cst_4 {dimension_numbers = #tpu.dot_dimension_numbers<[1], [0], [0], [1], [0, 0, 1, 1], [], []>} : vector<16x128xf32>, vector<128x32xf32>, vector<16x32xf32> -> vector<16x32xf32>
    %c0_5 = arith.constant 0 : index
    %c0_6 = arith.constant 0 : index
    %9 = vector.load %arg6[%c0_5, %c0_6] : memref<16x32xf32, #tpu.memory_space<vmem>>, vector<16x32xf32>
    %10 = arith.addf %8, %9 : vector<16x32xf32>
    %c0_7 = arith.constant 0 : index
    %c0_8 = arith.constant 0 : index
    %11 = vector.load %arg2[%c0_7, %c0_8] : memref<16x16xf32, #tpu.memory_space<vmem>>, vector<16x16xf32>
    %c0_9 = arith.constant 0 : index
    %c0_10 = arith.constant 0 : index
    %c0_11 = arith.constant 0 : index
    %12 = vector.load %arg16[%c0_9, %c0_10, %c0_11] : memref<2x6x32xf32, #tpu.memory_space<vmem>>, vector<1x6x32xf32>
    %13 = vector.shape_cast %12 : vector<1x6x32xf32> to vector<6x32xf32>
    %c0_12 = arith.constant 0 : index
    %c0_13 = arith.constant 0 : index
    %c0_14 = arith.constant 0 : index
    %c0_15 = arith.constant 0 : index
    %14 = vector.load %arg9[%c0_12, %c0_13, %c0_14, %c0_15] : memref<2x4x32x8xf32, #tpu.memory_space<vmem>>, vector<1x4x32x8xf32>
    %15 = vector.shape_cast %14 : vector<1x4x32x8xf32> to vector<4x32x8xf32>
    %c0_16 = arith.constant 0 : index
    %c0_17 = arith.constant 0 : index
    %c0_18 = arith.constant 0 : index
    %c0_19 = arith.constant 0 : index
    %16 = vector.load %arg10[%c0_16, %c0_17, %c0_18, %c0_19] : memref<2x4x1x8xf32, #tpu.memory_space<vmem>>, vector<1x4x1x8xf32>
    %17 = vector.shape_cast %16 : vector<1x4x1x8xf32> to vector<4x1x8xf32>
    %c0_20 = arith.constant 0 : index
    %c0_21 = arith.constant 0 : index
    %c0_22 = arith.constant 0 : index
    %c0_23 = arith.constant 0 : index
    %18 = vector.load %arg11[%c0_20, %c0_21, %c0_22, %c0_23] : memref<2x4x32x8xf32, #tpu.memory_space<vmem>>, vector<1x4x32x8xf32>
    %19 = vector.shape_cast %18 : vector<1x4x32x8xf32> to vector<4x32x8xf32>
    %c0_24 = arith.constant 0 : index
    %c0_25 = arith.constant 0 : index
    %c0_26 = arith.constant 0 : index
    %c0_27 = arith.constant 0 : index
    %20 = vector.load %arg12[%c0_24, %c0_25, %c0_26, %c0_27] : memref<2x4x32x32xf32, #tpu.memory_space<vmem>>, vector<1x4x32x32xf32>
    %21 = vector.shape_cast %20 : vector<1x4x32x32xf32> to vector<4x32x32xf32>
    %22 = vector.extract_strided_slice %13 {offsets = [0, 0], sizes = [1, 32], strides = [1, 1]} : vector<6x32xf32> to vector<1x32xf32>
    %23 = vector.extract_strided_slice %15 {offsets = [0, 0, 0], sizes = [1, 32, 8], strides = [1, 1, 1]} : vector<4x32x8xf32> to vector<1x32x8xf32>
    %24 = vector.shape_cast %23 : vector<1x32x8xf32> to vector<32x8xf32>
    %cst_28 = arith.constant dense<0.000000e+00> : vector<16x8xf32>
    %25 = tpu.matmul %10, %24, %cst_28 {dimension_numbers = #tpu.dot_dimension_numbers<[1], [0], [0], [1], [0, 0, 1, 1], [], []>} : vector<16x32xf32>, vector<32x8xf32>, vector<16x8xf32> -> vector<16x8xf32>
    %26 = vector.extract_strided_slice %17 {offsets = [0, 0, 0], sizes = [1, 1, 8], strides = [1, 1, 1]} : vector<4x1x8xf32> to vector<1x1x8xf32>
    %27 = vector.shape_cast %26 : vector<1x1x8xf32> to vector<1x8xf32>
    %28 = vector.broadcast %27 : vector<1x8xf32> to vector<16x8xf32>
    %29 = arith.addf %25, %28 : vector<16x8xf32>
    %30 = vector.extract_strided_slice %15 {offsets = [1, 0, 0], sizes = [1, 32, 8], strides = [1, 1, 1]} : vector<4x32x8xf32> to vector<1x32x8xf32>
    %31 = vector.shape_cast %30 : vector<1x32x8xf32> to vector<32x8xf32>
    %cst_29 = arith.constant dense<0.000000e+00> : vector<16x8xf32>
    %32 = tpu.matmul %10, %31, %cst_29 {dimension_numbers = #tpu.dot_dimension_numbers<[1], [0], [0], [1], [0, 0, 1, 1], [], []>} : vector<16x32xf32>, vector<32x8xf32>, vector<16x8xf32> -> vector<16x8xf32>
    %33 = vector.extract_strided_slice %17 {offsets = [1, 0, 0], sizes = [1, 1, 8], strides = [1, 1, 1]} : vector<4x1x8xf32> to vector<1x1x8xf32>
    %34 = vector.shape_cast %33 : vector<1x1x8xf32> to vector<1x8xf32>
    %35 = vector.broadcast %34 : vector<1x8xf32> to vector<16x8xf32>
    %36 = arith.addf %32, %35 : vector<16x8xf32>
    %37 = vector.extract_strided_slice %15 {offsets = [2, 0, 0], sizes = [1, 32, 8], strides = [1, 1, 1]} : vector<4x32x8xf32> to vector<1x32x8xf32>
    %38 = vector.shape_cast %37 : vector<1x32x8xf32> to vector<32x8xf32>
    %cst_30 = arith.constant dense<0.000000e+00> : vector<16x8xf32>
    %39 = tpu.matmul %10, %38, %cst_30 {dimension_numbers = #tpu.dot_dimension_numbers<[1], [0], [0], [1], [0, 0, 1, 1], [], []>} : vector<16x32xf32>, vector<32x8xf32>, vector<16x8xf32> -> vector<16x8xf32>
    %40 = vector.extract_strided_slice %17 {offsets = [2, 0, 0], sizes = [1, 1, 8], strides = [1, 1, 1]} : vector<4x1x8xf32> to vector<1x1x8xf32>
    %41 = vector.shape_cast %40 : vector<1x1x8xf32> to vector<1x8xf32>
    %42 = vector.broadcast %41 : vector<1x8xf32> to vector<16x8xf32>
    %43 = arith.addf %39, %42 : vector<16x8xf32>
    %44 = vector.extract_strided_slice %15 {offsets = [3, 0, 0], sizes = [1, 32, 8], strides = [1, 1, 1]} : vector<4x32x8xf32> to vector<1x32x8xf32>
    %45 = vector.shape_cast %44 : vector<1x32x8xf32> to vector<32x8xf32>
    %cst_31 = arith.constant dense<0.000000e+00> : vector<16x8xf32>
    %46 = tpu.matmul %10, %45, %cst_31 {dimension_numbers = #tpu.dot_dimension_numbers<[1], [0], [0], [1], [0, 0, 1, 1], [], []>} : vector<16x32xf32>, vector<32x8xf32>, vector<16x8xf32> -> vector<16x8xf32>
    %47 = vector.extract_strided_slice %17 {offsets = [3, 0, 0], sizes = [1, 1, 8], strides = [1, 1, 1]} : vector<4x1x8xf32> to vector<1x1x8xf32>
    %48 = vector.shape_cast %47 : vector<1x1x8xf32> to vector<1x8xf32>
    %49 = vector.broadcast %48 : vector<1x8xf32> to vector<16x8xf32>
    %50 = arith.addf %46, %49 : vector<16x8xf32>
    %51 = vector.shape_cast %29 : vector<16x8xf32> to vector<1x16x8xf32>
    %52 = vector.shape_cast %36 : vector<16x8xf32> to vector<1x16x8xf32>
    %53 = vector.shape_cast %43 : vector<16x8xf32> to vector<1x16x8xf32>
    %54 = vector.shape_cast %50 : vector<16x8xf32> to vector<1x16x8xf32>
    %55 = tpu.concatenate %51, %52, %53, %54 in 0 : vector<1x16x8xf32>, vector<1x16x8xf32>, vector<1x16x8xf32>, vector<1x16x8xf32> -> vector<4x16x8xf32>
    %56 = vector.extract_strided_slice %19 {offsets = [0, 0, 0], sizes = [1, 32, 8], strides = [1, 1, 1]} : vector<4x32x8xf32> to vector<1x32x8xf32>
    %57 = vector.shape_cast %56 : vector<1x32x8xf32> to vector<32x8xf32>
    %cst_32 = arith.constant dense<0.000000e+00> : vector<16x8xf32>
    %58 = tpu.matmul %10, %57, %cst_32 {dimension_numbers = #tpu.dot_dimension_numbers<[1], [0], [0], [1], [0, 0, 1, 1], [], []>} : vector<16x32xf32>, vector<32x8xf32>, vector<16x8xf32> -> vector<16x8xf32>
    %59 = vector.extract_strided_slice %19 {offsets = [1, 0, 0], sizes = [1, 32, 8], strides = [1, 1, 1]} : vector<4x32x8xf32> to vector<1x32x8xf32>
    %60 = vector.shape_cast %59 : vector<1x32x8xf32> to vector<32x8xf32>
    %cst_33 = arith.constant dense<0.000000e+00> : vector<16x8xf32>
    %61 = tpu.matmul %10, %60, %cst_33 {dimension_numbers = #tpu.dot_dimension_numbers<[1], [0], [0], [1], [0, 0, 1, 1], [], []>} : vector<16x32xf32>, vector<32x8xf32>, vector<16x8xf32> -> vector<16x8xf32>
    %62 = vector.extract_strided_slice %19 {offsets = [2, 0, 0], sizes = [1, 32, 8], strides = [1, 1, 1]} : vector<4x32x8xf32> to vector<1x32x8xf32>
    %63 = vector.shape_cast %62 : vector<1x32x8xf32> to vector<32x8xf32>
    %cst_34 = arith.constant dense<0.000000e+00> : vector<16x8xf32>
    %64 = tpu.matmul %10, %63, %cst_34 {dimension_numbers = #tpu.dot_dimension_numbers<[1], [0], [0], [1], [0, 0, 1, 1], [], []>} : vector<16x32xf32>, vector<32x8xf32>, vector<16x8xf32> -> vector<16x8xf32>
    %65 = vector.extract_strided_slice %19 {offsets = [3, 0, 0], sizes = [1, 32, 8], strides = [1, 1, 1]} : vector<4x32x8xf32> to vector<1x32x8xf32>
    %66 = vector.shape_cast %65 : vector<1x32x8xf32> to vector<32x8xf32>
    %cst_35 = arith.constant dense<0.000000e+00> : vector<16x8xf32>
    %67 = tpu.matmul %10, %66, %cst_35 {dimension_numbers = #tpu.dot_dimension_numbers<[1], [0], [0], [1], [0, 0, 1, 1], [], []>} : vector<16x32xf32>, vector<32x8xf32>, vector<16x8xf32> -> vector<16x8xf32>
    %68 = vector.shape_cast %58 : vector<16x8xf32> to vector<1x16x8xf32>
    %69 = vector.shape_cast %61 : vector<16x8xf32> to vector<1x16x8xf32>
    %70 = vector.shape_cast %64 : vector<16x8xf32> to vector<1x16x8xf32>
    %71 = vector.shape_cast %67 : vector<16x8xf32> to vector<1x16x8xf32>
    %72 = tpu.concatenate %68, %69, %70, %71 in 0 : vector<1x16x8xf32>, vector<1x16x8xf32>, vector<1x16x8xf32>, vector<1x16x8xf32> -> vector<4x16x8xf32>
    %73 = vector.extract_strided_slice %21 {offsets = [0, 0, 0], sizes = [1, 32, 32], strides = [1, 1, 1]} : vector<4x32x32xf32> to vector<1x32x32xf32>
    %74 = vector.shape_cast %73 : vector<1x32x32xf32> to vector<32x32xf32>
    %cst_36 = arith.constant dense<0.000000e+00> : vector<16x32xf32>
    %75 = tpu.matmul %10, %74, %cst_36 {dimension_numbers = #tpu.dot_dimension_numbers<[1], [0], [0], [1], [0, 0, 1, 1], [], []>} : vector<16x32xf32>, vector<32x32xf32>, vector<16x32xf32> -> vector<16x32xf32>
    %76 = vector.extract_strided_slice %21 {offsets = [1, 0, 0], sizes = [1, 32, 32], strides = [1, 1, 1]} : vector<4x32x32xf32> to vector<1x32x32xf32>
    %77 = vector.shape_cast %76 : vector<1x32x32xf32> to vector<32x32xf32>
    %cst_37 = arith.constant dense<0.000000e+00> : vector<16x32xf32>
    %78 = tpu.matmul %10, %77, %cst_37 {dimension_numbers = #tpu.dot_dimension_numbers<[1], [0], [0], [1], [0, 0, 1, 1], [], []>} : vector<16x32xf32>, vector<32x32xf32>, vector<16x32xf32> -> vector<16x32xf32>
    %79 = vector.extract_strided_slice %21 {offsets = [2, 0, 0], sizes = [1, 32, 32], strides = [1, 1, 1]} : vector<4x32x32xf32> to vector<1x32x32xf32>
    %80 = vector.shape_cast %79 : vector<1x32x32xf32> to vector<32x32xf32>
    %cst_38 = arith.constant dense<0.000000e+00> : vector<16x32xf32>
    %81 = tpu.matmul %10, %80, %cst_38 {dimension_numbers = #tpu.dot_dimension_numbers<[1], [0], [0], [1], [0, 0, 1, 1], [], []>} : vector<16x32xf32>, vector<32x32xf32>, vector<16x32xf32> -> vector<16x32xf32>
    %82 = vector.extract_strided_slice %21 {offsets = [3, 0, 0], sizes = [1, 32, 32], strides = [1, 1, 1]} : vector<4x32x32xf32> to vector<1x32x32xf32>
    %83 = vector.shape_cast %82 : vector<1x32x32xf32> to vector<32x32xf32>
    %cst_39 = arith.constant dense<0.000000e+00> : vector<16x32xf32>
    %84 = tpu.matmul %10, %83, %cst_39 {dimension_numbers = #tpu.dot_dimension_numbers<[1], [0], [0], [1], [0, 0, 1, 1], [], []>} : vector<16x32xf32>, vector<32x32xf32>, vector<16x32xf32> -> vector<16x32xf32>
    %85 = vector.shape_cast %75 : vector<16x32xf32> to vector<1x16x32xf32>
    %86 = vector.shape_cast %78 : vector<16x32xf32> to vector<1x16x32xf32>
    %87 = vector.shape_cast %81 : vector<16x32xf32> to vector<1x16x32xf32>
    %88 = vector.shape_cast %84 : vector<16x32xf32> to vector<1x16x32xf32>
    %89 = tpu.concatenate %85, %86, %87, %88 in 0 : vector<1x16x32xf32>, vector<1x16x32xf32>, vector<1x16x32xf32>, vector<1x16x32xf32> -> vector<4x16x32xf32>
    "tpu.trace_start"() <{level = 10 : i32, message = "hqd,hkd->hqk"}> : () -> ()
    %cst_40 = arith.constant dense<0.000000e+00> : vector<4x16x16xf32>
    %90 = tpu.matmul %55, %72, %cst_40 {dimension_numbers = #tpu.dot_dimension_numbers<[2], [2], [1], [1], [0, 0, 0, 1, 1, 1], [0], [0]>} : vector<4x16x8xf32>, vector<4x16x8xf32>, vector<4x16x16xf32> -> vector<4x16x16xf32>
    "tpu.trace_stop"() : () -> ()
    %91 = vector.shape_cast %11 : vector<16x16xf32> to vector<1x16x16xf32>
    %92 = vector.broadcast %91 : vector<1x16x16xf32> to vector<4x16x16xf32>
    %93 = arith.addf %90, %92 : vector<4x16x16xf32>
    %cst_41 = arith.constant dense<0xFF800000> : vector<4x16xf32>
    %94 = vector.multi_reduction <maximumf>, %93, %cst_41 [2] : vector<4x16x16xf32> to vector<4x16xf32>
    %95 = vector.shape_cast %94 : vector<4x16xf32> to vector<4x16x1xf32>
    %96 = vector.broadcast %95 : vector<4x16x1xf32> to vector<4x16x16xf32>
    %97 = arith.subf %93, %96 : vector<4x16x16xf32>
    %98 = math.exp %97 : vector<4x16x16xf32>
    %cst_42 = arith.constant dense<0.000000e+00> : vector<4x16xf32>
    %99 = vector.multi_reduction <add>, %98, %cst_42 [2] : vector<4x16x16xf32> to vector<4x16xf32>
    %100 = vector.shape_cast %99 : vector<4x16xf32> to vector<4x16x1xf32>
    %101 = tpu.reciprocal %100 {approx = true} : vector<4x16x1xf32> -> vector<4x16x1xf32>
    %102 = vector.broadcast %101 : vector<4x16x1xf32> to vector<4x16x16xf32>
    %103 = arith.mulf %98, %102 : vector<4x16x16xf32>
    "tpu.trace_start"() <{level = 10 : i32, message = "hqk,hkd->hqd"}> : () -> ()
    %cst_43 = arith.constant dense<0.000000e+00> : vector<4x16x32xf32>
    %104 = tpu.matmul %103, %89, %cst_43 {dimension_numbers = #tpu.dot_dimension_numbers<[2], [1], [1], [2], [0, 0, 0, 1, 1, 2], [0], [0]>} : vector<4x16x16xf32>, vector<4x16x32xf32>, vector<4x16x32xf32> -> vector<4x16x32xf32>
    "tpu.trace_stop"() : () -> ()
    %105 = vector.extract_strided_slice %104 {offsets = [0, 0, 0], sizes = [1, 16, 32], strides = [1, 1, 1]} : vector<4x16x32xf32> to vector<1x16x32xf32>
    %106 = vector.shape_cast %105 : vector<1x16x32xf32> to vector<16x32xf32>
    %107 = vector.extract_strided_slice %104 {offsets = [1, 0, 0], sizes = [1, 16, 32], strides = [1, 1, 1]} : vector<4x16x32xf32> to vector<1x16x32xf32>
    %108 = vector.shape_cast %107 : vector<1x16x32xf32> to vector<16x32xf32>
    %109 = arith.addf %106, %108 : vector<16x32xf32>
    %110 = vector.extract_strided_slice %104 {offsets = [2, 0, 0], sizes = [1, 16, 32], strides = [1, 1, 1]} : vector<4x16x32xf32> to vector<1x16x32xf32>
    %111 = vector.shape_cast %110 : vector<1x16x32xf32> to vector<16x32xf32>
    %112 = arith.addf %109, %111 : vector<16x32xf32>
    %113 = vector.extract_strided_slice %104 {offsets = [3, 0, 0], sizes = [1, 16, 32], strides = [1, 1, 1]} : vector<4x16x32xf32> to vector<1x16x32xf32>
    %114 = vector.shape_cast %113 : vector<1x16x32xf32> to vector<16x32xf32>
    %115 = arith.addf %112, %114 : vector<16x32xf32>
    %116 = vector.broadcast %22 : vector<1x32xf32> to vector<16x32xf32>
    %117 = arith.addf %115, %116 : vector<16x32xf32>
    %118 = arith.addf %10, %117 : vector<16x32xf32>
    %119 = vector.extract_strided_slice %13 {offsets = [1, 0], sizes = [1, 32], strides = [1, 1]} : vector<6x32xf32> to vector<1x32xf32>
    %120 = vector.extract_strided_slice %13 {offsets = [2, 0], sizes = [1, 32], strides = [1, 1]} : vector<6x32xf32> to vector<1x32xf32>
    %cst_44 = arith.constant dense<0.000000e+00> : vector<16xf32>
    %121 = vector.multi_reduction <add>, %118, %cst_44 [1] : vector<16x32xf32> to vector<16xf32>
    %122 = vector.shape_cast %121 : vector<16xf32> to vector<16x1xf32>
    %cst_45 = arith.constant 3.200000e+01 : f32
    %123 = vector.broadcast %cst_45 : f32 to vector<16x1xf32>
    %124 = arith.divf %122, %123 : vector<16x1xf32>
    %125 = vector.broadcast %124 : vector<16x1xf32> to vector<16x32xf32>
    %126 = arith.subf %118, %125 : vector<16x32xf32>
    %127 = arith.mulf %126, %126 : vector<16x32xf32>
    %cst_46 = arith.constant dense<0.000000e+00> : vector<16xf32>
    %128 = vector.multi_reduction <add>, %127, %cst_46 [1] : vector<16x32xf32> to vector<16xf32>
    %129 = vector.shape_cast %128 : vector<16xf32> to vector<16x1xf32>
    %cst_47 = arith.constant 3.200000e+01 : f32
    %130 = vector.broadcast %cst_47 : f32 to vector<16x1xf32>
    %131 = arith.divf %129, %130 : vector<16x1xf32>
    %132 = vector.broadcast %124 : vector<16x1xf32> to vector<16x32xf32>
    %133 = arith.subf %118, %132 : vector<16x32xf32>
    %cst_48 = arith.constant 9.99999974E-6 : f32
    %134 = vector.broadcast %cst_48 : f32 to vector<16x1xf32>
    %135 = arith.addf %131, %134 : vector<16x1xf32>
    %136 = math.rsqrt %135 : vector<16x1xf32>
    %137 = vector.broadcast %136 : vector<16x1xf32> to vector<16x32xf32>
    %138 = arith.mulf %133, %137 : vector<16x32xf32>
    %139 = vector.broadcast %119 : vector<1x32xf32> to vector<16x32xf32>
    %140 = arith.mulf %138, %139 : vector<16x32xf32>
    %141 = vector.broadcast %120 : vector<1x32xf32> to vector<16x32xf32>
    %142 = arith.addf %140, %141 : vector<16x32xf32>
    %c0_49 = arith.constant 0 : index
    %c0_50 = arith.constant 0 : index
    %c0_51 = arith.constant 0 : index
    %143 = vector.load %arg13[%c0_49, %c0_50, %c0_51] : memref<2x32x64xf32, #tpu.memory_space<vmem>>, vector<1x32x64xf32>
    %144 = vector.shape_cast %143 : vector<1x32x64xf32> to vector<32x64xf32>
    %cst_52 = arith.constant dense<0.000000e+00> : vector<16x64xf32>
    %145 = tpu.matmul %142, %144, %cst_52 {dimension_numbers = #tpu.dot_dimension_numbers<[1], [0], [0], [1], [0, 0, 1, 1], [], []>} : vector<16x32xf32>, vector<32x64xf32>, vector<16x64xf32> -> vector<16x64xf32>
    %c0_53 = arith.constant 0 : index
    %c0_54 = arith.constant 0 : index
    %c0_55 = arith.constant 0 : index
    %146 = vector.load %arg14[%c0_53, %c0_54, %c0_55] : memref<2x1x64xf32, #tpu.memory_space<vmem>>, vector<1x1x64xf32>
    %147 = vector.shape_cast %146 : vector<1x1x64xf32> to vector<1x64xf32>
    %148 = vector.broadcast %147 : vector<1x64xf32> to vector<16x64xf32>
    %149 = arith.addf %145, %148 : vector<16x64xf32>
    %cst_56 = arith.constant 0.000000e+00 : f32
    %150 = vector.broadcast %cst_56 : f32 to vector<16x64xf32>
    %151 = arith.maximumf %149, %150 : vector<16x64xf32>
    %c0_57 = arith.constant 0 : index
    %c0_58 = arith.constant 0 : index
    %c0_59 = arith.constant 0 : index
    %152 = vector.load %arg15[%c0_57, %c0_58, %c0_59] : memref<2x64x32xf32, #tpu.memory_space<vmem>>, vector<1x64x32xf32>
    %153 = vector.shape_cast %152 : vector<1x64x32xf32> to vector<64x32xf32>
    %cst_60 = arith.constant dense<0.000000e+00> : vector<16x32xf32>
    %154 = tpu.matmul %151, %153, %cst_60 {dimension_numbers = #tpu.dot_dimension_numbers<[1], [0], [0], [1], [0, 0, 1, 1], [], []>} : vector<16x64xf32>, vector<64x32xf32>, vector<16x32xf32> -> vector<16x32xf32>
    %155 = vector.extract_strided_slice %13 {offsets = [3, 0], sizes = [1, 32], strides = [1, 1]} : vector<6x32xf32> to vector<1x32xf32>
    %156 = vector.broadcast %155 : vector<1x32xf32> to vector<16x32xf32>
    %157 = arith.addf %154, %156 : vector<16x32xf32>
    %158 = arith.addf %142, %157 : vector<16x32xf32>
    %159 = vector.extract_strided_slice %13 {offsets = [4, 0], sizes = [1, 32], strides = [1, 1]} : vector<6x32xf32> to vector<1x32xf32>
    %160 = vector.extract_strided_slice %13 {offsets = [5, 0], sizes = [1, 32], strides = [1, 1]} : vector<6x32xf32> to vector<1x32xf32>
    %cst_61 = arith.constant dense<0.000000e+00> : vector<16xf32>
    %161 = vector.multi_reduction <add>, %158, %cst_61 [1] : vector<16x32xf32> to vector<16xf32>
    %162 = vector.shape_cast %161 : vector<16xf32> to vector<16x1xf32>
    %cst_62 = arith.constant 3.200000e+01 : f32
    %163 = vector.broadcast %cst_62 : f32 to vector<16x1xf32>
    %164 = arith.divf %162, %163 : vector<16x1xf32>
    %165 = vector.broadcast %164 : vector<16x1xf32> to vector<16x32xf32>
    %166 = arith.subf %158, %165 : vector<16x32xf32>
    %167 = arith.mulf %166, %166 : vector<16x32xf32>
    %cst_63 = arith.constant dense<0.000000e+00> : vector<16xf32>
    %168 = vector.multi_reduction <add>, %167, %cst_63 [1] : vector<16x32xf32> to vector<16xf32>
    %169 = vector.shape_cast %168 : vector<16xf32> to vector<16x1xf32>
    %cst_64 = arith.constant 3.200000e+01 : f32
    %170 = vector.broadcast %cst_64 : f32 to vector<16x1xf32>
    %171 = arith.divf %169, %170 : vector<16x1xf32>
    %172 = vector.broadcast %164 : vector<16x1xf32> to vector<16x32xf32>
    %173 = arith.subf %158, %172 : vector<16x32xf32>
    %cst_65 = arith.constant 9.99999974E-6 : f32
    %174 = vector.broadcast %cst_65 : f32 to vector<16x1xf32>
    %175 = arith.addf %171, %174 : vector<16x1xf32>
    %176 = math.rsqrt %175 : vector<16x1xf32>
    %177 = vector.broadcast %176 : vector<16x1xf32> to vector<16x32xf32>
    %178 = arith.mulf %173, %177 : vector<16x32xf32>
    %179 = vector.broadcast %159 : vector<1x32xf32> to vector<16x32xf32>
    %180 = arith.mulf %178, %179 : vector<16x32xf32>
    %181 = vector.broadcast %160 : vector<1x32xf32> to vector<16x32xf32>
    %182 = arith.addf %180, %181 : vector<16x32xf32>
    %c1 = arith.constant 1 : index
    %c0_66 = arith.constant 0 : index
    %c0_67 = arith.constant 0 : index
    %183 = vector.load %arg16[%c1, %c0_66, %c0_67] : memref<2x6x32xf32, #tpu.memory_space<vmem>>, vector<1x6x32xf32>
    %184 = vector.shape_cast %183 : vector<1x6x32xf32> to vector<6x32xf32>
    %c1_68 = arith.constant 1 : index
    %c0_69 = arith.constant 0 : index
    %c0_70 = arith.constant 0 : index
    %c0_71 = arith.constant 0 : index
    %185 = vector.load %arg9[%c1_68, %c0_69, %c0_70, %c0_71] : memref<2x4x32x8xf32, #tpu.memory_space<vmem>>, vector<1x4x32x8xf32>
    %186 = vector.shape_cast %185 : vector<1x4x32x8xf32> to vector<4x32x8xf32>
    %c1_72 = arith.constant 1 : index
    %c0_73 = arith.constant 0 : index
    %c0_74 = arith.constant 0 : index
    %c0_75 = arith.constant 0 : index
    %187 = vector.load %arg10[%c1_72, %c0_73, %c0_74, %c0_75] : memref<2x4x1x8xf32, #tpu.memory_space<vmem>>, vector<1x4x1x8xf32>
    %188 = vector.shape_cast %187 : vector<1x4x1x8xf32> to vector<4x1x8xf32>
    %c1_76 = arith.constant 1 : index
    %c0_77 = arith.constant 0 : index
    %c0_78 = arith.constant 0 : index
    %c0_79 = arith.constant 0 : index
    %189 = vector.load %arg11[%c1_76, %c0_77, %c0_78, %c0_79] : memref<2x4x32x8xf32, #tpu.memory_space<vmem>>, vector<1x4x32x8xf32>
    %190 = vector.shape_cast %189 : vector<1x4x32x8xf32> to vector<4x32x8xf32>
    %c1_80 = arith.constant 1 : index
    %c0_81 = arith.constant 0 : index
    %c0_82 = arith.constant 0 : index
    %c0_83 = arith.constant 0 : index
    %191 = vector.load %arg12[%c1_80, %c0_81, %c0_82, %c0_83] : memref<2x4x32x32xf32, #tpu.memory_space<vmem>>, vector<1x4x32x32xf32>
    %192 = vector.shape_cast %191 : vector<1x4x32x32xf32> to vector<4x32x32xf32>
    %193 = vector.extract_strided_slice %184 {offsets = [0, 0], sizes = [1, 32], strides = [1, 1]} : vector<6x32xf32> to vector<1x32xf32>
    %194 = vector.extract_strided_slice %186 {offsets = [0, 0, 0], sizes = [1, 32, 8], strides = [1, 1, 1]} : vector<4x32x8xf32> to vector<1x32x8xf32>
    %195 = vector.shape_cast %194 : vector<1x32x8xf32> to vector<32x8xf32>
    %cst_84 = arith.constant dense<0.000000e+00> : vector<16x8xf32>
    %196 = tpu.matmul %182, %195, %cst_84 {dimension_numbers = #tpu.dot_dimension_numbers<[1], [0], [0], [1], [0, 0, 1, 1], [], []>} : vector<16x32xf32>, vector<32x8xf32>, vector<16x8xf32> -> vector<16x8xf32>
    %197 = vector.extract_strided_slice %188 {offsets = [0, 0, 0], sizes = [1, 1, 8], strides = [1, 1, 1]} : vector<4x1x8xf32> to vector<1x1x8xf32>
    %198 = vector.shape_cast %197 : vector<1x1x8xf32> to vector<1x8xf32>
    %199 = vector.broadcast %198 : vector<1x8xf32> to vector<16x8xf32>
    %200 = arith.addf %196, %199 : vector<16x8xf32>
    %201 = vector.extract_strided_slice %186 {offsets = [1, 0, 0], sizes = [1, 32, 8], strides = [1, 1, 1]} : vector<4x32x8xf32> to vector<1x32x8xf32>
    %202 = vector.shape_cast %201 : vector<1x32x8xf32> to vector<32x8xf32>
    %cst_85 = arith.constant dense<0.000000e+00> : vector<16x8xf32>
    %203 = tpu.matmul %182, %202, %cst_85 {dimension_numbers = #tpu.dot_dimension_numbers<[1], [0], [0], [1], [0, 0, 1, 1], [], []>} : vector<16x32xf32>, vector<32x8xf32>, vector<16x8xf32> -> vector<16x8xf32>
    %204 = vector.extract_strided_slice %188 {offsets = [1, 0, 0], sizes = [1, 1, 8], strides = [1, 1, 1]} : vector<4x1x8xf32> to vector<1x1x8xf32>
    %205 = vector.shape_cast %204 : vector<1x1x8xf32> to vector<1x8xf32>
    %206 = vector.broadcast %205 : vector<1x8xf32> to vector<16x8xf32>
    %207 = arith.addf %203, %206 : vector<16x8xf32>
    %208 = vector.extract_strided_slice %186 {offsets = [2, 0, 0], sizes = [1, 32, 8], strides = [1, 1, 1]} : vector<4x32x8xf32> to vector<1x32x8xf32>
    %209 = vector.shape_cast %208 : vector<1x32x8xf32> to vector<32x8xf32>
    %cst_86 = arith.constant dense<0.000000e+00> : vector<16x8xf32>
    %210 = tpu.matmul %182, %209, %cst_86 {dimension_numbers = #tpu.dot_dimension_numbers<[1], [0], [0], [1], [0, 0, 1, 1], [], []>} : vector<16x32xf32>, vector<32x8xf32>, vector<16x8xf32> -> vector<16x8xf32>
    %211 = vector.extract_strided_slice %188 {offsets = [2, 0, 0], sizes = [1, 1, 8], strides = [1, 1, 1]} : vector<4x1x8xf32> to vector<1x1x8xf32>
    %212 = vector.shape_cast %211 : vector<1x1x8xf32> to vector<1x8xf32>
    %213 = vector.broadcast %212 : vector<1x8xf32> to vector<16x8xf32>
    %214 = arith.addf %210, %213 : vector<16x8xf32>
    %215 = vector.extract_strided_slice %186 {offsets = [3, 0, 0], sizes = [1, 32, 8], strides = [1, 1, 1]} : vector<4x32x8xf32> to vector<1x32x8xf32>
    %216 = vector.shape_cast %215 : vector<1x32x8xf32> to vector<32x8xf32>
    %cst_87 = arith.constant dense<0.000000e+00> : vector<16x8xf32>
    %217 = tpu.matmul %182, %216, %cst_87 {dimension_numbers = #tpu.dot_dimension_numbers<[1], [0], [0], [1], [0, 0, 1, 1], [], []>} : vector<16x32xf32>, vector<32x8xf32>, vector<16x8xf32> -> vector<16x8xf32>
    %218 = vector.extract_strided_slice %188 {offsets = [3, 0, 0], sizes = [1, 1, 8], strides = [1, 1, 1]} : vector<4x1x8xf32> to vector<1x1x8xf32>
    %219 = vector.shape_cast %218 : vector<1x1x8xf32> to vector<1x8xf32>
    %220 = vector.broadcast %219 : vector<1x8xf32> to vector<16x8xf32>
    %221 = arith.addf %217, %220 : vector<16x8xf32>
    %222 = vector.shape_cast %200 : vector<16x8xf32> to vector<1x16x8xf32>
    %223 = vector.shape_cast %207 : vector<16x8xf32> to vector<1x16x8xf32>
    %224 = vector.shape_cast %214 : vector<16x8xf32> to vector<1x16x8xf32>
    %225 = vector.shape_cast %221 : vector<16x8xf32> to vector<1x16x8xf32>
    %226 = tpu.concatenate %222, %223, %224, %225 in 0 : vector<1x16x8xf32>, vector<1x16x8xf32>, vector<1x16x8xf32>, vector<1x16x8xf32> -> vector<4x16x8xf32>
    %227 = vector.extract_strided_slice %190 {offsets = [0, 0, 0], sizes = [1, 32, 8], strides = [1, 1, 1]} : vector<4x32x8xf32> to vector<1x32x8xf32>
    %228 = vector.shape_cast %227 : vector<1x32x8xf32> to vector<32x8xf32>
    %cst_88 = arith.constant dense<0.000000e+00> : vector<16x8xf32>
    %229 = tpu.matmul %182, %228, %cst_88 {dimension_numbers = #tpu.dot_dimension_numbers<[1], [0], [0], [1], [0, 0, 1, 1], [], []>} : vector<16x32xf32>, vector<32x8xf32>, vector<16x8xf32> -> vector<16x8xf32>
    %230 = vector.extract_strided_slice %190 {offsets = [1, 0, 0], sizes = [1, 32, 8], strides = [1, 1, 1]} : vector<4x32x8xf32> to vector<1x32x8xf32>
    %231 = vector.shape_cast %230 : vector<1x32x8xf32> to vector<32x8xf32>
    %cst_89 = arith.constant dense<0.000000e+00> : vector<16x8xf32>
    %232 = tpu.matmul %182, %231, %cst_89 {dimension_numbers = #tpu.dot_dimension_numbers<[1], [0], [0], [1], [0, 0, 1, 1], [], []>} : vector<16x32xf32>, vector<32x8xf32>, vector<16x8xf32> -> vector<16x8xf32>
    %233 = vector.extract_strided_slice %190 {offsets = [2, 0, 0], sizes = [1, 32, 8], strides = [1, 1, 1]} : vector<4x32x8xf32> to vector<1x32x8xf32>
    %234 = vector.shape_cast %233 : vector<1x32x8xf32> to vector<32x8xf32>
    %cst_90 = arith.constant dense<0.000000e+00> : vector<16x8xf32>
    %235 = tpu.matmul %182, %234, %cst_90 {dimension_numbers = #tpu.dot_dimension_numbers<[1], [0], [0], [1], [0, 0, 1, 1], [], []>} : vector<16x32xf32>, vector<32x8xf32>, vector<16x8xf32> -> vector<16x8xf32>
    %236 = vector.extract_strided_slice %190 {offsets = [3, 0, 0], sizes = [1, 32, 8], strides = [1, 1, 1]} : vector<4x32x8xf32> to vector<1x32x8xf32>
    %237 = vector.shape_cast %236 : vector<1x32x8xf32> to vector<32x8xf32>
    %cst_91 = arith.constant dense<0.000000e+00> : vector<16x8xf32>
    %238 = tpu.matmul %182, %237, %cst_91 {dimension_numbers = #tpu.dot_dimension_numbers<[1], [0], [0], [1], [0, 0, 1, 1], [], []>} : vector<16x32xf32>, vector<32x8xf32>, vector<16x8xf32> -> vector<16x8xf32>
    %239 = vector.shape_cast %229 : vector<16x8xf32> to vector<1x16x8xf32>
    %240 = vector.shape_cast %232 : vector<16x8xf32> to vector<1x16x8xf32>
    %241 = vector.shape_cast %235 : vector<16x8xf32> to vector<1x16x8xf32>
    %242 = vector.shape_cast %238 : vector<16x8xf32> to vector<1x16x8xf32>
    %243 = tpu.concatenate %239, %240, %241, %242 in 0 : vector<1x16x8xf32>, vector<1x16x8xf32>, vector<1x16x8xf32>, vector<1x16x8xf32> -> vector<4x16x8xf32>
    %244 = vector.extract_strided_slice %192 {offsets = [0, 0, 0], sizes = [1, 32, 32], strides = [1, 1, 1]} : vector<4x32x32xf32> to vector<1x32x32xf32>
    %245 = vector.shape_cast %244 : vector<1x32x32xf32> to vector<32x32xf32>
    %cst_92 = arith.constant dense<0.000000e+00> : vector<16x32xf32>
    %246 = tpu.matmul %182, %245, %cst_92 {dimension_numbers = #tpu.dot_dimension_numbers<[1], [0], [0], [1], [0, 0, 1, 1], [], []>} : vector<16x32xf32>, vector<32x32xf32>, vector<16x32xf32> -> vector<16x32xf32>
    %247 = vector.extract_strided_slice %192 {offsets = [1, 0, 0], sizes = [1, 32, 32], strides = [1, 1, 1]} : vector<4x32x32xf32> to vector<1x32x32xf32>
    %248 = vector.shape_cast %247 : vector<1x32x32xf32> to vector<32x32xf32>
    %cst_93 = arith.constant dense<0.000000e+00> : vector<16x32xf32>
    %249 = tpu.matmul %182, %248, %cst_93 {dimension_numbers = #tpu.dot_dimension_numbers<[1], [0], [0], [1], [0, 0, 1, 1], [], []>} : vector<16x32xf32>, vector<32x32xf32>, vector<16x32xf32> -> vector<16x32xf32>
    %250 = vector.extract_strided_slice %192 {offsets = [2, 0, 0], sizes = [1, 32, 32], strides = [1, 1, 1]} : vector<4x32x32xf32> to vector<1x32x32xf32>
    %251 = vector.shape_cast %250 : vector<1x32x32xf32> to vector<32x32xf32>
    %cst_94 = arith.constant dense<0.000000e+00> : vector<16x32xf32>
    %252 = tpu.matmul %182, %251, %cst_94 {dimension_numbers = #tpu.dot_dimension_numbers<[1], [0], [0], [1], [0, 0, 1, 1], [], []>} : vector<16x32xf32>, vector<32x32xf32>, vector<16x32xf32> -> vector<16x32xf32>
    %253 = vector.extract_strided_slice %192 {offsets = [3, 0, 0], sizes = [1, 32, 32], strides = [1, 1, 1]} : vector<4x32x32xf32> to vector<1x32x32xf32>
    %254 = vector.shape_cast %253 : vector<1x32x32xf32> to vector<32x32xf32>
    %cst_95 = arith.constant dense<0.000000e+00> : vector<16x32xf32>
    %255 = tpu.matmul %182, %254, %cst_95 {dimension_numbers = #tpu.dot_dimension_numbers<[1], [0], [0], [1], [0, 0, 1, 1], [], []>} : vector<16x32xf32>, vector<32x32xf32>, vector<16x32xf32> -> vector<16x32xf32>
    %256 = vector.shape_cast %246 : vector<16x32xf32> to vector<1x16x32xf32>
    %257 = vector.shape_cast %249 : vector<16x32xf32> to vector<1x16x32xf32>
    %258 = vector.shape_cast %252 : vector<16x32xf32> to vector<1x16x32xf32>
    %259 = vector.shape_cast %255 : vector<16x32xf32> to vector<1x16x32xf32>
    %260 = tpu.concatenate %256, %257, %258, %259 in 0 : vector<1x16x32xf32>, vector<1x16x32xf32>, vector<1x16x32xf32>, vector<1x16x32xf32> -> vector<4x16x32xf32>
    "tpu.trace_start"() <{level = 10 : i32, message = "hqd,hkd->hqk"}> : () -> ()
    %cst_96 = arith.constant dense<0.000000e+00> : vector<4x16x16xf32>
    %261 = tpu.matmul %226, %243, %cst_96 {dimension_numbers = #tpu.dot_dimension_numbers<[2], [2], [1], [1], [0, 0, 0, 1, 1, 1], [0], [0]>} : vector<4x16x8xf32>, vector<4x16x8xf32>, vector<4x16x16xf32> -> vector<4x16x16xf32>
    "tpu.trace_stop"() : () -> ()
    %262 = vector.shape_cast %11 : vector<16x16xf32> to vector<1x16x16xf32>
    %263 = vector.broadcast %262 : vector<1x16x16xf32> to vector<4x16x16xf32>
    %264 = arith.addf %261, %263 : vector<4x16x16xf32>
    %cst_97 = arith.constant dense<0xFF800000> : vector<4x16xf32>
    %265 = vector.multi_reduction <maximumf>, %264, %cst_97 [2] : vector<4x16x16xf32> to vector<4x16xf32>
    %266 = vector.shape_cast %265 : vector<4x16xf32> to vector<4x16x1xf32>
    %267 = vector.broadcast %266 : vector<4x16x1xf32> to vector<4x16x16xf32>
    %268 = arith.subf %264, %267 : vector<4x16x16xf32>
    %269 = math.exp %268 : vector<4x16x16xf32>
    %cst_98 = arith.constant dense<0.000000e+00> : vector<4x16xf32>
    %270 = vector.multi_reduction <add>, %269, %cst_98 [2] : vector<4x16x16xf32> to vector<4x16xf32>
    %271 = vector.shape_cast %270 : vector<4x16xf32> to vector<4x16x1xf32>
    %272 = tpu.reciprocal %271 {approx = true} : vector<4x16x1xf32> -> vector<4x16x1xf32>
    %273 = vector.broadcast %272 : vector<4x16x1xf32> to vector<4x16x16xf32>
    %274 = arith.mulf %269, %273 : vector<4x16x16xf32>
    "tpu.trace_start"() <{level = 10 : i32, message = "hqk,hkd->hqd"}> : () -> ()
    %cst_99 = arith.constant dense<0.000000e+00> : vector<4x16x32xf32>
    %275 = tpu.matmul %274, %260, %cst_99 {dimension_numbers = #tpu.dot_dimension_numbers<[2], [1], [1], [2], [0, 0, 0, 1, 1, 2], [0], [0]>} : vector<4x16x16xf32>, vector<4x16x32xf32>, vector<4x16x32xf32> -> vector<4x16x32xf32>
    "tpu.trace_stop"() : () -> ()
    %276 = vector.extract_strided_slice %275 {offsets = [0, 0, 0], sizes = [1, 16, 32], strides = [1, 1, 1]} : vector<4x16x32xf32> to vector<1x16x32xf32>
    %277 = vector.shape_cast %276 : vector<1x16x32xf32> to vector<16x32xf32>
    %278 = vector.extract_strided_slice %275 {offsets = [1, 0, 0], sizes = [1, 16, 32], strides = [1, 1, 1]} : vector<4x16x32xf32> to vector<1x16x32xf32>
    %279 = vector.shape_cast %278 : vector<1x16x32xf32> to vector<16x32xf32>
    %280 = arith.addf %277, %279 : vector<16x32xf32>
    %281 = vector.extract_strided_slice %275 {offsets = [2, 0, 0], sizes = [1, 16, 32], strides = [1, 1, 1]} : vector<4x16x32xf32> to vector<1x16x32xf32>
    %282 = vector.shape_cast %281 : vector<1x16x32xf32> to vector<16x32xf32>
    %283 = arith.addf %280, %282 : vector<16x32xf32>
    %284 = vector.extract_strided_slice %275 {offsets = [3, 0, 0], sizes = [1, 16, 32], strides = [1, 1, 1]} : vector<4x16x32xf32> to vector<1x16x32xf32>
    %285 = vector.shape_cast %284 : vector<1x16x32xf32> to vector<16x32xf32>
    %286 = arith.addf %283, %285 : vector<16x32xf32>
    %287 = vector.broadcast %193 : vector<1x32xf32> to vector<16x32xf32>
    %288 = arith.addf %286, %287 : vector<16x32xf32>
    %289 = arith.addf %182, %288 : vector<16x32xf32>
    %290 = vector.extract_strided_slice %184 {offsets = [1, 0], sizes = [1, 32], strides = [1, 1]} : vector<6x32xf32> to vector<1x32xf32>
    %291 = vector.extract_strided_slice %184 {offsets = [2, 0], sizes = [1, 32], strides = [1, 1]} : vector<6x32xf32> to vector<1x32xf32>
    %cst_100 = arith.constant dense<0.000000e+00> : vector<16xf32>
    %292 = vector.multi_reduction <add>, %289, %cst_100 [1] : vector<16x32xf32> to vector<16xf32>
    %293 = vector.shape_cast %292 : vector<16xf32> to vector<16x1xf32>
    %cst_101 = arith.constant 3.200000e+01 : f32
    %294 = vector.broadcast %cst_101 : f32 to vector<16x1xf32>
    %295 = arith.divf %293, %294 : vector<16x1xf32>
    %296 = vector.broadcast %295 : vector<16x1xf32> to vector<16x32xf32>
    %297 = arith.subf %289, %296 : vector<16x32xf32>
    %298 = arith.mulf %297, %297 : vector<16x32xf32>
    %cst_102 = arith.constant dense<0.000000e+00> : vector<16xf32>
    %299 = vector.multi_reduction <add>, %298, %cst_102 [1] : vector<16x32xf32> to vector<16xf32>
    %300 = vector.shape_cast %299 : vector<16xf32> to vector<16x1xf32>
    %cst_103 = arith.constant 3.200000e+01 : f32
    %301 = vector.broadcast %cst_103 : f32 to vector<16x1xf32>
    %302 = arith.divf %300, %301 : vector<16x1xf32>
    %303 = vector.broadcast %295 : vector<16x1xf32> to vector<16x32xf32>
    %304 = arith.subf %289, %303 : vector<16x32xf32>
    %cst_104 = arith.constant 9.99999974E-6 : f32
    %305 = vector.broadcast %cst_104 : f32 to vector<16x1xf32>
    %306 = arith.addf %302, %305 : vector<16x1xf32>
    %307 = math.rsqrt %306 : vector<16x1xf32>
    %308 = vector.broadcast %307 : vector<16x1xf32> to vector<16x32xf32>
    %309 = arith.mulf %304, %308 : vector<16x32xf32>
    %310 = vector.broadcast %290 : vector<1x32xf32> to vector<16x32xf32>
    %311 = arith.mulf %309, %310 : vector<16x32xf32>
    %312 = vector.broadcast %291 : vector<1x32xf32> to vector<16x32xf32>
    %313 = arith.addf %311, %312 : vector<16x32xf32>
    %c1_105 = arith.constant 1 : index
    %c0_106 = arith.constant 0 : index
    %c0_107 = arith.constant 0 : index
    %314 = vector.load %arg13[%c1_105, %c0_106, %c0_107] : memref<2x32x64xf32, #tpu.memory_space<vmem>>, vector<1x32x64xf32>
    %315 = vector.shape_cast %314 : vector<1x32x64xf32> to vector<32x64xf32>
    %cst_108 = arith.constant dense<0.000000e+00> : vector<16x64xf32>
    %316 = tpu.matmul %313, %315, %cst_108 {dimension_numbers = #tpu.dot_dimension_numbers<[1], [0], [0], [1], [0, 0, 1, 1], [], []>} : vector<16x32xf32>, vector<32x64xf32>, vector<16x64xf32> -> vector<16x64xf32>
    %c1_109 = arith.constant 1 : index
    %c0_110 = arith.constant 0 : index
    %c0_111 = arith.constant 0 : index
    %317 = vector.load %arg14[%c1_109, %c0_110, %c0_111] : memref<2x1x64xf32, #tpu.memory_space<vmem>>, vector<1x1x64xf32>
    %318 = vector.shape_cast %317 : vector<1x1x64xf32> to vector<1x64xf32>
    %319 = vector.broadcast %318 : vector<1x64xf32> to vector<16x64xf32>
    %320 = arith.addf %316, %319 : vector<16x64xf32>
    %cst_112 = arith.constant 0.000000e+00 : f32
    %321 = vector.broadcast %cst_112 : f32 to vector<16x64xf32>
    %322 = arith.maximumf %320, %321 : vector<16x64xf32>
    %c1_113 = arith.constant 1 : index
    %c0_114 = arith.constant 0 : index
    %c0_115 = arith.constant 0 : index
    %323 = vector.load %arg15[%c1_113, %c0_114, %c0_115] : memref<2x64x32xf32, #tpu.memory_space<vmem>>, vector<1x64x32xf32>
    %324 = vector.shape_cast %323 : vector<1x64x32xf32> to vector<64x32xf32>
    %cst_116 = arith.constant dense<0.000000e+00> : vector<16x32xf32>
    %325 = tpu.matmul %322, %324, %cst_116 {dimension_numbers = #tpu.dot_dimension_numbers<[1], [0], [0], [1], [0, 0, 1, 1], [], []>} : vector<16x64xf32>, vector<64x32xf32>, vector<16x32xf32> -> vector<16x32xf32>
    %326 = vector.extract_strided_slice %184 {offsets = [3, 0], sizes = [1, 32], strides = [1, 1]} : vector<6x32xf32> to vector<1x32xf32>
    %327 = vector.broadcast %326 : vector<1x32xf32> to vector<16x32xf32>
    %328 = arith.addf %325, %327 : vector<16x32xf32>
    %329 = arith.addf %313, %328 : vector<16x32xf32>
    %330 = vector.extract_strided_slice %184 {offsets = [4, 0], sizes = [1, 32], strides = [1, 1]} : vector<6x32xf32> to vector<1x32xf32>
    %331 = vector.extract_strided_slice %184 {offsets = [5, 0], sizes = [1, 32], strides = [1, 1]} : vector<6x32xf32> to vector<1x32xf32>
    %cst_117 = arith.constant dense<0.000000e+00> : vector<16xf32>
    %332 = vector.multi_reduction <add>, %329, %cst_117 [1] : vector<16x32xf32> to vector<16xf32>
    %333 = vector.shape_cast %332 : vector<16xf32> to vector<16x1xf32>
    %cst_118 = arith.constant 3.200000e+01 : f32
    %334 = vector.broadcast %cst_118 : f32 to vector<16x1xf32>
    %335 = arith.divf %333, %334 : vector<16x1xf32>
    %336 = vector.broadcast %335 : vector<16x1xf32> to vector<16x32xf32>
    %337 = arith.subf %329, %336 : vector<16x32xf32>
    %338 = arith.mulf %337, %337 : vector<16x32xf32>
    %cst_119 = arith.constant dense<0.000000e+00> : vector<16xf32>
    %339 = vector.multi_reduction <add>, %338, %cst_119 [1] : vector<16x32xf32> to vector<16xf32>
    %340 = vector.shape_cast %339 : vector<16xf32> to vector<16x1xf32>
    %cst_120 = arith.constant 3.200000e+01 : f32
    %341 = vector.broadcast %cst_120 : f32 to vector<16x1xf32>
    %342 = arith.divf %340, %341 : vector<16x1xf32>
    %343 = vector.broadcast %335 : vector<16x1xf32> to vector<16x32xf32>
    %344 = arith.subf %329, %343 : vector<16x32xf32>
    %cst_121 = arith.constant 9.99999974E-6 : f32
    %345 = vector.broadcast %cst_121 : f32 to vector<16x1xf32>
    %346 = arith.addf %342, %345 : vector<16x1xf32>
    %347 = math.rsqrt %346 : vector<16x1xf32>
    %348 = vector.broadcast %347 : vector<16x1xf32> to vector<16x32xf32>
    %349 = arith.mulf %344, %348 : vector<16x32xf32>
    %350 = vector.broadcast %330 : vector<1x32xf32> to vector<16x32xf32>
    %351 = arith.mulf %349, %350 : vector<16x32xf32>
    %352 = vector.broadcast %331 : vector<1x32xf32> to vector<16x32xf32>
    %353 = arith.addf %351, %352 : vector<16x32xf32>
    %354 = tpu.iota {dimensions = array<i32: 1>} : vector<16x128xi32>
    %c0_122 = arith.constant 0 : index
    %c0_123 = arith.constant 0 : index
    %355 = vector.load %arg1[%c0_122, %c0_123] : memref<16x1xi32, #tpu.memory_space<vmem>>, vector<16x1xi32>
    %356 = vector.broadcast %355 : vector<16x1xi32> to vector<16x128xi32>
    %357 = arith.cmpi eq, %354, %356 : vector<16x128xi32>
    %cst_124 = arith.constant 1.000000e+00 : f32
    %cst_125 = arith.constant 0.000000e+00 : f32
    %358 = vector.broadcast %cst_124 : f32 to vector<16x128xf32>
    %359 = vector.broadcast %cst_125 : f32 to vector<16x128xf32>
    %360 = arith.select %357, %358, %359 : vector<16x128xi1>, vector<16x128xf32>
    %c0_126 = arith.constant 0 : index
    %c0_127 = arith.constant 0 : index
    %361 = vector.load %arg7[%c0_126, %c0_127] : memref<128x32xf32, #tpu.memory_space<vmem>>, vector<128x32xf32>
    %cst_128 = arith.constant dense<0.000000e+00> : vector<16x32xf32>
    %362 = tpu.matmul %360, %361, %cst_128 {dimension_numbers = #tpu.dot_dimension_numbers<[1], [0], [0], [1], [0, 0, 1, 1], [], []>} : vector<16x128xf32>, vector<128x32xf32>, vector<16x32xf32> -> vector<16x32xf32>
    %c0_129 = arith.constant 0 : index
    %c0_130 = arith.constant 0 : index
    %363 = vector.load %arg8[%c0_129, %c0_130] : memref<16x32xf32, #tpu.memory_space<vmem>>, vector<16x32xf32>
    %364 = arith.addf %362, %363 : vector<16x32xf32>
    %c0_131 = arith.constant 0 : index
    %c0_132 = arith.constant 0 : index
    %365 = vector.load %arg3[%c0_131, %c0_132] : memref<16x16xf32, #tpu.memory_space<vmem>>, vector<16x16xf32>
    %c0_133 = arith.constant 0 : index
    %c0_134 = arith.constant 0 : index
    %366 = vector.load %arg4[%c0_133, %c0_134] : memref<16x16xf32, #tpu.memory_space<vmem>>, vector<16x16xf32>
    %c0_135 = arith.constant 0 : index
    %c0_136 = arith.constant 0 : index
    %c0_137 = arith.constant 0 : index
    %367 = vector.load %arg24[%c0_135, %c0_136, %c0_137] : memref<2x9x32xf32, #tpu.memory_space<vmem>>, vector<1x9x32xf32>
    %368 = vector.shape_cast %367 : vector<1x9x32xf32> to vector<9x32xf32>
    %c0_138 = arith.constant 0 : index
    %c0_139 = arith.constant 0 : index
    %c0_140 = arith.constant 0 : index
    %c0_141 = arith.constant 0 : index
    %369 = vector.load %arg17[%c0_138, %c0_139, %c0_140, %c0_141] : memref<4x4x32x8xf32, #tpu.memory_space<vmem>>, vector<1x4x32x8xf32>
    %370 = vector.shape_cast %369 : vector<1x4x32x8xf32> to vector<4x32x8xf32>
    %c0_142 = arith.constant 0 : index
    %c0_143 = arith.constant 0 : index
    %c0_144 = arith.constant 0 : index
    %c0_145 = arith.constant 0 : index
    %371 = vector.load %arg18[%c0_142, %c0_143, %c0_144, %c0_145] : memref<4x4x1x8xf32, #tpu.memory_space<vmem>>, vector<1x4x1x8xf32>
    %372 = vector.shape_cast %371 : vector<1x4x1x8xf32> to vector<4x1x8xf32>
    %c0_146 = arith.constant 0 : index
    %c0_147 = arith.constant 0 : index
    %c0_148 = arith.constant 0 : index
    %c0_149 = arith.constant 0 : index
    %373 = vector.load %arg19[%c0_146, %c0_147, %c0_148, %c0_149] : memref<4x4x32x8xf32, #tpu.memory_space<vmem>>, vector<1x4x32x8xf32>
    %374 = vector.shape_cast %373 : vector<1x4x32x8xf32> to vector<4x32x8xf32>
    %c0_150 = arith.constant 0 : index
    %c0_151 = arith.constant 0 : index
    %c0_152 = arith.constant 0 : index
    %c0_153 = arith.constant 0 : index
    %375 = vector.load %arg20[%c0_150, %c0_151, %c0_152, %c0_153] : memref<4x4x32x32xf32, #tpu.memory_space<vmem>>, vector<1x4x32x32xf32>
    %376 = vector.shape_cast %375 : vector<1x4x32x32xf32> to vector<4x32x32xf32>
    %377 = vector.extract_strided_slice %368 {offsets = [0, 0], sizes = [1, 32], strides = [1, 1]} : vector<9x32xf32> to vector<1x32xf32>
    %378 = vector.extract_strided_slice %370 {offsets = [0, 0, 0], sizes = [1, 32, 8], strides = [1, 1, 1]} : vector<4x32x8xf32> to vector<1x32x8xf32>
    %379 = vector.shape_cast %378 : vector<1x32x8xf32> to vector<32x8xf32>
    %cst_154 = arith.constant dense<0.000000e+00> : vector<16x8xf32>
    %380 = tpu.matmul %364, %379, %cst_154 {dimension_numbers = #tpu.dot_dimension_numbers<[1], [0], [0], [1], [0, 0, 1, 1], [], []>} : vector<16x32xf32>, vector<32x8xf32>, vector<16x8xf32> -> vector<16x8xf32>
    %381 = vector.extract_strided_slice %372 {offsets = [0, 0, 0], sizes = [1, 1, 8], strides = [1, 1, 1]} : vector<4x1x8xf32> to vector<1x1x8xf32>
    %382 = vector.shape_cast %381 : vector<1x1x8xf32> to vector<1x8xf32>
    %383 = vector.broadcast %382 : vector<1x8xf32> to vector<16x8xf32>
    %384 = arith.addf %380, %383 : vector<16x8xf32>
    %385 = vector.extract_strided_slice %370 {offsets = [1, 0, 0], sizes = [1, 32, 8], strides = [1, 1, 1]} : vector<4x32x8xf32> to vector<1x32x8xf32>
    %386 = vector.shape_cast %385 : vector<1x32x8xf32> to vector<32x8xf32>
    %cst_155 = arith.constant dense<0.000000e+00> : vector<16x8xf32>
    %387 = tpu.matmul %364, %386, %cst_155 {dimension_numbers = #tpu.dot_dimension_numbers<[1], [0], [0], [1], [0, 0, 1, 1], [], []>} : vector<16x32xf32>, vector<32x8xf32>, vector<16x8xf32> -> vector<16x8xf32>
    %388 = vector.extract_strided_slice %372 {offsets = [1, 0, 0], sizes = [1, 1, 8], strides = [1, 1, 1]} : vector<4x1x8xf32> to vector<1x1x8xf32>
    %389 = vector.shape_cast %388 : vector<1x1x8xf32> to vector<1x8xf32>
    %390 = vector.broadcast %389 : vector<1x8xf32> to vector<16x8xf32>
    %391 = arith.addf %387, %390 : vector<16x8xf32>
    %392 = vector.extract_strided_slice %370 {offsets = [2, 0, 0], sizes = [1, 32, 8], strides = [1, 1, 1]} : vector<4x32x8xf32> to vector<1x32x8xf32>
    %393 = vector.shape_cast %392 : vector<1x32x8xf32> to vector<32x8xf32>
    %cst_156 = arith.constant dense<0.000000e+00> : vector<16x8xf32>
    %394 = tpu.matmul %364, %393, %cst_156 {dimension_numbers = #tpu.dot_dimension_numbers<[1], [0], [0], [1], [0, 0, 1, 1], [], []>} : vector<16x32xf32>, vector<32x8xf32>, vector<16x8xf32> -> vector<16x8xf32>
    %395 = vector.extract_strided_slice %372 {offsets = [2, 0, 0], sizes = [1, 1, 8], strides = [1, 1, 1]} : vector<4x1x8xf32> to vector<1x1x8xf32>
    %396 = vector.shape_cast %395 : vector<1x1x8xf32> to vector<1x8xf32>
    %397 = vector.broadcast %396 : vector<1x8xf32> to vector<16x8xf32>
    %398 = arith.addf %394, %397 : vector<16x8xf32>
    %399 = vector.extract_strided_slice %370 {offsets = [3, 0, 0], sizes = [1, 32, 8], strides = [1, 1, 1]} : vector<4x32x8xf32> to vector<1x32x8xf32>
    %400 = vector.shape_cast %399 : vector<1x32x8xf32> to vector<32x8xf32>
    %cst_157 = arith.constant dense<0.000000e+00> : vector<16x8xf32>
    %401 = tpu.matmul %364, %400, %cst_157 {dimension_numbers = #tpu.dot_dimension_numbers<[1], [0], [0], [1], [0, 0, 1, 1], [], []>} : vector<16x32xf32>, vector<32x8xf32>, vector<16x8xf32> -> vector<16x8xf32>
    %402 = vector.extract_strided_slice %372 {offsets = [3, 0, 0], sizes = [1, 1, 8], strides = [1, 1, 1]} : vector<4x1x8xf32> to vector<1x1x8xf32>
    %403 = vector.shape_cast %402 : vector<1x1x8xf32> to vector<1x8xf32>
    %404 = vector.broadcast %403 : vector<1x8xf32> to vector<16x8xf32>
    %405 = arith.addf %401, %404 : vector<16x8xf32>
    %406 = vector.shape_cast %384 : vector<16x8xf32> to vector<1x16x8xf32>
    %407 = vector.shape_cast %391 : vector<16x8xf32> to vector<1x16x8xf32>
    %408 = vector.shape_cast %398 : vector<16x8xf32> to vector<1x16x8xf32>
    %409 = vector.shape_cast %405 : vector<16x8xf32> to vector<1x16x8xf32>
    %410 = tpu.concatenate %406, %407, %408, %409 in 0 : vector<1x16x8xf32>, vector<1x16x8xf32>, vector<1x16x8xf32>, vector<1x16x8xf32> -> vector<4x16x8xf32>
    %411 = vector.extract_strided_slice %374 {offsets = [0, 0, 0], sizes = [1, 32, 8], strides = [1, 1, 1]} : vector<4x32x8xf32> to vector<1x32x8xf32>
    %412 = vector.shape_cast %411 : vector<1x32x8xf32> to vector<32x8xf32>
    %cst_158 = arith.constant dense<0.000000e+00> : vector<16x8xf32>
    %413 = tpu.matmul %364, %412, %cst_158 {dimension_numbers = #tpu.dot_dimension_numbers<[1], [0], [0], [1], [0, 0, 1, 1], [], []>} : vector<16x32xf32>, vector<32x8xf32>, vector<16x8xf32> -> vector<16x8xf32>
    %414 = vector.extract_strided_slice %374 {offsets = [1, 0, 0], sizes = [1, 32, 8], strides = [1, 1, 1]} : vector<4x32x8xf32> to vector<1x32x8xf32>
    %415 = vector.shape_cast %414 : vector<1x32x8xf32> to vector<32x8xf32>
    %cst_159 = arith.constant dense<0.000000e+00> : vector<16x8xf32>
    %416 = tpu.matmul %364, %415, %cst_159 {dimension_numbers = #tpu.dot_dimension_numbers<[1], [0], [0], [1], [0, 0, 1, 1], [], []>} : vector<16x32xf32>, vector<32x8xf32>, vector<16x8xf32> -> vector<16x8xf32>
    %417 = vector.extract_strided_slice %374 {offsets = [2, 0, 0], sizes = [1, 32, 8], strides = [1, 1, 1]} : vector<4x32x8xf32> to vector<1x32x8xf32>
    %418 = vector.shape_cast %417 : vector<1x32x8xf32> to vector<32x8xf32>
    %cst_160 = arith.constant dense<0.000000e+00> : vector<16x8xf32>
    %419 = tpu.matmul %364, %418, %cst_160 {dimension_numbers = #tpu.dot_dimension_numbers<[1], [0], [0], [1], [0, 0, 1, 1], [], []>} : vector<16x32xf32>, vector<32x8xf32>, vector<16x8xf32> -> vector<16x8xf32>
    %420 = vector.extract_strided_slice %374 {offsets = [3, 0, 0], sizes = [1, 32, 8], strides = [1, 1, 1]} : vector<4x32x8xf32> to vector<1x32x8xf32>
    %421 = vector.shape_cast %420 : vector<1x32x8xf32> to vector<32x8xf32>
    %cst_161 = arith.constant dense<0.000000e+00> : vector<16x8xf32>
    %422 = tpu.matmul %364, %421, %cst_161 {dimension_numbers = #tpu.dot_dimension_numbers<[1], [0], [0], [1], [0, 0, 1, 1], [], []>} : vector<16x32xf32>, vector<32x8xf32>, vector<16x8xf32> -> vector<16x8xf32>
    %423 = vector.shape_cast %413 : vector<16x8xf32> to vector<1x16x8xf32>
    %424 = vector.shape_cast %416 : vector<16x8xf32> to vector<1x16x8xf32>
    %425 = vector.shape_cast %419 : vector<16x8xf32> to vector<1x16x8xf32>
    %426 = vector.shape_cast %422 : vector<16x8xf32> to vector<1x16x8xf32>
    %427 = tpu.concatenate %423, %424, %425, %426 in 0 : vector<1x16x8xf32>, vector<1x16x8xf32>, vector<1x16x8xf32>, vector<1x16x8xf32> -> vector<4x16x8xf32>
    %428 = vector.extract_strided_slice %376 {offsets = [0, 0, 0], sizes = [1, 32, 32], strides = [1, 1, 1]} : vector<4x32x32xf32> to vector<1x32x32xf32>
    %429 = vector.shape_cast %428 : vector<1x32x32xf32> to vector<32x32xf32>
    %cst_162 = arith.constant dense<0.000000e+00> : vector<16x32xf32>
    %430 = tpu.matmul %364, %429, %cst_162 {dimension_numbers = #tpu.dot_dimension_numbers<[1], [0], [0], [1], [0, 0, 1, 1], [], []>} : vector<16x32xf32>, vector<32x32xf32>, vector<16x32xf32> -> vector<16x32xf32>
    %431 = vector.extract_strided_slice %376 {offsets = [1, 0, 0], sizes = [1, 32, 32], strides = [1, 1, 1]} : vector<4x32x32xf32> to vector<1x32x32xf32>
    %432 = vector.shape_cast %431 : vector<1x32x32xf32> to vector<32x32xf32>
    %cst_163 = arith.constant dense<0.000000e+00> : vector<16x32xf32>
    %433 = tpu.matmul %364, %432, %cst_163 {dimension_numbers = #tpu.dot_dimension_numbers<[1], [0], [0], [1], [0, 0, 1, 1], [], []>} : vector<16x32xf32>, vector<32x32xf32>, vector<16x32xf32> -> vector<16x32xf32>
    %434 = vector.extract_strided_slice %376 {offsets = [2, 0, 0], sizes = [1, 32, 32], strides = [1, 1, 1]} : vector<4x32x32xf32> to vector<1x32x32xf32>
    %435 = vector.shape_cast %434 : vector<1x32x32xf32> to vector<32x32xf32>
    %cst_164 = arith.constant dense<0.000000e+00> : vector<16x32xf32>
    %436 = tpu.matmul %364, %435, %cst_164 {dimension_numbers = #tpu.dot_dimension_numbers<[1], [0], [0], [1], [0, 0, 1, 1], [], []>} : vector<16x32xf32>, vector<32x32xf32>, vector<16x32xf32> -> vector<16x32xf32>
    %437 = vector.extract_strided_slice %376 {offsets = [3, 0, 0], sizes = [1, 32, 32], strides = [1, 1, 1]} : vector<4x32x32xf32> to vector<1x32x32xf32>
    %438 = vector.shape_cast %437 : vector<1x32x32xf32> to vector<32x32xf32>
    %cst_165 = arith.constant dense<0.000000e+00> : vector<16x32xf32>
    %439 = tpu.matmul %364, %438, %cst_165 {dimension_numbers = #tpu.dot_dimension_numbers<[1], [0], [0], [1], [0, 0, 1, 1], [], []>} : vector<16x32xf32>, vector<32x32xf32>, vector<16x32xf32> -> vector<16x32xf32>
    %440 = vector.shape_cast %430 : vector<16x32xf32> to vector<1x16x32xf32>
    %441 = vector.shape_cast %433 : vector<16x32xf32> to vector<1x16x32xf32>
    %442 = vector.shape_cast %436 : vector<16x32xf32> to vector<1x16x32xf32>
    %443 = vector.shape_cast %439 : vector<16x32xf32> to vector<1x16x32xf32>
    %444 = tpu.concatenate %440, %441, %442, %443 in 0 : vector<1x16x32xf32>, vector<1x16x32xf32>, vector<1x16x32xf32>, vector<1x16x32xf32> -> vector<4x16x32xf32>
    "tpu.trace_start"() <{level = 10 : i32, message = "hqd,hkd->hqk"}> : () -> ()
    %cst_166 = arith.constant dense<0.000000e+00> : vector<4x16x16xf32>
    %445 = tpu.matmul %410, %427, %cst_166 {dimension_numbers = #tpu.dot_dimension_numbers<[2], [2], [1], [1], [0, 0, 0, 1, 1, 1], [0], [0]>} : vector<4x16x8xf32>, vector<4x16x8xf32>, vector<4x16x16xf32> -> vector<4x16x16xf32>
    "tpu.trace_stop"() : () -> ()
    %446 = vector.shape_cast %365 : vector<16x16xf32> to vector<1x16x16xf32>
    %447 = vector.broadcast %446 : vector<1x16x16xf32> to vector<4x16x16xf32>
    %448 = arith.addf %445, %447 : vector<4x16x16xf32>
    %cst_167 = arith.constant dense<0xFF800000> : vector<4x16xf32>
    %449 = vector.multi_reduction <maximumf>, %448, %cst_167 [2] : vector<4x16x16xf32> to vector<4x16xf32>
    %450 = vector.shape_cast %449 : vector<4x16xf32> to vector<4x16x1xf32>
    %451 = vector.broadcast %450 : vector<4x16x1xf32> to vector<4x16x16xf32>
    %452 = arith.subf %448, %451 : vector<4x16x16xf32>
    %453 = math.exp %452 : vector<4x16x16xf32>
    %cst_168 = arith.constant dense<0.000000e+00> : vector<4x16xf32>
    %454 = vector.multi_reduction <add>, %453, %cst_168 [2] : vector<4x16x16xf32> to vector<4x16xf32>
    %455 = vector.shape_cast %454 : vector<4x16xf32> to vector<4x16x1xf32>
    %456 = tpu.reciprocal %455 {approx = true} : vector<4x16x1xf32> -> vector<4x16x1xf32>
    %457 = vector.broadcast %456 : vector<4x16x1xf32> to vector<4x16x16xf32>
    %458 = arith.mulf %453, %457 : vector<4x16x16xf32>
    "tpu.trace_start"() <{level = 10 : i32, message = "hqk,hkd->hqd"}> : () -> ()
    %cst_169 = arith.constant dense<0.000000e+00> : vector<4x16x32xf32>
    %459 = tpu.matmul %458, %444, %cst_169 {dimension_numbers = #tpu.dot_dimension_numbers<[2], [1], [1], [2], [0, 0, 0, 1, 1, 2], [0], [0]>} : vector<4x16x16xf32>, vector<4x16x32xf32>, vector<4x16x32xf32> -> vector<4x16x32xf32>
    "tpu.trace_stop"() : () -> ()
    %460 = vector.extract_strided_slice %459 {offsets = [0, 0, 0], sizes = [1, 16, 32], strides = [1, 1, 1]} : vector<4x16x32xf32> to vector<1x16x32xf32>
    %461 = vector.shape_cast %460 : vector<1x16x32xf32> to vector<16x32xf32>
    %462 = vector.extract_strided_slice %459 {offsets = [1, 0, 0], sizes = [1, 16, 32], strides = [1, 1, 1]} : vector<4x16x32xf32> to vector<1x16x32xf32>
    %463 = vector.shape_cast %462 : vector<1x16x32xf32> to vector<16x32xf32>
    %464 = arith.addf %461, %463 : vector<16x32xf32>
    %465 = vector.extract_strided_slice %459 {offsets = [2, 0, 0], sizes = [1, 16, 32], strides = [1, 1, 1]} : vector<4x16x32xf32> to vector<1x16x32xf32>
    %466 = vector.shape_cast %465 : vector<1x16x32xf32> to vector<16x32xf32>
    %467 = arith.addf %464, %466 : vector<16x32xf32>
    %468 = vector.extract_strided_slice %459 {offsets = [3, 0, 0], sizes = [1, 16, 32], strides = [1, 1, 1]} : vector<4x16x32xf32> to vector<1x16x32xf32>
    %469 = vector.shape_cast %468 : vector<1x16x32xf32> to vector<16x32xf32>
    %470 = arith.addf %467, %469 : vector<16x32xf32>
    %471 = vector.broadcast %377 : vector<1x32xf32> to vector<16x32xf32>
    %472 = arith.addf %470, %471 : vector<16x32xf32>
    %473 = arith.addf %364, %472 : vector<16x32xf32>
    %474 = vector.extract_strided_slice %368 {offsets = [1, 0], sizes = [1, 32], strides = [1, 1]} : vector<9x32xf32> to vector<1x32xf32>
    %475 = vector.extract_strided_slice %368 {offsets = [2, 0], sizes = [1, 32], strides = [1, 1]} : vector<9x32xf32> to vector<1x32xf32>
    %cst_170 = arith.constant dense<0.000000e+00> : vector<16xf32>
    %476 = vector.multi_reduction <add>, %473, %cst_170 [1] : vector<16x32xf32> to vector<16xf32>
    %477 = vector.shape_cast %476 : vector<16xf32> to vector<16x1xf32>
    %cst_171 = arith.constant 3.200000e+01 : f32
    %478 = vector.broadcast %cst_171 : f32 to vector<16x1xf32>
    %479 = arith.divf %477, %478 : vector<16x1xf32>
    %480 = vector.broadcast %479 : vector<16x1xf32> to vector<16x32xf32>
    %481 = arith.subf %473, %480 : vector<16x32xf32>
    %482 = arith.mulf %481, %481 : vector<16x32xf32>
    %cst_172 = arith.constant dense<0.000000e+00> : vector<16xf32>
    %483 = vector.multi_reduction <add>, %482, %cst_172 [1] : vector<16x32xf32> to vector<16xf32>
    %484 = vector.shape_cast %483 : vector<16xf32> to vector<16x1xf32>
    %cst_173 = arith.constant 3.200000e+01 : f32
    %485 = vector.broadcast %cst_173 : f32 to vector<16x1xf32>
    %486 = arith.divf %484, %485 : vector<16x1xf32>
    %487 = vector.broadcast %479 : vector<16x1xf32> to vector<16x32xf32>
    %488 = arith.subf %473, %487 : vector<16x32xf32>
    %cst_174 = arith.constant 9.99999974E-6 : f32
    %489 = vector.broadcast %cst_174 : f32 to vector<16x1xf32>
    %490 = arith.addf %486, %489 : vector<16x1xf32>
    %491 = math.rsqrt %490 : vector<16x1xf32>
    %492 = vector.broadcast %491 : vector<16x1xf32> to vector<16x32xf32>
    %493 = arith.mulf %488, %492 : vector<16x32xf32>
    %494 = vector.broadcast %474 : vector<1x32xf32> to vector<16x32xf32>
    %495 = arith.mulf %493, %494 : vector<16x32xf32>
    %496 = vector.broadcast %475 : vector<1x32xf32> to vector<16x32xf32>
    %497 = arith.addf %495, %496 : vector<16x32xf32>
    %c1_175 = arith.constant 1 : index
    %c0_176 = arith.constant 0 : index
    %c0_177 = arith.constant 0 : index
    %c0_178 = arith.constant 0 : index
    %498 = vector.load %arg17[%c1_175, %c0_176, %c0_177, %c0_178] : memref<4x4x32x8xf32, #tpu.memory_space<vmem>>, vector<1x4x32x8xf32>
    %499 = vector.shape_cast %498 : vector<1x4x32x8xf32> to vector<4x32x8xf32>
    %c1_179 = arith.constant 1 : index
    %c0_180 = arith.constant 0 : index
    %c0_181 = arith.constant 0 : index
    %c0_182 = arith.constant 0 : index
    %500 = vector.load %arg18[%c1_179, %c0_180, %c0_181, %c0_182] : memref<4x4x1x8xf32, #tpu.memory_space<vmem>>, vector<1x4x1x8xf32>
    %501 = vector.shape_cast %500 : vector<1x4x1x8xf32> to vector<4x1x8xf32>
    %c1_183 = arith.constant 1 : index
    %c0_184 = arith.constant 0 : index
    %c0_185 = arith.constant 0 : index
    %c0_186 = arith.constant 0 : index
    %502 = vector.load %arg19[%c1_183, %c0_184, %c0_185, %c0_186] : memref<4x4x32x8xf32, #tpu.memory_space<vmem>>, vector<1x4x32x8xf32>
    %503 = vector.shape_cast %502 : vector<1x4x32x8xf32> to vector<4x32x8xf32>
    %c1_187 = arith.constant 1 : index
    %c0_188 = arith.constant 0 : index
    %c0_189 = arith.constant 0 : index
    %c0_190 = arith.constant 0 : index
    %504 = vector.load %arg20[%c1_187, %c0_188, %c0_189, %c0_190] : memref<4x4x32x32xf32, #tpu.memory_space<vmem>>, vector<1x4x32x32xf32>
    %505 = vector.shape_cast %504 : vector<1x4x32x32xf32> to vector<4x32x32xf32>
    %506 = vector.extract_strided_slice %368 {offsets = [3, 0], sizes = [1, 32], strides = [1, 1]} : vector<9x32xf32> to vector<1x32xf32>
    %507 = vector.extract_strided_slice %499 {offsets = [0, 0, 0], sizes = [1, 32, 8], strides = [1, 1, 1]} : vector<4x32x8xf32> to vector<1x32x8xf32>
    %508 = vector.shape_cast %507 : vector<1x32x8xf32> to vector<32x8xf32>
    %cst_191 = arith.constant dense<0.000000e+00> : vector<16x8xf32>
    %509 = tpu.matmul %497, %508, %cst_191 {dimension_numbers = #tpu.dot_dimension_numbers<[1], [0], [0], [1], [0, 0, 1, 1], [], []>} : vector<16x32xf32>, vector<32x8xf32>, vector<16x8xf32> -> vector<16x8xf32>
    %510 = vector.extract_strided_slice %501 {offsets = [0, 0, 0], sizes = [1, 1, 8], strides = [1, 1, 1]} : vector<4x1x8xf32> to vector<1x1x8xf32>
    %511 = vector.shape_cast %510 : vector<1x1x8xf32> to vector<1x8xf32>
    %512 = vector.broadcast %511 : vector<1x8xf32> to vector<16x8xf32>
    %513 = arith.addf %509, %512 : vector<16x8xf32>
    %514 = vector.extract_strided_slice %499 {offsets = [1, 0, 0], sizes = [1, 32, 8], strides = [1, 1, 1]} : vector<4x32x8xf32> to vector<1x32x8xf32>
    %515 = vector.shape_cast %514 : vector<1x32x8xf32> to vector<32x8xf32>
    %cst_192 = arith.constant dense<0.000000e+00> : vector<16x8xf32>
    %516 = tpu.matmul %497, %515, %cst_192 {dimension_numbers = #tpu.dot_dimension_numbers<[1], [0], [0], [1], [0, 0, 1, 1], [], []>} : vector<16x32xf32>, vector<32x8xf32>, vector<16x8xf32> -> vector<16x8xf32>
    %517 = vector.extract_strided_slice %501 {offsets = [1, 0, 0], sizes = [1, 1, 8], strides = [1, 1, 1]} : vector<4x1x8xf32> to vector<1x1x8xf32>
    %518 = vector.shape_cast %517 : vector<1x1x8xf32> to vector<1x8xf32>
    %519 = vector.broadcast %518 : vector<1x8xf32> to vector<16x8xf32>
    %520 = arith.addf %516, %519 : vector<16x8xf32>
    %521 = vector.extract_strided_slice %499 {offsets = [2, 0, 0], sizes = [1, 32, 8], strides = [1, 1, 1]} : vector<4x32x8xf32> to vector<1x32x8xf32>
    %522 = vector.shape_cast %521 : vector<1x32x8xf32> to vector<32x8xf32>
    %cst_193 = arith.constant dense<0.000000e+00> : vector<16x8xf32>
    %523 = tpu.matmul %497, %522, %cst_193 {dimension_numbers = #tpu.dot_dimension_numbers<[1], [0], [0], [1], [0, 0, 1, 1], [], []>} : vector<16x32xf32>, vector<32x8xf32>, vector<16x8xf32> -> vector<16x8xf32>
    %524 = vector.extract_strided_slice %501 {offsets = [2, 0, 0], sizes = [1, 1, 8], strides = [1, 1, 1]} : vector<4x1x8xf32> to vector<1x1x8xf32>
    %525 = vector.shape_cast %524 : vector<1x1x8xf32> to vector<1x8xf32>
    %526 = vector.broadcast %525 : vector<1x8xf32> to vector<16x8xf32>
    %527 = arith.addf %523, %526 : vector<16x8xf32>
    %528 = vector.extract_strided_slice %499 {offsets = [3, 0, 0], sizes = [1, 32, 8], strides = [1, 1, 1]} : vector<4x32x8xf32> to vector<1x32x8xf32>
    %529 = vector.shape_cast %528 : vector<1x32x8xf32> to vector<32x8xf32>
    %cst_194 = arith.constant dense<0.000000e+00> : vector<16x8xf32>
    %530 = tpu.matmul %497, %529, %cst_194 {dimension_numbers = #tpu.dot_dimension_numbers<[1], [0], [0], [1], [0, 0, 1, 1], [], []>} : vector<16x32xf32>, vector<32x8xf32>, vector<16x8xf32> -> vector<16x8xf32>
    %531 = vector.extract_strided_slice %501 {offsets = [3, 0, 0], sizes = [1, 1, 8], strides = [1, 1, 1]} : vector<4x1x8xf32> to vector<1x1x8xf32>
    %532 = vector.shape_cast %531 : vector<1x1x8xf32> to vector<1x8xf32>
    %533 = vector.broadcast %532 : vector<1x8xf32> to vector<16x8xf32>
    %534 = arith.addf %530, %533 : vector<16x8xf32>
    %535 = vector.shape_cast %513 : vector<16x8xf32> to vector<1x16x8xf32>
    %536 = vector.shape_cast %520 : vector<16x8xf32> to vector<1x16x8xf32>
    %537 = vector.shape_cast %527 : vector<16x8xf32> to vector<1x16x8xf32>
    %538 = vector.shape_cast %534 : vector<16x8xf32> to vector<1x16x8xf32>
    %539 = tpu.concatenate %535, %536, %537, %538 in 0 : vector<1x16x8xf32>, vector<1x16x8xf32>, vector<1x16x8xf32>, vector<1x16x8xf32> -> vector<4x16x8xf32>
    %540 = vector.extract_strided_slice %503 {offsets = [0, 0, 0], sizes = [1, 32, 8], strides = [1, 1, 1]} : vector<4x32x8xf32> to vector<1x32x8xf32>
    %541 = vector.shape_cast %540 : vector<1x32x8xf32> to vector<32x8xf32>
    %cst_195 = arith.constant dense<0.000000e+00> : vector<16x8xf32>
    %542 = tpu.matmul %353, %541, %cst_195 {dimension_numbers = #tpu.dot_dimension_numbers<[1], [0], [0], [1], [0, 0, 1, 1], [], []>} : vector<16x32xf32>, vector<32x8xf32>, vector<16x8xf32> -> vector<16x8xf32>
    %543 = vector.extract_strided_slice %503 {offsets = [1, 0, 0], sizes = [1, 32, 8], strides = [1, 1, 1]} : vector<4x32x8xf32> to vector<1x32x8xf32>
    %544 = vector.shape_cast %543 : vector<1x32x8xf32> to vector<32x8xf32>
    %cst_196 = arith.constant dense<0.000000e+00> : vector<16x8xf32>
    %545 = tpu.matmul %353, %544, %cst_196 {dimension_numbers = #tpu.dot_dimension_numbers<[1], [0], [0], [1], [0, 0, 1, 1], [], []>} : vector<16x32xf32>, vector<32x8xf32>, vector<16x8xf32> -> vector<16x8xf32>
    %546 = vector.extract_strided_slice %503 {offsets = [2, 0, 0], sizes = [1, 32, 8], strides = [1, 1, 1]} : vector<4x32x8xf32> to vector<1x32x8xf32>
    %547 = vector.shape_cast %546 : vector<1x32x8xf32> to vector<32x8xf32>
    %cst_197 = arith.constant dense<0.000000e+00> : vector<16x8xf32>
    %548 = tpu.matmul %353, %547, %cst_197 {dimension_numbers = #tpu.dot_dimension_numbers<[1], [0], [0], [1], [0, 0, 1, 1], [], []>} : vector<16x32xf32>, vector<32x8xf32>, vector<16x8xf32> -> vector<16x8xf32>
    %549 = vector.extract_strided_slice %503 {offsets = [3, 0, 0], sizes = [1, 32, 8], strides = [1, 1, 1]} : vector<4x32x8xf32> to vector<1x32x8xf32>
    %550 = vector.shape_cast %549 : vector<1x32x8xf32> to vector<32x8xf32>
    %cst_198 = arith.constant dense<0.000000e+00> : vector<16x8xf32>
    %551 = tpu.matmul %353, %550, %cst_198 {dimension_numbers = #tpu.dot_dimension_numbers<[1], [0], [0], [1], [0, 0, 1, 1], [], []>} : vector<16x32xf32>, vector<32x8xf32>, vector<16x8xf32> -> vector<16x8xf32>
    %552 = vector.shape_cast %542 : vector<16x8xf32> to vector<1x16x8xf32>
    %553 = vector.shape_cast %545 : vector<16x8xf32> to vector<1x16x8xf32>
    %554 = vector.shape_cast %548 : vector<16x8xf32> to vector<1x16x8xf32>
    %555 = vector.shape_cast %551 : vector<16x8xf32> to vector<1x16x8xf32>
    %556 = tpu.concatenate %552, %553, %554, %555 in 0 : vector<1x16x8xf32>, vector<1x16x8xf32>, vector<1x16x8xf32>, vector<1x16x8xf32> -> vector<4x16x8xf32>
    %557 = vector.extract_strided_slice %505 {offsets = [0, 0, 0], sizes = [1, 32, 32], strides = [1, 1, 1]} : vector<4x32x32xf32> to vector<1x32x32xf32>
    %558 = vector.shape_cast %557 : vector<1x32x32xf32> to vector<32x32xf32>
    %cst_199 = arith.constant dense<0.000000e+00> : vector<16x32xf32>
    %559 = tpu.matmul %353, %558, %cst_199 {dimension_numbers = #tpu.dot_dimension_numbers<[1], [0], [0], [1], [0, 0, 1, 1], [], []>} : vector<16x32xf32>, vector<32x32xf32>, vector<16x32xf32> -> vector<16x32xf32>
    %560 = vector.extract_strided_slice %505 {offsets = [1, 0, 0], sizes = [1, 32, 32], strides = [1, 1, 1]} : vector<4x32x32xf32> to vector<1x32x32xf32>
    %561 = vector.shape_cast %560 : vector<1x32x32xf32> to vector<32x32xf32>
    %cst_200 = arith.constant dense<0.000000e+00> : vector<16x32xf32>
    %562 = tpu.matmul %353, %561, %cst_200 {dimension_numbers = #tpu.dot_dimension_numbers<[1], [0], [0], [1], [0, 0, 1, 1], [], []>} : vector<16x32xf32>, vector<32x32xf32>, vector<16x32xf32> -> vector<16x32xf32>
    %563 = vector.extract_strided_slice %505 {offsets = [2, 0, 0], sizes = [1, 32, 32], strides = [1, 1, 1]} : vector<4x32x32xf32> to vector<1x32x32xf32>
    %564 = vector.shape_cast %563 : vector<1x32x32xf32> to vector<32x32xf32>
    %cst_201 = arith.constant dense<0.000000e+00> : vector<16x32xf32>
    %565 = tpu.matmul %353, %564, %cst_201 {dimension_numbers = #tpu.dot_dimension_numbers<[1], [0], [0], [1], [0, 0, 1, 1], [], []>} : vector<16x32xf32>, vector<32x32xf32>, vector<16x32xf32> -> vector<16x32xf32>
    %566 = vector.extract_strided_slice %505 {offsets = [3, 0, 0], sizes = [1, 32, 32], strides = [1, 1, 1]} : vector<4x32x32xf32> to vector<1x32x32xf32>
    %567 = vector.shape_cast %566 : vector<1x32x32xf32> to vector<32x32xf32>
    %cst_202 = arith.constant dense<0.000000e+00> : vector<16x32xf32>
    %568 = tpu.matmul %353, %567, %cst_202 {dimension_numbers = #tpu.dot_dimension_numbers<[1], [0], [0], [1], [0, 0, 1, 1], [], []>} : vector<16x32xf32>, vector<32x32xf32>, vector<16x32xf32> -> vector<16x32xf32>
    %569 = vector.shape_cast %559 : vector<16x32xf32> to vector<1x16x32xf32>
    %570 = vector.shape_cast %562 : vector<16x32xf32> to vector<1x16x32xf32>
    %571 = vector.shape_cast %565 : vector<16x32xf32> to vector<1x16x32xf32>
    %572 = vector.shape_cast %568 : vector<16x32xf32> to vector<1x16x32xf32>
    %573 = tpu.concatenate %569, %570, %571, %572 in 0 : vector<1x16x32xf32>, vector<1x16x32xf32>, vector<1x16x32xf32>, vector<1x16x32xf32> -> vector<4x16x32xf32>
    "tpu.trace_start"() <{level = 10 : i32, message = "hqd,hkd->hqk"}> : () -> ()
    %cst_203 = arith.constant dense<0.000000e+00> : vector<4x16x16xf32>
    %574 = tpu.matmul %539, %556, %cst_203 {dimension_numbers = #tpu.dot_dimension_numbers<[2], [2], [1], [1], [0, 0, 0, 1, 1, 1], [0], [0]>} : vector<4x16x8xf32>, vector<4x16x8xf32>, vector<4x16x16xf32> -> vector<4x16x16xf32>
    "tpu.trace_stop"() : () -> ()
    %575 = vector.shape_cast %366 : vector<16x16xf32> to vector<1x16x16xf32>
    %576 = vector.broadcast %575 : vector<1x16x16xf32> to vector<4x16x16xf32>
    %577 = arith.addf %574, %576 : vector<4x16x16xf32>
    %cst_204 = arith.constant dense<0xFF800000> : vector<4x16xf32>
    %578 = vector.multi_reduction <maximumf>, %577, %cst_204 [2] : vector<4x16x16xf32> to vector<4x16xf32>
    %579 = vector.shape_cast %578 : vector<4x16xf32> to vector<4x16x1xf32>
    %580 = vector.broadcast %579 : vector<4x16x1xf32> to vector<4x16x16xf32>
    %581 = arith.subf %577, %580 : vector<4x16x16xf32>
    %582 = math.exp %581 : vector<4x16x16xf32>
    %cst_205 = arith.constant dense<0.000000e+00> : vector<4x16xf32>
    %583 = vector.multi_reduction <add>, %582, %cst_205 [2] : vector<4x16x16xf32> to vector<4x16xf32>
    %584 = vector.shape_cast %583 : vector<4x16xf32> to vector<4x16x1xf32>
    %585 = tpu.reciprocal %584 {approx = true} : vector<4x16x1xf32> -> vector<4x16x1xf32>
    %586 = vector.broadcast %585 : vector<4x16x1xf32> to vector<4x16x16xf32>
    %587 = arith.mulf %582, %586 : vector<4x16x16xf32>
    "tpu.trace_start"() <{level = 10 : i32, message = "hqk,hkd->hqd"}> : () -> ()
    %cst_206 = arith.constant dense<0.000000e+00> : vector<4x16x32xf32>
    %588 = tpu.matmul %587, %573, %cst_206 {dimension_numbers = #tpu.dot_dimension_numbers<[2], [1], [1], [2], [0, 0, 0, 1, 1, 2], [0], [0]>} : vector<4x16x16xf32>, vector<4x16x32xf32>, vector<4x16x32xf32> -> vector<4x16x32xf32>
    "tpu.trace_stop"() : () -> ()
    %589 = vector.extract_strided_slice %588 {offsets = [0, 0, 0], sizes = [1, 16, 32], strides = [1, 1, 1]} : vector<4x16x32xf32> to vector<1x16x32xf32>
    %590 = vector.shape_cast %589 : vector<1x16x32xf32> to vector<16x32xf32>
    %591 = vector.extract_strided_slice %588 {offsets = [1, 0, 0], sizes = [1, 16, 32], strides = [1, 1, 1]} : vector<4x16x32xf32> to vector<1x16x32xf32>
    %592 = vector.shape_cast %591 : vector<1x16x32xf32> to vector<16x32xf32>
    %593 = arith.addf %590, %592 : vector<16x32xf32>
    %594 = vector.extract_strided_slice %588 {offsets = [2, 0, 0], sizes = [1, 16, 32], strides = [1, 1, 1]} : vector<4x16x32xf32> to vector<1x16x32xf32>
    %595 = vector.shape_cast %594 : vector<1x16x32xf32> to vector<16x32xf32>
    %596 = arith.addf %593, %595 : vector<16x32xf32>
    %597 = vector.extract_strided_slice %588 {offsets = [3, 0, 0], sizes = [1, 16, 32], strides = [1, 1, 1]} : vector<4x16x32xf32> to vector<1x16x32xf32>
    %598 = vector.shape_cast %597 : vector<1x16x32xf32> to vector<16x32xf32>
    %599 = arith.addf %596, %598 : vector<16x32xf32>
    %600 = vector.broadcast %506 : vector<1x32xf32> to vector<16x32xf32>
    %601 = arith.addf %599, %600 : vector<16x32xf32>
    %602 = arith.addf %497, %601 : vector<16x32xf32>
    %603 = vector.extract_strided_slice %368 {offsets = [4, 0], sizes = [1, 32], strides = [1, 1]} : vector<9x32xf32> to vector<1x32xf32>
    %604 = vector.extract_strided_slice %368 {offsets = [5, 0], sizes = [1, 32], strides = [1, 1]} : vector<9x32xf32> to vector<1x32xf32>
    %cst_207 = arith.constant dense<0.000000e+00> : vector<16xf32>
    %605 = vector.multi_reduction <add>, %602, %cst_207 [1] : vector<16x32xf32> to vector<16xf32>
    %606 = vector.shape_cast %605 : vector<16xf32> to vector<16x1xf32>
    %cst_208 = arith.constant 3.200000e+01 : f32
    %607 = vector.broadcast %cst_208 : f32 to vector<16x1xf32>
    %608 = arith.divf %606, %607 : vector<16x1xf32>
    %609 = vector.broadcast %608 : vector<16x1xf32> to vector<16x32xf32>
    %610 = arith.subf %602, %609 : vector<16x32xf32>
    %611 = arith.mulf %610, %610 : vector<16x32xf32>
    %cst_209 = arith.constant dense<0.000000e+00> : vector<16xf32>
    %612 = vector.multi_reduction <add>, %611, %cst_209 [1] : vector<16x32xf32> to vector<16xf32>
    %613 = vector.shape_cast %612 : vector<16xf32> to vector<16x1xf32>
    %cst_210 = arith.constant 3.200000e+01 : f32
    %614 = vector.broadcast %cst_210 : f32 to vector<16x1xf32>
    %615 = arith.divf %613, %614 : vector<16x1xf32>
    %616 = vector.broadcast %608 : vector<16x1xf32> to vector<16x32xf32>
    %617 = arith.subf %602, %616 : vector<16x32xf32>
    %cst_211 = arith.constant 9.99999974E-6 : f32
    %618 = vector.broadcast %cst_211 : f32 to vector<16x1xf32>
    %619 = arith.addf %615, %618 : vector<16x1xf32>
    %620 = math.rsqrt %619 : vector<16x1xf32>
    %621 = vector.broadcast %620 : vector<16x1xf32> to vector<16x32xf32>
    %622 = arith.mulf %617, %621 : vector<16x32xf32>
    %623 = vector.broadcast %603 : vector<1x32xf32> to vector<16x32xf32>
    %624 = arith.mulf %622, %623 : vector<16x32xf32>
    %625 = vector.broadcast %604 : vector<1x32xf32> to vector<16x32xf32>
    %626 = arith.addf %624, %625 : vector<16x32xf32>
    %c0_212 = arith.constant 0 : index
    %c0_213 = arith.constant 0 : index
    %c0_214 = arith.constant 0 : index
    %627 = vector.load %arg21[%c0_212, %c0_213, %c0_214] : memref<2x32x64xf32, #tpu.memory_space<vmem>>, vector<1x32x64xf32>
    %628 = vector.shape_cast %627 : vector<1x32x64xf32> to vector<32x64xf32>
    %cst_215 = arith.constant dense<0.000000e+00> : vector<16x64xf32>
    %629 = tpu.matmul %626, %628, %cst_215 {dimension_numbers = #tpu.dot_dimension_numbers<[1], [0], [0], [1], [0, 0, 1, 1], [], []>} : vector<16x32xf32>, vector<32x64xf32>, vector<16x64xf32> -> vector<16x64xf32>
    %c0_216 = arith.constant 0 : index
    %c0_217 = arith.constant 0 : index
    %c0_218 = arith.constant 0 : index
    %630 = vector.load %arg22[%c0_216, %c0_217, %c0_218] : memref<2x1x64xf32, #tpu.memory_space<vmem>>, vector<1x1x64xf32>
    %631 = vector.shape_cast %630 : vector<1x1x64xf32> to vector<1x64xf32>
    %632 = vector.broadcast %631 : vector<1x64xf32> to vector<16x64xf32>
    %633 = arith.addf %629, %632 : vector<16x64xf32>
    %cst_219 = arith.constant 0.000000e+00 : f32
    %634 = vector.broadcast %cst_219 : f32 to vector<16x64xf32>
    %635 = arith.maximumf %633, %634 : vector<16x64xf32>
    %c0_220 = arith.constant 0 : index
    %c0_221 = arith.constant 0 : index
    %c0_222 = arith.constant 0 : index
    %636 = vector.load %arg23[%c0_220, %c0_221, %c0_222] : memref<2x64x32xf32, #tpu.memory_space<vmem>>, vector<1x64x32xf32>
    %637 = vector.shape_cast %636 : vector<1x64x32xf32> to vector<64x32xf32>
    %cst_223 = arith.constant dense<0.000000e+00> : vector<16x32xf32>
    %638 = tpu.matmul %635, %637, %cst_223 {dimension_numbers = #tpu.dot_dimension_numbers<[1], [0], [0], [1], [0, 0, 1, 1], [], []>} : vector<16x64xf32>, vector<64x32xf32>, vector<16x32xf32> -> vector<16x32xf32>
    %639 = vector.extract_strided_slice %368 {offsets = [6, 0], sizes = [1, 32], strides = [1, 1]} : vector<9x32xf32> to vector<1x32xf32>
    %640 = vector.broadcast %639 : vector<1x32xf32> to vector<16x32xf32>
    %641 = arith.addf %638, %640 : vector<16x32xf32>
    %642 = arith.addf %626, %641 : vector<16x32xf32>
    %643 = vector.extract_strided_slice %368 {offsets = [7, 0], sizes = [1, 32], strides = [1, 1]} : vector<9x32xf32> to vector<1x32xf32>
    %644 = vector.extract_strided_slice %368 {offsets = [8, 0], sizes = [1, 32], strides = [1, 1]} : vector<9x32xf32> to vector<1x32xf32>
    %cst_224 = arith.constant dense<0.000000e+00> : vector<16xf32>
    %645 = vector.multi_reduction <add>, %642, %cst_224 [1] : vector<16x32xf32> to vector<16xf32>
    %646 = vector.shape_cast %645 : vector<16xf32> to vector<16x1xf32>
    %cst_225 = arith.constant 3.200000e+01 : f32
    %647 = vector.broadcast %cst_225 : f32 to vector<16x1xf32>
    %648 = arith.divf %646, %647 : vector<16x1xf32>
    %649 = vector.broadcast %648 : vector<16x1xf32> to vector<16x32xf32>
    %650 = arith.subf %642, %649 : vector<16x32xf32>
    %651 = arith.mulf %650, %650 : vector<16x32xf32>
    %cst_226 = arith.constant dense<0.000000e+00> : vector<16xf32>
    %652 = vector.multi_reduction <add>, %651, %cst_226 [1] : vector<16x32xf32> to vector<16xf32>
    %653 = vector.shape_cast %652 : vector<16xf32> to vector<16x1xf32>
    %cst_227 = arith.constant 3.200000e+01 : f32
    %654 = vector.broadcast %cst_227 : f32 to vector<16x1xf32>
    %655 = arith.divf %653, %654 : vector<16x1xf32>
    %656 = vector.broadcast %648 : vector<16x1xf32> to vector<16x32xf32>
    %657 = arith.subf %642, %656 : vector<16x32xf32>
    %cst_228 = arith.constant 9.99999974E-6 : f32
    %658 = vector.broadcast %cst_228 : f32 to vector<16x1xf32>
    %659 = arith.addf %655, %658 : vector<16x1xf32>
    %660 = math.rsqrt %659 : vector<16x1xf32>
    %661 = vector.broadcast %660 : vector<16x1xf32> to vector<16x32xf32>
    %662 = arith.mulf %657, %661 : vector<16x32xf32>
    %663 = vector.broadcast %643 : vector<1x32xf32> to vector<16x32xf32>
    %664 = arith.mulf %662, %663 : vector<16x32xf32>
    %665 = vector.broadcast %644 : vector<1x32xf32> to vector<16x32xf32>
    %666 = arith.addf %664, %665 : vector<16x32xf32>
    %c1_229 = arith.constant 1 : index
    %c0_230 = arith.constant 0 : index
    %c0_231 = arith.constant 0 : index
    %667 = vector.load %arg24[%c1_229, %c0_230, %c0_231] : memref<2x9x32xf32, #tpu.memory_space<vmem>>, vector<1x9x32xf32>
    %668 = vector.shape_cast %667 : vector<1x9x32xf32> to vector<9x32xf32>
    %c2 = arith.constant 2 : index
    %c0_232 = arith.constant 0 : index
    %c0_233 = arith.constant 0 : index
    %c0_234 = arith.constant 0 : index
    %669 = vector.load %arg17[%c2, %c0_232, %c0_233, %c0_234] : memref<4x4x32x8xf32, #tpu.memory_space<vmem>>, vector<1x4x32x8xf32>
    %670 = vector.shape_cast %669 : vector<1x4x32x8xf32> to vector<4x32x8xf32>
    %c2_235 = arith.constant 2 : index
    %c0_236 = arith.constant 0 : index
    %c0_237 = arith.constant 0 : index
    %c0_238 = arith.constant 0 : index
    %671 = vector.load %arg18[%c2_235, %c0_236, %c0_237, %c0_238] : memref<4x4x1x8xf32, #tpu.memory_space<vmem>>, vector<1x4x1x8xf32>
    %672 = vector.shape_cast %671 : vector<1x4x1x8xf32> to vector<4x1x8xf32>
    %c2_239 = arith.constant 2 : index
    %c0_240 = arith.constant 0 : index
    %c0_241 = arith.constant 0 : index
    %c0_242 = arith.constant 0 : index
    %673 = vector.load %arg19[%c2_239, %c0_240, %c0_241, %c0_242] : memref<4x4x32x8xf32, #tpu.memory_space<vmem>>, vector<1x4x32x8xf32>
    %674 = vector.shape_cast %673 : vector<1x4x32x8xf32> to vector<4x32x8xf32>
    %c2_243 = arith.constant 2 : index
    %c0_244 = arith.constant 0 : index
    %c0_245 = arith.constant 0 : index
    %c0_246 = arith.constant 0 : index
    %675 = vector.load %arg20[%c2_243, %c0_244, %c0_245, %c0_246] : memref<4x4x32x32xf32, #tpu.memory_space<vmem>>, vector<1x4x32x32xf32>
    %676 = vector.shape_cast %675 : vector<1x4x32x32xf32> to vector<4x32x32xf32>
    %677 = vector.extract_strided_slice %668 {offsets = [0, 0], sizes = [1, 32], strides = [1, 1]} : vector<9x32xf32> to vector<1x32xf32>
    %678 = vector.extract_strided_slice %670 {offsets = [0, 0, 0], sizes = [1, 32, 8], strides = [1, 1, 1]} : vector<4x32x8xf32> to vector<1x32x8xf32>
    %679 = vector.shape_cast %678 : vector<1x32x8xf32> to vector<32x8xf32>
    %cst_247 = arith.constant dense<0.000000e+00> : vector<16x8xf32>
    %680 = tpu.matmul %666, %679, %cst_247 {dimension_numbers = #tpu.dot_dimension_numbers<[1], [0], [0], [1], [0, 0, 1, 1], [], []>} : vector<16x32xf32>, vector<32x8xf32>, vector<16x8xf32> -> vector<16x8xf32>
    %681 = vector.extract_strided_slice %672 {offsets = [0, 0, 0], sizes = [1, 1, 8], strides = [1, 1, 1]} : vector<4x1x8xf32> to vector<1x1x8xf32>
    %682 = vector.shape_cast %681 : vector<1x1x8xf32> to vector<1x8xf32>
    %683 = vector.broadcast %682 : vector<1x8xf32> to vector<16x8xf32>
    %684 = arith.addf %680, %683 : vector<16x8xf32>
    %685 = vector.extract_strided_slice %670 {offsets = [1, 0, 0], sizes = [1, 32, 8], strides = [1, 1, 1]} : vector<4x32x8xf32> to vector<1x32x8xf32>
    %686 = vector.shape_cast %685 : vector<1x32x8xf32> to vector<32x8xf32>
    %cst_248 = arith.constant dense<0.000000e+00> : vector<16x8xf32>
    %687 = tpu.matmul %666, %686, %cst_248 {dimension_numbers = #tpu.dot_dimension_numbers<[1], [0], [0], [1], [0, 0, 1, 1], [], []>} : vector<16x32xf32>, vector<32x8xf32>, vector<16x8xf32> -> vector<16x8xf32>
    %688 = vector.extract_strided_slice %672 {offsets = [1, 0, 0], sizes = [1, 1, 8], strides = [1, 1, 1]} : vector<4x1x8xf32> to vector<1x1x8xf32>
    %689 = vector.shape_cast %688 : vector<1x1x8xf32> to vector<1x8xf32>
    %690 = vector.broadcast %689 : vector<1x8xf32> to vector<16x8xf32>
    %691 = arith.addf %687, %690 : vector<16x8xf32>
    %692 = vector.extract_strided_slice %670 {offsets = [2, 0, 0], sizes = [1, 32, 8], strides = [1, 1, 1]} : vector<4x32x8xf32> to vector<1x32x8xf32>
    %693 = vector.shape_cast %692 : vector<1x32x8xf32> to vector<32x8xf32>
    %cst_249 = arith.constant dense<0.000000e+00> : vector<16x8xf32>
    %694 = tpu.matmul %666, %693, %cst_249 {dimension_numbers = #tpu.dot_dimension_numbers<[1], [0], [0], [1], [0, 0, 1, 1], [], []>} : vector<16x32xf32>, vector<32x8xf32>, vector<16x8xf32> -> vector<16x8xf32>
    %695 = vector.extract_strided_slice %672 {offsets = [2, 0, 0], sizes = [1, 1, 8], strides = [1, 1, 1]} : vector<4x1x8xf32> to vector<1x1x8xf32>
    %696 = vector.shape_cast %695 : vector<1x1x8xf32> to vector<1x8xf32>
    %697 = vector.broadcast %696 : vector<1x8xf32> to vector<16x8xf32>
    %698 = arith.addf %694, %697 : vector<16x8xf32>
    %699 = vector.extract_strided_slice %670 {offsets = [3, 0, 0], sizes = [1, 32, 8], strides = [1, 1, 1]} : vector<4x32x8xf32> to vector<1x32x8xf32>
    %700 = vector.shape_cast %699 : vector<1x32x8xf32> to vector<32x8xf32>
    %cst_250 = arith.constant dense<0.000000e+00> : vector<16x8xf32>
    %701 = tpu.matmul %666, %700, %cst_250 {dimension_numbers = #tpu.dot_dimension_numbers<[1], [0], [0], [1], [0, 0, 1, 1], [], []>} : vector<16x32xf32>, vector<32x8xf32>, vector<16x8xf32> -> vector<16x8xf32>
    %702 = vector.extract_strided_slice %672 {offsets = [3, 0, 0], sizes = [1, 1, 8], strides = [1, 1, 1]} : vector<4x1x8xf32> to vector<1x1x8xf32>
    %703 = vector.shape_cast %702 : vector<1x1x8xf32> to vector<1x8xf32>
    %704 = vector.broadcast %703 : vector<1x8xf32> to vector<16x8xf32>
    %705 = arith.addf %701, %704 : vector<16x8xf32>
    %706 = vector.shape_cast %684 : vector<16x8xf32> to vector<1x16x8xf32>
    %707 = vector.shape_cast %691 : vector<16x8xf32> to vector<1x16x8xf32>
    %708 = vector.shape_cast %698 : vector<16x8xf32> to vector<1x16x8xf32>
    %709 = vector.shape_cast %705 : vector<16x8xf32> to vector<1x16x8xf32>
    %710 = tpu.concatenate %706, %707, %708, %709 in 0 : vector<1x16x8xf32>, vector<1x16x8xf32>, vector<1x16x8xf32>, vector<1x16x8xf32> -> vector<4x16x8xf32>
    %711 = vector.extract_strided_slice %674 {offsets = [0, 0, 0], sizes = [1, 32, 8], strides = [1, 1, 1]} : vector<4x32x8xf32> to vector<1x32x8xf32>
    %712 = vector.shape_cast %711 : vector<1x32x8xf32> to vector<32x8xf32>
    %cst_251 = arith.constant dense<0.000000e+00> : vector<16x8xf32>
    %713 = tpu.matmul %666, %712, %cst_251 {dimension_numbers = #tpu.dot_dimension_numbers<[1], [0], [0], [1], [0, 0, 1, 1], [], []>} : vector<16x32xf32>, vector<32x8xf32>, vector<16x8xf32> -> vector<16x8xf32>
    %714 = vector.extract_strided_slice %674 {offsets = [1, 0, 0], sizes = [1, 32, 8], strides = [1, 1, 1]} : vector<4x32x8xf32> to vector<1x32x8xf32>
    %715 = vector.shape_cast %714 : vector<1x32x8xf32> to vector<32x8xf32>
    %cst_252 = arith.constant dense<0.000000e+00> : vector<16x8xf32>
    %716 = tpu.matmul %666, %715, %cst_252 {dimension_numbers = #tpu.dot_dimension_numbers<[1], [0], [0], [1], [0, 0, 1, 1], [], []>} : vector<16x32xf32>, vector<32x8xf32>, vector<16x8xf32> -> vector<16x8xf32>
    %717 = vector.extract_strided_slice %674 {offsets = [2, 0, 0], sizes = [1, 32, 8], strides = [1, 1, 1]} : vector<4x32x8xf32> to vector<1x32x8xf32>
    %718 = vector.shape_cast %717 : vector<1x32x8xf32> to vector<32x8xf32>
    %cst_253 = arith.constant dense<0.000000e+00> : vector<16x8xf32>
    %719 = tpu.matmul %666, %718, %cst_253 {dimension_numbers = #tpu.dot_dimension_numbers<[1], [0], [0], [1], [0, 0, 1, 1], [], []>} : vector<16x32xf32>, vector<32x8xf32>, vector<16x8xf32> -> vector<16x8xf32>
    %720 = vector.extract_strided_slice %674 {offsets = [3, 0, 0], sizes = [1, 32, 8], strides = [1, 1, 1]} : vector<4x32x8xf32> to vector<1x32x8xf32>
    %721 = vector.shape_cast %720 : vector<1x32x8xf32> to vector<32x8xf32>
    %cst_254 = arith.constant dense<0.000000e+00> : vector<16x8xf32>
    %722 = tpu.matmul %666, %721, %cst_254 {dimension_numbers = #tpu.dot_dimension_numbers<[1], [0], [0], [1], [0, 0, 1, 1], [], []>} : vector<16x32xf32>, vector<32x8xf32>, vector<16x8xf32> -> vector<16x8xf32>
    %723 = vector.shape_cast %713 : vector<16x8xf32> to vector<1x16x8xf32>
    %724 = vector.shape_cast %716 : vector<16x8xf32> to vector<1x16x8xf32>
    %725 = vector.shape_cast %719 : vector<16x8xf32> to vector<1x16x8xf32>
    %726 = vector.shape_cast %722 : vector<16x8xf32> to vector<1x16x8xf32>
    %727 = tpu.concatenate %723, %724, %725, %726 in 0 : vector<1x16x8xf32>, vector<1x16x8xf32>, vector<1x16x8xf32>, vector<1x16x8xf32> -> vector<4x16x8xf32>
    %728 = vector.extract_strided_slice %676 {offsets = [0, 0, 0], sizes = [1, 32, 32], strides = [1, 1, 1]} : vector<4x32x32xf32> to vector<1x32x32xf32>
    %729 = vector.shape_cast %728 : vector<1x32x32xf32> to vector<32x32xf32>
    %cst_255 = arith.constant dense<0.000000e+00> : vector<16x32xf32>
    %730 = tpu.matmul %666, %729, %cst_255 {dimension_numbers = #tpu.dot_dimension_numbers<[1], [0], [0], [1], [0, 0, 1, 1], [], []>} : vector<16x32xf32>, vector<32x32xf32>, vector<16x32xf32> -> vector<16x32xf32>
    %731 = vector.extract_strided_slice %676 {offsets = [1, 0, 0], sizes = [1, 32, 32], strides = [1, 1, 1]} : vector<4x32x32xf32> to vector<1x32x32xf32>
    %732 = vector.shape_cast %731 : vector<1x32x32xf32> to vector<32x32xf32>
    %cst_256 = arith.constant dense<0.000000e+00> : vector<16x32xf32>
    %733 = tpu.matmul %666, %732, %cst_256 {dimension_numbers = #tpu.dot_dimension_numbers<[1], [0], [0], [1], [0, 0, 1, 1], [], []>} : vector<16x32xf32>, vector<32x32xf32>, vector<16x32xf32> -> vector<16x32xf32>
    %734 = vector.extract_strided_slice %676 {offsets = [2, 0, 0], sizes = [1, 32, 32], strides = [1, 1, 1]} : vector<4x32x32xf32> to vector<1x32x32xf32>
    %735 = vector.shape_cast %734 : vector<1x32x32xf32> to vector<32x32xf32>
    %cst_257 = arith.constant dense<0.000000e+00> : vector<16x32xf32>
    %736 = tpu.matmul %666, %735, %cst_257 {dimension_numbers = #tpu.dot_dimension_numbers<[1], [0], [0], [1], [0, 0, 1, 1], [], []>} : vector<16x32xf32>, vector<32x32xf32>, vector<16x32xf32> -> vector<16x32xf32>
    %737 = vector.extract_strided_slice %676 {offsets = [3, 0, 0], sizes = [1, 32, 32], strides = [1, 1, 1]} : vector<4x32x32xf32> to vector<1x32x32xf32>
    %738 = vector.shape_cast %737 : vector<1x32x32xf32> to vector<32x32xf32>
    %cst_258 = arith.constant dense<0.000000e+00> : vector<16x32xf32>
    %739 = tpu.matmul %666, %738, %cst_258 {dimension_numbers = #tpu.dot_dimension_numbers<[1], [0], [0], [1], [0, 0, 1, 1], [], []>} : vector<16x32xf32>, vector<32x32xf32>, vector<16x32xf32> -> vector<16x32xf32>
    %740 = vector.shape_cast %730 : vector<16x32xf32> to vector<1x16x32xf32>
    %741 = vector.shape_cast %733 : vector<16x32xf32> to vector<1x16x32xf32>
    %742 = vector.shape_cast %736 : vector<16x32xf32> to vector<1x16x32xf32>
    %743 = vector.shape_cast %739 : vector<16x32xf32> to vector<1x16x32xf32>
    %744 = tpu.concatenate %740, %741, %742, %743 in 0 : vector<1x16x32xf32>, vector<1x16x32xf32>, vector<1x16x32xf32>, vector<1x16x32xf32> -> vector<4x16x32xf32>
    "tpu.trace_start"() <{level = 10 : i32, message = "hqd,hkd->hqk"}> : () -> ()
    %cst_259 = arith.constant dense<0.000000e+00> : vector<4x16x16xf32>
    %745 = tpu.matmul %710, %727, %cst_259 {dimension_numbers = #tpu.dot_dimension_numbers<[2], [2], [1], [1], [0, 0, 0, 1, 1, 1], [0], [0]>} : vector<4x16x8xf32>, vector<4x16x8xf32>, vector<4x16x16xf32> -> vector<4x16x16xf32>
    "tpu.trace_stop"() : () -> ()
    %746 = vector.shape_cast %365 : vector<16x16xf32> to vector<1x16x16xf32>
    %747 = vector.broadcast %746 : vector<1x16x16xf32> to vector<4x16x16xf32>
    %748 = arith.addf %745, %747 : vector<4x16x16xf32>
    %cst_260 = arith.constant dense<0xFF800000> : vector<4x16xf32>
    %749 = vector.multi_reduction <maximumf>, %748, %cst_260 [2] : vector<4x16x16xf32> to vector<4x16xf32>
    %750 = vector.shape_cast %749 : vector<4x16xf32> to vector<4x16x1xf32>
    %751 = vector.broadcast %750 : vector<4x16x1xf32> to vector<4x16x16xf32>
    %752 = arith.subf %748, %751 : vector<4x16x16xf32>
    %753 = math.exp %752 : vector<4x16x16xf32>
    %cst_261 = arith.constant dense<0.000000e+00> : vector<4x16xf32>
    %754 = vector.multi_reduction <add>, %753, %cst_261 [2] : vector<4x16x16xf32> to vector<4x16xf32>
    %755 = vector.shape_cast %754 : vector<4x16xf32> to vector<4x16x1xf32>
    %756 = tpu.reciprocal %755 {approx = true} : vector<4x16x1xf32> -> vector<4x16x1xf32>
    %757 = vector.broadcast %756 : vector<4x16x1xf32> to vector<4x16x16xf32>
    %758 = arith.mulf %753, %757 : vector<4x16x16xf32>
    "tpu.trace_start"() <{level = 10 : i32, message = "hqk,hkd->hqd"}> : () -> ()
    %cst_262 = arith.constant dense<0.000000e+00> : vector<4x16x32xf32>
    %759 = tpu.matmul %758, %744, %cst_262 {dimension_numbers = #tpu.dot_dimension_numbers<[2], [1], [1], [2], [0, 0, 0, 1, 1, 2], [0], [0]>} : vector<4x16x16xf32>, vector<4x16x32xf32>, vector<4x16x32xf32> -> vector<4x16x32xf32>
    "tpu.trace_stop"() : () -> ()
    %760 = vector.extract_strided_slice %759 {offsets = [0, 0, 0], sizes = [1, 16, 32], strides = [1, 1, 1]} : vector<4x16x32xf32> to vector<1x16x32xf32>
    %761 = vector.shape_cast %760 : vector<1x16x32xf32> to vector<16x32xf32>
    %762 = vector.extract_strided_slice %759 {offsets = [1, 0, 0], sizes = [1, 16, 32], strides = [1, 1, 1]} : vector<4x16x32xf32> to vector<1x16x32xf32>
    %763 = vector.shape_cast %762 : vector<1x16x32xf32> to vector<16x32xf32>
    %764 = arith.addf %761, %763 : vector<16x32xf32>
    %765 = vector.extract_strided_slice %759 {offsets = [2, 0, 0], sizes = [1, 16, 32], strides = [1, 1, 1]} : vector<4x16x32xf32> to vector<1x16x32xf32>
    %766 = vector.shape_cast %765 : vector<1x16x32xf32> to vector<16x32xf32>
    %767 = arith.addf %764, %766 : vector<16x32xf32>
    %768 = vector.extract_strided_slice %759 {offsets = [3, 0, 0], sizes = [1, 16, 32], strides = [1, 1, 1]} : vector<4x16x32xf32> to vector<1x16x32xf32>
    %769 = vector.shape_cast %768 : vector<1x16x32xf32> to vector<16x32xf32>
    %770 = arith.addf %767, %769 : vector<16x32xf32>
    %771 = vector.broadcast %677 : vector<1x32xf32> to vector<16x32xf32>
    %772 = arith.addf %770, %771 : vector<16x32xf32>
    %773 = arith.addf %666, %772 : vector<16x32xf32>
    %774 = vector.extract_strided_slice %668 {offsets = [1, 0], sizes = [1, 32], strides = [1, 1]} : vector<9x32xf32> to vector<1x32xf32>
    %775 = vector.extract_strided_slice %668 {offsets = [2, 0], sizes = [1, 32], strides = [1, 1]} : vector<9x32xf32> to vector<1x32xf32>
    %cst_263 = arith.constant dense<0.000000e+00> : vector<16xf32>
    %776 = vector.multi_reduction <add>, %773, %cst_263 [1] : vector<16x32xf32> to vector<16xf32>
    %777 = vector.shape_cast %776 : vector<16xf32> to vector<16x1xf32>
    %cst_264 = arith.constant 3.200000e+01 : f32
    %778 = vector.broadcast %cst_264 : f32 to vector<16x1xf32>
    %779 = arith.divf %777, %778 : vector<16x1xf32>
    %780 = vector.broadcast %779 : vector<16x1xf32> to vector<16x32xf32>
    %781 = arith.subf %773, %780 : vector<16x32xf32>
    %782 = arith.mulf %781, %781 : vector<16x32xf32>
    %cst_265 = arith.constant dense<0.000000e+00> : vector<16xf32>
    %783 = vector.multi_reduction <add>, %782, %cst_265 [1] : vector<16x32xf32> to vector<16xf32>
    %784 = vector.shape_cast %783 : vector<16xf32> to vector<16x1xf32>
    %cst_266 = arith.constant 3.200000e+01 : f32
    %785 = vector.broadcast %cst_266 : f32 to vector<16x1xf32>
    %786 = arith.divf %784, %785 : vector<16x1xf32>
    %787 = vector.broadcast %779 : vector<16x1xf32> to vector<16x32xf32>
    %788 = arith.subf %773, %787 : vector<16x32xf32>
    %cst_267 = arith.constant 9.99999974E-6 : f32
    %789 = vector.broadcast %cst_267 : f32 to vector<16x1xf32>
    %790 = arith.addf %786, %789 : vector<16x1xf32>
    %791 = math.rsqrt %790 : vector<16x1xf32>
    %792 = vector.broadcast %791 : vector<16x1xf32> to vector<16x32xf32>
    %793 = arith.mulf %788, %792 : vector<16x32xf32>
    %794 = vector.broadcast %774 : vector<1x32xf32> to vector<16x32xf32>
    %795 = arith.mulf %793, %794 : vector<16x32xf32>
    %796 = vector.broadcast %775 : vector<1x32xf32> to vector<16x32xf32>
    %797 = arith.addf %795, %796 : vector<16x32xf32>
    %c3 = arith.constant 3 : index
    %c0_268 = arith.constant 0 : index
    %c0_269 = arith.constant 0 : index
    %c0_270 = arith.constant 0 : index
    %798 = vector.load %arg17[%c3, %c0_268, %c0_269, %c0_270] : memref<4x4x32x8xf32, #tpu.memory_space<vmem>>, vector<1x4x32x8xf32>
    %799 = vector.shape_cast %798 : vector<1x4x32x8xf32> to vector<4x32x8xf32>
    %c3_271 = arith.constant 3 : index
    %c0_272 = arith.constant 0 : index
    %c0_273 = arith.constant 0 : index
    %c0_274 = arith.constant 0 : index
    %800 = vector.load %arg18[%c3_271, %c0_272, %c0_273, %c0_274] : memref<4x4x1x8xf32, #tpu.memory_space<vmem>>, vector<1x4x1x8xf32>
    %801 = vector.shape_cast %800 : vector<1x4x1x8xf32> to vector<4x1x8xf32>
    %c3_275 = arith.constant 3 : index
    %c0_276 = arith.constant 0 : index
    %c0_277 = arith.constant 0 : index
    %c0_278 = arith.constant 0 : index
    %802 = vector.load %arg19[%c3_275, %c0_276, %c0_277, %c0_278] : memref<4x4x32x8xf32, #tpu.memory_space<vmem>>, vector<1x4x32x8xf32>
    %803 = vector.shape_cast %802 : vector<1x4x32x8xf32> to vector<4x32x8xf32>
    %c3_279 = arith.constant 3 : index
    %c0_280 = arith.constant 0 : index
    %c0_281 = arith.constant 0 : index
    %c0_282 = arith.constant 0 : index
    %804 = vector.load %arg20[%c3_279, %c0_280, %c0_281, %c0_282] : memref<4x4x32x32xf32, #tpu.memory_space<vmem>>, vector<1x4x32x32xf32>
    %805 = vector.shape_cast %804 : vector<1x4x32x32xf32> to vector<4x32x32xf32>
    %806 = vector.extract_strided_slice %668 {offsets = [3, 0], sizes = [1, 32], strides = [1, 1]} : vector<9x32xf32> to vector<1x32xf32>
    %807 = vector.extract_strided_slice %799 {offsets = [0, 0, 0], sizes = [1, 32, 8], strides = [1, 1, 1]} : vector<4x32x8xf32> to vector<1x32x8xf32>
    %808 = vector.shape_cast %807 : vector<1x32x8xf32> to vector<32x8xf32>
    %cst_283 = arith.constant dense<0.000000e+00> : vector<16x8xf32>
    %809 = tpu.matmul %797, %808, %cst_283 {dimension_numbers = #tpu.dot_dimension_numbers<[1], [0], [0], [1], [0, 0, 1, 1], [], []>} : vector<16x32xf32>, vector<32x8xf32>, vector<16x8xf32> -> vector<16x8xf32>
    %810 = vector.extract_strided_slice %801 {offsets = [0, 0, 0], sizes = [1, 1, 8], strides = [1, 1, 1]} : vector<4x1x8xf32> to vector<1x1x8xf32>
    %811 = vector.shape_cast %810 : vector<1x1x8xf32> to vector<1x8xf32>
    %812 = vector.broadcast %811 : vector<1x8xf32> to vector<16x8xf32>
    %813 = arith.addf %809, %812 : vector<16x8xf32>
    %814 = vector.extract_strided_slice %799 {offsets = [1, 0, 0], sizes = [1, 32, 8], strides = [1, 1, 1]} : vector<4x32x8xf32> to vector<1x32x8xf32>
    %815 = vector.shape_cast %814 : vector<1x32x8xf32> to vector<32x8xf32>
    %cst_284 = arith.constant dense<0.000000e+00> : vector<16x8xf32>
    %816 = tpu.matmul %797, %815, %cst_284 {dimension_numbers = #tpu.dot_dimension_numbers<[1], [0], [0], [1], [0, 0, 1, 1], [], []>} : vector<16x32xf32>, vector<32x8xf32>, vector<16x8xf32> -> vector<16x8xf32>
    %817 = vector.extract_strided_slice %801 {offsets = [1, 0, 0], sizes = [1, 1, 8], strides = [1, 1, 1]} : vector<4x1x8xf32> to vector<1x1x8xf32>
    %818 = vector.shape_cast %817 : vector<1x1x8xf32> to vector<1x8xf32>
    %819 = vector.broadcast %818 : vector<1x8xf32> to vector<16x8xf32>
    %820 = arith.addf %816, %819 : vector<16x8xf32>
    %821 = vector.extract_strided_slice %799 {offsets = [2, 0, 0], sizes = [1, 32, 8], strides = [1, 1, 1]} : vector<4x32x8xf32> to vector<1x32x8xf32>
    %822 = vector.shape_cast %821 : vector<1x32x8xf32> to vector<32x8xf32>
    %cst_285 = arith.constant dense<0.000000e+00> : vector<16x8xf32>
    %823 = tpu.matmul %797, %822, %cst_285 {dimension_numbers = #tpu.dot_dimension_numbers<[1], [0], [0], [1], [0, 0, 1, 1], [], []>} : vector<16x32xf32>, vector<32x8xf32>, vector<16x8xf32> -> vector<16x8xf32>
    %824 = vector.extract_strided_slice %801 {offsets = [2, 0, 0], sizes = [1, 1, 8], strides = [1, 1, 1]} : vector<4x1x8xf32> to vector<1x1x8xf32>
    %825 = vector.shape_cast %824 : vector<1x1x8xf32> to vector<1x8xf32>
    %826 = vector.broadcast %825 : vector<1x8xf32> to vector<16x8xf32>
    %827 = arith.addf %823, %826 : vector<16x8xf32>
    %828 = vector.extract_strided_slice %799 {offsets = [3, 0, 0], sizes = [1, 32, 8], strides = [1, 1, 1]} : vector<4x32x8xf32> to vector<1x32x8xf32>
    %829 = vector.shape_cast %828 : vector<1x32x8xf32> to vector<32x8xf32>
    %cst_286 = arith.constant dense<0.000000e+00> : vector<16x8xf32>
    %830 = tpu.matmul %797, %829, %cst_286 {dimension_numbers = #tpu.dot_dimension_numbers<[1], [0], [0], [1], [0, 0, 1, 1], [], []>} : vector<16x32xf32>, vector<32x8xf32>, vector<16x8xf32> -> vector<16x8xf32>
    %831 = vector.extract_strided_slice %801 {offsets = [3, 0, 0], sizes = [1, 1, 8], strides = [1, 1, 1]} : vector<4x1x8xf32> to vector<1x1x8xf32>
    %832 = vector.shape_cast %831 : vector<1x1x8xf32> to vector<1x8xf32>
    %833 = vector.broadcast %832 : vector<1x8xf32> to vector<16x8xf32>
    %834 = arith.addf %830, %833 : vector<16x8xf32>
    %835 = vector.shape_cast %813 : vector<16x8xf32> to vector<1x16x8xf32>
    %836 = vector.shape_cast %820 : vector<16x8xf32> to vector<1x16x8xf32>
    %837 = vector.shape_cast %827 : vector<16x8xf32> to vector<1x16x8xf32>
    %838 = vector.shape_cast %834 : vector<16x8xf32> to vector<1x16x8xf32>
    %839 = tpu.concatenate %835, %836, %837, %838 in 0 : vector<1x16x8xf32>, vector<1x16x8xf32>, vector<1x16x8xf32>, vector<1x16x8xf32> -> vector<4x16x8xf32>
    %840 = vector.extract_strided_slice %803 {offsets = [0, 0, 0], sizes = [1, 32, 8], strides = [1, 1, 1]} : vector<4x32x8xf32> to vector<1x32x8xf32>
    %841 = vector.shape_cast %840 : vector<1x32x8xf32> to vector<32x8xf32>
    %cst_287 = arith.constant dense<0.000000e+00> : vector<16x8xf32>
    %842 = tpu.matmul %353, %841, %cst_287 {dimension_numbers = #tpu.dot_dimension_numbers<[1], [0], [0], [1], [0, 0, 1, 1], [], []>} : vector<16x32xf32>, vector<32x8xf32>, vector<16x8xf32> -> vector<16x8xf32>
    %843 = vector.extract_strided_slice %803 {offsets = [1, 0, 0], sizes = [1, 32, 8], strides = [1, 1, 1]} : vector<4x32x8xf32> to vector<1x32x8xf32>
    %844 = vector.shape_cast %843 : vector<1x32x8xf32> to vector<32x8xf32>
    %cst_288 = arith.constant dense<0.000000e+00> : vector<16x8xf32>
    %845 = tpu.matmul %353, %844, %cst_288 {dimension_numbers = #tpu.dot_dimension_numbers<[1], [0], [0], [1], [0, 0, 1, 1], [], []>} : vector<16x32xf32>, vector<32x8xf32>, vector<16x8xf32> -> vector<16x8xf32>
    %846 = vector.extract_strided_slice %803 {offsets = [2, 0, 0], sizes = [1, 32, 8], strides = [1, 1, 1]} : vector<4x32x8xf32> to vector<1x32x8xf32>
    %847 = vector.shape_cast %846 : vector<1x32x8xf32> to vector<32x8xf32>
    %cst_289 = arith.constant dense<0.000000e+00> : vector<16x8xf32>
    %848 = tpu.matmul %353, %847, %cst_289 {dimension_numbers = #tpu.dot_dimension_numbers<[1], [0], [0], [1], [0, 0, 1, 1], [], []>} : vector<16x32xf32>, vector<32x8xf32>, vector<16x8xf32> -> vector<16x8xf32>
    %849 = vector.extract_strided_slice %803 {offsets = [3, 0, 0], sizes = [1, 32, 8], strides = [1, 1, 1]} : vector<4x32x8xf32> to vector<1x32x8xf32>
    %850 = vector.shape_cast %849 : vector<1x32x8xf32> to vector<32x8xf32>
    %cst_290 = arith.constant dense<0.000000e+00> : vector<16x8xf32>
    %851 = tpu.matmul %353, %850, %cst_290 {dimension_numbers = #tpu.dot_dimension_numbers<[1], [0], [0], [1], [0, 0, 1, 1], [], []>} : vector<16x32xf32>, vector<32x8xf32>, vector<16x8xf32> -> vector<16x8xf32>
    %852 = vector.shape_cast %842 : vector<16x8xf32> to vector<1x16x8xf32>
    %853 = vector.shape_cast %845 : vector<16x8xf32> to vector<1x16x8xf32>
    %854 = vector.shape_cast %848 : vector<16x8xf32> to vector<1x16x8xf32>
    %855 = vector.shape_cast %851 : vector<16x8xf32> to vector<1x16x8xf32>
    %856 = tpu.concatenate %852, %853, %854, %855 in 0 : vector<1x16x8xf32>, vector<1x16x8xf32>, vector<1x16x8xf32>, vector<1x16x8xf32> -> vector<4x16x8xf32>
    %857 = vector.extract_strided_slice %805 {offsets = [0, 0, 0], sizes = [1, 32, 32], strides = [1, 1, 1]} : vector<4x32x32xf32> to vector<1x32x32xf32>
    %858 = vector.shape_cast %857 : vector<1x32x32xf32> to vector<32x32xf32>
    %cst_291 = arith.constant dense<0.000000e+00> : vector<16x32xf32>
    %859 = tpu.matmul %353, %858, %cst_291 {dimension_numbers = #tpu.dot_dimension_numbers<[1], [0], [0], [1], [0, 0, 1, 1], [], []>} : vector<16x32xf32>, vector<32x32xf32>, vector<16x32xf32> -> vector<16x32xf32>
    %860 = vector.extract_strided_slice %805 {offsets = [1, 0, 0], sizes = [1, 32, 32], strides = [1, 1, 1]} : vector<4x32x32xf32> to vector<1x32x32xf32>
    %861 = vector.shape_cast %860 : vector<1x32x32xf32> to vector<32x32xf32>
    %cst_292 = arith.constant dense<0.000000e+00> : vector<16x32xf32>
    %862 = tpu.matmul %353, %861, %cst_292 {dimension_numbers = #tpu.dot_dimension_numbers<[1], [0], [0], [1], [0, 0, 1, 1], [], []>} : vector<16x32xf32>, vector<32x32xf32>, vector<16x32xf32> -> vector<16x32xf32>
    %863 = vector.extract_strided_slice %805 {offsets = [2, 0, 0], sizes = [1, 32, 32], strides = [1, 1, 1]} : vector<4x32x32xf32> to vector<1x32x32xf32>
    %864 = vector.shape_cast %863 : vector<1x32x32xf32> to vector<32x32xf32>
    %cst_293 = arith.constant dense<0.000000e+00> : vector<16x32xf32>
    %865 = tpu.matmul %353, %864, %cst_293 {dimension_numbers = #tpu.dot_dimension_numbers<[1], [0], [0], [1], [0, 0, 1, 1], [], []>} : vector<16x32xf32>, vector<32x32xf32>, vector<16x32xf32> -> vector<16x32xf32>
    %866 = vector.extract_strided_slice %805 {offsets = [3, 0, 0], sizes = [1, 32, 32], strides = [1, 1, 1]} : vector<4x32x32xf32> to vector<1x32x32xf32>
    %867 = vector.shape_cast %866 : vector<1x32x32xf32> to vector<32x32xf32>
    %cst_294 = arith.constant dense<0.000000e+00> : vector<16x32xf32>
    %868 = tpu.matmul %353, %867, %cst_294 {dimension_numbers = #tpu.dot_dimension_numbers<[1], [0], [0], [1], [0, 0, 1, 1], [], []>} : vector<16x32xf32>, vector<32x32xf32>, vector<16x32xf32> -> vector<16x32xf32>
    %869 = vector.shape_cast %859 : vector<16x32xf32> to vector<1x16x32xf32>
    %870 = vector.shape_cast %862 : vector<16x32xf32> to vector<1x16x32xf32>
    %871 = vector.shape_cast %865 : vector<16x32xf32> to vector<1x16x32xf32>
    %872 = vector.shape_cast %868 : vector<16x32xf32> to vector<1x16x32xf32>
    %873 = tpu.concatenate %869, %870, %871, %872 in 0 : vector<1x16x32xf32>, vector<1x16x32xf32>, vector<1x16x32xf32>, vector<1x16x32xf32> -> vector<4x16x32xf32>
    "tpu.trace_start"() <{level = 10 : i32, message = "hqd,hkd->hqk"}> : () -> ()
    %cst_295 = arith.constant dense<0.000000e+00> : vector<4x16x16xf32>
    %874 = tpu.matmul %839, %856, %cst_295 {dimension_numbers = #tpu.dot_dimension_numbers<[2], [2], [1], [1], [0, 0, 0, 1, 1, 1], [0], [0]>} : vector<4x16x8xf32>, vector<4x16x8xf32>, vector<4x16x16xf32> -> vector<4x16x16xf32>
    "tpu.trace_stop"() : () -> ()
    %875 = vector.shape_cast %366 : vector<16x16xf32> to vector<1x16x16xf32>
    %876 = vector.broadcast %875 : vector<1x16x16xf32> to vector<4x16x16xf32>
    %877 = arith.addf %874, %876 : vector<4x16x16xf32>
    %cst_296 = arith.constant dense<0xFF800000> : vector<4x16xf32>
    %878 = vector.multi_reduction <maximumf>, %877, %cst_296 [2] : vector<4x16x16xf32> to vector<4x16xf32>
    %879 = vector.shape_cast %878 : vector<4x16xf32> to vector<4x16x1xf32>
    %880 = vector.broadcast %879 : vector<4x16x1xf32> to vector<4x16x16xf32>
    %881 = arith.subf %877, %880 : vector<4x16x16xf32>
    %882 = math.exp %881 : vector<4x16x16xf32>
    %cst_297 = arith.constant dense<0.000000e+00> : vector<4x16xf32>
    %883 = vector.multi_reduction <add>, %882, %cst_297 [2] : vector<4x16x16xf32> to vector<4x16xf32>
    %884 = vector.shape_cast %883 : vector<4x16xf32> to vector<4x16x1xf32>
    %885 = tpu.reciprocal %884 {approx = true} : vector<4x16x1xf32> -> vector<4x16x1xf32>
    %886 = vector.broadcast %885 : vector<4x16x1xf32> to vector<4x16x16xf32>
    %887 = arith.mulf %882, %886 : vector<4x16x16xf32>
    "tpu.trace_start"() <{level = 10 : i32, message = "hqk,hkd->hqd"}> : () -> ()
    %cst_298 = arith.constant dense<0.000000e+00> : vector<4x16x32xf32>
    %888 = tpu.matmul %887, %873, %cst_298 {dimension_numbers = #tpu.dot_dimension_numbers<[2], [1], [1], [2], [0, 0, 0, 1, 1, 2], [0], [0]>} : vector<4x16x16xf32>, vector<4x16x32xf32>, vector<4x16x32xf32> -> vector<4x16x32xf32>
    "tpu.trace_stop"() : () -> ()
    %889 = vector.extract_strided_slice %888 {offsets = [0, 0, 0], sizes = [1, 16, 32], strides = [1, 1, 1]} : vector<4x16x32xf32> to vector<1x16x32xf32>
    %890 = vector.shape_cast %889 : vector<1x16x32xf32> to vector<16x32xf32>
    %891 = vector.extract_strided_slice %888 {offsets = [1, 0, 0], sizes = [1, 16, 32], strides = [1, 1, 1]} : vector<4x16x32xf32> to vector<1x16x32xf32>
    %892 = vector.shape_cast %891 : vector<1x16x32xf32> to vector<16x32xf32>
    %893 = arith.addf %890, %892 : vector<16x32xf32>
    %894 = vector.extract_strided_slice %888 {offsets = [2, 0, 0], sizes = [1, 16, 32], strides = [1, 1, 1]} : vector<4x16x32xf32> to vector<1x16x32xf32>
    %895 = vector.shape_cast %894 : vector<1x16x32xf32> to vector<16x32xf32>
    %896 = arith.addf %893, %895 : vector<16x32xf32>
    %897 = vector.extract_strided_slice %888 {offsets = [3, 0, 0], sizes = [1, 16, 32], strides = [1, 1, 1]} : vector<4x16x32xf32> to vector<1x16x32xf32>
    %898 = vector.shape_cast %897 : vector<1x16x32xf32> to vector<16x32xf32>
    %899 = arith.addf %896, %898 : vector<16x32xf32>
    %900 = vector.broadcast %806 : vector<1x32xf32> to vector<16x32xf32>
    %901 = arith.addf %899, %900 : vector<16x32xf32>
    %902 = arith.addf %797, %901 : vector<16x32xf32>
    %903 = vector.extract_strided_slice %668 {offsets = [4, 0], sizes = [1, 32], strides = [1, 1]} : vector<9x32xf32> to vector<1x32xf32>
    %904 = vector.extract_strided_slice %668 {offsets = [5, 0], sizes = [1, 32], strides = [1, 1]} : vector<9x32xf32> to vector<1x32xf32>
    %cst_299 = arith.constant dense<0.000000e+00> : vector<16xf32>
    %905 = vector.multi_reduction <add>, %902, %cst_299 [1] : vector<16x32xf32> to vector<16xf32>
    %906 = vector.shape_cast %905 : vector<16xf32> to vector<16x1xf32>
    %cst_300 = arith.constant 3.200000e+01 : f32
    %907 = vector.broadcast %cst_300 : f32 to vector<16x1xf32>
    %908 = arith.divf %906, %907 : vector<16x1xf32>
    %909 = vector.broadcast %908 : vector<16x1xf32> to vector<16x32xf32>
    %910 = arith.subf %902, %909 : vector<16x32xf32>
    %911 = arith.mulf %910, %910 : vector<16x32xf32>
    %cst_301 = arith.constant dense<0.000000e+00> : vector<16xf32>
    %912 = vector.multi_reduction <add>, %911, %cst_301 [1] : vector<16x32xf32> to vector<16xf32>
    %913 = vector.shape_cast %912 : vector<16xf32> to vector<16x1xf32>
    %cst_302 = arith.constant 3.200000e+01 : f32
    %914 = vector.broadcast %cst_302 : f32 to vector<16x1xf32>
    %915 = arith.divf %913, %914 : vector<16x1xf32>
    %916 = vector.broadcast %908 : vector<16x1xf32> to vector<16x32xf32>
    %917 = arith.subf %902, %916 : vector<16x32xf32>
    %cst_303 = arith.constant 9.99999974E-6 : f32
    %918 = vector.broadcast %cst_303 : f32 to vector<16x1xf32>
    %919 = arith.addf %915, %918 : vector<16x1xf32>
    %920 = math.rsqrt %919 : vector<16x1xf32>
    %921 = vector.broadcast %920 : vector<16x1xf32> to vector<16x32xf32>
    %922 = arith.mulf %917, %921 : vector<16x32xf32>
    %923 = vector.broadcast %903 : vector<1x32xf32> to vector<16x32xf32>
    %924 = arith.mulf %922, %923 : vector<16x32xf32>
    %925 = vector.broadcast %904 : vector<1x32xf32> to vector<16x32xf32>
    %926 = arith.addf %924, %925 : vector<16x32xf32>
    %c1_304 = arith.constant 1 : index
    %c0_305 = arith.constant 0 : index
    %c0_306 = arith.constant 0 : index
    %927 = vector.load %arg21[%c1_304, %c0_305, %c0_306] : memref<2x32x64xf32, #tpu.memory_space<vmem>>, vector<1x32x64xf32>
    %928 = vector.shape_cast %927 : vector<1x32x64xf32> to vector<32x64xf32>
    %cst_307 = arith.constant dense<0.000000e+00> : vector<16x64xf32>
    %929 = tpu.matmul %926, %928, %cst_307 {dimension_numbers = #tpu.dot_dimension_numbers<[1], [0], [0], [1], [0, 0, 1, 1], [], []>} : vector<16x32xf32>, vector<32x64xf32>, vector<16x64xf32> -> vector<16x64xf32>
    %c1_308 = arith.constant 1 : index
    %c0_309 = arith.constant 0 : index
    %c0_310 = arith.constant 0 : index
    %930 = vector.load %arg22[%c1_308, %c0_309, %c0_310] : memref<2x1x64xf32, #tpu.memory_space<vmem>>, vector<1x1x64xf32>
    %931 = vector.shape_cast %930 : vector<1x1x64xf32> to vector<1x64xf32>
    %932 = vector.broadcast %931 : vector<1x64xf32> to vector<16x64xf32>
    %933 = arith.addf %929, %932 : vector<16x64xf32>
    %cst_311 = arith.constant 0.000000e+00 : f32
    %934 = vector.broadcast %cst_311 : f32 to vector<16x64xf32>
    %935 = arith.maximumf %933, %934 : vector<16x64xf32>
    %c1_312 = arith.constant 1 : index
    %c0_313 = arith.constant 0 : index
    %c0_314 = arith.constant 0 : index
    %936 = vector.load %arg23[%c1_312, %c0_313, %c0_314] : memref<2x64x32xf32, #tpu.memory_space<vmem>>, vector<1x64x32xf32>
    %937 = vector.shape_cast %936 : vector<1x64x32xf32> to vector<64x32xf32>
    %cst_315 = arith.constant dense<0.000000e+00> : vector<16x32xf32>
    %938 = tpu.matmul %935, %937, %cst_315 {dimension_numbers = #tpu.dot_dimension_numbers<[1], [0], [0], [1], [0, 0, 1, 1], [], []>} : vector<16x64xf32>, vector<64x32xf32>, vector<16x32xf32> -> vector<16x32xf32>
    %939 = vector.extract_strided_slice %668 {offsets = [6, 0], sizes = [1, 32], strides = [1, 1]} : vector<9x32xf32> to vector<1x32xf32>
    %940 = vector.broadcast %939 : vector<1x32xf32> to vector<16x32xf32>
    %941 = arith.addf %938, %940 : vector<16x32xf32>
    %942 = arith.addf %926, %941 : vector<16x32xf32>
    %943 = vector.extract_strided_slice %668 {offsets = [7, 0], sizes = [1, 32], strides = [1, 1]} : vector<9x32xf32> to vector<1x32xf32>
    %944 = vector.extract_strided_slice %668 {offsets = [8, 0], sizes = [1, 32], strides = [1, 1]} : vector<9x32xf32> to vector<1x32xf32>
    %cst_316 = arith.constant dense<0.000000e+00> : vector<16xf32>
    %945 = vector.multi_reduction <add>, %942, %cst_316 [1] : vector<16x32xf32> to vector<16xf32>
    %946 = vector.shape_cast %945 : vector<16xf32> to vector<16x1xf32>
    %cst_317 = arith.constant 3.200000e+01 : f32
    %947 = vector.broadcast %cst_317 : f32 to vector<16x1xf32>
    %948 = arith.divf %946, %947 : vector<16x1xf32>
    %949 = vector.broadcast %948 : vector<16x1xf32> to vector<16x32xf32>
    %950 = arith.subf %942, %949 : vector<16x32xf32>
    %951 = arith.mulf %950, %950 : vector<16x32xf32>
    %cst_318 = arith.constant dense<0.000000e+00> : vector<16xf32>
    %952 = vector.multi_reduction <add>, %951, %cst_318 [1] : vector<16x32xf32> to vector<16xf32>
    %953 = vector.shape_cast %952 : vector<16xf32> to vector<16x1xf32>
    %cst_319 = arith.constant 3.200000e+01 : f32
    %954 = vector.broadcast %cst_319 : f32 to vector<16x1xf32>
    %955 = arith.divf %953, %954 : vector<16x1xf32>
    %956 = vector.broadcast %948 : vector<16x1xf32> to vector<16x32xf32>
    %957 = arith.subf %942, %956 : vector<16x32xf32>
    %cst_320 = arith.constant 9.99999974E-6 : f32
    %958 = vector.broadcast %cst_320 : f32 to vector<16x1xf32>
    %959 = arith.addf %955, %958 : vector<16x1xf32>
    %960 = math.rsqrt %959 : vector<16x1xf32>
    %961 = vector.broadcast %960 : vector<16x1xf32> to vector<16x32xf32>
    %962 = arith.mulf %957, %961 : vector<16x32xf32>
    %963 = vector.broadcast %943 : vector<1x32xf32> to vector<16x32xf32>
    %964 = arith.mulf %962, %963 : vector<16x32xf32>
    %965 = vector.broadcast %944 : vector<1x32xf32> to vector<16x32xf32>
    %966 = arith.addf %964, %965 : vector<16x32xf32>
    %c0_321 = arith.constant 0 : index
    %c0_322 = arith.constant 0 : index
    %967 = vector.load %arg25[%c0_321, %c0_322] : memref<32x50xf32, #tpu.memory_space<vmem>>, vector<32x50xf32>
    %cst_323 = arith.constant dense<0.000000e+00> : vector<16x50xf32>
    %968 = tpu.matmul %966, %967, %cst_323 {dimension_numbers = #tpu.dot_dimension_numbers<[1], [0], [0], [1], [0, 0, 1, 1], [], []>} : vector<16x32xf32>, vector<32x50xf32>, vector<16x50xf32> -> vector<16x50xf32>
    %c0_324 = arith.constant 0 : index
    %c0_325 = arith.constant 0 : index
    %969 = vector.load %arg26[%c0_324, %c0_325] : memref<1x50xf32, #tpu.memory_space<vmem>>, vector<1x50xf32>
    %970 = vector.broadcast %969 : vector<1x50xf32> to vector<16x50xf32>
    %971 = arith.addf %968, %970 : vector<16x50xf32>
    %c0_326 = arith.constant 0 : index
    %c0_327 = arith.constant 0 : index
    %972 = vector.load %arg27[%c0_326, %c0_327] : memref<16x50xf32, #tpu.memory_space<vmem>>, vector<16x50xf32>
    tpu.vector_store %arg27[%c0_326, %c0_327], %971 {strides = array<i32>} : memref<16x50xf32, #tpu.memory_space<vmem>>, vector<16x50xf32>,
    %c0_328 = arith.constant 0 : index
    %c0_329 = arith.constant 0 : index
    %c0_330 = arith.constant 0 : index
    %973 = vector.load %arg28[%c0_328, %c0_329, %c0_330] : memref<4x16x16xf32, #tpu.memory_space<vmem>>, vector<4x16x16xf32>
    tpu.vector_store %arg28[%c0_328, %c0_329, %c0_330], %887 {strides = array<i32>} : memref<4x16x16xf32, #tpu.memory_space<vmem>>, vector<4x16x16xf32>,
    return
  }
}

</mosaic_0001>

<bundles_post_ra>
// kernel: tile.18
= control target key start
LH: loop header
LB: loop body
LE: loop exit
PB: predicated region body
PF: predicated region fallthrough
CT: control target
= control target key end

     0   :  { %s154_s0 = inlined_call_operand.vmem [shape: f32[8,8], index: 0, kind: input, shape index: {}]   ;;  %s155_s1 = inlined_call_operand.vmem [shape: f32[2,8,2,8], index: 1, kind: output, shape index: {}]  }
   0x1   :  { %v4_v0 = vld [vmem:[%s154_s0] ss:$0 sm:$0xff]  ;;  %v51_v1 = vld [vmem:[%s154_s0 + $0x1] ss:$0 sm:$0xff]  ;;  %v54_v2 = vld [vmem:[%s154_s0 + $0x2] ss:$0 sm:$0xff] }
   0x2   :  { %5 = vst [vmem:[%s155_s1] sm:$0x3] %v4_v0  ;;  %50 = vst [vmem:[%s155_s1 + $0x10] sm:$0x3] %v4_v0  ;;  %v57_v3 = vld [vmem:[%s154_s0 + $0x3] ss:$0 sm:$0xff] }
   0x3   :  { %52 = vst [vmem:[%s155_s1 + $0x2] sm:$0x3] %v51_v1  ;;  %53 = vst [vmem:[%s155_s1 + $0x12] sm:$0x3] %v51_v1  ;;  %v60_v4 = vld [vmem:[%s154_s0 + $0x4] ss:$0 sm:$0xff] }
   0x4   :  { %55 = vst [vmem:[%s155_s1 + $0x4] sm:$0x3] %v54_v2  ;;  %56 = vst [vmem:[%s155_s1 + $0x14] sm:$0x3] %v54_v2  ;;  %v63_v5 = vld [vmem:[%s154_s0 + $0x5] ss:$0 sm:$0xff] }
   0x5   :  { %58 = vst [vmem:[%s155_s1 + $0x6] sm:$0x3] %v57_v3  ;;  %59 = vst [vmem:[%s155_s1 + $0x16] sm:$0x3] %v57_v3  ;;  %v66_v6 = vld [vmem:[%s154_s0 + $0x6] ss:$0 sm:$0xff] }
   0x6   :  { %61 = vst [vmem:[%s155_s1 + $0x8] sm:$0x3] %v60_v4  ;;  %62 = vst [vmem:[%s155_s1 + $0x18] sm:$0x3] %v60_v4  ;;  %v69_v7 = vld [vmem:[%s154_s0 + $0x7] ss:$0 sm:$0xff] }
   0x7   :  { %64 = vst [vmem:[%s155_s1 + $0xa] sm:$0x3] %v63_v5  ;;  %65 = vst [vmem:[%s155_s1 + $0x1a] sm:$0x3] %v63_v5 }
   0x8   :  { %67 = vst [vmem:[%s155_s1 + $0xc] sm:$0x3] %v66_v6  ;;  %68 = vst [vmem:[%s155_s1 + $0x1c] sm:$0x3] %v66_v6 }
   0x9   :  { %70 = vst [vmem:[%s155_s1 + $0xe] sm:$0x3] %v69_v7  ;;  %71 = vst [vmem:[%s155_s1 + $0x1e] sm:$0x3] %v69_v7 }

// kernel: tile.19
= control target key start
LH: loop header
LB: loop body
LE: loop exit
PB: predicated region body
PF: predicated region fallthrough
CT: control target
= control target key end

     0   :  { %vm82_vm0 = vcmask 1047556   ;;  %vm84_vm1 = vcmask 64512   ;;  %vm103_vm2 = vcmask 130112   ;;  %s225_s0 = inlined_call_operand.vmem [shape: f32[2,8,2,8], index: 0, kind: input, shape index: {}]   ;;  %s226_s1 = inlined_call_operand.vmem [shape: f32[16,16], index: 1, kind: output, shape index: {}]  }
   0x1   :  { %v138_v0 = vld [vmem:[%s225_s0 + $0xe] sm:$0x3]  ;;  %v139_v1 = vld [vmem:[%s225_s0 + $0xc] sm:$0x3]  ;;  %v140_v2 = vld [vmem:[%s225_s0 + $0xa] sm:$0x3] }
   0x2   :  { %48 = vst [vmem:[#allocation0 + $0x38] sm:$0x3] %v138_v0  ;;  %53 = vst [vmem:[#allocation0 + $0x30] sm:$0x3] %v139_v1  ;;  %v141_v3 = vld [vmem:[%s225_s0 + $0x8] sm:$0x3] }
   0x3   :  { %58 = vst [vmem:[#allocation0 + $0x28] sm:$0x3] %v140_v2  ;;  %v142_v4 = vld [vmem:[%s225_s0 + $0x6] sm:$0x3]  ;;  %v143_v5 = vld [vmem:[%s225_s0 + $0x4] sm:$0x3] }
   0x4   :  { %63 = vst [vmem:[#allocation0 + $0x20] sm:$0x3] %v141_v3  ;;  %68 = vst [vmem:[#allocation0 + $0x18] sm:$0x3] %v142_v4  ;;  %v144_v6 = vld [vmem:[%s225_s0 + $0x2] sm:$0x3] }
   0x5   :  { %73 = vst [vmem:[#allocation0 + $0x10] sm:$0x3] %v143_v5  ;;  %v78_v7 = vld [vmem:[%s225_s0] sm:$0x3]  ;;  %77 = vst [vmem:[#allocation0 + $0x8] sm:$0x3] %v144_v6 }
   0x6   :  { %79 = vst [vmem:[#allocation0] sm:$0x3] %v78_v7  ;;  %v130_v8 = vld [vmem:[%s225_s0 + $0x1e] sm:$0x3]  ;;  %v131_v9 = vld [vmem:[%s225_s0 + $0x1c] sm:$0x3] }
   0x7   :  { %v132_v10 = vld [vmem:[%s225_s0 + $0x1a] sm:$0x3]  ;;  %8 = vst [vmem:[#allocation0 + $0x78] sm:$0x3] %v130_v8  ;;  %13 = vst [vmem:[#allocation0 + $0x70] sm:$0x3] %v131_v9 }
   0x8   :  { %18 = vst [vmem:[#allocation0 + $0x68] sm:$0x3] %v132_v10  ;;  %v133_v11 = vld [vmem:[%s225_s0 + $0x18] sm:$0x3]  ;;  %v134_v12 = vld [vmem:[%s225_s0 + $0x16] sm:$0x3] }
   0x9   :  { %v135_v13 = vld [vmem:[%s225_s0 + $0x14] sm:$0x3]  ;;  %23 = vst [vmem:[#allocation0 + $0x60] sm:$0x3] %v133_v11  ;;  %28 = vst [vmem:[#allocation0 + $0x58] sm:$0x3] %v134_v12 }
   0xa   :  { %33 = vst [vmem:[#allocation0 + $0x50] sm:$0x3] %v135_v13  ;;  %v136_v14 = vld [vmem:[%s225_s0 + $0x12] sm:$0x3]  ;;  %v137_v15 = vld [vmem:[%s225_s0 + $0x10] sm:$0x3] }
   0xb   :  { %38 = vst [vmem:[#allocation0 + $0x48] sm:$0x3] %v136_v14  ;;  %43 = vst [vmem:[#allocation0 + $0x40] sm:$0x3] %v137_v15  ;;  %s148_s0 = smov 8  }
   0xc   :  { %v98_v16 = vld [vmem:[#allocation0 + $0x1] ss:$8 sm:$0xf0]   ;;  %v81_v17 = vld [vmem:[#allocation0] ss:$8 sm:$0xf0]  }
   0xd   :  { %v96_v18 = vld [vmem:[#allocation0 + $0x1] ss:$8 sm:$0xf]   ;;  %v80_v19 = vld [vmem:[#allocation0] ss:$8 sm:$0xf]  }
   0xe   :  { %v100_v20 = vsel %vm82_vm0, %v98_v16, %v96_v18  ;;  %v83_v21 = vsel %vm82_vm0, %v81_v17, %v80_v19 }
   0xf   :  { %101 = vrot.lane.b32.xlu0 %v100_v20, %s148_s0  ;;  %85 = vst.msk [vmem:[%s226_s1] sm:$0xff] %vm84_vm1, %v83_v21  }
  0x10   :  { %v108_v22 = vld [vmem:[#allocation0 + $0x41] ss:$8 sm:$0xf0]   ;;  %v89_v23 = vld [vmem:[#allocation0 + $0x40] ss:$8 sm:$0xf0]  }
  0x12   :  { %v106_v24 = vld [vmem:[#allocation0 + $0x41] ss:$8 sm:$0xf]   ;;  %v87_v25 = vld [vmem:[#allocation0 + $0x40] ss:$8 sm:$0xf]  }
  0x13   :  { %v110_v26 = vsel %vm82_vm0, %v108_v22, %v106_v24  ;;  %v91_v27 = vsel %vm82_vm0, %v89_v23, %v87_v25 }
  0x14   :  { %145 = vst.msk [vmem:[%s226_s1 + $0x8] sm:$0xff] %vm84_vm1, %v91_v27   ;;  %111 = vrot.lane.b32.xlu0 %v110_v26, %s148_s0 }
  0x81   :  { %v102_v28 = vpop.permute.xlu0 %101  }
  0x82   :  { %104 = vst.msk [vmem:[%s226_s1] sm:$0xff] %vm103_vm2, %v102_v28  }
  0x86   :  { %v112_v29 = vpop.permute.xlu0 %111  }
  0x87   :  { %146 = vst.msk [vmem:[%s226_s1 + $0x8] sm:$0xff] %vm103_vm2, %v112_v29  }

// kernel: seq2seq_forward.1
= control target key start
LH: loop header
LB: loop body
LE: loop exit
PB: predicated region body
PF: predicated region fallthrough
CT: control target
= control target key end

     0   :  { %s18448_s0 = inlined_call_operand.vmem [shape: s32[16,1], index: 0, kind: input, shape index: {}]   ;;  %s18449_s1 = inlined_call_operand.vmem [shape: s32[16,1], index: 1, kind: input, shape index: {}]   ;;  %s18450_s2 = inlined_call_operand.vmem [shape: f32[16,16], index: 2, kind: input, shape index: {}, may-alias: {2,4}]   ;;  %s18451_s3 = inlined_call_operand.vmem [shape: f32[16,16], index: 3, kind: input, shape index: {}]   ;;  %s18452_s4 = inlined_call_operand.vmem [shape: f32[16,16], index: 4, kind: input, shape index: {}, may-alias: {2,4}]   ;;  %s18453_s5 = inlined_call_operand.vmem [shape: f32[128,32], index: 5, kind: input, shape index: {}]   ;;  %s18454_s6 = inlined_call_operand.vmem [shape: f32[16,32], index: 6, kind: input, shape index: {}]   ;;  %s18455_s7 = inlined_call_operand.vmem [shape: f32[128,32], index: 7, kind: input, shape index: {}]   ;;  %s18456_s8 = inlined_call_operand.vmem [shape: f32[16,32], index: 8, kind: input, shape index: {}]   ;;  %s18457_s9 = inlined_call_operand.vmem [shape: f32[2,4,32,8], index: 9, kind: input, shape index: {}]   ;;  %s18458_s10 = inlined_call_operand.vmem [shape: f32[2,4,1,8], index: 10, kind: input, shape index: {}]   ;;  %s18459_s11 = inlined_call_operand.vmem [shape: f32[2,4,32,8], index: 11, kind: input, shape index: {}]   ;;  %s18460_s12 = inlined_call_operand.vmem [shape: f32[2,4,32,32], index: 12, kind: input, shape index: {}]   ;;  %s18461_s13 = inlined_call_operand.vmem [shape: f32[2,32,64], index: 13, kind: input, shape index: {}]   ;;  %s18462_s14 = inlined_call_operand.vmem [shape: f32[2,1,64], index: 14, kind: input, shape index: {}]   ;;  %s18463_s15 = inlined_call_operand.vmem [shape: f32[2,64,32], index: 15, kind: input, shape index: {}]   ;;  %s18464_s16 = inlined_call_operand.vmem [shape: f32[2,6,32], index: 16, kind: input, shape index: {}]   ;;  %s18465_s17 = inlined_call_operand.vmem [shape: f32[4,4,32,8], index: 17, kind: input, shape index: {}]   ;;  %s18466_s18 = inlined_call_operand.vmem [shape: f32[4,4,1,8], index: 18, kind: input, shape index: {}]   ;;  %s18467_s19 = inlined_call_operand.vmem [shape: f32[4,4,32,8], index: 19, kind: input, shape index: {}]   ;;  %s18468_s20 = inlined_call_operand.vmem [shape: f32[4,4,32,32], index: 20, kind: input, shape index: {}]   ;;  %s18469_s21 = inlined_call_operand.vmem [shape: f32[2,32,64], index: 21, kind: input, shape index: {}]   ;;  %s18470_s22 = inlined_call_operand.vmem [shape: f32[2,1,64], index: 22, kind: input, shape index: {}]   ;;  %s18471_s23 = inlined_call_operand.vmem [shape: f32[2,64,32], index: 23, kind: input, shape index: {}]   ;;  %s18472_s24 = inlined_call_operand.vmem [shape: f32[2,9,32], index: 24, kind: input, shape index: {}]   ;;  %s18473_s25 = inlined_call_operand.vmem [shape: f32[32,50], index: 25, kind: input, shape index: {}]   ;;  %s18474_s26 = inlined_call_operand.vmem [shape: f32[1,50], index: 26, kind: input, shape index: {}]   ;;  %s18475_s27 = inlined_call_operand.hbm [shape: f32[16,50], index: 27, kind: output, shape index: {0}]   ;;  %s18476_s28 = inlined_call_operand.vmem [shape: f32[4,16,16], index: 28, kind: output, shape index: {1}]  }
   0x1   :  { %18491 = sst [smem:[#allocation5_spill]] %s18448_s0 }
   0x2   :  { %18492 = sst [smem:[#allocation6_spill]] %s18449_s1 }
   0x3   :  { %18493 = sst [smem:[#allocation7_spill]] %s18450_s2 }
   0x4   :  { %18494 = sst [smem:[#allocation8_spill]] %s18451_s3 }
   0x5   :  { %18495 = sst [smem:[#allocation9_spill]] %s18452_s4 }
   0x6   :  { %18496 = sst [smem:[#allocation10_spill]] %s18453_s5 }
   0x7   :  { %18497 = sst [smem:[#allocation11_spill]] %s18454_s6 }
   0x8   :  { %18498 = sst [smem:[#allocation12_spill]] %s18455_s7 }
   0x9   :  { %18499 = sst [smem:[#allocation13_spill]] %s18456_s8 }
   0xa   :  { %18500 = sst [smem:[#allocation14_spill]] %s18457_s9 }
   0xb   :  { %18501 = sst [smem:[#allocation15_spill]] %s18458_s10 }
   0xc   :  { %18502 = sst [smem:[#allocation16_spill]] %s18459_s11 }
   0xd   :  { %18503 = sst [smem:[#allocation17_spill]] %s18460_s12 }
   0xe   :  { %18504 = sst [smem:[#allocation18_spill]] %s18470_s22 }
   0xf   :  { %s18505_s9 = sld [smem:[#allocation5_spill]]  ;;  %s18506_s22 = sld [smem:[#allocation10_spill]]  ;;  %v16070_v2 = vmov 0  }
  0x10   :  { %15805 = vset.pattern.permute.xlu0 %v16070_v2  ;;  %15806 = vset.pattern.permute.xlu1 %v16070_v2 }
  0x15   :  { %v91_v0 = vld [vmem:[%s18505_s9] sm:$0xff]  ;;  %v104_v3 = vld [vmem:[%s18506_s22 + $0x8] sm:$0xff]  ;;  %v105_v4 = vld [vmem:[%s18506_s22 + $0x10] sm:$0xff] }
  0x16   :  { %v103_v1 = vld [vmem:[%s18506_s22] sm:$0xff]  ;;  %v106_v5 = vld [vmem:[%s18506_s22 + $0x18] sm:$0xff]  ;;  %94 = vperm.xlu0 %15805, %v91_v0   ;;  %v92_v8 = vld [vmem:[%s18505_s9 + $0x8] sm:$0xff] }
  0x17   :  { %v14780_v6 = vpack.c.bf16 %v104_v3, %v103_v1  ;;  %v14784_v7 = vpack.c.bf16 %v106_v5, %v105_v4  ;;  %v107_v9 = vld [vmem:[%s18506_s22 + $0x20] sm:$0xff]  ;;  %v108_v10 = vld [vmem:[%s18506_s22 + $0x28] sm:$0xff]  ;;  %v109_v12 = vld [vmem:[%s18506_s22 + $0x30] sm:$0xff] }
  0x18   :  { %v14788_v11 = vpack.c.bf16 %v108_v10, %v107_v9 }
  0x19   :  { %14781 = vmatprep.subr.bf16.mxu0 %v14780_v6 }
  0x1a   :  { %14783 = vmatpush3.bf16.msra.mxu0 %v14780_v6  ;;  %97 = vperm.xlu0 %15805, %v92_v8  }
  0x1b   :  { %14785 = vmatprep.subr.bf16.mxu0 %v14784_v7 }
  0x1c   :  { %34 = vsyncpa [#allocation3], 0  ;;  %v110_v13 = vld [vmem:[%s18506_s22 + $0x38] sm:$0xff]  ;;  %s18507_s11 = sld [smem:[#allocation14_spill]]  ;;  %v111_v18 = vld [vmem:[%s18506_s22 + $0x40] sm:$0xff]  ;;  %s18508_s8 = sld [smem:[#allocation16_spill]]  ;;  %v89_v33 = vlaneseq }
  0x1d   :  { %v14792_v17 = vpack.c.bf16 %v110_v13, %v109_v12  ;;  %v112_v19 = vld [vmem:[%s18506_s22 + $0x48] sm:$0xff]  ;;  %v113_v21 = vld [vmem:[%s18506_s22 + $0x50] sm:$0xff]  ;;  %v114_v22 = vld [vmem:[%s18506_s22 + $0x58] sm:$0xff]  ;;  %v16071_v36 = vmov 1.0   ;;  %s18509_s10 = sld [smem:[#allocation11_spill]]  ;;  %vm257_vm2 = vcmask 261120  }
  0x1e   :  { %14787 = vmatpush3.bf16.msra.mxu0 %v14784_v7  ;;  %v14796_v20 = vpack.c.bf16 %v112_v19, %v111_v18  ;;  %v14800_v23 = vpack.c.bf16 %v114_v22, %v113_v21  ;;  %v115_v24 = vld [vmem:[%s18506_s22 + $0x60] sm:$0xff]  ;;  %v116_v25 = vld [vmem:[%s18506_s22 + $0x68] sm:$0xff]  ;;  %v117_v27 = vld [vmem:[%s18506_s22 + $0x70] sm:$0xff]  ;;  %v16287_v34 = vand.u32 127, %v89_v33  ;;  %s18510_s2 = sld [smem:[#allocation17_spill]]  ;;  %vm1182_vm3 = vcmask 64512  }
  0x1f   :  { %14789 = vmatprep.subr.bf16.mxu0 %v14788_v11  ;;  %v14804_v26 = vpack.c.bf16 %v116_v25, %v115_v24  ;;  %v118_v28 = vld [vmem:[%s18506_s22 + $0x78] sm:$0xff]  ;;  %s18511_s6 = sld [smem:[#allocation15_spill]]  ;;  %vm16488_vm4 = vmpackc.low %vm1182_vm3, %vm1182_vm3  ;;  %vm1531_vm5 = vcmask 130048   ;;  %vm2103_vm6 = vcmask 523264   ;;  %s18515_s1 = sld [smem:[#allocation12_spill]]  ;;  %vm12112_vm9 = vcmask 408576  }
  0x20   :  { %v14808_v29 = vpack.c.bf16 %v118_v28, %v117_v27  ;;  %s18514_s5 = sld [smem:[#allocation7_spill]]  ;;  %s18516_s12 = sld [smem:[#allocation6_spill]] }
  0x21   :  { %s18517_s7 = sld [smem:[#allocation13_spill]] }
  0x22   :  { %v199_v14 = vld [vmem:[%s18507_s11] sm:$0xff]  ;;  %v200_v15 = vld [vmem:[%s18507_s11 + $0x8] sm:$0xff]  ;;  %14791 = vmatpush3.bf16.msra.mxu0 %v14788_v11  ;;  %v201_v38 = vld [vmem:[%s18507_s11 + $0x10] sm:$0xff] }
  0x23   :  { %v14812_v16 = vpack.c.bf16 %v200_v15, %v199_v14  ;;  %14793 = vmatprep.subr.bf16.mxu0 %v14792_v17  ;;  %v219_v30 = vld [vmem:[%s18508_s8] sm:$0xff]  ;;  %v220_v31 = vld [vmem:[%s18508_s8 + $0x8] sm:$0xff]  ;;  %v202_v39 = vld [vmem:[%s18507_s11 + $0x18] sm:$0xff] }
  0x24   :  { %v14844_v32 = vpack.c.bf16 %v220_v31, %v219_v30  ;;  %v221_v40 = vld [vmem:[%s18508_s8 + $0x10] sm:$0xff]  ;;  %v14816_v41 = vpack.c.bf16 %v202_v39, %v201_v38  ;;  %v222_v42 = vld [vmem:[%s18508_s8 + $0x18] sm:$0xff]  ;;  %v203_v44 = vld [vmem:[%s18507_s11 + $0x20] sm:$0xff] }
  0x25   :  { %14813 = vmatprep.subr.bf16.mxu1 %v14812_v16  ;;  %v14848_v43 = vpack.c.bf16 %v222_v42, %v221_v40  ;;  %v204_v45 = vld [vmem:[%s18507_s11 + $0x28] sm:$0xff]  ;;  %v227_v47 = vld [vmem:[%s18508_s8 + $0x40] sm:$0xff]  ;;  %v205_v53 = vld [vmem:[%s18507_s11 + $0x30] sm:$0xff] }
  0x26   :  { %14815 = vmatpush3.bf16.msra.mxu1 %v14812_v16  ;;  %14795 = vmatpush3.bf16.msra.mxu0 %v14792_v17  ;;  %v14820_v46 = vpack.c.bf16 %v204_v45, %v203_v44  ;;  %v228_v48 = vld [vmem:[%s18508_s8 + $0x48] sm:$0xff]  ;;  %v119_v50 = vld [vmem:[%s18509_s10] sm:$0xff]  ;;  %v206_v55 = vld [vmem:[%s18507_s11 + $0x38] sm:$0xff] }
  0x27   :  { %14797 = vmatprep.subr.bf16.mxu0 %v14796_v20  ;;  %14817 = vmatprep.subr.bf16.mxu1 %v14816_v41  ;;  %v14860_v49 = vpack.c.bf16 %v228_v48, %v227_v47  ;;  %v120_v51 = vld [vmem:[%s18509_s10 + $0x8] sm:$0xff]  ;;  %v229_v56 = vld [vmem:[%s18508_s8 + $0x50] sm:$0xff]  ;;  %v230_v57 = vld [vmem:[%s18508_s8 + $0x58] sm:$0xff]  ;;  %v14824_v61 = vpack.c.bf16 %v206_v55, %v205_v53 }
  0x28   :  { %v207_v60 = vld [vmem:[%s18507_s11 + $0x40] sm:$0xff]  ;;  %v14864_v62 = vpack.c.bf16 %v230_v57, %v229_v56  ;;  %v208_v63 = vld [vmem:[%s18507_s11 + $0x48] sm:$0xff]  ;;  %v209_v4 = vld [vmem:[%s18507_s11 + $0x50] sm:$0xff] }
  0x29   :  { %v235_v0 = vld [vmem:[%s18510_s2] sm:$0xff]  ;;  %v236_v1 = vld [vmem:[%s18510_s2 + $0x8] sm:$0xff]  ;;  %v14828_v2 = vpack.c.bf16 %v208_v63, %v207_v60  ;;  %v210_v5 = vld [vmem:[%s18507_s11 + $0x58] sm:$0xff] }
  0x2a   :  { %14799 = vmatpush3.bf16.msra.mxu0 %v14796_v20  ;;  %14819 = vmatpush3.bf16.msra.mxu1 %v14816_v41  ;;  %v14876_v3 = vpack.c.bf16 %v236_v1, %v235_v0  ;;  %v237_v6 = vld [vmem:[%s18510_s2 + $0x10] sm:$0xff]  ;;  %v238_v7 = vld [vmem:[%s18510_s2 + $0x18] sm:$0xff]  ;;  %v14832_v8 = vpack.c.bf16 %v210_v5, %v209_v4  ;;  %v211_v10 = vld [vmem:[%s18507_s11 + $0x60] sm:$0xff] }
  0x2b   :  { %14801 = vmatprep.subr.bf16.mxu0 %v14800_v23  ;;  %14821 = vmatprep.subr.bf16.mxu1 %v14820_v46  ;;  %v14880_v9 = vpack.c.bf16 %v238_v7, %v237_v6  ;;  %v212_v11 = vld [vmem:[%s18507_s11 + $0x68] sm:$0xff]  ;;  %v243_v12 = vld [vmem:[%s18510_s2 + $0x40] sm:$0xff]  ;;  %v213_v16 = vld [vmem:[%s18507_s11 + $0x70] sm:$0xff] }
  0x2c   :  { %v244_v13 = vld [vmem:[%s18510_s2 + $0x48] sm:$0xff]  ;;  %v14836_v14 = vpack.c.bf16 %v212_v11, %v211_v10  ;;  %v214_v17 = vld [vmem:[%s18507_s11 + $0x78] sm:$0xff]  ;;  %v245_v18 = vld [vmem:[%s18510_s2 + $0x50] sm:$0xff] }
  0x2d   :  { %v14892_v15 = vpack.c.bf16 %v244_v13, %v243_v12  ;;  %v246_v19 = vld [vmem:[%s18510_s2 + $0x58] sm:$0xff]  ;;  %v14840_v20 = vpack.c.bf16 %v214_v17, %v213_v16  ;;  %v223_v21 = vld [vmem:[%s18508_s8 + $0x20] sm:$0xff]  ;;  %v224_v22 = vld [vmem:[%s18508_s8 + $0x28] sm:$0xff] }
  0x2e   :  { %14803 = vmatpush3.bf16.msra.mxu0 %v14800_v23  ;;  %v14896_v23 = vpack.c.bf16 %v246_v19, %v245_v18  ;;  %v14852_v24 = vpack.c.bf16 %v224_v22, %v223_v21  ;;  %v225_v25 = vld [vmem:[%s18508_s8 + $0x30] sm:$0xff]  ;;  %v231_v28 = vld [vmem:[%s18508_s8 + $0x60] sm:$0xff]  ;;  %v240_v38 = vld [vmem:[%s18510_s2 + $0x28] sm:$0xff] }
  0x2f   :  { %14805 = vmatprep.subr.bf16.mxu0 %v14804_v26  ;;  %v233_v31 = vld [vmem:[%s18508_s8 + $0x70] sm:$0xff]  ;;  %v242_v41 = vld [vmem:[%s18510_s2 + $0x38] sm:$0xff]  ;;  %v248_v44 = vld [vmem:[%s18510_s2 + $0x68] sm:$0xff] }
  0x30   :  { %v241_v40 = vld [vmem:[%s18510_s2 + $0x30] sm:$0xff]  ;;  %v250_v47 = vld [vmem:[%s18510_s2 + $0x78] sm:$0xff]  ;;  %v12148_v57 = vld [vmem:[%s18511_s6 + $0x1] ss:$0 sm:$0xff] }
  0x31   :  { %v14888_v42 = vpack.c.bf16 %v242_v41, %v241_v40  ;;  %v12154_v19 = vld [vmem:[%s18511_s6 + $0x3] ss:$0 sm:$0xff] }
  0x32   :  { %14807 = vmatpush3.bf16.msra.mxu0 %v14804_v26  ;;  %v226_v26 = vld [vmem:[%s18508_s8 + $0x38] sm:$0xff] }
  0x33   :  { %14809 = vmatprep.subr.bf16.mxu0 %v14808_v29  ;;  %v14856_v27 = vpack.c.bf16 %v226_v26, %v225_v25 }
  0x36   :  { %14811 = vmatpush3.bf16.msra.mxu0 %v14808_v29  ;;  %v232_v29 = vld [vmem:[%s18508_s8 + $0x68] sm:$0xff] }
  0x37   :  { %14845 = vmatprep.subr.bf16.mxu0 %v14844_v32  ;;  %v14868_v30 = vpack.c.bf16 %v232_v29, %v231_v28 }
  0x95   :  { %v95_v35 = vpop.permute.xlu0 %94 }
  0x96   :  { %vm99_vm0 = vcmp.eq.s32.totalorder %v16287_v34, %v95_v35 }
  0x97   :  { %13483 = vmatprep.mubr.msk.f32.mxu0 %vm99_vm0, %v16071_v36 }
  0x99   :  { %v98_v37 = vpop.permute.xlu0 %97 }
  0x9a   :  { %vm100_vm1 = vcmp.eq.s32.totalorder %v16287_v34, %v98_v37  ;;  %v239_v37 = vld [vmem:[%s18510_s2 + $0x20] sm:$0xff] }
  0x9b   :  { %13484 = vmatmul.mubr.msk.f32.vlgmr.msra.gmra.mrb[0].mxu0 %vm100_vm1, %v16071_v36  ;;  %v14884_v39 = vpack.c.bf16 %v240_v38, %v239_v37  ;;  %v16533_v38 = vld [vmem:[%s18514_s5] sm:$0xff] }
  0x9c   :  { %14847 = vmatpush3.bf16.msra.mxu0 %v14844_v32  ;;  %v234_v32 = vld [vmem:[%s18508_s8 + $0x78] sm:$0xff] }
  0x9d   :  { %14849 = vmatprep.subr.bf16.mxu0 %v14848_v43  ;;  %v14872_v35 = vpack.c.bf16 %v234_v32, %v233_v31 }
  0xa0   :  { %14851 = vmatpush3.bf16.msra.mxu0 %v14848_v43  ;;  %v247_v43 = vld [vmem:[%s18510_s2 + $0x60] sm:$0xff] }
  0xa1   :  { %14861 = vmatprep.subr.bf16.mxu0 %v14860_v49  ;;  %v14900_v45 = vpack.c.bf16 %v248_v44, %v247_v43 }
 0x16e   :  { %v13485_v52 = vpop.f32.mrb[0].mxu0 }
 0x16f   :  { %v187_v54 = vpop.f32.mrb[1].mxu0  ;;  %v16337_v59 = vadd.f32 %v13485_v52, %v120_v51 }
 0x170   :  { %v16335_v58 = vadd.f32 %v187_v54, %v119_v50 }
 0x172   :  { %13494 = vmatprep.mubr.msk.f32.mxu1 %vm257_vm2, %v16335_v58  ;;  %13538 = vmatprep.mubr.msk.f32.mxu0 %vm257_vm2, %v16335_v58 }
 0x173   :  { %13495 = vmatmul.mubr.msk.f32.vlgmr.msra.gmra.mrb[0].mxu1 %vm257_vm2, %v16337_v59  ;;  %13539 = vmatmul.mubr.msk.f32.vlgmr.msra.gmra.mrb[2].mxu0 %vm257_vm2, %v16337_v59 }
 0x174   :  { %14823 = vmatpush3.bf16.msra.mxu1 %v14820_v46  ;;  %14863 = vmatpush3.bf16.msra.mxu0 %v14860_v49  ;;  %v249_v46 = vld [vmem:[%s18510_s2 + $0x70] sm:$0xff]  ;;  %v12145_v49 = vld [vmem:[%s18511_s6] ss:$0 sm:$0xff] }
 0x175   :  { %13505 = vmatprep.mubr.msk.f32.mxu1 %vm257_vm2, %v16335_v58  ;;  %13560 = vmatprep.mubr.msk.f32.mxu0 %vm257_vm2, %v16335_v58  ;;  %v14904_v48 = vpack.c.bf16 %v250_v47, %v249_v46 }
 0x176   :  { %14825 = vmatprep.subr.bf16.mxu1 %v14824_v61  ;;  %14865 = vmatprep.subr.bf16.mxu0 %v14864_v62 }
 0x178   :  { %14827 = vmatpush3.bf16.msra.mxu1 %v14824_v61  ;;  %14867 = vmatpush3.bf16.msra.mxu0 %v14864_v62 }
 0x179   :  { %14829 = vmatprep.subr.bf16.mxu1 %v14828_v2  ;;  %14877 = vmatprep.subr.bf16.mxu0 %v14876_v3 }
 0x17b   :  { %13506 = vmatmul.mubr.msk.f32.vlgmr.msra.gmra.mrb[2].mxu1 %vm257_vm2, %v16337_v59  ;;  %13561 = vmatmul.mubr.msk.f32.vlgmr.msra.gmra.mrb[4].mxu0 %vm257_vm2, %v16337_v59 }
 0x17c   :  { %14831 = vmatpush3.bf16.msra.mxu1 %v14828_v2  ;;  %13516 = vmatprep.mubr.msk.f32.mxu1 %vm257_vm2, %v16335_v58 }
 0x17d   :  { %14879 = vmatpush3.bf16.msra.mxu0 %v14876_v3  ;;  %13582 = vmatprep.mubr.msk.f32.mxu0 %vm257_vm2, %v16335_v58  ;;  %v12151_v3 = vld [vmem:[%s18511_s6 + $0x2] ss:$0 sm:$0xff] }
 0x17e   :  { %14833 = vmatprep.subr.bf16.mxu1 %v14832_v8  ;;  %14881 = vmatprep.subr.bf16.mxu0 %v14880_v9 }
 0x180   :  { %14835 = vmatpush3.bf16.msra.mxu1 %v14832_v8 }
 0x181   :  { %14883 = vmatpush3.bf16.msra.mxu0 %v14880_v9  ;;  %14837 = vmatprep.subr.bf16.mxu1 %v14836_v14 }
 0x182   :  { %14893 = vmatprep.subr.bf16.mxu0 %v14892_v15 }
 0x183   :  { %13517 = vmatmul.mubr.msk.f32.vlgmr.msra.gmra.mrb[4].mxu1 %vm257_vm2, %v16337_v59 }
 0x184   :  { %13583 = vmatmul.mubr.msk.f32.vlgmr.msra.gmra.mrb[6].mxu0 %vm257_vm2, %v16337_v59  ;;  %14839 = vmatpush3.bf16.msra.mxu1 %v14836_v14 }
 0x185   :  { %13527 = vmatprep.mubr.msk.f32.mxu1 %vm257_vm2, %v16335_v58  ;;  %14895 = vmatpush3.bf16.msra.mxu0 %v14892_v15 }
 0x186   :  { %13604 = vmatprep.mubr.msk.f32.mxu0 %vm257_vm2, %v16335_v58  ;;  %14841 = vmatprep.subr.bf16.mxu1 %v14840_v20 }
 0x187   :  { %14897 = vmatprep.subr.bf16.mxu0 %v14896_v23 }
 0x188   :  { %14843 = vmatpush3.bf16.msra.mxu1 %v14840_v20 }
 0x189   :  { %14899 = vmatpush3.bf16.msra.mxu0 %v14896_v23  ;;  %14853 = vmatprep.subr.bf16.mxu1 %v14852_v24 }
 0x18b   :  { %13528 = vmatmul.mubr.msk.f32.vlgmr.msra.gmra.mrb[6].mxu1 %vm257_vm2, %v16337_v59 }
 0x18c   :  { %13605 = vmatmul.mubr.msk.f32.vlgmr.msra.gmra.mrb[8].mxu0 %vm257_vm2, %v16337_v59  ;;  %14855 = vmatpush3.bf16.msra.mxu1 %v14852_v24 }
 0x18d   :  { %13549 = vmatprep.mubr.msk.f32.mxu1 %vm257_vm2, %v16335_v58  ;;  %14857 = vmatprep.subr.bf16.mxu1 %v14856_v27 }
 0x190   :  { %14859 = vmatpush3.bf16.msra.mxu1 %v14856_v27 }
 0x191   :  { %14869 = vmatprep.subr.bf16.mxu1 %v14868_v30 }
 0x193   :  { %13550 = vmatmul.mubr.msk.f32.vlgmr.msra.gmra.mrb[8].mxu1 %vm257_vm2, %v16337_v59 }
 0x194   :  { %14871 = vmatpush3.bf16.msra.mxu1 %v14868_v30  ;;  %13571 = vmatprep.mubr.msk.f32.mxu1 %vm257_vm2, %v16335_v58 }
 0x195   :  { %14873 = vmatprep.subr.bf16.mxu1 %v14872_v35 }
 0x198   :  { %14875 = vmatpush3.bf16.msra.mxu1 %v14872_v35 }
 0x199   :  { %14885 = vmatprep.subr.bf16.mxu1 %v14884_v39 }
 0x19b   :  { %13572 = vmatmul.mubr.msk.f32.vlgmr.msra.gmra.mrb[10].mxu1 %vm257_vm2, %v16337_v59 }
 0x19c   :  { %14887 = vmatpush3.bf16.msra.mxu1 %v14884_v39  ;;  %13593 = vmatprep.mubr.msk.f32.mxu1 %vm257_vm2, %v16335_v58 }
 0x19d   :  { %14889 = vmatprep.subr.bf16.mxu1 %v14888_v42 }
 0x1a0   :  { %14891 = vmatpush3.bf16.msra.mxu1 %v14888_v42  ;;  %v16540_v42 = vld [vmem:[%s18514_s5 + $0x8] sm:$0xff] }
 0x1a1   :  { %14901 = vmatprep.subr.bf16.mxu1 %v14900_v45 }
 0x1a3   :  { %13594 = vmatmul.mubr.msk.f32.vlgmr.msra.gmra.mrb[12].mxu1 %vm257_vm2, %v16337_v59 }
 0x1a4   :  { %14903 = vmatpush3.bf16.msra.mxu1 %v14900_v45  ;;  %13615 = vmatprep.mubr.msk.f32.mxu1 %vm257_vm2, %v16335_v58 }
 0x1a5   :  { %14905 = vmatprep.subr.bf16.mxu1 %v14904_v48 }
 0x1a8   :  { %14907 = vmatpush3.bf16.msra.mxu1 %v14904_v48 }
 0x1ab   :  { %13616 = vmatmul.mubr.msk.f32.vlgmr.msra.gmra.mrb[14].mxu1 %vm257_vm2, %v16337_v59 }
 0x246   :  { %v13496_v50 = vpop.f32.mrb[0].mxu1  ;;  %v13540_v51 = vpop.f32.mrb[2].mxu0 }
 0x247   :  { %v330_v52 = vpop.f32.mrb[1].mxu1  ;;  %v648_v53 = vpop.f32.mrb[3].mxu0  ;;  %v336_v2 = vadd.f32 %v13496_v50, %v12145_v49 }
 0x248   :  { %v331_v55 = vadd.f32 %v12145_v49, %v330_v52  ;;  %v14908_v56 = vpack.c.bf16 %v13540_v51, %v648_v53 }
 0x24a   :  { %14910 = vmatprep.subr.msk.bf16.mxu0 %vm16488_vm4, %v14908_v56  ;;  %13622 = vmatprep.mubr.msk.f32.mxu0 %vm1182_vm3, %v331_v55 }
 0x24b   :  { %14913 = vmatpush3.bf16.xpose.msk.msra.mxu0 %vm16488_vm4, %v14908_v56 }
 0x24e   :  { %v13507_v60 = vpop.f32.mrb[2].mxu1  ;;  %v13562_v61 = vpop.f32.mrb[4].mxu0 }
 0x24f   :  { %v411_v62 = vpop.f32.mrb[3].mxu1  ;;  %v798_v63 = vpop.f32.mrb[5].mxu0  ;;  %v417_v22 = vadd.f32 %v13507_v60, %v12148_v57 }
 0x250   :  { %v412_v0 = vadd.f32 %v12148_v57, %v411_v62  ;;  %v14920_v1 = vpack.c.bf16 %v13562_v61, %v798_v63 }
 0x252   :  { %13629 = vmatprep.mubr.msk.f32.mxu1 %vm1182_vm3, %v412_v0  ;;  %14922 = vmatprep.subr.msk.bf16.mxu0 %vm16488_vm4, %v14920_v1 }
 0x253   :  { %13623 = vmatmul.mubr.msk.f32.vlgmr.msra.gmra.mrb[10].mxu0 %vm1182_vm3, %v336_v2 }
 0x254   :  { %14925 = vmatpush3.bf16.xpose.msk.msra.mxu0 %vm16488_vm4, %v14920_v1 }
 0x256   :  { %v13518_v4 = vpop.f32.mrb[4].mxu1 }
 0x257   :  { %v13584_v5 = vpop.f32.mrb[6].mxu0  ;;  %v492_v6 = vpop.f32.mrb[5].mxu1  ;;  %v498_v9 = vadd.f32 %v13518_v4, %v12151_v3 }
 0x258   :  { %v493_v7 = vadd.f32 %v12151_v3, %v492_v6  ;;  %v948_v8 = vpop.f32.mrb[7].mxu0 }
 0x259   :  { %v14932_v10 = vpack.c.bf16 %v13584_v5, %v948_v8 }
 0x25a   :  { %13636 = vmatprep.mubr.msk.f32.mxu0 %vm1182_vm3, %v493_v7 }
 0x25b   :  { %13637 = vmatmul.mubr.msk.f32.vlgmr.msra.gmra.mrb[12].mxu0 %vm1182_vm3, %v498_v9 }
 0x25e   :  { %v13529_v11 = vpop.f32.mrb[6].mxu1 }
 0x25f   :  { %v13606_v12 = vpop.f32.mrb[8].mxu0  ;;  %v573_v13 = vpop.f32.mrb[7].mxu1  ;;  %v579_v27 = vadd.f32 %v13529_v11, %v12154_v19 }
 0x260   :  { %v1098_v14 = vpop.f32.mrb[9].mxu0  ;;  %v574_v24 = vadd.f32 %v12154_v19, %v573_v13 }
 0x261   :  { %v16511_v15 = vpack.c.bf16 %v13606_v12, %v1098_v14 }
 0x266   :  { %v13551_v16 = vpop.f32.mrb[8].mxu1 }
 0x267   :  { %v723_v17 = vpop.f32.mrb[9].mxu1 }
 0x268   :  { %v14914_v18 = vpack.c.bf16 %v13551_v16, %v723_v17 }
 0x26a   :  { %14916 = vmatprep.subr.msk.bf16.mxu1 %vm16488_vm4, %v14914_v18 }
 0x26b   :  { %14919 = vmatpush3.bf16.xpose.msk.msra.mxu1 %vm16488_vm4, %v14914_v18 }
 0x26e   :  { %v13573_v20 = vpop.f32.mrb[10].mxu1 }
 0x26f   :  { %v873_v21 = vpop.f32.mrb[11].mxu1 }
 0x270   :  { %v14926_v23 = vpack.c.bf16 %v13573_v20, %v873_v21 }
 0x272   :  { %13630 = vmatmul.mubr.msk.f32.vlgmr.msra.gmra.mrb[16].mxu1 %vm1182_vm3, %v417_v22  ;;  %14928 = vmatprep.subr.msk.bf16.mxu1 %vm16488_vm4, %v14926_v23 }
 0x273   :  { %14931 = vmatpush3.bf16.xpose.msk.msra.mxu1 %vm16488_vm4, %v14926_v23  ;;  %13643 = vmatprep.mubr.msk.f32.mxu1 %vm1182_vm3, %v574_v24 }
 0x274   :  { %14933 = vmatprep.subr.bf16.mxu1 %v14932_v10 }
 0x276   :  { %v13595_v25 = vpop.f32.mrb[12].mxu1 }
 0x277   :  { %v1023_v26 = vpop.f32.mrb[13].mxu1 }
 0x278   :  { %v14936_v28 = vpack.c.bf16 %v13595_v25, %v1023_v26 }
 0x27a   :  { %13644 = vmatmul.mubr.msk.f32.vlgmr.msra.gmra.mrb[18].mxu1 %vm1182_vm3, %v579_v27  ;;  %14937 = vmatprep.subr.bf16.mxu0 %v14936_v28 }
 0x27b   :  { %14935 = vmatpush3.bf16.msra.mxu1 %v14932_v10  ;;  %14939 = vmatpush3.bf16.msra.mxu0 %v14936_v28 }
 0x27c   :  { %14941 = vmatprep.subr.bf16.mxu0 %v16511_v15 }
 0x27e   :  { %v13617_v29 = vpop.f32.mrb[14].mxu1 }
 0x27f   :  { %v1173_v30 = vpop.f32.mrb[15].mxu1 }
 0x280   :  { %v16528_v31 = vpack.c.bf16 %v13617_v29, %v1173_v30 }
 0x326   :  { %v13624_v32 = vpop.f32.mrb[10].mxu0 }
 0x327   :  { %v1261_v35 = vpop.f32.mrb[11].mxu0  ;;  %v1267_v55 = vadd.f32 %v13624_v32, %v16540_v42 }
 0x328   :  { %v1262_v52 = vadd.f32 %v1261_v35, %v16533_v38 }
 0x329   :  { %v1535_v60 = vsel %vm1531_vm5, %v1267_v55, -inf }
 0x32a   :  { %v1532_v56 = vsel %vm1531_vm5, %v1262_v52, -inf }
 0x32e   :  { %v13638_v37 = vpop.f32.mrb[12].mxu0 }
 0x32f   :  { %v1435_v39 = vpop.f32.mrb[13].mxu0  ;;  %v1441_v48 = vadd.f32 %v13638_v37, %v16540_v42 }
 0x330   :  { %v1436_v40 = vadd.f32 %v1435_v39, %v16533_v38 }
 0x331   :  { %v1547_v53 = vsel %vm1531_vm5, %v1441_v48, -inf }
 0x332   :  { %v1544_v41 = vsel %vm1531_vm5, %v1436_v40, -inf }
 0x333   :  { %1545 = vmax.xlane.f32.xlu0 %v1544_v41 }
 0x345   :  { %v13631_v43 = vpop.f32.mrb[16].mxu1 }
 0x346   :  { %v1354_v44 = vadd.f32 %v13631_v43, %v16540_v42  ;;  %v1348_v45 = vpop.f32.mrb[17].mxu1 }
 0x347   :  { %v1349_v46 = vadd.f32 %v1348_v45, %v16533_v38 }
 0x348   :  { %v1541_v47 = vsel %vm1531_vm5, %v1354_v44, -inf }
 0x349   :  { %1542 = vmax.xlane.f32.xlu1 %v1541_v47  ;;  %v1538_v49 = vsel %vm1531_vm5, %v1349_v46, -inf }
 0x34d   :  { %v13645_v50 = vpop.f32.mrb[18].mxu1  ;;  %1539 = vmax.xlane.f32.xlu1 %v1538_v49 }
 0x34e   :  { %v1522_v51 = vpop.f32.mrb[19].mxu1  ;;  %v1528_v61 = vadd.f32 %v13645_v50, %v16540_v42 }
 0x34f   :  { %v1523_v57 = vadd.f32 %v1522_v51, %v16533_v38 }
 0x350   :  { %v1553_v63 = vsel %vm1531_vm5, %v1528_v61, -inf }
 0x351   :  { %1548 = vmax.xlane.f32.xlu1 %v1547_v53  ;;  %v1550_v62 = vsel %vm1531_vm5, %v1523_v57, -inf }
 0x355   :  { %1533 = vmax.xlane.f32.xlu1 %v1532_v56 }
 0x359   :  { %1536 = vmax.xlane.f32.xlu1 %v1535_v60 }
 0x35d   :  { %1551 = vmax.xlane.f32.xlu1 %v1550_v62 }
 0x361   :  { %1554 = vmax.xlane.f32.xlu1 %v1553_v63 }
 0x3c0   :  { %v1546_v2 = vpop.xlane.xlu0 %1545 }
 0x3c1   :  { %v1560_v5 = vsub.f32 %v1436_v40, %v1546_v2 }
 0x3c3   :  { %v1572_v10 = vmul.f32 1.442695, %v1560_v5 }
 0x3d6   :  { %v1543_v0 = vpop.xlane.xlu1 %1542 }
 0x3d7   :  { %v1559_v1 = vsub.f32 %v1354_v44, %v1543_v0 }
 0x3d9   :  { %v1570_v6 = vmul.f32 1.442695, %v1559_v1 }
 0x3da   :  { %v1540_v3 = vpop.xlane.xlu1 %1539 }
 0x3db   :  { %v1558_v4 = vsub.f32 %v1349_v46, %v1540_v3 }
 0x3dd   :  { %v1568_v7 = vmul.f32 1.442695, %v1558_v4 }
 0x3de   :  { %v1549_v8 = vpop.xlane.xlu1 %1548 }
 0x3df   :  { %15807 = vpow2.f32 %v1568_v7  ;;  %v1561_v9 = vsub.f32 %v1441_v48, %v1549_v8 }
 0x3e0   :  { %15809 = vpow2.f32 %v1570_v6 }
 0x3e1   :  { %v1574_v11 = vmul.f32 1.442695, %v1561_v9  ;;  %v16576_v9 = vshrl.u32 %v89_v33, 7 }
 0x3e2   :  { %v1534_v12 = vpop.xlane.xlu1 %1533 }
 0x3e3   :  { %15811 = vpow2.f32 %v1574_v11  ;;  %v1556_v13 = vsub.f32 %v1262_v52, %v1534_v12 }
 0x3e4   :  { %15813 = vpow2.f32 %v1572_v10  ;;  %v16579_v10 = vsub.s32 0, %v16576_v9 }
 0x3e5   :  { %v1564_v14 = vmul.f32 1.442695, %v1556_v13 }
 0x3e6   :  { %v1537_v16 = vpop.xlane.xlu1 %1536 }
 0x3e7   :  { %v1557_v17 = vsub.f32 %v1267_v55, %v1537_v16  ;;  %15815 = vpow2.f32 %v1564_v14 }
 0x3e9   :  { %v15808_v18 = vpop.eup %15807  ;;  %v1566_v19 = vmul.f32 1.442695, %v1557_v17 }
 0x3ea   :  { %v1552_v20 = vpop.xlane.xlu1 %1551  ;;  %v1586_v21 = vsel %vm1531_vm5, %v15808_v18, 0.0  ;;  %v15810_v22 = vpop.eup %15809 }
 0x3eb   :  { %v1562_v23 = vsub.f32 %v1523_v57, %v1552_v20  ;;  %1587 = vadd.xlane.f32.xlu1 %v1586_v21  ;;  %15817 = vpow2.f32 %v1566_v19  ;;  %v1589_v28 = vsel %vm1531_vm5, %v15810_v22, 0.0 }
 0x3ed   :  { %v15812_v24 = vpop.eup %15811  ;;  %v1576_v25 = vmul.f32 1.442695, %v1562_v23 }
 0x3ee   :  { %v1555_v26 = vpop.xlane.xlu1 %1554  ;;  %v1595_v27 = vsel %vm1531_vm5, %v15812_v24, 0.0  ;;  %v15814_v29 = vpop.eup %15813 }
 0x3ef   :  { %15819 = vpow2.f32 %v1576_v25  ;;  %v1563_v30 = vsub.f32 %v1528_v61, %v1555_v26  ;;  %1596 = vadd.xlane.f32.xlu0 %v1595_v27  ;;  %1590 = vadd.xlane.f32.xlu1 %v1589_v28  ;;  %v1592_v35 = vsel %vm1531_vm5, %v15814_v29, 0.0 }
 0x3f1   :  { %v1578_v32 = vmul.f32 1.442695, %v1563_v30  ;;  %v15816_v37 = vpop.eup %15815 }
 0x3f2   :  { %v1580_v39 = vsel %vm1531_vm5, %v15816_v37, 0.0 }
 0x3f3   :  { %15821 = vpow2.f32 %v1578_v32  ;;  %1593 = vadd.xlane.f32.xlu1 %v1592_v35 }
 0x3f5   :  { %v15818_v40 = vpop.eup %15817 }
 0x3f6   :  { %v1583_v43 = vsel %vm1531_vm5, %v15818_v40, 0.0 }
 0x3f7   :  { %1581 = vadd.xlane.f32.xlu1 %v1580_v39 }
 0x3f9   :  { %v15820_v41 = vpop.eup %15819 }
 0x3fa   :  { %v1598_v44 = vsel %vm1531_vm5, %v15820_v41, 0.0 }
 0x3fb   :  { %1584 = vadd.xlane.f32.xlu1 %v1583_v43  ;;  %1599 = vadd.xlane.f32.xlu0 %v1598_v44  ;;  %v2091_v44 = vld [vmem:[%s18463_s15] sm:$0xff] }
 0x3fd   :  { %v15822_v45 = vpop.eup %15821 }
 0x3fe   :  { %v1601_v46 = vsel %vm1531_vm5, %v15822_v45, 0.0 }
 0x3ff   :  { %1602 = vadd.xlane.f32.xlu0 %v1601_v46 }
 0x478   :  { %v1588_v47 = vpop.xlane.xlu1 %1587 }
 0x479   :  { %15823 = vrcp.f32 %v1588_v47 }
 0x47c   :  { %v1591_v48 = vpop.xlane.xlu1 %1590  ;;  %v1597_v50 = vpop.xlane.xlu0 %1596 }
 0x47d   :  { %15825 = vrcp.f32 %v1591_v48 }
 0x480   :  { %v1594_v49 = vpop.xlane.xlu1 %1593 }
 0x481   :  { %15827 = vrcp.f32 %v1594_v49 }
 0x482   :  { %15829 = vrcp.f32 %v1597_v50 }
 0x483   :  { %v15824_v51 = vpop.eup %15823 }
 0x484   :  { %v1582_v52 = vpop.xlane.xlu1 %1581  ;;  %v1614_v53 = vmul.f32 %v15824_v51, %v15808_v18 }
 0x485   :  { %15831 = vrcp.f32 %v1582_v52 }
 0x486   :  { %13657 = vmatprep.mubr.msk.f32.mxu0 %vm1531_vm5, %v1614_v53  ;;  %v16613_v53 = vsub.s32 1, %v16576_v9 }
 0x487   :  { %v15826_v55 = vpop.eup %15825 }
 0x488   :  { %v1600_v56 = vpop.xlane.xlu0 %1599  ;;  %v1585_v57 = vpop.xlane.xlu1 %1584  ;;  %v1615_v60 = vmul.f32 %v15826_v55, %v15810_v22  ;;  %v16616_v55 = vsub.s32 2, %v16576_v9 }
 0x489   :  { %15833 = vrcp.f32 %v1600_v56 }
 0x48a   :  { %15835 = vrcp.f32 %v1585_v57  ;;  %13658 = vmatmul.mubr.msk.f32.vlgmr.msra.gmra.mrb[14].mxu0 %vm1531_vm5, %v1615_v60 }
 0x48b   :  { %v15828_v61 = vpop.eup %15827  ;;  %14943 = vmatpush3.bf16.msra.mxu0 %v16511_v15 }
 0x48c   :  { %v1603_v62 = vpop.xlane.xlu0 %1602  ;;  %v1616_v63 = vmul.f32 %v15828_v61, %v15814_v29  ;;  %14945 = vmatprep.subr.bf16.mxu0 %v16528_v31  ;;  %v15830_v0 = vpop.eup %15829 }
 0x48d   :  { %15837 = vrcp.f32 %v1603_v62  ;;  %v1617_v3 = vmul.f32 %v15830_v0, %v15812_v24 }
 0x48e   :  { %13664 = vmatprep.mubr.msk.f32.mxu0 %vm1531_vm5, %v1616_v63 }
 0x48f   :  { %v15832_v1 = vpop.eup %15831 }
 0x490   :  { %v1612_v2 = vmul.f32 %v15832_v1, %v15816_v37  ;;  %v1998_v37 = vld [vmem:[%s18461_s13 + $0x8] sm:$0xff] }
 0x492   :  { %13650 = vmatprep.mubr.msk.f32.mxu1 %vm1531_vm5, %v1612_v2  ;;  %13665 = vmatmul.mubr.msk.f32.vlgmr.msra.gmra.mrb[14].mxu0 %vm1531_vm5, %v1617_v3  ;;  %v2093_v2 = vld [vmem:[%s18463_s15 + $0x10] sm:$0xff]  ;;  %v2094_v3 = vld [vmem:[%s18463_s15 + $0x18] sm:$0xff] }
 0x493   :  { %v15834_v4 = vpop.eup %15833  ;;  %14947 = vmatpush3.bf16.msra.mxu0 %v16528_v31  ;;  %v16584_v31 = vld [vmem:[%s18464_s16] sm:$0x3f] }
 0x494   :  { %v15836_v5 = vpop.eup %15835  ;;  %v1618_v15 = vmul.f32 %v15834_v4, %v15820_v41  ;;  %v1953_v13 = vrot.slane %v16584_v31, %v16579_v10  ;;  %v2000_v41 = vld [vmem:[%s18461_s13 + $0x18] sm:$0xff]  ;;  %v1988_v56 = vrot.slane %v16584_v31, %v16613_v53  ;;  %v1994_v63 = vrot.slane %v16584_v31, %v16616_v55 }
 0x495   :  { %v1613_v6 = vmul.f32 %v15836_v5, %v15818_v40  ;;  %v1999_v40 = vld [vmem:[%s18461_s13 + $0x10] sm:$0xff] }
 0x496   :  { %13671 = vmatprep.mubr.msk.f32.mxu0 %vm1531_vm5, %v1618_v15  ;;  %v14952_v43 = vpack.c.bf16 %v2000_v41, %v1999_v40  ;;  %v14960_v15 = vpack.c.bf16 %v2094_v3, %v2093_v2  ;;  %v12224_v2 = vld [vmem:[%s18508_s8 + $0x88] sm:$0xff] }
 0x497   :  { %v15838_v7 = vpop.eup %15837  ;;  %13651 = vmatmul.mubr.msk.f32.vlgmr.msra.gmra.mrb[20].mxu1 %vm1531_vm5, %v1613_v6  ;;  %v2095_v6 = vld [vmem:[%s18463_s15 + $0x20] sm:$0xff] }
 0x498   :  { %v1619_v8 = vmul.f32 %v15838_v7, %v15822_v45  ;;  %v2092_v45 = vld [vmem:[%s18463_s15 + $0x8] sm:$0xff] }
 0x499   :  { %v14956_v46 = vpack.c.bf16 %v2092_v45, %v2091_v44  ;;  %v2096_v7 = vld [vmem:[%s18463_s15 + $0x28] sm:$0xff]  ;;  %v12203_v45 = vld [vmem:[%s18507_s11 + $0x80] sm:$0xff] }
 0x49a   :  { %13672 = vmatmul.mubr.msk.f32.vlgmr.msra.gmra.mrb[14].mxu0 %vm1531_vm5, %v1619_v8  ;;  %v14964_v8 = vpack.c.bf16 %v2096_v7, %v2095_v6 }
 0x56a   :  { %v13652_v11 = vpop.f32.mrb[20].mxu1 }
 0x56b   :  { %v1692_v12 = vpop.f32.mrb[21].mxu1 }
 0x56d   :  { %v13673_v14 = vpop.f32.mrb[14].mxu0 }
 0x56e   :  { %v15764_v16 = vadd.f32 %v13673_v14, %v13652_v11  ;;  %v1935_v17 = vpop.f32.mrb[15].mxu0  ;;  %v2097_v11 = vld [vmem:[%s18463_s15 + $0x30] sm:$0xff]  ;;  %v12197_v14 = vld [vmem:[%s18462_s14] ss:$0 sm:$0xff] }
 0x56f   :  { %v15765_v18 = vadd.f32 %v1935_v17, %v1692_v12  ;;  %v2098_v12 = vld [vmem:[%s18463_s15 + $0x38] sm:$0xff] }
 0x570   :  { %v1955_v19 = vadd.f32 %v15764_v16, %v1953_v13 }
 0x571   :  { %v1954_v33 = vadd.f32 %v15765_v18, %v1953_v13  ;;  %v14968_v13 = vpack.c.bf16 %v2098_v12, %v2097_v11  ;;  %v16693_v11 = vsub.s32 4, %v16576_v9  ;;  %v16696_v12 = vsub.s32 5, %v16576_v9 }
 0x572   :  { %v1957_v20 = vadd.f32 %v1955_v19, %v16337_v59 }
 0x573   :  { %v1956_v21 = vadd.f32 %v1954_v33, %v16335_v58  ;;  %v1997_v58 = vld [vmem:[%s18461_s13] sm:$0xff] }
 0x574   :  { %v1961_v22 = vsel %vm257_vm2, %v1957_v20, 0.0  ;;  %v14948_v39 = vpack.c.bf16 %v1998_v37, %v1997_v58 }
 0x575   :  { %1962 = vadd.xlane.f32.xlu0 %v1961_v22  ;;  %v1958_v23 = vsel %vm257_vm2, %v1956_v21, 0.0 }
 0x576   :  { %1959 = vadd.xlane.f32.xlu1 %v1958_v23  ;;  %14949 = vmatprep.subr.bf16.mxu1 %v14948_v39 }
 0x577   :  { %14951 = vmatpush3.bf16.msra.mxu1 %v14948_v39 }
 0x578   :  { %14953 = vmatprep.subr.bf16.mxu1 %v14952_v43 }
 0x57b   :  { %14955 = vmatpush3.bf16.msra.mxu1 %v14952_v43 }
 0x57c   :  { %14957 = vmatprep.subr.bf16.mxu1 %v14956_v46 }
 0x602   :  { %v1963_v24 = vpop.xlane.xlu0 %1962 }
 0x603   :  { %v1966_v25 = vmul.f32 0.03125, %v1963_v24  ;;  %v1960_v26 = vpop.xlane.xlu1 %1959 }
 0x604   :  { %v1965_v27 = vmul.f32 0.03125, %v1960_v26 }
 0x605   :  { %v1968_v28 = vsub.f32 %v1957_v20, %v1966_v25 }
 0x606   :  { %v1967_v29 = vsub.f32 %v1956_v21, %v1965_v27  ;;  %v16648_v21 = vsub.s32 3, %v16576_v9 }
 0x607   :  { %v1970_v30 = vmul.f32 %v1968_v28, %v1968_v28 }
 0x608   :  { %v1969_v32 = vmul.f32 %v1967_v29, %v1967_v29  ;;  %v2102_v22 = vrot.slane %v16584_v31, %v16648_v21 }
 0x609   :  { %v1974_v35 = vsel %vm257_vm2, %v1970_v30, 0.0 }
 0x60a   :  { %1975 = vadd.xlane.f32.xlu0 %v1974_v35  ;;  %v1971_v59 = vsel %vm257_vm2, %v1969_v32, 0.0 }
 0x60b   :  { %1972 = vadd.xlane.f32.xlu1 %v1971_v59 }
 0x697   :  { %v1976_v47 = vpop.xlane.xlu0 %1975 }
 0x698   :  { %v1978_v48 = vmul.f32 0.03125, %v1976_v47  ;;  %v1973_v49 = vpop.xlane.xlu1 %1972  ;;  %v12211_v47 = vld [vmem:[%s18507_s11 + $0xc0] sm:$0xff] }
 0x699   :  { %v1977_v50 = vmul.f32 0.03125, %v1973_v49  ;;  %v12212_v49 = vld [vmem:[%s18507_s11 + $0xc8] sm:$0xff] }
 0x69a   :  { %v1980_v51 = vadd.f32 1e-05, %v1978_v48 }
 0x69b   :  { %v1979_v52 = vadd.f32 1e-05, %v1977_v50  ;;  %v14988_v50 = vpack.c.bf16 %v12212_v49, %v12211_v47  ;;  %v12239_v47 = vld [vmem:[%s18510_s2 + $0x80] sm:$0xff] }
 0x69c   :  { %15839 = vrsqrt.f32 %v1980_v51  ;;  %v12205_v51 = vld [vmem:[%s18507_s11 + $0x90] sm:$0xff] }
 0x69d   :  { %15841 = vrsqrt.f32 %v1979_v52  ;;  %v12206_v52 = vld [vmem:[%s18507_s11 + $0x98] sm:$0xff] }
 0x6a6   :  { %v15840_v57 = vpop.eup %15839 }
 0x6a7   :  { %v15842_v60 = vpop.eup %15841  ;;  %v1984_v61 = vmul.f32 %v15840_v57, %v1968_v28  ;;  %v14976_v57 = vpack.c.bf16 %v12206_v52, %v12205_v51  ;;  %v12229_v51 = vld [vmem:[%s18508_s8 + $0xb0] sm:$0xff]  ;;  %v12230_v52 = vld [vmem:[%s18508_s8 + $0xb8] sm:$0xff] }
 0x6a8   :  { %v1983_v62 = vmul.f32 %v15842_v60, %v1967_v29  ;;  %v12214_v60 = vld [vmem:[%s18507_s11 + $0xd8] sm:$0xff] }
 0x6a9   :  { %v1990_v0 = vmul.f32 %v1988_v56, %v1984_v61 }
 0x6aa   :  { %v1989_v1 = vmul.f32 %v1988_v56, %v1983_v62  ;;  %v12213_v56 = vld [vmem:[%s18507_s11 + $0xd0] sm:$0xff]  ;;  %v12207_v62 = vld [vmem:[%s18507_s11 + $0xa0] sm:$0xff] }
 0x6ab   :  { %v1996_v5 = vadd.f32 %v1994_v63, %v1990_v0  ;;  %v14992_v61 = vpack.c.bf16 %v12214_v60, %v12213_v56  ;;  %v12223_v0 = vld [vmem:[%s18508_s8 + $0x80] sm:$0xff]  ;;  %v12241_v56 = vld [vmem:[%s18510_s2 + $0x90] sm:$0xff]  ;;  %v15016_v60 = vpack.c.bf16 %v12230_v52, %v12229_v51 }
 0x6ac   :  { %v1995_v4 = vadd.f32 %v1994_v63, %v1989_v1  ;;  %v12208_v63 = vld [vmem:[%s18507_s11 + $0xa8] sm:$0xff]  ;;  %v15004_v3 = vpack.c.bf16 %v12224_v2, %v12223_v0  ;;  %v12247_v0 = vld [vmem:[%s18510_s2 + $0xc0] sm:$0xff] }
 0x6ad   :  { %v14980_v1 = vpack.c.bf16 %v12208_v63, %v12207_v62  ;;  %v12236_v62 = vld [vmem:[%s18508_s8 + $0xe8] sm:$0xff] }
 0x6ae   :  { %13682 = vmatprep.mubr.msk.f32.mxu1 %vm257_vm2, %v1995_v4 }
 0x6af   :  { %13683 = vmatmul.mubr.msk.f32.vlgmr.msra.gmra.mrb[22].mxu1 %vm257_vm2, %v1996_v5 }
 0x6b0   :  { %14959 = vmatpush3.bf16.msra.mxu1 %v14956_v46  ;;  %v12204_v46 = vld [vmem:[%s18507_s11 + $0x88] sm:$0xff] }
 0x6b1   :  { %14961 = vmatprep.subr.bf16.mxu1 %v14960_v15  ;;  %v14972_v48 = vpack.c.bf16 %v12204_v46, %v12203_v45  ;;  %v12227_v45 = vld [vmem:[%s18508_s8 + $0xa0] sm:$0xff]  ;;  %v12228_v46 = vld [vmem:[%s18508_s8 + $0xa8] sm:$0xff] }
 0x6b2   :  { %v15012_v49 = vpack.c.bf16 %v12228_v46, %v12227_v45 }
 0x6b3   :  { %14973 = vmatprep.subr.bf16.mxu0 %v14972_v48 }
 0x6b4   :  { %14963 = vmatpush3.bf16.msra.mxu1 %v14960_v15  ;;  %14975 = vmatpush3.bf16.msra.mxu0 %v14972_v48  ;;  %v12240_v48 = vld [vmem:[%s18510_s2 + $0x88] sm:$0xff] }
 0x6b5   :  { %14965 = vmatprep.subr.bf16.mxu1 %v14964_v8  ;;  %14977 = vmatprep.subr.bf16.mxu0 %v14976_v57 }
 0x6b8   :  { %14967 = vmatpush3.bf16.msra.mxu1 %v14964_v8  ;;  %14979 = vmatpush3.bf16.msra.mxu0 %v14976_v57  ;;  %v12242_v57 = vld [vmem:[%s18510_s2 + $0x98] sm:$0xff] }
 0x6b9   :  { %14969 = vmatprep.subr.bf16.mxu1 %v14968_v13  ;;  %14981 = vmatprep.subr.bf16.mxu0 %v14980_v1  ;;  %v15040_v63 = vpack.c.bf16 %v12242_v57, %v12241_v56 }
 0x6bc   :  { %14971 = vmatpush3.bf16.msra.mxu1 %v14968_v13  ;;  %v2216_v13 = vrot.slane %v16584_v31, %v16693_v11 }
 0x6bd   :  { %14989 = vmatprep.subr.bf16.mxu1 %v14988_v50 }
 0x782   :  { %v13684_v16 = vpop.f32.mrb[22].mxu1 }
 0x783   :  { %v2086_v17 = vadd.f32 %v13684_v16, %v12197_v14  ;;  %v2080_v18 = vpop.f32.mrb[23].mxu1 }
 0x784   :  { %v2081_v19 = vadd.f32 %v12197_v14, %v2080_v18  ;;  %v2222_v18 = vrot.slane %v16584_v31, %v16696_v12 }
 0x785   :  { %v2090_v20 = vmax.f32 %v2086_v17, 0.0 }
 0x786   :  { %v2089_v33 = vmax.f32 %v2081_v19, 0.0 }
 0x788   :  { %13701 = vmatprep.mubr.msk.f32.mxu1 %vm2103_vm6, %v2089_v33 }
 0x789   :  { %13702 = vmatmul.mubr.msk.f32.vlgmr.msra.gmra.mrb[24].mxu1 %vm2103_vm6, %v2090_v20 }
 0x78a   :  { %14991 = vmatpush3.bf16.msra.mxu1 %v14988_v50  ;;  %v15036_v50 = vpack.c.bf16 %v12240_v48, %v12239_v47 }
 0x78b   :  { %14993 = vmatprep.subr.bf16.mxu1 %v14992_v61 }
 0x78e   :  { %14995 = vmatpush3.bf16.msra.mxu1 %v14992_v61  ;;  %v12235_v61 = vld [vmem:[%s18508_s8 + $0xe0] sm:$0xff] }
 0x78f   :  { %15005 = vmatprep.subr.bf16.mxu1 %v15004_v3  ;;  %v15028_v2 = vpack.c.bf16 %v12236_v62, %v12235_v61 }
 0x85c   :  { %v13703_v23 = vpop.f32.mrb[24].mxu1 }
 0x85d   :  { %v2182_v24 = vadd.f32 %v13703_v23, %v2102_v22  ;;  %v2176_v25 = vpop.f32.mrb[25].mxu1  ;;  %v12210_v23 = vld [vmem:[%s18507_s11 + $0xb8] sm:$0xff] }
 0x85e   :  { %v2177_v26 = vadd.f32 %v2176_v25, %v2102_v22  ;;  %v12209_v22 = vld [vmem:[%s18507_s11 + $0xb0] sm:$0xff]  ;;  %v12226_v25 = vld [vmem:[%s18508_s8 + $0x98] sm:$0xff] }
 0x85f   :  { %v2186_v27 = vadd.f32 %v2182_v24, %v1996_v5  ;;  %v12225_v24 = vld [vmem:[%s18508_s8 + $0x90] sm:$0xff] }
 0x860   :  { %v2185_v28 = vadd.f32 %v2177_v26, %v1995_v4 }
 0x861   :  { %v2190_v29 = vsel %vm257_vm2, %v2186_v27, 0.0 }
 0x862   :  { %2191 = vadd.xlane.f32.xlu0 %v2190_v29  ;;  %v2187_v30 = vsel %vm257_vm2, %v2185_v28, 0.0  ;;  %v15008_v29 = vpack.c.bf16 %v12226_v25, %v12225_v24  ;;  %v12254_v24 = vld [vmem:[%s18510_s2 + $0xf8] sm:$0xff] }
 0x863   :  { %2188 = vadd.xlane.f32.xlu1 %v2187_v30  ;;  %v12216_v30 = vld [vmem:[%s18507_s11 + $0xe8] sm:$0xff] }
 0x8ef   :  { %v2192_v32 = vpop.xlane.xlu0 %2191 }
 0x8f0   :  { %v2194_v35 = vmul.f32 0.03125, %v2192_v32  ;;  %v2189_v59 = vpop.xlane.xlu1 %2188  ;;  %v12231_v32 = vld [vmem:[%s18508_s8 + $0xc0] sm:$0xff] }
 0x8f1   :  { %v2193_v58 = vmul.f32 0.03125, %v2189_v59 }
 0x8f2   :  { %v2196_v37 = vsub.f32 %v2186_v27, %v2194_v35  ;;  %v12215_v27 = vld [vmem:[%s18507_s11 + $0xe0] sm:$0xff]  ;;  %v12232_v35 = vld [vmem:[%s18508_s8 + $0xc8] sm:$0xff] }
 0x8f3   :  { %v2195_v39 = vsub.f32 %v2185_v28, %v2193_v58  ;;  %v14984_v28 = vpack.c.bf16 %v12210_v23, %v12209_v22  ;;  %v14996_v59 = vpack.c.bf16 %v12216_v30, %v12215_v27  ;;  %v15020_v58 = vpack.c.bf16 %v12232_v35, %v12231_v32  ;;  %v12253_v23 = vld [vmem:[%s18510_s2 + $0xf0] sm:$0xff]  ;;  %v12255_v27 = vld [vmem:[%s18511_s6 + $0x4] ss:$0 sm:$0xff] }
 0x8f4   :  { %v2198_v40 = vmul.f32 %v2196_v37, %v2196_v37  ;;  %v15064_v25 = vpack.c.bf16 %v12254_v24, %v12253_v23 }
 0x8f5   :  { %v2197_v41 = vmul.f32 %v2195_v39, %v2195_v39 }
 0x8f6   :  { %v2202_v43 = vsel %vm257_vm2, %v2198_v40, 0.0  ;;  %v12233_v40 = vld [vmem:[%s18508_s8 + $0xd0] sm:$0xff] }
 0x8f7   :  { %2203 = vadd.xlane.f32.xlu0 %v2202_v43  ;;  %v2199_v44 = vsel %vm257_vm2, %v2197_v41, 0.0  ;;  %v12234_v41 = vld [vmem:[%s18508_s8 + $0xd8] sm:$0xff] }
 0x8f8   :  { %2200 = vadd.xlane.f32.xlu1 %v2199_v44  ;;  %v15024_v44 = vpack.c.bf16 %v12234_v41, %v12233_v40 }
 0x984   :  { %v2204_v4 = vpop.xlane.xlu0 %2203 }
 0x985   :  { %v2206_v5 = vmul.f32 0.03125, %v2204_v4  ;;  %v2201_v15 = vpop.xlane.xlu1 %2200  ;;  %v12237_v4 = vld [vmem:[%s18508_s8 + $0xf0] sm:$0xff] }
 0x986   :  { %v2205_v6 = vmul.f32 0.03125, %v2201_v15  ;;  %v12249_v15 = vld [vmem:[%s18510_s2 + $0xd0] sm:$0xff] }
 0x987   :  { %v2208_v7 = vadd.f32 1e-05, %v2206_v5  ;;  %v12238_v5 = vld [vmem:[%s18508_s8 + $0xf8] sm:$0xff]  ;;  %s18520_s8 = sld [smem:[#allocation18_spill]] }
 0x988   :  { %v2207_v8 = vadd.f32 1e-05, %v2205_v6  ;;  %v12250_v6 = vld [vmem:[%s18510_s2 + $0xd8] sm:$0xff] }
 0x989   :  { %15843 = vrsqrt.f32 %v2208_v7  ;;  %v15032_v7 = vpack.c.bf16 %v12238_v5, %v12237_v4 }
 0x98a   :  { %15845 = vrsqrt.f32 %v2207_v8  ;;  %v12243_v8 = vld [vmem:[%s18510_s2 + $0xa0] sm:$0xff] }
 0x993   :  { %v15844_v14 = vpop.eup %15843 }
 0x994   :  { %v15846_v16 = vpop.eup %15845  ;;  %v2212_v17 = vmul.f32 %v15844_v14, %v2196_v37  ;;  %v12217_v37 = vld [vmem:[%s18507_s11 + $0xf0] sm:$0xff]  ;;  %v15056_v14 = vpack.c.bf16 %v12250_v6, %v12249_v15 }
 0x995   :  { %v2211_v19 = vmul.f32 %v15846_v16, %v2195_v39  ;;  %v12218_v39 = vld [vmem:[%s18507_s11 + $0xf8] sm:$0xff]  ;;  %s18519_s11 = sld [smem:[#allocation9_spill]] }
 0x996   :  { %v2218_v33 = vmul.f32 %v2216_v13, %v2212_v17  ;;  %v15000_v43 = vpack.c.bf16 %v12218_v39, %v12217_v37  ;;  %v12245_v17 = vld [vmem:[%s18510_s2 + $0xb0] sm:$0xff] }
 0x997   :  { %v2217_v20 = vmul.f32 %v2216_v13, %v2211_v19  ;;  %v12244_v13 = vld [vmem:[%s18510_s2 + $0xa8] sm:$0xff] }
 0x998   :  { %v16716_v26 = vadd.f32 %v2222_v18, %v2218_v33  ;;  %v15044_v16 = vpack.c.bf16 %v12244_v13, %v12243_v8  ;;  %v12251_v33 = vld [vmem:[%s18510_s2 + $0xe0] sm:$0xff] }
 0x999   :  { %v16714_v31 = vadd.f32 %v2222_v18, %v2217_v20  ;;  %v12246_v18 = vld [vmem:[%s18510_s2 + $0xb8] sm:$0xff]  ;;  %v12252_v20 = vld [vmem:[%s18510_s2 + $0xe8] sm:$0xff] }
 0x99a   :  { %v15048_v19 = vpack.c.bf16 %v12246_v18, %v12245_v17  ;;  %v15060_v22 = vpack.c.bf16 %v12252_v20, %v12251_v33 }
 0x99b   :  { %13712 = vmatprep.mubr.msk.f32.mxu0 %vm257_vm2, %v16714_v31  ;;  %13734 = vmatprep.mubr.msk.f32.mxu1 %vm257_vm2, %v16714_v31  ;;  %v16043_v54 = vld [vmem:[%s18519_s11 + $0x8] sm:$0xff] }
 0x99c   :  { %13713 = vmatmul.mubr.msk.f32.vlgmr.msra.gmra.mrb[16].mxu0 %vm257_vm2, %v16716_v26  ;;  %13735 = vmatmul.mubr.msk.f32.vlgmr.msra.gmra.mrb[26].mxu1 %vm257_vm2, %v16716_v26 }
 0x99d   :  { %14983 = vmatpush3.bf16.msra.mxu0 %v14980_v1  ;;  %15007 = vmatpush3.bf16.msra.mxu1 %v15004_v3  ;;  %v12248_v1 = vld [vmem:[%s18510_s2 + $0xc8] sm:$0xff] }
 0x99e   :  { %13723 = vmatprep.mubr.msk.f32.mxu0 %vm257_vm2, %v16714_v31  ;;  %13756 = vmatprep.mubr.msk.f32.mxu1 %vm257_vm2, %v16714_v31  ;;  %v15052_v3 = vpack.c.bf16 %v12248_v1, %v12247_v0  ;;  %v12264_v1 = vld [vmem:[%s18511_s6 + $0x7] ss:$0 sm:$0xff] }
 0x99f   :  { %14985 = vmatprep.subr.bf16.mxu0 %v14984_v28  ;;  %15009 = vmatprep.subr.bf16.mxu1 %v15008_v29 }
 0x9a1   :  { %14987 = vmatpush3.bf16.msra.mxu0 %v14984_v28  ;;  %15011 = vmatpush3.bf16.msra.mxu1 %v15008_v29 }
 0x9a2   :  { %14997 = vmatprep.subr.bf16.mxu0 %v14996_v59  ;;  %15021 = vmatprep.subr.bf16.mxu1 %v15020_v58 }
 0x9a4   :  { %13724 = vmatmul.mubr.msk.f32.vlgmr.msra.gmra.mrb[18].mxu0 %vm257_vm2, %v16716_v26  ;;  %13757 = vmatmul.mubr.msk.f32.vlgmr.msra.gmra.mrb[28].mxu1 %vm257_vm2, %v16716_v26 }
 0x9a5   :  { %14999 = vmatpush3.bf16.msra.mxu0 %v14996_v59  ;;  %13745 = vmatprep.mubr.msk.f32.mxu0 %vm257_vm2, %v16714_v31  ;;  %v12258_v59 = vld [vmem:[%s18511_s6 + $0x5] ss:$0 sm:$0xff] }
 0x9a6   :  { %15023 = vmatpush3.bf16.msra.mxu1 %v15020_v58  ;;  %13778 = vmatprep.mubr.msk.f32.mxu1 %vm257_vm2, %v16714_v31 }
 0x9a7   :  { %15001 = vmatprep.subr.bf16.mxu0 %v15000_v43  ;;  %15025 = vmatprep.subr.bf16.mxu1 %v15024_v44 }
 0x9a9   :  { %15003 = vmatpush3.bf16.msra.mxu0 %v15000_v43 }
 0x9aa   :  { %15027 = vmatpush3.bf16.msra.mxu1 %v15024_v44  ;;  %15013 = vmatprep.subr.bf16.mxu0 %v15012_v49  ;;  %v12261_v44 = vld [vmem:[%s18511_s6 + $0x6] ss:$0 sm:$0xff] }
 0x9ab   :  { %15037 = vmatprep.subr.bf16.mxu1 %v15036_v50 }
 0x9ac   :  { %13746 = vmatmul.mubr.msk.f32.vlgmr.msra.gmra.mrb[20].mxu0 %vm257_vm2, %v16716_v26 }
 0x9ad   :  { %13779 = vmatmul.mubr.msk.f32.vlgmr.msra.gmra.mrb[30].mxu1 %vm257_vm2, %v16716_v26  ;;  %15015 = vmatpush3.bf16.msra.mxu0 %v15012_v49 }
 0x9ae   :  { %13767 = vmatprep.mubr.msk.f32.mxu0 %vm257_vm2, %v16714_v31  ;;  %15039 = vmatpush3.bf16.msra.mxu1 %v15036_v50 }
 0x9af   :  { %13800 = vmatprep.mubr.msk.f32.mxu1 %vm257_vm2, %v16714_v31  ;;  %15017 = vmatprep.subr.bf16.mxu0 %v15016_v60 }
 0x9b0   :  { %15041 = vmatprep.subr.bf16.mxu1 %v15040_v63 }
 0x9b1   :  { %15019 = vmatpush3.bf16.msra.mxu0 %v15016_v60 }
 0x9b2   :  { %15043 = vmatpush3.bf16.msra.mxu1 %v15040_v63  ;;  %15029 = vmatprep.subr.bf16.mxu0 %v15028_v2 }
 0x9b3   :  { %15053 = vmatprep.subr.bf16.mxu1 %v15052_v3 }
 0x9b4   :  { %13768 = vmatmul.mubr.msk.f32.vlgmr.msra.gmra.mrb[22].mxu0 %vm257_vm2, %v16716_v26 }
 0x9b5   :  { %13801 = vmatmul.mubr.msk.f32.vlgmr.msra.gmra.mrb[32].mxu1 %vm257_vm2, %v16716_v26  ;;  %15031 = vmatpush3.bf16.msra.mxu0 %v15028_v2 }
 0x9b6   :  { %13789 = vmatprep.mubr.msk.f32.mxu0 %vm257_vm2, %v16714_v31  ;;  %15055 = vmatpush3.bf16.msra.mxu1 %v15052_v3 }
 0x9b7   :  { %13822 = vmatprep.mubr.msk.f32.mxu1 %vm257_vm2, %v16714_v31  ;;  %15033 = vmatprep.subr.bf16.mxu0 %v15032_v7 }
 0x9b8   :  { %15057 = vmatprep.subr.bf16.mxu1 %v15056_v14 }
 0x9b9   :  { %15035 = vmatpush3.bf16.msra.mxu0 %v15032_v7 }
 0x9ba   :  { %15059 = vmatpush3.bf16.msra.mxu1 %v15056_v14  ;;  %15045 = vmatprep.subr.bf16.mxu0 %v15044_v16 }
 0x9bc   :  { %13790 = vmatmul.mubr.msk.f32.vlgmr.msra.gmra.mrb[24].mxu0 %vm257_vm2, %v16716_v26 }
 0x9bd   :  { %13823 = vmatmul.mubr.msk.f32.vlgmr.msra.gmra.mrb[34].mxu1 %vm257_vm2, %v16716_v26  ;;  %15047 = vmatpush3.bf16.msra.mxu0 %v15044_v16 }
 0x9be   :  { %13811 = vmatprep.mubr.msk.f32.mxu0 %vm257_vm2, %v16714_v31  ;;  %15049 = vmatprep.subr.bf16.mxu0 %v15048_v19 }
 0x9c1   :  { %15051 = vmatpush3.bf16.msra.mxu0 %v15048_v19 }
 0x9c2   :  { %15061 = vmatprep.subr.bf16.mxu0 %v15060_v22 }
 0x9c4   :  { %13812 = vmatmul.mubr.msk.f32.vlgmr.msra.gmra.mrb[26].mxu0 %vm257_vm2, %v16716_v26 }
 0x9c5   :  { %15063 = vmatpush3.bf16.msra.mxu0 %v15060_v22  ;;  %13833 = vmatprep.mubr.msk.f32.mxu0 %vm257_vm2, %v16714_v31 }
 0x9c6   :  { %15065 = vmatprep.subr.bf16.mxu0 %v15064_v25 }
 0x9c9   :  { %15067 = vmatpush3.bf16.msra.mxu0 %v15064_v25 }
 0x9cc   :  { %13834 = vmatmul.mubr.msk.f32.vlgmr.msra.gmra.mrb[28].mxu0 %vm257_vm2, %v16716_v26 }
 0xa6f   :  { %v13714_v28 = vpop.f32.mrb[16].mxu0  ;;  %v13736_v29 = vpop.f32.mrb[26].mxu1 }
 0xa70   :  { %v2361_v30 = vpop.f32.mrb[17].mxu0  ;;  %v2523_v32 = vpop.f32.mrb[27].mxu1  ;;  %v2367_v48 = vadd.f32 %v13714_v28, %v12255_v27  ;;  %v2529_v62 = vadd.f32 %v13736_v29, %v12261_v44 }
 0xa71   :  { %v2362_v35 = vadd.f32 %v12255_v27, %v2361_v30  ;;  %v2524_v50 = vadd.f32 %v12261_v44, %v2523_v32 }
 0xa73   :  { %13840 = vmatprep.mubr.msk.f32.mxu1 %vm1182_vm3, %v2362_v35 }
 0xa77   :  { %v13725_v58 = vpop.f32.mrb[18].mxu0  ;;  %v13758_v37 = vpop.f32.mrb[28].mxu1 }
 0xa78   :  { %v2442_v39 = vpop.f32.mrb[19].mxu0  ;;  %v2679_v40 = vpop.f32.mrb[29].mxu1  ;;  %v2448_v15 = vadd.f32 %v13725_v58, %v12258_v59 }
 0xa79   :  { %v2443_v41 = vadd.f32 %v12258_v59, %v2442_v39  ;;  %v15068_v43 = vpack.c.bf16 %v13758_v37, %v2679_v40 }
 0xa7b   :  { %15070 = vmatprep.subr.msk.bf16.mxu1 %vm16488_vm4, %v15068_v43  ;;  %13847 = vmatprep.mubr.msk.f32.mxu0 %vm1182_vm3, %v2443_v41 }
 0xa7c   :  { %15073 = vmatpush3.bf16.xpose.msk.msra.mxu1 %vm16488_vm4, %v15068_v43 }
 0xa7f   :  { %v13747_v45 = vpop.f32.mrb[20].mxu0 }
 0xa80   :  { %v13780_v46 = vpop.f32.mrb[30].mxu1  ;;  %v2604_v47 = vpop.f32.mrb[21].mxu0  ;;  %v2610_v16 = vadd.f32 %v13747_v45, %v12264_v1 }
 0xa81   :  { %v2829_v49 = vpop.f32.mrb[31].mxu1  ;;  %v2605_v7 = vadd.f32 %v12264_v1, %v2604_v47 }
 0xa82   :  { %v15080_v51 = vpack.c.bf16 %v13780_v46, %v2829_v49 }
 0xa83   :  { %13841 = vmatmul.mubr.msk.f32.vlgmr.msra.gmra.mrb[36].mxu1 %vm1182_vm3, %v2367_v48 }
 0xa84   :  { %15082 = vmatprep.subr.msk.bf16.mxu1 %vm16488_vm4, %v15080_v51  ;;  %13854 = vmatprep.mubr.msk.f32.mxu1 %vm1182_vm3, %v2524_v50 }
 0xa85   :  { %15085 = vmatpush3.bf16.xpose.msk.msra.mxu1 %vm16488_vm4, %v15080_v51 }
 0xa87   :  { %v13769_v52 = vpop.f32.mrb[22].mxu0 }
 0xa88   :  { %v13802_v56 = vpop.f32.mrb[32].mxu1  ;;  %v2754_v57 = vpop.f32.mrb[23].mxu0 }
 0xa89   :  { %v15074_v60 = vpack.c.bf16 %v13769_v52, %v2754_v57  ;;  %v2979_v61 = vpop.f32.mrb[33].mxu1 }
 0xa8a   :  { %v15092_v63 = vpack.c.bf16 %v13802_v56, %v2979_v61 }
 0xa8b   :  { %15076 = vmatprep.subr.msk.bf16.mxu0 %vm16488_vm4, %v15074_v60 }
 0xa8c   :  { %13855 = vmatmul.mubr.msk.f32.vlgmr.msra.gmra.mrb[38].mxu1 %vm1182_vm3, %v2529_v62  ;;  %15093 = vmatprep.subr.bf16.mxu1 %v15092_v63 }
 0xa8d   :  { %15079 = vmatpush3.bf16.xpose.msk.msra.mxu0 %vm16488_vm4, %v15074_v60  ;;  %15095 = vmatpush3.bf16.msra.mxu1 %v15092_v63 }
 0xa8f   :  { %v13791_v0 = vpop.f32.mrb[24].mxu0 }
 0xa90   :  { %v13824_v2 = vpop.f32.mrb[34].mxu1  ;;  %v2904_v3 = vpop.f32.mrb[25].mxu0 }
 0xa91   :  { %v15086_v4 = vpack.c.bf16 %v13791_v0, %v2904_v3  ;;  %v3129_v5 = vpop.f32.mrb[35].mxu1 }
 0xa92   :  { %v16891_v6 = vpack.c.bf16 %v13824_v2, %v3129_v5 }
 0xa93   :  { %15088 = vmatprep.subr.msk.bf16.mxu0 %vm16488_vm4, %v15086_v4 }
 0xa94   :  { %13848 = vmatmul.mubr.msk.f32.vlgmr.msra.gmra.mrb[30].mxu0 %vm1182_vm3, %v2448_v15 }
 0xa95   :  { %15091 = vmatpush3.bf16.xpose.msk.msra.mxu0 %vm16488_vm4, %v15086_v4  ;;  %13861 = vmatprep.mubr.msk.f32.mxu0 %vm1182_vm3, %v2605_v7 }
 0xa97   :  { %v13813_v8 = vpop.f32.mrb[26].mxu0 }
 0xa98   :  { %v3054_v13 = vpop.f32.mrb[27].mxu0 }
 0xa99   :  { %v16899_v14 = vpack.c.bf16 %v13813_v8, %v3054_v13 }
 0xa9b   :  { %15097 = vmatprep.subr.bf16.mxu1 %v16899_v14 }
 0xa9c   :  { %13862 = vmatmul.mubr.msk.f32.vlgmr.msra.gmra.mrb[32].mxu0 %vm1182_vm3, %v2610_v16 }
 0xa9f   :  { %v13835_v17 = vpop.f32.mrb[28].mxu0 }
 0xaa0   :  { %v3204_v18 = vpop.f32.mrb[29].mxu0 }
 0xaa1   :  { %v16903_v19 = vpack.c.bf16 %v13835_v17, %v3204_v18 }
 0xb56   :  { %v13842_v33 = vpop.f32.mrb[36].mxu1 }
 0xb57   :  { %v3297_v20 = vadd.f32 %v13842_v33, %v16540_v42  ;;  %v3291_v22 = vpop.f32.mrb[37].mxu1 }
 0xb58   :  { %v3292_v23 = vadd.f32 %v3291_v22, %v16533_v38 }
 0xb59   :  { %v3564_v24 = vsel %vm1531_vm5, %v3297_v20, -inf }
 0xb5a   :  { %3565 = vmax.xlane.f32.xlu0 %v3564_v24  ;;  %v3561_v25 = vsel %vm1531_vm5, %v3292_v23, -inf }
 0xb5b   :  { %3562 = vmax.xlane.f32.xlu1 %v3561_v25 }
 0xb5f   :  { %v13856_v27 = vpop.f32.mrb[38].mxu1 }
 0xb60   :  { %v3465_v28 = vpop.f32.mrb[39].mxu1  ;;  %v3471_v59 = vadd.f32 %v13856_v27, %v16540_v42 }
 0xb61   :  { %v3466_v37 = vadd.f32 %v3465_v28, %v16533_v38 }
 0xb62   :  { %v3576_v40 = vsel %vm1531_vm5, %v3471_v59, -inf }
 0xb63   :  { %v3573_v43 = vsel %vm1531_vm5, %v3466_v37, -inf }
 0xb67   :  { %v13849_v29 = vpop.f32.mrb[30].mxu0 }
 0xb68   :  { %v3384_v30 = vadd.f32 %v13849_v29, %v16540_v42  ;;  %v3378_v32 = vpop.f32.mrb[31].mxu0 }
 0xb69   :  { %v3379_v35 = vadd.f32 %v3378_v32, %v16533_v38 }
 0xb6a   :  { %v3570_v58 = vsel %vm1531_vm5, %v3384_v30, -inf }
 0xb6b   :  { %3571 = vmax.xlane.f32.xlu0 %v3570_v58  ;;  %v3567_v39 = vsel %vm1531_vm5, %v3379_v35, -inf }
 0xb6c   :  { %3568 = vmax.xlane.f32.xlu1 %v3567_v39 }
 0xb6f   :  { %v13863_v41 = vpop.f32.mrb[32].mxu0  ;;  %3577 = vmax.xlane.f32.xlu0 %v3576_v40 }
 0xb70   :  { %v3558_v44 = vadd.f32 %v13863_v41, %v16540_v42  ;;  %v3552_v45 = vpop.f32.mrb[33].mxu0  ;;  %3574 = vmax.xlane.f32.xlu1 %v3573_v43 }
 0xb71   :  { %v3553_v46 = vadd.f32 %v3552_v45, %v16533_v38 }
 0xb72   :  { %v3582_v47 = vsel %vm1531_vm5, %v3558_v44, -inf }
 0xb73   :  { %3583 = vmax.xlane.f32.xlu0 %v3582_v47  ;;  %v3579_v48 = vsel %vm1531_vm5, %v3553_v46, -inf }
 0xb74   :  { %3580 = vmax.xlane.f32.xlu1 %v3579_v48 }
 0xbe7   :  { %v3566_v49 = vpop.xlane.xlu0 %3565 }
 0xbe8   :  { %v3586_v50 = vsub.f32 %v3297_v20, %v3566_v49  ;;  %v3563_v51 = vpop.xlane.xlu1 %3562 }
 0xbe9   :  { %v3585_v52 = vsub.f32 %v3292_v23, %v3563_v51 }
 0xbea   :  { %v3595_v56 = vmul.f32 1.442695, %v3586_v50 }
 0xbeb   :  { %v3593_v57 = vmul.f32 1.442695, %v3585_v52 }
 0xbec   :  { %15847 = vpow2.f32 %v3595_v56 }
 0xbed   :  { %15849 = vpow2.f32 %v3593_v57 }
 0xbf6   :  { %v15848_v60 = vpop.eup %15847 }
 0xbf7   :  { %v15850_v42 = vpop.eup %15849  ;;  %v3612_v61 = vsel %vm1531_vm5, %v15848_v60, 0.0 }
 0xbf8   :  { %v3572_v62 = vpop.xlane.xlu0 %3571  ;;  %3613 = vadd.xlane.f32.xlu0 %v3612_v61  ;;  %v3609_v38 = vsel %vm1531_vm5, %v15850_v42, 0.0 }
 0xbf9   :  { %v3588_v63 = vsub.f32 %v3384_v30, %v3572_v62  ;;  %v3569_v0 = vpop.xlane.xlu1 %3568  ;;  %3610 = vadd.xlane.f32.xlu1 %v3609_v38 }
 0xbfa   :  { %v3587_v1 = vsub.f32 %v3379_v35, %v3569_v0 }
 0xbfb   :  { %v3599_v2 = vmul.f32 1.442695, %v3588_v63 }
 0xbfc   :  { %v3597_v3 = vmul.f32 1.442695, %v3587_v1  ;;  %v3578_v4 = vpop.xlane.xlu0 %3577 }
 0xbfd   :  { %15851 = vpow2.f32 %v3599_v2  ;;  %v3590_v5 = vsub.f32 %v3471_v59, %v3578_v4  ;;  %v3575_v15 = vpop.xlane.xlu1 %3574 }
 0xbfe   :  { %15853 = vpow2.f32 %v3597_v3  ;;  %v3589_v7 = vsub.f32 %v3466_v37, %v3575_v15 }
 0xbff   :  { %v3603_v8 = vmul.f32 1.442695, %v3590_v5 }
 0xc00   :  { %v3601_v13 = vmul.f32 1.442695, %v3589_v7  ;;  %v3584_v16 = vpop.xlane.xlu0 %3583 }
 0xc01   :  { %15855 = vpow2.f32 %v3603_v8  ;;  %v3592_v17 = vsub.f32 %v3558_v44, %v3584_v16  ;;  %v3581_v18 = vpop.xlane.xlu1 %3580  ;;  %v4267_v16 = vld [vmem:[%s18515_s1] sm:$0xff] }
 0xc02   :  { %15857 = vpow2.f32 %v3601_v13  ;;  %v3591_v33 = vsub.f32 %v3553_v46, %v3581_v18 }
 0xc03   :  { %v3607_v20 = vmul.f32 1.442695, %v3592_v17  ;;  %v4268_v17 = vld [vmem:[%s18515_s1 + $0x8] sm:$0xff] }
 0xc04   :  { %v3605_v22 = vmul.f32 1.442695, %v3591_v33  ;;  %v15132_v18 = vpack.c.bf16 %v4268_v17, %v4267_v16 }
 0xc05   :  { %15859 = vpow2.f32 %v3607_v20  ;;  %v4271_v20 = vld [vmem:[%s18515_s1 + $0x20] sm:$0xff] }
 0xc06   :  { %15861 = vpow2.f32 %v3605_v22  ;;  %v4272_v22 = vld [vmem:[%s18515_s1 + $0x28] sm:$0xff] }
 0xc07   :  { %v15852_v23 = vpop.eup %15851 }
 0xc08   :  { %v15854_v24 = vpop.eup %15853  ;;  %v3618_v25 = vsel %vm1531_vm5, %v15852_v23, 0.0 }
 0xc09   :  { %3619 = vadd.xlane.f32.xlu0 %v3618_v25  ;;  %v3615_v27 = vsel %vm1531_vm5, %v15854_v24, 0.0  ;;  %v4274_v25 = vld [vmem:[%s18515_s1 + $0x38] sm:$0xff] }
 0xc0a   :  { %3616 = vadd.xlane.f32.xlu1 %v3615_v27 }
 0xc0b   :  { %v15856_v28 = vpop.eup %15855 }
 0xc0c   :  { %v15858_v29 = vpop.eup %15857  ;;  %v3624_v30 = vsel %vm1531_vm5, %v15856_v28, 0.0 }
 0xc0d   :  { %3625 = vadd.xlane.f32.xlu0 %v3624_v30  ;;  %v3621_v32 = vsel %vm1531_vm5, %v15858_v29, 0.0 }
 0xc0e   :  { %3622 = vadd.xlane.f32.xlu1 %v3621_v32  ;;  %v4277_v32 = vld [vmem:[%s18515_s1 + $0x50] sm:$0xff] }
 0xc0f   :  { %v15860_v35 = vpop.eup %15859 }
 0xc10   :  { %v15862_v59 = vpop.eup %15861  ;;  %v3630_v58 = vsel %vm1531_vm5, %v15860_v35, 0.0 }
 0xc11   :  { %3631 = vadd.xlane.f32.xlu0 %v3630_v58  ;;  %v3627_v37 = vsel %vm1531_vm5, %v15862_v59, 0.0 }
 0xc12   :  { %3628 = vadd.xlane.f32.xlu1 %v3627_v37 }
 0xc85   :  { %v3614_v39 = vpop.xlane.xlu0 %3613 }
 0xc86   :  { %15863 = vrcp.f32 %v3614_v39  ;;  %v3611_v40 = vpop.xlane.xlu1 %3610 }
 0xc87   :  { %15865 = vrcp.f32 %v3611_v40 }
 0xc90   :  { %v15864_v41 = vpop.eup %15863 }
 0xc91   :  { %v15866_v43 = vpop.eup %15865  ;;  %v3642_v45 = vmul.f32 %v15864_v41, %v15848_v60 }
 0xc92   :  { %v3641_v44 = vmul.f32 %v15866_v43, %v15850_v42 }
 0xc94   :  { %13868 = vmatprep.mubr.msk.f32.mxu1 %vm1531_vm5, %v3641_v44 }
 0xc95   :  { %13869 = vmatmul.mubr.msk.f32.vlgmr.msra.gmra.mrb[40].mxu1 %vm1531_vm5, %v3642_v45 }
 0xc96   :  { %v3620_v46 = vpop.xlane.xlu0 %3619  ;;  %15099 = vmatpush3.bf16.msra.mxu1 %v16899_v14 }
 0xc97   :  { %15867 = vrcp.f32 %v3620_v46  ;;  %15101 = vmatprep.subr.bf16.mxu1 %v16891_v6  ;;  %v3617_v47 = vpop.xlane.xlu1 %3616 }
 0xc98   :  { %15869 = vrcp.f32 %v3617_v47 }
 0xc9a   :  { %v3626_v49 = vpop.xlane.xlu0 %3625 }
 0xc9b   :  { %v3623_v48 = vpop.xlane.xlu1 %3622 }
 0xc9c   :  { %15871 = vrcp.f32 %v3623_v48  ;;  %v4279_v48 = vld [vmem:[%s18515_s1 + $0x60] sm:$0xff] }
 0xc9d   :  { %15873 = vrcp.f32 %v3626_v49  ;;  %v4280_v49 = vld [vmem:[%s18515_s1 + $0x68] sm:$0xff] }
 0xc9e   :  { %v3632_v57 = vpop.xlane.xlu0 %3631 }
 0xc9f   :  { %v3629_v50 = vpop.xlane.xlu1 %3628 }
 0xca0   :  { %15875 = vrcp.f32 %v3629_v50  ;;  %v15156_v50 = vpack.c.bf16 %v4280_v49, %v4279_v48  ;;  %v4283_v49 = vld [vmem:[%s18517_s7] sm:$0xff] }
 0xca1   :  { %v15868_v51 = vpop.eup %15867  ;;  %15877 = vrcp.f32 %v3632_v57 }
 0xca2   :  { %v15870_v52 = vpop.eup %15869  ;;  %v3644_v60 = vmul.f32 %v15868_v51, %v15852_v23  ;;  %v15140_v23 = vpack.c.bf16 %v4272_v22, %v4271_v20  ;;  %v4255_v51 = vld [vmem:[%s18516_s12] sm:$0xff] }
 0xca3   :  { %v3643_v56 = vmul.f32 %v15870_v52, %v15854_v24  ;;  %v4273_v24 = vld [vmem:[%s18515_s1 + $0x30] sm:$0xff] }
 0xca4   :  { %v15144_v27 = vpack.c.bf16 %v4274_v25, %v4273_v24  ;;  %v4281_v52 = vld [vmem:[%s18515_s1 + $0x70] sm:$0xff] }
 0xca5   :  { %13875 = vmatprep.mubr.msk.f32.mxu1 %vm1531_vm5, %v3643_v56  ;;  %v4282_v56 = vld [vmem:[%s18515_s1 + $0x78] sm:$0xff] }
 0xca6   :  { %v15872_v42 = vpop.eup %15871  ;;  %13876 = vmatmul.mubr.msk.f32.vlgmr.msra.gmra.mrb[40].mxu1 %vm1531_vm5, %v3644_v60  ;;  %v15160_v57 = vpack.c.bf16 %v4282_v56, %v4281_v52  ;;  %v4256_v60 = vld [vmem:[%s18516_s12 + $0x8] sm:$0xff]  ;;  %v4392_v52 = vld [vmem:[%s18467_s19 + $0x30] sm:$0xff]  ;;  %v4393_v56 = vld [vmem:[%s18467_s19 + $0x38] sm:$0xff]  ;;  %s18518_s12 = sld [smem:[#allocation8_spill]] }
 0xca7   :  { %15103 = vmatpush3.bf16.msra.mxu1 %v16891_v6  ;;  %v3645_v14 = vmul.f32 %v15872_v42, %v15858_v29  ;;  %v15874_v61 = vpop.eup %15873  ;;  %v16945_v6 = vld [vmem:[%s18464_s16 + $0x8] sm:$0x3f]  ;;  %v12307_v42 = vld [vmem:[%s18461_s13 + $0x20] sm:$0xff] }
 0xca8   :  { %15105 = vmatprep.subr.bf16.mxu1 %v16903_v19  ;;  %v3646_v38 = vmul.f32 %v15874_v61, %v15856_v28  ;;  %v3982_v2 = vrot.slane %v16945_v6, %v16579_v10  ;;  %v4275_v28 = vld [vmem:[%s18515_s1 + $0x40] sm:$0xff]  ;;  %v4276_v29 = vld [vmem:[%s18515_s1 + $0x48] sm:$0xff]  ;;  %v4016_v16 = vrot.slane %v16945_v6, %v16613_v53 }
 0xca9   :  { %13882 = vmatprep.mubr.msk.f32.mxu1 %vm1531_vm5, %v3645_v14  ;;  %v15148_v30 = vpack.c.bf16 %v4276_v29, %v4275_v28  ;;  %v12308_v14 = vld [vmem:[%s18461_s13 + $0x28] sm:$0xff]  ;;  %v4390_v29 = vld [vmem:[%s18467_s19 + $0x20] sm:$0xff] }
 0xcaa   :  { %v15876_v62 = vpop.eup %15875  ;;  %v15108_v61 = vpack.c.bf16 %v12308_v14, %v12307_v42  ;;  %v12316_v28 = vld [vmem:[%s18463_s15 + $0x48] sm:$0xff]  ;;  %v15208_v14 = vpack.c.bf16 %v4393_v56, %v4392_v52 }
 0xcab   :  { %v3647_v63 = vmul.f32 %v15876_v62, %v15862_v59  ;;  %v15878_v0 = vpop.eup %15877  ;;  %v12309_v62 = vld [vmem:[%s18461_s13 + $0x30] sm:$0xff]  ;;  %v4395_v52 = vld [vmem:[%s18467_s19 + $0x48] sm:$0xff] }
 0xcac   :  { %v3648_v1 = vmul.f32 %v15878_v0, %v15860_v35  ;;  %v4278_v35 = vld [vmem:[%s18515_s1 + $0x58] sm:$0xff]  ;;  %15109 = vmatprep.subr.bf16.mxu0 %v15108_v61  ;;  %v4378_v0 = vld [vmem:[%s18465_s17 + $0x60] sm:$0xff] }
 0xcad   :  { %v15152_v59 = vpack.c.bf16 %v4278_v35, %v4277_v32  ;;  %15111 = vmatpush3.bf16.msra.mxu0 %v15108_v61  ;;  %v4391_v32 = vld [vmem:[%s18467_s19 + $0x28] sm:$0xff]  ;;  %v4398_v61 = vld [vmem:[%s18467_s19 + $0x60] sm:$0xff] }
 0xcae   :  { %13883 = vmatmul.mubr.msk.f32.vlgmr.msra.gmra.mrb[40].mxu1 %vm1531_vm5, %v3646_v38  ;;  %v12310_v38 = vld [vmem:[%s18461_s13 + $0x38] sm:$0xff]  ;;  %v15204_v35 = vpack.c.bf16 %v4391_v32, %v4390_v29  ;;  %v4372_v29 = vld [vmem:[%s18465_s17 + $0x30] sm:$0xff] }
 0xcaf   :  { %15107 = vmatpush3.bf16.msra.mxu1 %v16903_v19  ;;  %13889 = vmatprep.mubr.msk.f32.mxu1 %vm1531_vm5, %v3647_v63  ;;  %v15112_v63 = vpack.c.bf16 %v12310_v38, %v12309_v62  ;;  %v4399_v62 = vld [vmem:[%s18467_s19 + $0x68] sm:$0xff]  ;;  %v4416_v32 = vld [vmem:[%s18468_s20 + $0x70] sm:$0xff] }
 0xcb0   :  { %15133 = vmatprep.subr.bf16.mxu1 %v15132_v18  ;;  %v15220_v38 = vpack.c.bf16 %v4399_v62, %v4398_v61  ;;  %v4402_v62 = vld [vmem:[%s18468_s20] sm:$0xff] }
 0xcb1   :  { %15113 = vmatprep.subr.bf16.mxu0 %v15112_v63 }
 0xcb2   :  { %15115 = vmatpush3.bf16.msra.mxu0 %v15112_v63  ;;  %v4400_v63 = vld [vmem:[%s18467_s19 + $0x70] sm:$0xff] }
 0xcb6   :  { %13890 = vmatmul.mubr.msk.f32.vlgmr.msra.gmra.mrb[40].mxu1 %vm1531_vm5, %v3648_v1  ;;  %v4379_v1 = vld [vmem:[%s18465_s17 + $0x68] sm:$0xff] }
 0xcb7   :  { %15135 = vmatpush3.bf16.msra.mxu1 %v15132_v18 }
 0xd89   :  { %v13891_v3 = vpop.f32.mrb[40].mxu1 }
 0xd8a   :  { %v3984_v4 = vadd.f32 %v13891_v3, %v3982_v2  ;;  %v3964_v5 = vpop.f32.mrb[41].mxu1 }
 0xd8b   :  { %v3983_v15 = vadd.f32 %v3982_v2, %v3964_v5  ;;  %v15188_v2 = vpack.c.bf16 %v4379_v1, %v4378_v0  ;;  %v4401_v0 = vld [vmem:[%s18467_s19 + $0x78] sm:$0xff] }
 0xd8c   :  { %v3986_v19 = vadd.f32 %v3984_v4, %v16716_v26  ;;  %v4269_v26 = vld [vmem:[%s18515_s1 + $0x10] sm:$0xff]  ;;  %v15224_v1 = vpack.c.bf16 %v4401_v0, %v4400_v63 }
 0xd8d   :  { %v3985_v7 = vadd.f32 %v3983_v15, %v16714_v31  ;;  %v4270_v31 = vld [vmem:[%s18515_s1 + $0x18] sm:$0xff]  ;;  %v4404_v0 = vld [vmem:[%s18468_s20 + $0x10] sm:$0xff] }
 0xd8e   :  { %v3990_v8 = vsel %vm257_vm2, %v3986_v19, 0.0  ;;  %v15136_v33 = vpack.c.bf16 %v4270_v31, %v4269_v26 }
 0xd8f   :  { %3991 = vadd.xlane.f32.xlu0 %v3990_v8  ;;  %v3987_v13 = vsel %vm257_vm2, %v3985_v7, 0.0 }
 0xd90   :  { %3988 = vadd.xlane.f32.xlu1 %v3987_v13  ;;  %15137 = vmatprep.subr.bf16.mxu1 %v15136_v33 }
 0xd91   :  { %15139 = vmatpush3.bf16.msra.mxu1 %v15136_v33  ;;  %v4022_v33 = vrot.slane %v16945_v6, %v16616_v55 }
 0xd92   :  { %15141 = vmatprep.subr.bf16.mxu1 %v15140_v23 }
 0xd95   :  { %15143 = vmatpush3.bf16.msra.mxu1 %v15140_v23 }
 0xd96   :  { %15145 = vmatprep.subr.bf16.mxu1 %v15144_v27 }
 0xd99   :  { %15147 = vmatpush3.bf16.msra.mxu1 %v15144_v27  ;;  %v12315_v27 = vld [vmem:[%s18463_s15 + $0x40] sm:$0xff] }
 0xd9a   :  { %15149 = vmatprep.subr.bf16.mxu1 %v15148_v30 }
 0xd9d   :  { %15151 = vmatpush3.bf16.msra.mxu1 %v15148_v30  ;;  %v15116_v30 = vpack.c.bf16 %v12316_v28, %v12315_v27 }
 0xd9e   :  { %15153 = vmatprep.subr.bf16.mxu1 %v15152_v59 }
 0xd9f   :  { %15117 = vmatprep.subr.bf16.mxu0 %v15116_v30 }
 0xda1   :  { %15155 = vmatpush3.bf16.msra.mxu1 %v15152_v59  ;;  %v12317_v59 = vld [vmem:[%s18463_s15 + $0x50] sm:$0xff] }
 0xda2   :  { %15157 = vmatprep.subr.bf16.mxu1 %v15156_v50 }
 0xda5   :  { %15159 = vmatpush3.bf16.msra.mxu1 %v15156_v50  ;;  %v4284_v50 = vld [vmem:[%s18517_s7 + $0x8] sm:$0xff] }
 0xda6   :  { %15161 = vmatprep.subr.bf16.mxu1 %v15160_v57 }
 0xda9   :  { %15163 = vmatpush3.bf16.msra.mxu1 %v15160_v57 }
 0xdaa   :  { %15189 = vmatprep.subr.bf16.mxu1 %v15188_v2 }
 0xe1c   :  { %v3992_v58 = vpop.xlane.xlu0 %3991 }
 0xe1d   :  { %v3994_v37 = vmul.f32 0.03125, %v3992_v58  ;;  %v3989_v39 = vpop.xlane.xlu1 %3988  ;;  %v12318_v58 = vld [vmem:[%s18463_s15 + $0x58] sm:$0xff] }
 0xe1e   :  { %v3993_v40 = vmul.f32 0.03125, %v3989_v39  ;;  %v12319_v39 = vld [vmem:[%s18463_s15 + $0x60] sm:$0xff] }
 0xe1f   :  { %v3996_v41 = vsub.f32 %v3986_v19, %v3994_v37  ;;  %v15120_v37 = vpack.c.bf16 %v12318_v58, %v12317_v59 }
 0xe20   :  { %v3995_v43 = vsub.f32 %v3985_v7, %v3993_v40  ;;  %v12320_v40 = vld [vmem:[%s18463_s15 + $0x68] sm:$0xff] }
 0xe21   :  { %v3998_v44 = vmul.f32 %v3996_v41, %v3996_v41 }
 0xe22   :  { %v3997_v45 = vmul.f32 %v3995_v43, %v3995_v43 }
 0xe23   :  { %v4002_v46 = vsel %vm257_vm2, %v3998_v44, 0.0  ;;  %v12322_v44 = vld [vmem:[%s18463_s15 + $0x78] sm:$0xff] }
 0xe24   :  { %4003 = vadd.xlane.f32.xlu0 %v4002_v46  ;;  %v3999_v47 = vsel %vm257_vm2, %v3997_v45, 0.0  ;;  %v4366_v46 = vld [vmem:[%s18465_s17] sm:$0xff] }
 0xe25   :  { %4000 = vadd.xlane.f32.xlu1 %v3999_v47  ;;  %v4367_v47 = vld [vmem:[%s18465_s17 + $0x8] sm:$0xff] }
 0xe26   :  { %v15164_v48 = vpack.c.bf16 %v4367_v47, %v4366_v46  ;;  %v4387_v46 = vld [vmem:[%s18467_s19 + $0x8] sm:$0xff] }
 0xe36   :  { %4258 = vperm.xlu1 %15806, %v4255_v51  }
 0xe3a   :  { %4261 = vperm.xlu0 %15805, %v4256_v60  }
 0xeb1   :  { %v4004_v3 = vpop.xlane.xlu0 %4003 }
 0xeb2   :  { %v4006_v4 = vmul.f32 0.03125, %v4004_v3  ;;  %v4001_v5 = vpop.xlane.xlu1 %4000  ;;  %v4406_v3 = vld [vmem:[%s18468_s20 + $0x20] sm:$0xff] }
 0xeb3   :  { %v4005_v15 = vmul.f32 0.03125, %v4001_v5 }
 0xeb4   :  { %v4008_v19 = vadd.f32 1e-05, %v4006_v4  ;;  %v4407_v4 = vld [vmem:[%s18468_s20 + $0x28] sm:$0xff] }
 0xeb5   :  { %v4007_v7 = vadd.f32 1e-05, %v4005_v15 }
 0xeb6   :  { %15879 = vrsqrt.f32 %v4008_v19  ;;  %v4259_v8 = vpop.permute.xlu1 %4258 }
 0xeb7   :  { %15881 = vrsqrt.f32 %v4007_v7  ;;  %vm4263_vm7 = vcmp.eq.s32.totalorder %v16287_v34, %v4259_v8  ;;  %v15236_v7 = vpack.c.bf16 %v4407_v4, %v4406_v3  ;;  %v4410_v3 = vld [vmem:[%s18468_s20 + $0x40] sm:$0xff]  ;;  %v4411_v4 = vld [vmem:[%s18468_s20 + $0x48] sm:$0xff] }
 0xeb8   :  { %13954 = vmatprep.mubr.msk.f32.mxu1 %vm4263_vm7, %v16071_v36 }
 0xeb9   :  { %v4262_v13 = vpop.permute.xlu0 %4261 }
 0xeba   :  { %vm4264_vm8 = vcmp.eq.s32.totalorder %v16287_v34, %v4262_v13  ;;  %v4380_v34 = vld [vmem:[%s18465_s17 + $0x70] sm:$0xff] }
 0xebb   :  { %13955 = vmatmul.mubr.msk.f32.vlgmr.msra.gmra.mrb[42].mxu1 %vm4264_vm8, %v16071_v36  ;;  %v4381_v36 = vld [vmem:[%s18465_s17 + $0x78] sm:$0xff]  ;;  %v4368_v13 = vld [vmem:[%s18465_s17 + $0x10] sm:$0xff] }
 0xebc   :  { %15191 = vmatpush3.bf16.msra.mxu1 %v15188_v2  ;;  %v15192_v25 = vpack.c.bf16 %v4381_v36, %v4380_v34  ;;  %v12312_v2 = vld [vmem:[%s18462_s14 + $0x1] ss:$0 sm:$0xff]  ;;  %v4371_v34 = vld [vmem:[%s18465_s17 + $0x28] sm:$0xff] }
 0xebd   :  { %v4414_v36 = vld [vmem:[%s18468_s20 + $0x60] sm:$0xff] }
 0xebe   :  { %15193 = vmatprep.subr.bf16.mxu1 %v15192_v25 }
 0xec0   :  { %v15880_v17 = vpop.eup %15879  ;;  %15195 = vmatpush3.bf16.msra.mxu1 %v15192_v25  ;;  %v4415_v25 = vld [vmem:[%s18468_s20 + $0x68] sm:$0xff] }
 0xec1   :  { %v15882_v26 = vpop.eup %15881  ;;  %v4012_v18 = vmul.f32 %v15880_v17, %v3996_v41  ;;  %15205 = vmatprep.subr.bf16.mxu1 %v15204_v35  ;;  %v15124_v41 = vpack.c.bf16 %v12320_v40, %v12319_v39  ;;  %v4408_v17 = vld [vmem:[%s18468_s20 + $0x30] sm:$0xff]  ;;  %v15252_v28 = vpack.c.bf16 %v4415_v25, %v4414_v36  ;;  %v4375_v39 = vld [vmem:[%s18465_s17 + $0x48] sm:$0xff] }
 0xec2   :  { %v4011_v31 = vmul.f32 %v15882_v26, %v3995_v43  ;;  %v12321_v43 = vld [vmem:[%s18463_s15 + $0x70] sm:$0xff]  ;;  %v4409_v26 = vld [vmem:[%s18468_s20 + $0x38] sm:$0xff] }
 0xec3   :  { %v4018_v20 = vmul.f32 %v4016_v16, %v4012_v18  ;;  %v15128_v45 = vpack.c.bf16 %v12322_v44, %v12321_v43  ;;  %v4377_v43 = vld [vmem:[%s18465_s17 + $0x58] sm:$0xff] }
 0xec4   :  { %v4017_v22 = vmul.f32 %v4016_v16, %v4011_v31  ;;  %v4369_v16 = vld [vmem:[%s18465_s17 + $0x18] sm:$0xff] }
 0xec5   :  { %v17037_v24 = vadd.f32 %v4022_v33, %v4018_v20  ;;  %v15168_v20 = vpack.c.bf16 %v4369_v16, %v4368_v13 }
 0xec6   :  { %v17035_v23 = vadd.f32 %v4022_v33, %v4017_v22  ;;  %v4370_v33 = vld [vmem:[%s18465_s17 + $0x20] sm:$0xff]  ;;  %v15240_v22 = vpack.c.bf16 %v4409_v26, %v4408_v17 }
 0xec7   :  { %v15172_v27 = vpack.c.bf16 %v4371_v34, %v4370_v33  ;;  %v12327_v34 = vld [vmem:[%s18466_s18] ss:$0 sm:$0xff] }
 0xec8   :  { %13900 = vmatprep.mubr.msk.f32.mxu0 %vm257_vm2, %v17035_v23 }
 0xec9   :  { %13901 = vmatmul.mubr.msk.f32.vlgmr.msra.gmra.mrb[34].mxu0 %vm257_vm2, %v17037_v24 }
 0xeca   :  { %15119 = vmatpush3.bf16.msra.mxu0 %v15116_v30  ;;  %v4373_v30 = vld [vmem:[%s18465_s17 + $0x38] sm:$0xff] }
 0xecb   :  { %15121 = vmatprep.subr.bf16.mxu0 %v15120_v37  ;;  %v15176_v59 = vpack.c.bf16 %v4373_v30, %v4372_v29 }
 0xece   :  { %15123 = vmatpush3.bf16.msra.mxu0 %v15120_v37  ;;  %v4374_v37 = vld [vmem:[%s18465_s17 + $0x40] sm:$0xff] }
 0xecf   :  { %15125 = vmatprep.subr.bf16.mxu0 %v15124_v41  ;;  %v15180_v40 = vpack.c.bf16 %v4375_v39, %v4374_v37 }
 0xed2   :  { %15127 = vmatpush3.bf16.msra.mxu0 %v15124_v41  ;;  %v4376_v41 = vld [vmem:[%s18465_s17 + $0x50] sm:$0xff] }
 0xed3   :  { %15129 = vmatprep.subr.bf16.mxu0 %v15128_v45  ;;  %v15184_v44 = vpack.c.bf16 %v4377_v43, %v4376_v41 }
 0xed6   :  { %15131 = vmatpush3.bf16.msra.mxu0 %v15128_v45  ;;  %v4386_v45 = vld [vmem:[%s18467_s19] sm:$0xff] }
 0xed7   :  { %15165 = vmatprep.subr.bf16.mxu0 %v15164_v48  ;;  %v15196_v47 = vpack.c.bf16 %v4387_v46, %v4386_v45 }
 0xf8e   :  { %v13956_v51 = vpop.f32.mrb[42].mxu1 }
 0xf8f   :  { %v4351_v57 = vpop.f32.mrb[43].mxu1  ;;  %v17099_v42 = vadd.f32 %v13956_v51, %v4284_v50  ;;  %v4394_v51 = vld [vmem:[%s18467_s19 + $0x40] sm:$0xff] }
 0xf90   :  { %v17097_v60 = vadd.f32 %v4351_v57, %v4283_v49  ;;  %v4389_v49 = vld [vmem:[%s18467_s19 + $0x18] sm:$0xff]  ;;  %v15212_v56 = vpack.c.bf16 %v4395_v52, %v4394_v51  ;;  %v4396_v57 = vld [vmem:[%s18467_s19 + $0x50] sm:$0xff]  ;;  %v12333_v51 = vld [vmem:[%s18466_s18 + $0x2] ss:$0 sm:$0xff] }
 0xf92   :  { %13998 = vmatprep.mubr.msk.f32.mxu1 %vm257_vm2, %v17097_v60 }
 0xf93   :  { %13999 = vmatmul.mubr.msk.f32.vlgmr.msra.gmra.mrb[44].mxu1 %vm257_vm2, %v17099_v42 }
 0xf94   :  { %15207 = vmatpush3.bf16.msra.mxu1 %v15204_v35  ;;  %14020 = vmatprep.mubr.msk.f32.mxu1 %vm257_vm2, %v17097_v60  ;;  %v4417_v35 = vld [vmem:[%s18468_s20 + $0x78] sm:$0xff] }
 0xf95   :  { %15209 = vmatprep.subr.bf16.mxu1 %v15208_v14  ;;  %v15256_v58 = vpack.c.bf16 %v4417_v35, %v4416_v32  ;;  %v12330_v32 = vld [vmem:[%s18466_s18 + $0x1] ss:$0 sm:$0xff] }
 0xf98   :  { %15211 = vmatpush3.bf16.msra.mxu1 %v15208_v14  ;;  %v4397_v14 = vld [vmem:[%s18467_s19 + $0x58] sm:$0xff] }
 0xf99   :  { %15221 = vmatprep.subr.bf16.mxu1 %v15220_v38  ;;  %v15216_v61 = vpack.c.bf16 %v4397_v14, %v4396_v57 }
 0xf9b   :  { %14021 = vmatmul.mubr.msk.f32.vlgmr.msra.gmra.mrb[46].mxu1 %vm257_vm2, %v17099_v42 }
 0xf9c   :  { %15223 = vmatpush3.bf16.msra.mxu1 %v15220_v38  ;;  %14042 = vmatprep.mubr.msk.f32.mxu1 %vm257_vm2, %v17097_v60  ;;  %v13902_v5 = vpop.f32.mrb[34].mxu0  ;;  %v4403_v38 = vld [vmem:[%s18468_s20 + $0x8] sm:$0xff] }
 0xf9d   :  { %v4116_v15 = vadd.f32 %v13902_v5, %v12312_v2  ;;  %v4110_v19 = vpop.f32.mrb[35].mxu0  ;;  %15225 = vmatprep.subr.bf16.mxu1 %v15224_v1  ;;  %v15228_v63 = vpack.c.bf16 %v4403_v38, %v4402_v62  ;;  %v15244_v5 = vpack.c.bf16 %v4411_v4, %v4410_v3 }
 0xf9e   :  { %v4111_v8 = vadd.f32 %v12312_v2, %v4110_v19  ;;  %v4413_v19 = vld [vmem:[%s18468_s20 + $0x58] sm:$0xff] }
 0xf9f   :  { %v4120_v31 = vmax.f32 %v4116_v15, 0.0  ;;  %v4412_v15 = vld [vmem:[%s18468_s20 + $0x50] sm:$0xff] }
 0xfa0   :  { %v4119_v18 = vmax.f32 %v4111_v8, 0.0  ;;  %15227 = vmatpush3.bf16.msra.mxu1 %v15224_v1  ;;  %v4405_v1 = vld [vmem:[%s18468_s20 + $0x18] sm:$0xff] }
 0xfa1   :  { %15237 = vmatprep.subr.bf16.mxu1 %v15236_v7  ;;  %v15232_v2 = vpack.c.bf16 %v4405_v1, %v4404_v0 }
 0xfa2   :  { %13919 = vmatprep.mubr.msk.f32.mxu0 %vm2103_vm6, %v4119_v18 }
 0xfa3   :  { %14043 = vmatmul.mubr.msk.f32.vlgmr.msra.gmra.mrb[48].mxu1 %vm257_vm2, %v17099_v42  ;;  %13920 = vmatmul.mubr.msk.f32.vlgmr.msra.gmra.mrb[36].mxu0 %vm2103_vm6, %v4120_v31 }
 0xfa4   :  { %15167 = vmatpush3.bf16.msra.mxu0 %v15164_v48  ;;  %15239 = vmatpush3.bf16.msra.mxu1 %v15236_v7  ;;  %v4388_v48 = vld [vmem:[%s18467_s19 + $0x10] sm:$0xff]  ;;  %v15248_v7 = vpack.c.bf16 %v4413_v19, %v4412_v15 }
 0xfa5   :  { %14064 = vmatprep.mubr.msk.f32.mxu1 %vm257_vm2, %v17097_v60  ;;  %13965 = vmatprep.mubr.msk.f32.mxu0 %vm257_vm2, %v17097_v60  ;;  %v15200_v50 = vpack.c.bf16 %v4389_v49, %v4388_v48 }
 0xfa6   :  { %15169 = vmatprep.subr.bf16.mxu0 %v15168_v20  ;;  %15241 = vmatprep.subr.bf16.mxu1 %v15240_v22 }
 0xfa8   :  { %15171 = vmatpush3.bf16.msra.mxu0 %v15168_v20  ;;  %15243 = vmatpush3.bf16.msra.mxu1 %v15240_v22 }
 0xfa9   :  { %15173 = vmatprep.subr.bf16.mxu0 %v15172_v27  ;;  %15253 = vmatprep.subr.bf16.mxu1 %v15252_v28 }
 0xfab   :  { %13966 = vmatmul.mubr.msk.f32.vlgmr.msra.gmra.mrb[38].mxu0 %vm257_vm2, %v17099_v42  ;;  %14065 = vmatmul.mubr.msk.f32.vlgmr.msra.gmra.mrb[50].mxu1 %vm257_vm2, %v17099_v42 }
 0xfac   :  { %15175 = vmatpush3.bf16.msra.mxu0 %v15172_v27  ;;  %13976 = vmatprep.mubr.msk.f32.mxu0 %vm257_vm2, %v17097_v60 }
 0xfad   :  { %15255 = vmatpush3.bf16.msra.mxu1 %v15252_v28  ;;  %14086 = vmatprep.mubr.msk.f32.mxu1 %vm257_vm2, %v17097_v60 }
 0xfae   :  { %15177 = vmatprep.subr.bf16.mxu0 %v15176_v59  ;;  %15257 = vmatprep.subr.bf16.mxu1 %v15256_v58 }
 0xfb0   :  { %15179 = vmatpush3.bf16.msra.mxu0 %v15176_v59  ;;  %v12336_v59 = vld [vmem:[%s18466_s18 + $0x3] ss:$0 sm:$0xff] }
 0xfb1   :  { %15259 = vmatpush3.bf16.msra.mxu1 %v15256_v58  ;;  %15181 = vmatprep.subr.bf16.mxu0 %v15180_v40 }
 0xfb3   :  { %13977 = vmatmul.mubr.msk.f32.vlgmr.msra.gmra.mrb[40].mxu0 %vm257_vm2, %v17099_v42 }
 0xfb4   :  { %14087 = vmatmul.mubr.msk.f32.vlgmr.msra.gmra.mrb[52].mxu1 %vm257_vm2, %v17099_v42  ;;  %15183 = vmatpush3.bf16.msra.mxu0 %v15180_v40 }
 0xfb5   :  { %13987 = vmatprep.mubr.msk.f32.mxu0 %vm257_vm2, %v17097_v60  ;;  %15185 = vmatprep.subr.bf16.mxu0 %v15184_v44 }
 0xfb8   :  { %15187 = vmatpush3.bf16.msra.mxu0 %v15184_v44 }
 0xfb9   :  { %15197 = vmatprep.subr.bf16.mxu0 %v15196_v47 }
 0xfbb   :  { %13988 = vmatmul.mubr.msk.f32.vlgmr.msra.gmra.mrb[42].mxu0 %vm257_vm2, %v17099_v42 }
 0xfbc   :  { %15199 = vmatpush3.bf16.msra.mxu0 %v15196_v47  ;;  %14009 = vmatprep.mubr.msk.f32.mxu0 %vm257_vm2, %v17097_v60 }
 0xfbd   :  { %15201 = vmatprep.subr.bf16.mxu0 %v15200_v50 }
 0xfc0   :  { %15203 = vmatpush3.bf16.msra.mxu0 %v15200_v50 }
 0xfc1   :  { %15213 = vmatprep.subr.bf16.mxu0 %v15212_v56 }
 0xfc3   :  { %14010 = vmatmul.mubr.msk.f32.vlgmr.msra.gmra.mrb[44].mxu0 %vm257_vm2, %v17099_v42 }
 0xfc4   :  { %15215 = vmatpush3.bf16.msra.mxu0 %v15212_v56  ;;  %14031 = vmatprep.mubr.msk.f32.mxu0 %vm257_vm2, %v17097_v60 }
 0xfc5   :  { %15217 = vmatprep.subr.bf16.mxu0 %v15216_v61 }
 0xfc8   :  { %15219 = vmatpush3.bf16.msra.mxu0 %v15216_v61 }
 0xfc9   :  { %15229 = vmatprep.subr.bf16.mxu0 %v15228_v63 }
 0xfcb   :  { %14032 = vmatmul.mubr.msk.f32.vlgmr.msra.gmra.mrb[46].mxu0 %vm257_vm2, %v17099_v42 }
 0xfcc   :  { %15231 = vmatpush3.bf16.msra.mxu0 %v15228_v63  ;;  %14053 = vmatprep.mubr.msk.f32.mxu0 %vm257_vm2, %v17097_v60 }
 0xfcd   :  { %15233 = vmatprep.subr.bf16.mxu0 %v15232_v2 }
 0xfd0   :  { %15235 = vmatpush3.bf16.msra.mxu0 %v15232_v2 }
 0xfd1   :  { %15245 = vmatprep.subr.bf16.mxu0 %v15244_v5 }
 0xfd3   :  { %14054 = vmatmul.mubr.msk.f32.vlgmr.msra.gmra.mrb[48].mxu0 %vm257_vm2, %v17099_v42 }
 0xfd4   :  { %15247 = vmatpush3.bf16.msra.mxu0 %v15244_v5  ;;  %14075 = vmatprep.mubr.msk.f32.mxu0 %vm257_vm2, %v17097_v60 }
 0xfd5   :  { %15249 = vmatprep.subr.bf16.mxu0 %v15248_v7 }
 0xfd8   :  { %15251 = vmatpush3.bf16.msra.mxu0 %v15248_v7  ;;  %v4361_v7 = vld [vmem:[%s18518_s12 + $0x8] sm:$0xff] }
 0xfdb   :  { %14076 = vmatmul.mubr.msk.f32.vlgmr.msra.gmra.mrb[50].mxu0 %vm257_vm2, %v17099_v42 }
0x1066   :  { %v14000_v8 = vpop.f32.mrb[44].mxu1 }
0x1067   :  { %v4739_v13 = vpop.f32.mrb[45].mxu1  ;;  %v4745_v47 = vadd.f32 %v14000_v8, %v12336_v59 }
0x1068   :  { %v4740_v44 = vadd.f32 %v12336_v59, %v4739_v13  ;;  %v4360_v13 = vld [vmem:[%s18518_s12] sm:$0xff] }
0x106e   :  { %v14022_v16 = vpop.f32.mrb[46].mxu1 }
0x106f   :  { %v4889_v17 = vpop.f32.mrb[47].mxu1 }
0x1070   :  { %v15266_v26 = vpack.c.bf16 %v14022_v16, %v4889_v17 }
0x1072   :  { %15268 = vmatprep.subr.msk.bf16.mxu1 %vm16488_vm4, %v15266_v26 }
0x1073   :  { %15271 = vmatpush3.bf16.xpose.msk.msra.mxu1 %vm16488_vm4, %v15266_v26 }
0x1076   :  { %v14044_v18 = vpop.f32.mrb[48].mxu1  ;;  %v17272_v31 = vpop.f32.mrb[36].mxu0 }
0x1077   :  { %v5039_v33 = vpop.f32.mrb[49].mxu1  ;;  %v17274_v20 = vpop.f32.mrb[37].mxu0 }
0x1078   :  { %v15278_v22 = vpack.c.bf16 %v14044_v18, %v5039_v33 }
0x107a   :  { %15280 = vmatprep.subr.msk.bf16.mxu1 %vm16488_vm4, %v15278_v22 }
0x107e   :  { %v13967_v36 = vpop.f32.mrb[38].mxu0  ;;  %v14066_v25 = vpop.f32.mrb[50].mxu1 }
0x107f   :  { %v4496_v27 = vpop.f32.mrb[39].mxu0  ;;  %v5189_v28 = vpop.f32.mrb[51].mxu1  ;;  %v4502_v57 = vadd.f32 %v13967_v36, %v12327_v34 }
0x1080   :  { %v4497_v29 = vadd.f32 %v12327_v34, %v4496_v27  ;;  %v17281_v30 = vpack.c.bf16 %v14066_v25, %v5189_v28 }
0x1082   :  { %14093 = vmatprep.mubr.msk.f32.mxu0 %vm1182_vm3, %v4497_v29 }
0x1086   :  { %v13978_v35 = vpop.f32.mrb[40].mxu0 }
0x1087   :  { %v14088_v58 = vpop.f32.mrb[52].mxu1  ;;  %v4577_v37 = vpop.f32.mrb[41].mxu0  ;;  %v4583_v41 = vadd.f32 %v13978_v35, %v12330_v32 }
0x1088   :  { %v4578_v39 = vadd.f32 %v12330_v32, %v4577_v37  ;;  %v5339_v40 = vpop.f32.mrb[53].mxu1 }
0x1089   :  { %v17290_v43 = vpack.c.bf16 %v14088_v58, %v5339_v40 }
0x108a   :  { %14100 = vmatprep.mubr.msk.f32.mxu1 %vm1182_vm3, %v4578_v39 }
0x108b   :  { %14101 = vmatmul.mubr.msk.f32.vlgmr.msra.gmra.mrb[54].mxu1 %vm1182_vm3, %v4583_v41 }
0x108c   :  { %15283 = vmatpush3.bf16.xpose.msk.msra.mxu1 %vm16488_vm4, %v15278_v22  ;;  %14114 = vmatprep.mubr.msk.f32.mxu1 %vm1182_vm3, %v4740_v44 }
0x108e   :  { %v13989_v45 = vpop.f32.mrb[42].mxu0 }
0x108f   :  { %v4658_v46 = vpop.f32.mrb[43].mxu0  ;;  %v4664_v63 = vadd.f32 %v13989_v45, %v12333_v51 }
0x1090   :  { %v4659_v61 = vadd.f32 %v12333_v51, %v4658_v46 }
0x1093   :  { %14115 = vmatmul.mubr.msk.f32.vlgmr.msra.gmra.mrb[56].mxu1 %vm1182_vm3, %v4745_v47 }
0x1096   :  { %v14011_v48 = vpop.f32.mrb[44].mxu0 }
0x1097   :  { %v4814_v49 = vpop.f32.mrb[45].mxu0 }
0x1098   :  { %v15260_v50 = vpack.c.bf16 %v14011_v48, %v4814_v49 }
0x109a   :  { %15262 = vmatprep.subr.msk.bf16.mxu0 %vm16488_vm4, %v15260_v50 }
0x109b   :  { %15265 = vmatpush3.bf16.xpose.msk.msra.mxu0 %vm16488_vm4, %v15260_v50 }
0x109e   :  { %v14033_v52 = vpop.f32.mrb[46].mxu0 }
0x109f   :  { %v4964_v56 = vpop.f32.mrb[47].mxu0 }
0x10a0   :  { %v15272_v14 = vpack.c.bf16 %v14033_v52, %v4964_v56 }
0x10a2   :  { %14094 = vmatmul.mubr.msk.f32.vlgmr.msra.gmra.mrb[52].mxu0 %vm1182_vm3, %v4502_v57  ;;  %15274 = vmatprep.subr.msk.bf16.mxu0 %vm16488_vm4, %v15272_v14 }
0x10a3   :  { %15277 = vmatpush3.bf16.xpose.msk.msra.mxu0 %vm16488_vm4, %v15272_v14  ;;  %14107 = vmatprep.mubr.msk.f32.mxu0 %vm1182_vm3, %v4659_v61 }
0x10a6   :  { %v14055_v62 = vpop.f32.mrb[48].mxu0 }
0x10a7   :  { %v5114_v38 = vpop.f32.mrb[49].mxu0 }
0x10a8   :  { %v15284_v0 = vpack.c.bf16 %v14055_v62, %v5114_v38 }
0x10aa   :  { %14108 = vmatmul.mubr.msk.f32.vlgmr.msra.gmra.mrb[54].mxu0 %vm1182_vm3, %v4664_v63  ;;  %15285 = vmatprep.subr.bf16.mxu0 %v15284_v0 }
0x10ab   :  { %15287 = vmatpush3.bf16.msra.mxu0 %v15284_v0 }
0x10ac   :  { %15289 = vmatprep.subr.bf16.mxu0 %v17281_v30 }
0x10ae   :  { %v14077_v1 = vpop.f32.mrb[50].mxu0 }
0x10af   :  { %v5264_v2 = vpop.f32.mrb[51].mxu0 }
0x10b0   :  { %v17313_v3 = vpack.c.bf16 %v14077_v1, %v5264_v2 }
0x115e   :  { %v14102_v4 = vpop.f32.mrb[54].mxu1 }
0x115f   :  { %v5513_v5 = vpop.f32.mrb[55].mxu1  ;;  %v5519_v18 = vadd.f32 %v14102_v4, %v4361_v7 }
0x1160   :  { %v5514_v22 = vadd.f32 %v5513_v5, %v4360_v13 }
0x1161   :  { %v5705_v36 = vsel %vm1531_vm5, %v5519_v18, -inf }
0x1162   :  { %v5702_v27 = vsel %vm1531_vm5, %v5514_v22, -inf }
0x1166   :  { %v14116_v15 = vpop.f32.mrb[56].mxu1 }
0x1167   :  { %v5687_v19 = vpop.f32.mrb[57].mxu1  ;;  %v5693_v35 = vadd.f32 %v14116_v15, %v4361_v7 }
0x1168   :  { %v5688_v58 = vadd.f32 %v5687_v19, %v4360_v13 }
0x1169   :  { %v5717_v39 = vsel %vm1531_vm5, %v5693_v35, -inf }
0x116a   :  { %v5714_v40 = vsel %vm1531_vm5, %v5688_v58, -inf }
0x1175   :  { %v14095_v8 = vpop.f32.mrb[52].mxu0 }
0x1176   :  { %v5432_v16 = vadd.f32 %v14095_v8, %v4361_v7  ;;  %v5426_v17 = vpop.f32.mrb[53].mxu0 }
0x1177   :  { %v5427_v26 = vadd.f32 %v5426_v17, %v4360_v13 }
0x1178   :  { %v5699_v33 = vsel %vm1531_vm5, %v5432_v16, -inf }
0x1179   :  { %5700 = vmax.xlane.f32.xlu0 %v5699_v33  ;;  %v5696_v34 = vsel %vm1531_vm5, %v5427_v26, -inf }
0x117a   :  { %5697 = vmax.xlane.f32.xlu1 %v5696_v34 }
0x117d   :  { %5706 = vmax.xlane.f32.xlu0 %v5705_v36  ;;  %v14109_v25 = vpop.f32.mrb[54].mxu0 }
0x117e   :  { %v5606_v28 = vadd.f32 %v14109_v25, %v4361_v7  ;;  %v5600_v29 = vpop.f32.mrb[55].mxu0  ;;  %5703 = vmax.xlane.f32.xlu1 %v5702_v27 }
0x117f   :  { %v5601_v32 = vadd.f32 %v5600_v29, %v4360_v13 }
0x1180   :  { %v5711_v59 = vsel %vm1531_vm5, %v5606_v28, -inf }
0x1181   :  { %5712 = vmax.xlane.f32.xlu0 %v5711_v59  ;;  %v5708_v37 = vsel %vm1531_vm5, %v5601_v32, -inf }
0x1182   :  { %5709 = vmax.xlane.f32.xlu1 %v5708_v37 }
0x1185   :  { %5718 = vmax.xlane.f32.xlu0 %v5717_v39 }
0x1186   :  { %5715 = vmax.xlane.f32.xlu1 %v5714_v40 }
0x1206   :  { %v5701_v41 = vpop.xlane.xlu0 %5700 }
0x1207   :  { %v5721_v44 = vsub.f32 %v5432_v16, %v5701_v41  ;;  %v5698_v45 = vpop.xlane.xlu1 %5697 }
0x1208   :  { %v5720_v46 = vsub.f32 %v5427_v26, %v5698_v45 }
0x1209   :  { %v5730_v47 = vmul.f32 1.442695, %v5721_v44 }
0x120a   :  { %v5728_v48 = vmul.f32 1.442695, %v5720_v46  ;;  %v5707_v49 = vpop.xlane.xlu0 %5706 }
0x120b   :  { %15883 = vpow2.f32 %v5730_v47  ;;  %v5723_v50 = vsub.f32 %v5519_v18, %v5707_v49  ;;  %v5704_v51 = vpop.xlane.xlu1 %5703 }
0x120c   :  { %15885 = vpow2.f32 %v5728_v48  ;;  %v5722_v52 = vsub.f32 %v5514_v22, %v5704_v51 }
0x120d   :  { %v5734_v56 = vmul.f32 1.442695, %v5723_v50 }
0x120e   :  { %v5732_v57 = vmul.f32 1.442695, %v5722_v52  ;;  %v5713_v14 = vpop.xlane.xlu0 %5712 }
0x120f   :  { %15887 = vpow2.f32 %v5734_v56  ;;  %v5725_v61 = vsub.f32 %v5606_v28, %v5713_v14  ;;  %v5710_v62 = vpop.xlane.xlu1 %5709 }
0x1210   :  { %15889 = vpow2.f32 %v5732_v57  ;;  %v5724_v38 = vsub.f32 %v5601_v32, %v5710_v62 }
0x1211   :  { %v5738_v63 = vmul.f32 1.442695, %v5725_v61 }
0x1212   :  { %v5736_v0 = vmul.f32 1.442695, %v5724_v38  ;;  %v5719_v1 = vpop.xlane.xlu0 %5718 }
0x1213   :  { %15891 = vpow2.f32 %v5738_v63  ;;  %v5727_v2 = vsub.f32 %v5693_v35, %v5719_v1  ;;  %v5716_v4 = vpop.xlane.xlu1 %5715 }
0x1214   :  { %15893 = vpow2.f32 %v5736_v0  ;;  %v5726_v5 = vsub.f32 %v5688_v58, %v5716_v4  ;;  %v4133_v0 = vrot.slane %v16945_v6, %v16648_v21 }
0x1215   :  { %v15884_v15 = vpop.eup %15883  ;;  %v5742_v19 = vmul.f32 1.442695, %v5727_v2 }
0x1216   :  { %v15886_v7 = vpop.eup %15885  ;;  %v5740_v8 = vmul.f32 1.442695, %v5726_v5  ;;  %v5747_v13 = vsel %vm1531_vm5, %v15884_v15, 0.0 }
0x1217   :  { %15895 = vpow2.f32 %v5742_v19  ;;  %5748 = vadd.xlane.f32.xlu0 %v5747_v13  ;;  %v5744_v16 = vsel %vm1531_vm5, %v15886_v7, 0.0 }
0x1218   :  { %15897 = vpow2.f32 %v5740_v8  ;;  %5745 = vadd.xlane.f32.xlu1 %v5744_v16 }
0x1219   :  { %v15888_v17 = vpop.eup %15887 }
0x121a   :  { %v15890_v26 = vpop.eup %15889  ;;  %v5753_v18 = vsel %vm1531_vm5, %v15888_v17, 0.0 }
0x121b   :  { %5754 = vadd.xlane.f32.xlu0 %v5753_v18  ;;  %v5750_v33 = vsel %vm1531_vm5, %v15890_v26, 0.0 }
0x121c   :  { %5751 = vadd.xlane.f32.xlu1 %v5750_v33 }
0x121d   :  { %v15892_v22 = vpop.eup %15891 }
0x121e   :  { %v15894_v34 = vpop.eup %15893  ;;  %v5759_v36 = vsel %vm1531_vm5, %v15892_v22, 0.0 }
0x121f   :  { %5760 = vadd.xlane.f32.xlu0 %v5759_v36  ;;  %v5756_v25 = vsel %vm1531_vm5, %v15894_v34, 0.0 }
0x1220   :  { %5757 = vadd.xlane.f32.xlu1 %v5756_v25 }
0x1221   :  { %v15896_v27 = vpop.eup %15895 }
0x1222   :  { %v15898_v28 = vpop.eup %15897  ;;  %v5765_v29 = vsel %vm1531_vm5, %v15896_v27, 0.0 }
0x1223   :  { %5766 = vadd.xlane.f32.xlu0 %v5765_v29  ;;  %v5762_v32 = vsel %vm1531_vm5, %v15898_v28, 0.0 }
0x1224   :  { %5763 = vadd.xlane.f32.xlu1 %v5762_v32 }
0x12a4   :  { %v5749_v35 = vpop.xlane.xlu0 %5748 }
0x12a5   :  { %15899 = vrcp.f32 %v5749_v35  ;;  %v5746_v59 = vpop.xlane.xlu1 %5745 }
0x12a6   :  { %15901 = vrcp.f32 %v5746_v59 }
0x12a8   :  { %v5755_v37 = vpop.xlane.xlu0 %5754 }
0x12a9   :  { %v5752_v58 = vpop.xlane.xlu1 %5751 }
0x12aa   :  { %15903 = vrcp.f32 %v5752_v58 }
0x12ab   :  { %15905 = vrcp.f32 %v5755_v37 }
0x12ac   :  { %v5761_v46 = vpop.xlane.xlu0 %5760 }
0x12ad   :  { %v5758_v39 = vpop.xlane.xlu1 %5757 }
0x12ae   :  { %15907 = vrcp.f32 %v5758_v39 }
0x12af   :  { %v15900_v40 = vpop.eup %15899  ;;  %15909 = vrcp.f32 %v5761_v46  ;;  %v12388_v46 = vld [vmem:[%s18465_s17 + $0xc8] sm:$0xff] }
0x12b0   :  { %v15902_v41 = vpop.eup %15901  ;;  %v5777_v45 = vmul.f32 %v15900_v40, %v15884_v15  ;;  %v5767_v56 = vpop.xlane.xlu0 %5766  ;;  %v4207_v15 = vadd.f32 %v17274_v20, %v4133_v0  ;;  %v12379_v40 = vld [vmem:[%s18465_s17 + $0x80] sm:$0xff] }
0x12b1   :  { %v5776_v44 = vmul.f32 %v15902_v41, %v15886_v7  ;;  %v5764_v47 = vpop.xlane.xlu1 %5763  ;;  %v12380_v41 = vld [vmem:[%s18465_s17 + $0x88] sm:$0xff] }
0x12b2   :  { %15911 = vrcp.f32 %v5764_v47 }
0x12b3   :  { %14121 = vmatprep.mubr.msk.f32.mxu0 %vm1531_vm5, %v5776_v44  ;;  %15913 = vrcp.f32 %v5767_v56  ;;  %v12387_v44 = vld [vmem:[%s18465_s17 + $0xc0] sm:$0xff] }
0x12b4   :  { %v15904_v48 = vpop.eup %15903  ;;  %14122 = vmatmul.mubr.msk.f32.vlgmr.msra.gmra.mrb[56].mxu0 %vm1531_vm5, %v5777_v45  ;;  %v15300_v45 = vpack.c.bf16 %v12380_v41, %v12379_v40  ;;  %v15316_v47 = vpack.c.bf16 %v12388_v46, %v12387_v44  ;;  %v12408_v44 = vld [vmem:[%s18467_s19 + $0xc8] sm:$0xff] }
0x12b5   :  { %15291 = vmatpush3.bf16.msra.mxu0 %v17281_v30  ;;  %v5778_v49 = vmul.f32 %v15904_v48, %v15890_v26  ;;  %v15906_v50 = vpop.eup %15905  ;;  %v12381_v48 = vld [vmem:[%s18465_s17 + $0x90] sm:$0xff] }
0x12b6   :  { %15293 = vmatprep.subr.bf16.mxu0 %v17313_v3  ;;  %v5779_v52 = vmul.f32 %v15906_v50, %v15888_v17  ;;  %v4215_v17 = vadd.f32 %v4207_v15, %v17035_v23  ;;  %15301 = vmatprep.subr.bf16.mxu1 %v15300_v45  ;;  %v12389_v50 = vld [vmem:[%s18465_s17 + $0xd0] sm:$0xff] }
0x12b7   :  { %14128 = vmatprep.mubr.msk.f32.mxu0 %vm1531_vm5, %v5778_v49  ;;  %15303 = vmatpush3.bf16.msra.mxu1 %v15300_v45  ;;  %v12382_v49 = vld [vmem:[%s18465_s17 + $0x98] sm:$0xff] }
0x12b8   :  { %v15908_v51 = vpop.eup %15907  ;;  %v4217_v20 = vsel %vm257_vm2, %v4215_v17, 0.0 }
0x12b9   :  { %v5780_v57 = vmul.f32 %v15908_v51, %v15894_v34  ;;  %v15910_v30 = vpop.eup %15909  ;;  %v15304_v51 = vpack.c.bf16 %v12382_v49, %v12381_v48  ;;  %v12393_v49 = vld [vmem:[%s18465_s17 + $0xf0] sm:$0xff] }
0x12ba   :  { %v5781_v61 = vmul.f32 %v15910_v30, %v15892_v22  ;;  %v12384_v30 = vld [vmem:[%s18465_s17 + $0xa8] sm:$0xff] }
0x12bb   :  { %15305 = vmatprep.subr.bf16.mxu1 %v15304_v51 }
0x12bc   :  { %14129 = vmatmul.mubr.msk.f32.vlgmr.msra.gmra.mrb[56].mxu0 %vm1531_vm5, %v5779_v52  ;;  %v15912_v14 = vpop.eup %15911  ;;  %v12390_v52 = vld [vmem:[%s18465_s17 + $0xd8] sm:$0xff]  ;;  %15307 = vmatpush3.bf16.msra.mxu1 %v15304_v51  ;;  %v12409_v51 = vld [vmem:[%s18467_s19 + $0xd0] sm:$0xff] }
0x12bd   :  { %15295 = vmatpush3.bf16.msra.mxu0 %v17313_v3  ;;  %14135 = vmatprep.mubr.msk.f32.mxu0 %vm1531_vm5, %v5780_v57  ;;  %v5782_v62 = vmul.f32 %v15912_v14, %v15898_v28  ;;  %v15914_v38 = vpop.eup %15913  ;;  %v17353_v3 = vld [vmem:[%s18472_s24] sm:$0xff]  ;;  %v15320_v56 = vpack.c.bf16 %v12390_v52, %v12389_v50  ;;  %v12394_v50 = vld [vmem:[%s18465_s17 + $0xf8] sm:$0xff] }
0x12be   :  { %15297 = vmatprep.subr.bf16.mxu0 %v17290_v43  ;;  %v5783_v63 = vmul.f32 %v15914_v38, %v15896_v27  ;;  %v6117_v1 = vrot.slane %v17353_v3, %v16579_v10  ;;  %v12383_v57 = vld [vmem:[%s18465_s17 + $0xa0] sm:$0xff]  ;;  %v12410_v52 = vld [vmem:[%s18467_s19 + $0xd8] sm:$0xff] }
0x12bf   :  { %v12399_v14 = vld [vmem:[%s18467_s19 + $0x80] sm:$0xff] }
0x12c4   :  { %14136 = vmatmul.mubr.msk.f32.vlgmr.msra.gmra.mrb[56].mxu0 %vm1531_vm5, %v5781_v61  ;;  %v15308_v61 = vpack.c.bf16 %v12384_v30, %v12383_v57  ;;  %v15328_v57 = vpack.c.bf16 %v12394_v50, %v12393_v49  ;;  %v15352_v30 = vpack.c.bf16 %v12410_v52, %v12409_v51 }
0x12c5   :  { %15299 = vmatpush3.bf16.msra.mxu0 %v17290_v43  ;;  %14142 = vmatprep.mubr.msk.f32.mxu0 %vm1531_vm5, %v5782_v62  ;;  %v4212_v43 = vadd.f32 %v17272_v31, %v4133_v0  ;;  %v12400_v62 = vld [vmem:[%s18467_s19 + $0x88] sm:$0xff] }
0x12c6   :  { %15317 = vmatprep.subr.bf16.mxu0 %v15316_v47  ;;  %v15332_v38 = vpack.c.bf16 %v12400_v62, %v12399_v14  ;;  %15309 = vmatprep.subr.bf16.mxu1 %v15308_v61  ;;  %v12403_v14 = vld [vmem:[%s18467_s19 + $0xa0] sm:$0xff] }
0x12c7   :  { %v4216_v16 = vadd.f32 %v4212_v43, %v17037_v24  ;;  %v12415_v62 = vld [vmem:[%s18468_s20 + $0x80] sm:$0xff] }
0x12c9   :  { %v4220_v31 = vsel %vm257_vm2, %v4216_v16, 0.0 }
0x12cc   :  { %14143 = vmatmul.mubr.msk.f32.vlgmr.msra.gmra.mrb[56].mxu0 %vm1531_vm5, %v5783_v63 }
0x12cd   :  { %15319 = vmatpush3.bf16.msra.mxu0 %v15316_v47 }
0x12ce   :  { %15321 = vmatprep.subr.bf16.mxu0 %v15320_v56 }
0x12d1   :  { %15323 = vmatpush3.bf16.msra.mxu0 %v15320_v56 }
0x12d2   :  { %15333 = vmatprep.subr.bf16.mxu0 %v15332_v38 }
0x139f   :  { %v14144_v2 = vpop.f32.mrb[56].mxu0 }
0x13a0   :  { %v6119_v4 = vadd.f32 %v14144_v2, %v6117_v1  ;;  %v6099_v5 = vpop.f32.mrb[57].mxu0 }
0x13a1   :  { %v6118_v19 = vadd.f32 %v6117_v1, %v6099_v5 }
0x13a2   :  { %v6121_v7 = vadd.f32 %v6119_v4, %v17099_v42 }
0x13a3   :  { %v6120_v8 = vadd.f32 %v6118_v19, %v17097_v60 }
0x13a4   :  { %v6125_v13 = vsel %vm257_vm2, %v6121_v7, 0.0 }
0x13a5   :  { %6126 = vadd.xlane.f32.xlu0 %v6125_v13  ;;  %v6122_v6 = vsel %vm257_vm2, %v6120_v8, 0.0 }
0x13a6   :  { %6123 = vadd.xlane.f32.xlu1 %v6122_v6 }
0x13a9   :  { %4221 = vadd.xlane.f32.xlu0 %v4220_v31 }
0x13aa   :  { %4218 = vadd.xlane.f32.xlu1 %v4217_v20 }
0x1432   :  { %v6127_v26 = vpop.xlane.xlu0 %6126 }
0x1433   :  { %v6129_v42 = vmul.f32 0.03125, %v6127_v26  ;;  %v6124_v18 = vpop.xlane.xlu1 %6123  ;;  %v6157_v26 = vrot.slane %v17353_v3, %v16616_v55 }
0x1434   :  { %v6128_v60 = vmul.f32 0.03125, %v6124_v18 }
0x1435   :  { %v17369_v33 = vsub.f32 %v6121_v7, %v6129_v42 }
0x1436   :  { %v17371_v22 = vsub.f32 %v6120_v8, %v6128_v60  ;;  %v4222_v24 = vpop.xlane.xlu0 %4221  ;;  %v16039_v60 = vld [vmem:[%s18464_s16 + $0x8] sm:$0x3f] }
0x1437   :  { %v4224_v34 = vmul.f32 0.03125, %v4222_v24  ;;  %v4219_v36 = vpop.xlane.xlu1 %4218  ;;  %v6133_v23 = vmul.f32 %v17369_v33, %v17369_v33  ;;  %v4246_v24 = vrot.slane %v16039_v60, %v16693_v11 }
0x1438   :  { %v4223_v25 = vmul.f32 0.03125, %v4219_v36  ;;  %v6132_v27 = vmul.f32 %v17371_v22, %v17371_v22  ;;  %v12385_v36 = vld [vmem:[%s18465_s17 + $0xb0] sm:$0xff] }
0x1439   :  { %v17377_v28 = vsub.f32 %v4216_v16, %v4224_v34  ;;  %v6137_v29 = vsel %vm257_vm2, %v6133_v23, 0.0  ;;  %v6151_v16 = vrot.slane %v17353_v3, %v16613_v53  ;;  %v12401_v23 = vld [vmem:[%s18467_s19 + $0x90] sm:$0xff] }
0x143a   :  { %v17380_v32 = vsub.f32 %v4215_v17, %v4223_v25  ;;  %6138 = vadd.xlane.f32.xlu0 %v6137_v29  ;;  %v6134_v35 = vsel %vm257_vm2, %v6132_v27, 0.0  ;;  %v12402_v25 = vld [vmem:[%s18467_s19 + $0x98] sm:$0xff]  ;;  %v4252_v27 = vrot.slane %v16039_v60, %v16696_v12  ;;  %v12420_v60 = vld [vmem:[%s18468_s20 + $0xa8] sm:$0xff] }
0x143b   :  { %6135 = vadd.xlane.f32.xlu1 %v6134_v35  ;;  %v4228_v59 = vmul.f32 %v17377_v28, %v17377_v28  ;;  %v15336_v41 = vpack.c.bf16 %v12402_v25, %v12401_v23  ;;  %v12427_v23 = vld [vmem:[%s18468_s20 + $0xe0] sm:$0xff]  ;;  %v12428_v25 = vld [vmem:[%s18468_s20 + $0xe8] sm:$0xff] }
0x143c   :  { %v4227_v58 = vmul.f32 %v17380_v32, %v17380_v32 }
0x143d   :  { %v4232_v37 = vsel %vm257_vm2, %v4228_v59, 0.0 }
0x143e   :  { %4233 = vadd.xlane.f32.xlu0 %v4232_v37  ;;  %v4229_v39 = vsel %vm257_vm2, %v4227_v58, 0.0 }
0x143f   :  { %4230 = vadd.xlane.f32.xlu1 %v4229_v39  ;;  %v12391_v39 = vld [vmem:[%s18465_s17 + $0xe0] sm:$0xff] }
0x14c7   :  { %v6139_v63 = vpop.xlane.xlu0 %6138 }
0x14c8   :  { %v6141_v0 = vmul.f32 0.03125, %v6139_v63  ;;  %v6136_v1 = vpop.xlane.xlu1 %6135 }
0x14c9   :  { %v6140_v2 = vmul.f32 0.03125, %v6136_v1  ;;  %v12405_v1 = vld [vmem:[%s18467_s19 + $0xb0] sm:$0xff] }
0x14ca   :  { %v6143_v43 = vadd.f32 1e-05, %v6141_v0 }
0x14cb   :  { %v6142_v4 = vadd.f32 1e-05, %v6140_v2  ;;  %v4234_v5 = vpop.xlane.xlu0 %4233  ;;  %v12406_v2 = vld [vmem:[%s18467_s19 + $0xb8] sm:$0xff] }
0x14cc   :  { %15915 = vrsqrt.f32 %v6143_v43  ;;  %v4236_v15 = vmul.f32 0.03125, %v4234_v5  ;;  %v4231_v19 = vpop.xlane.xlu1 %4230  ;;  %v12417_v43 = vld [vmem:[%s18468_s20 + $0x90] sm:$0xff]  ;;  %v15344_v5 = vpack.c.bf16 %v12406_v2, %v12405_v1 }
0x14cd   :  { %15917 = vrsqrt.f32 %v6142_v4  ;;  %v4235_v7 = vmul.f32 0.03125, %v4231_v19  ;;  %v12418_v4 = vld [vmem:[%s18468_s20 + $0x98] sm:$0xff]  ;;  %v12412_v19 = vld [vmem:[%s18467_s19 + $0xe8] sm:$0xff] }
0x14ce   :  { %v4238_v8 = vadd.f32 1e-05, %v4236_v15  ;;  %v12411_v15 = vld [vmem:[%s18467_s19 + $0xe0] sm:$0xff] }
0x14cf   :  { %v4237_v13 = vadd.f32 1e-05, %v4235_v7  ;;  %v15368_v7 = vpack.c.bf16 %v12418_v4, %v12417_v43 }
0x14d0   :  { %15919 = vrsqrt.f32 %v4238_v8  ;;  %v12423_v8 = vld [vmem:[%s18468_s20 + $0xc0] sm:$0xff] }
0x14d1   :  { %15921 = vrsqrt.f32 %v4237_v13  ;;  %v12424_v13 = vld [vmem:[%s18468_s20 + $0xc8] sm:$0xff] }
0x14d6   :  { %v15916_v6 = vpop.eup %15915 }
0x14d7   :  { %v15918_v17 = vpop.eup %15917  ;;  %v6147_v31 = vmul.f32 %v15916_v6, %v17369_v33  ;;  %v12386_v33 = vld [vmem:[%s18465_s17 + $0xb8] sm:$0xff]  ;;  %v15380_v6 = vpack.c.bf16 %v12424_v13, %v12423_v8  ;;  %v12440_v8 = vld [vmem:[%s18466_s18 + $0x7] ss:$0 sm:$0xff] }
0x14d8   :  { %v6146_v20 = vmul.f32 %v15918_v17, %v17371_v22  ;;  %v15312_v37 = vpack.c.bf16 %v12386_v33, %v12385_v36  ;;  %v12413_v17 = vld [vmem:[%s18467_s19 + $0xf0] sm:$0xff]  ;;  %v12422_v33 = vld [vmem:[%s18468_s20 + $0xb8] sm:$0xff] }
0x14d9   :  { %v6153_v42 = vmul.f32 %v6151_v16, %v6147_v31  ;;  %v12414_v31 = vld [vmem:[%s18467_s19 + $0xf8] sm:$0xff]  ;;  %v12421_v36 = vld [vmem:[%s18468_s20 + $0xb0] sm:$0xff] }
0x14da   :  { %v15920_v18 = vpop.eup %15919  ;;  %v6152_v34 = vmul.f32 %v6151_v16, %v6146_v20  ;;  %v15356_v16 = vpack.c.bf16 %v12412_v19, %v12411_v15  ;;  %v12425_v20 = vld [vmem:[%s18468_s20 + $0xd0] sm:$0xff] }
0x14db   :  { %v15922_v22 = vpop.eup %15921  ;;  %v4242_v59 = vmul.f32 %v15920_v18, %v17377_v28  ;;  %v17452_v58 = vadd.f32 %v6157_v26, %v6153_v42  ;;  %v12407_v28 = vld [vmem:[%s18467_s19 + $0xc0] sm:$0xff]  ;;  %v15360_v42 = vpack.c.bf16 %v12414_v31, %v12413_v17 }
0x14dc   :  { %v4241_v29 = vmul.f32 %v15922_v22, %v17380_v32  ;;  %v17449_v35 = vadd.f32 %v6157_v26, %v6152_v34  ;;  %v12392_v32 = vld [vmem:[%s18465_s17 + $0xe8] sm:$0xff]  ;;  %v15348_v48 = vpack.c.bf16 %v12408_v44, %v12407_v28  ;;  %v12426_v26 = vld [vmem:[%s18468_s20 + $0xd8] sm:$0xff]  ;;  %v12419_v18 = vld [vmem:[%s18468_s20 + $0xa0] sm:$0xff]  ;;  %v15376_v22 = vpack.c.bf16 %v12422_v33, %v12421_v36 }
0x14dd   :  { %v4248_v46 = vmul.f32 %v4246_v24, %v4242_v59  ;;  %v15324_v47 = vpack.c.bf16 %v12392_v32, %v12391_v39  ;;  %v15372_v34 = vpack.c.bf16 %v12420_v60, %v12419_v18  ;;  %v12430_v59 = vld [vmem:[%s18468_s20 + $0xf8] sm:$0xff]  ;;  %v12431_v39 = vld [vmem:[%s18466_s18 + $0x4] ss:$0 sm:$0xff] }
0x14de   :  { %v4247_v40 = vmul.f32 %v4246_v24, %v4241_v29  ;;  %14153 = vmatprep.mubr.msk.f32.mxu1 %vm257_vm2, %v17449_v35  ;;  %14175 = vmatprep.mubr.msk.f32.mxu0 %vm257_vm2, %v17449_v35  ;;  %v15384_v24 = vpack.c.bf16 %v12426_v26, %v12425_v20  ;;  %v12429_v29 = vld [vmem:[%s18468_s20 + $0xf0] sm:$0xff] }
0x14df   :  { %14154 = vmatmul.mubr.msk.f32.vlgmr.msra.gmra.mrb[58].mxu1 %vm257_vm2, %v17452_v58  ;;  %14176 = vmatmul.mubr.msk.f32.vlgmr.msra.gmra.mrb[58].mxu0 %vm257_vm2, %v17452_v58  ;;  %v17492_v56 = vadd.f32 %v4252_v27, %v4248_v46  ;;  %v12434_v46 = vld [vmem:[%s18466_s18 + $0x5] ss:$0 sm:$0xff] }
0x14e0   :  { %v17474_v45 = vadd.f32 %v4252_v27, %v4247_v40  ;;  %15311 = vmatpush3.bf16.msra.mxu1 %v15308_v61  ;;  %15335 = vmatpush3.bf16.msra.mxu0 %v15332_v38  ;;  %v12404_v61 = vld [vmem:[%s18467_s19 + $0xa8] sm:$0xff]  ;;  %v15388_v27 = vpack.c.bf16 %v12428_v25, %v12427_v23  ;;  %v4362_v23 = vld [vmem:[%s18519_s11] sm:$0xff] }
0x14e1   :  { %14164 = vmatprep.mubr.msk.f32.mxu1 %vm257_vm2, %v17449_v35  ;;  %15313 = vmatprep.subr.bf16.mxu1 %v15312_v37  ;;  %v12416_v38 = vld [vmem:[%s18468_s20 + $0x88] sm:$0xff]  ;;  %v15340_v63 = vpack.c.bf16 %v12404_v61, %v12403_v14 }
0x14e2   :  { %15337 = vmatprep.subr.bf16.mxu0 %v15336_v41  ;;  %14197 = vmatprep.mubr.msk.f32.mxu0 %vm257_vm2, %v17474_v45  ;;  %v15364_v0 = vpack.c.bf16 %v12416_v38, %v12415_v62 }
0x14e4   :  { %15315 = vmatpush3.bf16.msra.mxu1 %v15312_v37  ;;  %15339 = vmatpush3.bf16.msra.mxu0 %v15336_v41  ;;  %v15392_v37 = vpack.c.bf16 %v12430_v59, %v12429_v29 }
0x14e5   :  { %15325 = vmatprep.subr.bf16.mxu1 %v15324_v47  ;;  %15349 = vmatprep.subr.bf16.mxu0 %v15348_v48 }
0x14e7   :  { %14165 = vmatmul.mubr.msk.f32.vlgmr.msra.gmra.mrb[60].mxu1 %vm257_vm2, %v17452_v58  ;;  %14198 = vmatmul.mubr.msk.f32.vlgmr.msra.gmra.mrb[60].mxu0 %vm257_vm2, %v17492_v56 }
0x14e8   :  { %15327 = vmatpush3.bf16.msra.mxu1 %v15324_v47  ;;  %14186 = vmatprep.mubr.msk.f32.mxu1 %vm257_vm2, %v17449_v35 }
0x14e9   :  { %15351 = vmatpush3.bf16.msra.mxu0 %v15348_v48  ;;  %14219 = vmatprep.mubr.msk.f32.mxu0 %vm257_vm2, %v17474_v45 }
0x14ea   :  { %15329 = vmatprep.subr.bf16.mxu1 %v15328_v57  ;;  %15353 = vmatprep.subr.bf16.mxu0 %v15352_v30 }
0x14ec   :  { %15331 = vmatpush3.bf16.msra.mxu1 %v15328_v57  ;;  %v12437_v57 = vld [vmem:[%s18466_s18 + $0x6] ss:$0 sm:$0xff] }
0x14ed   :  { %15355 = vmatpush3.bf16.msra.mxu0 %v15352_v30  ;;  %15341 = vmatprep.subr.bf16.mxu1 %v15340_v63 }
0x14ee   :  { %15365 = vmatprep.subr.bf16.mxu0 %v15364_v0 }
0x14ef   :  { %14187 = vmatmul.mubr.msk.f32.vlgmr.msra.gmra.mrb[62].mxu1 %vm257_vm2, %v17452_v58 }
0x14f0   :  { %14220 = vmatmul.mubr.msk.f32.vlgmr.msra.gmra.mrb[62].mxu0 %vm257_vm2, %v17492_v56  ;;  %15343 = vmatpush3.bf16.msra.mxu1 %v15340_v63 }
0x14f1   :  { %14208 = vmatprep.mubr.msk.f32.mxu1 %vm257_vm2, %v17474_v45  ;;  %15367 = vmatpush3.bf16.msra.mxu0 %v15364_v0 }
0x14f2   :  { %14241 = vmatprep.mubr.msk.f32.mxu0 %vm257_vm2, %v17474_v45  ;;  %15345 = vmatprep.subr.bf16.mxu1 %v15344_v5 }
0x14f3   :  { %15369 = vmatprep.subr.bf16.mxu0 %v15368_v7 }
0x14f4   :  { %15347 = vmatpush3.bf16.msra.mxu1 %v15344_v5 }
0x14f5   :  { %15371 = vmatpush3.bf16.msra.mxu0 %v15368_v7  ;;  %15357 = vmatprep.subr.bf16.mxu1 %v15356_v16 }
0x14f6   :  { %15381 = vmatprep.subr.bf16.mxu0 %v15380_v6 }
0x14f7   :  { %14209 = vmatmul.mubr.msk.f32.vlgmr.msra.gmra.mrb[64].mxu1 %vm257_vm2, %v17492_v56 }
0x14f8   :  { %14242 = vmatmul.mubr.msk.f32.vlgmr.msra.gmra.mrb[64].mxu0 %vm257_vm2, %v17492_v56  ;;  %15359 = vmatpush3.bf16.msra.mxu1 %v15356_v16 }
0x14f9   :  { %14230 = vmatprep.mubr.msk.f32.mxu1 %vm257_vm2, %v17474_v45  ;;  %15383 = vmatpush3.bf16.msra.mxu0 %v15380_v6 }
0x14fa   :  { %14263 = vmatprep.mubr.msk.f32.mxu0 %vm257_vm2, %v17474_v45  ;;  %15361 = vmatprep.subr.bf16.mxu1 %v15360_v42 }
0x14fb   :  { %15385 = vmatprep.subr.bf16.mxu0 %v15384_v24 }
0x14fc   :  { %15363 = vmatpush3.bf16.msra.mxu1 %v15360_v42 }
0x14fd   :  { %15387 = vmatpush3.bf16.msra.mxu0 %v15384_v24  ;;  %15373 = vmatprep.subr.bf16.mxu1 %v15372_v34 }
0x14ff   :  { %14231 = vmatmul.mubr.msk.f32.vlgmr.msra.gmra.mrb[66].mxu1 %vm257_vm2, %v17492_v56 }
0x1500   :  { %14264 = vmatmul.mubr.msk.f32.vlgmr.msra.gmra.mrb[66].mxu0 %vm257_vm2, %v17492_v56  ;;  %15375 = vmatpush3.bf16.msra.mxu1 %v15372_v34 }
0x1501   :  { %14252 = vmatprep.mubr.msk.f32.mxu1 %vm257_vm2, %v17474_v45  ;;  %15377 = vmatprep.subr.bf16.mxu1 %v15376_v22 }
0x1504   :  { %15379 = vmatpush3.bf16.msra.mxu1 %v15376_v22  ;;  %v4363_v22 = vld [vmem:[%s18519_s11 + $0x8] sm:$0xff] }
0x1505   :  { %15389 = vmatprep.subr.bf16.mxu1 %v15388_v27 }
0x1507   :  { %14253 = vmatmul.mubr.msk.f32.vlgmr.msra.gmra.mrb[68].mxu1 %vm257_vm2, %v17492_v56 }
0x1508   :  { %15391 = vmatpush3.bf16.msra.mxu1 %v15388_v27  ;;  %14274 = vmatprep.mubr.msk.f32.mxu1 %vm257_vm2, %v17474_v45 }
0x1509   :  { %15393 = vmatprep.subr.bf16.mxu1 %v15392_v37 }
0x150c   :  { %15395 = vmatpush3.bf16.msra.mxu1 %v15392_v37 }
0x150f   :  { %14275 = vmatmul.mubr.msk.f32.vlgmr.msra.gmra.mrb[70].mxu1 %vm257_vm2, %v17492_v56 }
0x15b2   :  { %v14155_v40 = vpop.f32.mrb[58].mxu1  ;;  %v14177_v41 = vpop.f32.mrb[58].mxu0 }
0x15b3   :  { %v6294_v32 = vpop.f32.mrb[59].mxu1  ;;  %v6456_v28 = vpop.f32.mrb[59].mxu0  ;;  %v6300_v62 = vadd.f32 %v14155_v40, %v12431_v39  ;;  %v6462_v15 = vadd.f32 %v14177_v41, %v12437_v57 }
0x15b4   :  { %v6295_v44 = vadd.f32 %v12431_v39, %v6294_v32  ;;  %v6457_v63 = vadd.f32 %v12437_v57, %v6456_v28 }
0x15b6   :  { %14281 = vmatprep.mubr.msk.f32.mxu0 %vm1182_vm3, %v6295_v44 }
0x15ba   :  { %v14166_v47 = vpop.f32.mrb[60].mxu1  ;;  %v14199_v48 = vpop.f32.mrb[60].mxu0 }
0x15bb   :  { %v6375_v49 = vpop.f32.mrb[61].mxu1  ;;  %v6618_v50 = vpop.f32.mrb[61].mxu0  ;;  %v6381_v31 = vadd.f32 %v14166_v47, %v12434_v46 }
0x15bc   :  { %v6376_v51 = vadd.f32 %v12434_v46, %v6375_v49  ;;  %v15396_v52 = vpack.c.bf16 %v14199_v48, %v6618_v50 }
0x15be   :  { %15398 = vmatprep.subr.msk.bf16.mxu0 %vm16488_vm4, %v15396_v52  ;;  %14288 = vmatprep.mubr.msk.f32.mxu1 %vm1182_vm3, %v6376_v51 }
0x15bf   :  { %15401 = vmatpush3.bf16.xpose.msk.msra.mxu0 %vm16488_vm4, %v15396_v52 }
0x15c2   :  { %v14188_v30 = vpop.f32.mrb[62].mxu1 }
0x15c3   :  { %v14221_v14 = vpop.f32.mrb[62].mxu0  ;;  %v6537_v61 = vpop.f32.mrb[63].mxu1  ;;  %v6543_v24 = vadd.f32 %v14188_v30, %v12440_v8 }
0x15c4   :  { %v6768_v38 = vpop.f32.mrb[63].mxu0  ;;  %v6538_v26 = vadd.f32 %v12440_v8, %v6537_v61 }
0x15c5   :  { %v15408_v0 = vpack.c.bf16 %v14221_v14, %v6768_v38 }
0x15c6   :  { %14282 = vmatmul.mubr.msk.f32.vlgmr.msra.gmra.mrb[68].mxu0 %vm1182_vm3, %v6300_v62 }
0x15c7   :  { %15410 = vmatprep.subr.msk.bf16.mxu0 %vm16488_vm4, %v15408_v0  ;;  %14295 = vmatprep.mubr.msk.f32.mxu0 %vm1182_vm3, %v6457_v63 }
0x15c8   :  { %15413 = vmatpush3.bf16.xpose.msk.msra.mxu0 %vm16488_vm4, %v15408_v0 }
0x15ca   :  { %v14210_v1 = vpop.f32.mrb[64].mxu1 }
0x15cb   :  { %v14243_v2 = vpop.f32.mrb[64].mxu0  ;;  %v6693_v43 = vpop.f32.mrb[65].mxu1 }
0x15cc   :  { %v15402_v4 = vpack.c.bf16 %v14210_v1, %v6693_v43  ;;  %v6918_v5 = vpop.f32.mrb[65].mxu0 }
0x15cd   :  { %v15420_v19 = vpack.c.bf16 %v14243_v2, %v6918_v5 }
0x15ce   :  { %15404 = vmatprep.subr.msk.bf16.mxu1 %vm16488_vm4, %v15402_v4 }
0x15cf   :  { %14296 = vmatmul.mubr.msk.f32.vlgmr.msra.gmra.mrb[70].mxu0 %vm1182_vm3, %v6462_v15  ;;  %15421 = vmatprep.subr.bf16.mxu0 %v15420_v19 }
0x15d0   :  { %15407 = vmatpush3.bf16.xpose.msk.msra.mxu1 %vm16488_vm4, %v15402_v4  ;;  %15423 = vmatpush3.bf16.msra.mxu0 %v15420_v19 }
0x15d2   :  { %v14232_v7 = vpop.f32.mrb[66].mxu1 }
0x15d3   :  { %v14265_v13 = vpop.f32.mrb[66].mxu0  ;;  %v6843_v16 = vpop.f32.mrb[67].mxu1 }
0x15d4   :  { %v15414_v6 = vpack.c.bf16 %v14232_v7, %v6843_v16  ;;  %v7068_v17 = vpop.f32.mrb[67].mxu0 }
0x15d5   :  { %v17631_v20 = vpack.c.bf16 %v14265_v13, %v7068_v17 }
0x15d6   :  { %15416 = vmatprep.subr.msk.bf16.mxu1 %vm16488_vm4, %v15414_v6 }
0x15d7   :  { %14289 = vmatmul.mubr.msk.f32.vlgmr.msra.gmra.mrb[72].mxu1 %vm1182_vm3, %v6381_v31 }
0x15d8   :  { %15419 = vmatpush3.bf16.xpose.msk.msra.mxu1 %vm16488_vm4, %v15414_v6  ;;  %14302 = vmatprep.mubr.msk.f32.mxu1 %vm1182_vm3, %v6538_v26 }
0x15da   :  { %v14254_v42 = vpop.f32.mrb[68].mxu1 }
0x15db   :  { %v6993_v18 = vpop.f32.mrb[69].mxu1 }
0x15dc   :  { %v17639_v60 = vpack.c.bf16 %v14254_v42, %v6993_v18 }
0x15de   :  { %15425 = vmatprep.subr.bf16.mxu0 %v17639_v60 }
0x15df   :  { %14303 = vmatmul.mubr.msk.f32.vlgmr.msra.gmra.mrb[74].mxu1 %vm1182_vm3, %v6543_v24 }
0x15e2   :  { %v14276_v34 = vpop.f32.mrb[70].mxu1 }
0x15e3   :  { %v7143_v36 = vpop.f32.mrb[71].mxu1 }
0x15e4   :  { %v17643_v33 = vpack.c.bf16 %v14276_v34, %v7143_v36 }
0x1699   :  { %v14283_v25 = vpop.f32.mrb[68].mxu0 }
0x169a   :  { %v7236_v27 = vadd.f32 %v14283_v25, %v4363_v22  ;;  %v7230_v29 = vpop.f32.mrb[69].mxu0 }
0x169b   :  { %v7231_v59 = vadd.f32 %v7230_v29, %v4362_v23 }
0x169c   :  { %v7503_v37 = vsel %vm1531_vm5, %v7236_v27, -inf }
0x169d   :  { %7504 = vmax.xlane.f32.xlu0 %v7503_v37  ;;  %v7500_v39 = vsel %vm1531_vm5, %v7231_v59, -inf }
0x169e   :  { %7501 = vmax.xlane.f32.xlu1 %v7500_v39 }
0x16a2   :  { %v14297_v40 = vpop.f32.mrb[70].mxu0 }
0x16a3   :  { %v7404_v41 = vpop.f32.mrb[71].mxu0  ;;  %v7410_v47 = vadd.f32 %v14297_v40, %v4363_v22 }
0x16a4   :  { %v7405_v49 = vadd.f32 %v7404_v41, %v4362_v23 }
0x16a5   :  { %v7515_v51 = vsel %vm1531_vm5, %v7410_v47, -inf }
0x16a6   :  { %v7512_v57 = vsel %vm1531_vm5, %v7405_v49, -inf }
0x16aa   :  { %v14290_v32 = vpop.f32.mrb[72].mxu1 }
0x16ab   :  { %v7323_v28 = vadd.f32 %v14290_v32, %v4363_v22  ;;  %v7317_v44 = vpop.f32.mrb[73].mxu1 }
0x16ac   :  { %v7318_v46 = vadd.f32 %v7317_v44, %v4362_v23 }
0x16ad   :  { %v7509_v48 = vsel %vm1531_vm5, %v7323_v28, -inf }
0x16ae   :  { %7510 = vmax.xlane.f32.xlu0 %v7509_v48  ;;  %v7506_v50 = vsel %vm1531_vm5, %v7318_v46, -inf }
0x16af   :  { %7507 = vmax.xlane.f32.xlu1 %v7506_v50 }
0x16b2   :  { %v14304_v52 = vpop.f32.mrb[74].mxu1  ;;  %7516 = vmax.xlane.f32.xlu0 %v7515_v51 }
0x16b3   :  { %v7497_v30 = vadd.f32 %v14304_v52, %v4363_v22  ;;  %v7491_v14 = vpop.f32.mrb[75].mxu1  ;;  %7513 = vmax.xlane.f32.xlu1 %v7512_v57 }
0x16b4   :  { %v7492_v61 = vadd.f32 %v7491_v14, %v4362_v23 }
0x16b5   :  { %v7521_v62 = vsel %vm1531_vm5, %v7497_v30, -inf }
0x16b6   :  { %7522 = vmax.xlane.f32.xlu0 %v7521_v62  ;;  %v7518_v38 = vsel %vm1531_vm5, %v7492_v61, -inf }
0x16b7   :  { %7519 = vmax.xlane.f32.xlu1 %v7518_v38 }
0x172a   :  { %v7505_v63 = vpop.xlane.xlu0 %7504 }
0x172b   :  { %v7525_v0 = vsub.f32 %v7236_v27, %v7505_v63  ;;  %v7502_v1 = vpop.xlane.xlu1 %7501 }
0x172c   :  { %v7524_v2 = vsub.f32 %v7231_v59, %v7502_v1 }
0x172d   :  { %v7534_v43 = vmul.f32 1.442695, %v7525_v0 }
0x172e   :  { %v7532_v4 = vmul.f32 1.442695, %v7524_v2 }
0x172f   :  { %15923 = vpow2.f32 %v7534_v43 }
0x1730   :  { %15925 = vpow2.f32 %v7532_v4 }
0x1739   :  { %v15924_v5 = vpop.eup %15923 }
0x173a   :  { %v15926_v15 = vpop.eup %15925  ;;  %v7551_v19 = vsel %vm1531_vm5, %v15924_v5, 0.0 }
0x173b   :  { %v7511_v7 = vpop.xlane.xlu0 %7510  ;;  %7552 = vadd.xlane.f32.xlu0 %v7551_v19  ;;  %v7548_v8 = vsel %vm1531_vm5, %v15926_v15, 0.0 }
0x173c   :  { %v7527_v13 = vsub.f32 %v7323_v28, %v7511_v7  ;;  %v7508_v16 = vpop.xlane.xlu1 %7507  ;;  %7549 = vadd.xlane.f32.xlu1 %v7548_v8 }
0x173d   :  { %v7526_v6 = vsub.f32 %v7318_v46, %v7508_v16 }
0x173e   :  { %v7538_v17 = vmul.f32 1.442695, %v7527_v13 }
0x173f   :  { %v7536_v31 = vmul.f32 1.442695, %v7526_v6  ;;  %v7517_v26 = vpop.xlane.xlu0 %7516 }
0x1740   :  { %15927 = vpow2.f32 %v7538_v17  ;;  %v7529_v42 = vsub.f32 %v7410_v47, %v7517_v26  ;;  %v7514_v18 = vpop.xlane.xlu1 %7513 }
0x1741   :  { %15929 = vpow2.f32 %v7536_v31  ;;  %v7528_v24 = vsub.f32 %v7405_v49, %v7514_v18 }
0x1742   :  { %v7542_v34 = vmul.f32 1.442695, %v7529_v42 }
0x1743   :  { %v7540_v36 = vmul.f32 1.442695, %v7528_v24  ;;  %v7523_v22 = vpop.xlane.xlu0 %7522 }
0x1744   :  { %15931 = vpow2.f32 %v7542_v34  ;;  %v7531_v23 = vsub.f32 %v7497_v30, %v7523_v22  ;;  %v7520_v25 = vpop.xlane.xlu1 %7519 }
0x1745   :  { %15933 = vpow2.f32 %v7540_v36  ;;  %v7530_v27 = vsub.f32 %v7492_v61, %v7520_v25 }
0x1746   :  { %v7546_v29 = vmul.f32 1.442695, %v7531_v23 }
0x1747   :  { %v7544_v59 = vmul.f32 1.442695, %v7530_v27 }
0x1748   :  { %15935 = vpow2.f32 %v7546_v29 }
0x1749   :  { %15937 = vpow2.f32 %v7544_v59 }
0x174a   :  { %v15928_v37 = vpop.eup %15927 }
0x174b   :  { %v15930_v39 = vpop.eup %15929  ;;  %v7557_v40 = vsel %vm1531_vm5, %v15928_v37, 0.0 }
0x174c   :  { %7558 = vadd.xlane.f32.xlu0 %v7557_v40  ;;  %v7554_v41 = vsel %vm1531_vm5, %v15930_v39, 0.0 }
0x174d   :  { %7555 = vadd.xlane.f32.xlu1 %v7554_v41  ;;  %v7965_v41 = vld [vmem:[%s18469_s21 + $0x8] sm:$0xff] }
0x174e   :  { %v15932_v32 = vpop.eup %15931 }
0x174f   :  { %v15934_v28 = vpop.eup %15933  ;;  %v7563_v44 = vsel %vm1531_vm5, %v15932_v32, 0.0 }
0x1750   :  { %7564 = vadd.xlane.f32.xlu0 %v7563_v44  ;;  %v7560_v46 = vsel %vm1531_vm5, %v15934_v28, 0.0  ;;  %v7967_v44 = vld [vmem:[%s18469_s21 + $0x18] sm:$0xff] }
0x1751   :  { %7561 = vadd.xlane.f32.xlu1 %v7560_v46 }
0x1752   :  { %v15936_v47 = vpop.eup %15935 }
0x1753   :  { %v15938_v48 = vpop.eup %15937  ;;  %v7569_v49 = vsel %vm1531_vm5, %v15936_v47, 0.0 }
0x1754   :  { %7570 = vadd.xlane.f32.xlu0 %v7569_v49  ;;  %v7566_v50 = vsel %vm1531_vm5, %v15938_v48, 0.0 }
0x1755   :  { %7567 = vadd.xlane.f32.xlu1 %v7566_v50 }
0x17c8   :  { %v7553_v51 = vpop.xlane.xlu0 %7552 }
0x17c9   :  { %15939 = vrcp.f32 %v7553_v51  ;;  %v7550_v52 = vpop.xlane.xlu1 %7549 }
0x17ca   :  { %15941 = vrcp.f32 %v7550_v52 }
0x17d3   :  { %v15940_v57 = vpop.eup %15939 }
0x17d4   :  { %v15942_v30 = vpop.eup %15941  ;;  %v7581_v61 = vmul.f32 %v15940_v57, %v15924_v5 }
0x17d5   :  { %v7580_v14 = vmul.f32 %v15942_v30, %v15926_v15 }
0x17d7   :  { %14309 = vmatprep.mubr.msk.f32.mxu0 %vm1531_vm5, %v7580_v14 }
0x17d8   :  { %14310 = vmatmul.mubr.msk.f32.vlgmr.msra.gmra.mrb[72].mxu0 %vm1531_vm5, %v7581_v61  ;;  %v7955_v61 = vrot.slane %v17353_v3, %v16693_v11 }
0x17d9   :  { %v7559_v62 = vpop.xlane.xlu0 %7558  ;;  %15427 = vmatpush3.bf16.msra.mxu0 %v17639_v60 }
0x17da   :  { %15943 = vrcp.f32 %v7559_v62  ;;  %15429 = vmatprep.subr.bf16.mxu0 %v17631_v20  ;;  %v7556_v38 = vpop.xlane.xlu1 %7555 }
0x17db   :  { %15945 = vrcp.f32 %v7556_v38 }
0x17dd   :  { %v7565_v0 = vpop.xlane.xlu0 %7564 }
0x17de   :  { %v7562_v63 = vpop.xlane.xlu1 %7561 }
0x17df   :  { %15947 = vrcp.f32 %v7562_v63 }
0x17e0   :  { %15949 = vrcp.f32 %v7565_v0 }
0x17e1   :  { %v7571_v15 = vpop.xlane.xlu0 %7570 }
0x17e2   :  { %v7568_v1 = vpop.xlane.xlu1 %7567 }
0x17e3   :  { %15951 = vrcp.f32 %v7568_v1  ;;  %v7961_v1 = vrot.slane %v17353_v3, %v16696_v12 }
0x17e4   :  { %v15944_v2 = vpop.eup %15943  ;;  %15953 = vrcp.f32 %v7571_v15 }
0x17e5   :  { %v15946_v43 = vpop.eup %15945  ;;  %v7583_v5 = vmul.f32 %v15944_v2, %v15928_v37 }
0x17e6   :  { %v7582_v4 = vmul.f32 %v15946_v43, %v15930_v39 }
0x17e8   :  { %14316 = vmatprep.mubr.msk.f32.mxu0 %vm1531_vm5, %v7582_v4  ;;  %v8060_v4 = vld [vmem:[%s18471_s23 + $0x10] sm:$0xff] }
0x17e9   :  { %v15948_v19 = vpop.eup %15947  ;;  %14317 = vmatmul.mubr.msk.f32.vlgmr.msra.gmra.mrb[72].mxu0 %vm1531_vm5, %v7583_v5  ;;  %v8061_v5 = vld [vmem:[%s18471_s23 + $0x18] sm:$0xff] }
0x17ea   :  { %15431 = vmatpush3.bf16.msra.mxu0 %v17631_v20  ;;  %v7584_v60 = vmul.f32 %v15948_v19, %v15934_v28  ;;  %v15950_v7 = vpop.eup %15949  ;;  %v7921_v20 = vrot.slane %v17353_v3, %v16648_v21  ;;  %v7966_v28 = vld [vmem:[%s18469_s21 + $0x10] sm:$0xff] }
0x17eb   :  { %15433 = vmatprep.subr.bf16.mxu0 %v17643_v33  ;;  %v7585_v13 = vmul.f32 %v15950_v7, %v15932_v32  ;;  %v15440_v46 = vpack.c.bf16 %v7967_v44, %v7966_v28  ;;  %v8062_v7 = vld [vmem:[%s18471_s23 + $0x20] sm:$0xff] }
0x17ec   :  { %14323 = vmatprep.mubr.msk.f32.mxu0 %vm1531_vm5, %v7584_v60  ;;  %v15448_v60 = vpack.c.bf16 %v8061_v5, %v8060_v4  ;;  %v12512_v4 = vld [vmem:[%s18467_s19 + $0x108] sm:$0xff] }
0x17ed   :  { %v15952_v8 = vpop.eup %15951 }
0x17ee   :  { %v7586_v16 = vmul.f32 %v15952_v8, %v15938_v48  ;;  %v15954_v6 = vpop.eup %15953  ;;  %v8059_v48 = vld [vmem:[%s18471_s23 + $0x8] sm:$0xff] }
0x17ef   :  { %v7587_v17 = vmul.f32 %v15954_v6, %v15936_v47  ;;  %v8058_v47 = vld [vmem:[%s18471_s23] sm:$0xff]  ;;  %v8063_v8 = vld [vmem:[%s18471_s23 + $0x28] sm:$0xff]  ;;  %v8065_v6 = vld [vmem:[%s18471_s23 + $0x38] sm:$0xff] }
0x17f0   :  { %v15444_v49 = vpack.c.bf16 %v8059_v48, %v8058_v47  ;;  %v12491_v48 = vld [vmem:[%s18465_s17 + $0x100] sm:$0xff] }
0x17f1   :  { %14324 = vmatmul.mubr.msk.f32.vlgmr.msra.gmra.mrb[72].mxu0 %vm1531_vm5, %v7585_v13  ;;  %v15452_v13 = vpack.c.bf16 %v8063_v8, %v8062_v7 }
0x17f2   :  { %15435 = vmatpush3.bf16.msra.mxu0 %v17643_v33  ;;  %14330 = vmatprep.mubr.msk.f32.mxu0 %vm1531_vm5, %v7586_v16  ;;  %v8064_v16 = vld [vmem:[%s18471_s23 + $0x30] sm:$0xff] }
0x17f9   :  { %14331 = vmatmul.mubr.msk.f32.vlgmr.msra.gmra.mrb[72].mxu0 %vm1531_vm5, %v7587_v17  ;;  %v15456_v17 = vpack.c.bf16 %v8065_v6, %v8064_v16  ;;  %v8181_v16 = vsub.s32 7, %v16576_v9  ;;  %v16040_v6 = vld [vmem:[%s18472_s24] sm:$0xff] }
0x18cc   :  { %v14332_v31 = vpop.f32.mrb[72].mxu0 }
0x18cd   :  { %v7923_v26 = vadd.f32 %v14332_v31, %v7921_v20  ;;  %v7903_v42 = vpop.f32.mrb[73].mxu0 }
0x18ce   :  { %v7922_v18 = vadd.f32 %v7921_v20, %v7903_v42  ;;  %v12483_v20 = vld [vmem:[%s18520_s8] ss:$0 sm:$0xff] }
0x18cf   :  { %v7925_v24 = vadd.f32 %v7923_v26, %v17452_v58 }
0x18d0   :  { %v7924_v34 = vadd.f32 %v7922_v18, %v17449_v35  ;;  %v7964_v35 = vld [vmem:[%s18469_s21] sm:$0xff] }
0x18d1   :  { %v7929_v36 = vsel %vm257_vm2, %v7925_v24, 0.0  ;;  %v15436_v32 = vpack.c.bf16 %v7965_v41, %v7964_v35 }
0x18d2   :  { %7930 = vadd.xlane.f32.xlu0 %v7929_v36  ;;  %v7926_v33 = vsel %vm257_vm2, %v7924_v34, 0.0  ;;  %v8068_v36 = vsub.s32 6, %v16576_v9  ;;  %v12718_v9 = vld [vmem:[%s18474_s26] ss:$0 sm:$0xff] }
0x18d3   :  { %7927 = vadd.xlane.f32.xlu1 %v7926_v33  ;;  %15437 = vmatprep.subr.bf16.mxu1 %v15436_v32 }
0x18d4   :  { %15439 = vmatpush3.bf16.msra.mxu1 %v15436_v32  ;;  %v8069_v33 = vrot.slane %v17353_v3, %v8068_v36 }
0x18d5   :  { %15441 = vmatprep.subr.bf16.mxu1 %v15440_v46 }
0x18d8   :  { %15443 = vmatpush3.bf16.msra.mxu1 %v15440_v46 }
0x18d9   :  { %15445 = vmatprep.subr.bf16.mxu1 %v15444_v49 }
0x195f   :  { %v7931_v22 = vpop.xlane.xlu0 %7930 }
0x1960   :  { %v7933_v23 = vmul.f32 0.03125, %v7931_v22  ;;  %v7928_v25 = vpop.xlane.xlu1 %7927 }
0x1961   :  { %v7932_v27 = vmul.f32 0.03125, %v7928_v25 }
0x1962   :  { %v7935_v29 = vsub.f32 %v7925_v24, %v7933_v23 }
0x1963   :  { %v7934_v59 = vsub.f32 %v7924_v34, %v7932_v27 }
0x1964   :  { %v7937_v37 = vmul.f32 %v7935_v29, %v7935_v29 }
0x1965   :  { %v7936_v39 = vmul.f32 %v7934_v59, %v7934_v59 }
0x1966   :  { %v7941_v40 = vsel %vm257_vm2, %v7937_v37, 0.0 }
0x1967   :  { %7942 = vadd.xlane.f32.xlu0 %v7941_v40  ;;  %v7938_v58 = vsel %vm257_vm2, %v7936_v39, 0.0 }
0x1968   :  { %7939 = vadd.xlane.f32.xlu1 %v7938_v58 }
0x19f4   :  { %v7943_v50 = vpop.xlane.xlu0 %7942 }
0x19f5   :  { %v7945_v51 = vmul.f32 0.03125, %v7943_v50  ;;  %v7940_v52 = vpop.xlane.xlu1 %7939  ;;  %v12499_v50 = vld [vmem:[%s18465_s17 + $0x140] sm:$0xff] }
0x19f6   :  { %v7944_v57 = vmul.f32 0.03125, %v7940_v52  ;;  %v12500_v52 = vld [vmem:[%s18465_s17 + $0x148] sm:$0xff] }
0x19f7   :  { %v7947_v30 = vadd.f32 1e-05, %v7945_v51 }
0x19f8   :  { %v7946_v14 = vadd.f32 1e-05, %v7944_v57  ;;  %v15476_v57 = vpack.c.bf16 %v12500_v52, %v12499_v50  ;;  %v12516_v50 = vld [vmem:[%s18467_s19 + $0x128] sm:$0xff] }
0x19f9   :  { %15955 = vrsqrt.f32 %v7947_v30  ;;  %v12493_v30 = vld [vmem:[%s18465_s17 + $0x110] sm:$0xff]  ;;  %v12528_v52 = vld [vmem:[%s18468_s20 + $0x108] sm:$0xff] }
0x19fa   :  { %15957 = vrsqrt.f32 %v7946_v14  ;;  %v12494_v14 = vld [vmem:[%s18465_s17 + $0x118] sm:$0xff] }
0x1a03   :  { %v15956_v62 = vpop.eup %15955 }
0x1a04   :  { %v15958_v38 = vpop.eup %15957  ;;  %v7951_v63 = vmul.f32 %v15956_v62, %v7935_v29  ;;  %v15464_v62 = vpack.c.bf16 %v12494_v14, %v12493_v30  ;;  %v12517_v14 = vld [vmem:[%s18467_s19 + $0x130] sm:$0xff] }
0x1a05   :  { %v7950_v0 = vmul.f32 %v15958_v38, %v7934_v59  ;;  %v12502_v38 = vld [vmem:[%s18465_s17 + $0x158] sm:$0xff] }
0x1a06   :  { %v7957_v2 = vmul.f32 %v7955_v61, %v7951_v63 }
0x1a07   :  { %v7956_v43 = vmul.f32 %v7955_v61, %v7950_v0  ;;  %v12501_v61 = vld [vmem:[%s18465_s17 + $0x150] sm:$0xff]  ;;  %v12495_v0 = vld [vmem:[%s18465_s17 + $0x120] sm:$0xff] }
0x1a08   :  { %v7963_v19 = vadd.f32 %v7961_v1, %v7957_v2  ;;  %v15480_v63 = vpack.c.bf16 %v12502_v38, %v12501_v61  ;;  %v12511_v2 = vld [vmem:[%s18467_s19 + $0x100] sm:$0xff]  ;;  %v12518_v61 = vld [vmem:[%s18467_s19 + $0x138] sm:$0xff] }
0x1a09   :  { %v7962_v15 = vadd.f32 %v7961_v1, %v7956_v43  ;;  %v12496_v1 = vld [vmem:[%s18465_s17 + $0x128] sm:$0xff]  ;;  %v15492_v5 = vpack.c.bf16 %v12512_v4, %v12511_v2  ;;  %v12530_v38 = vld [vmem:[%s18468_s20 + $0x118] sm:$0xff] }
0x1a0a   :  { %v15468_v43 = vpack.c.bf16 %v12496_v1, %v12495_v0  ;;  %v12523_v0 = vld [vmem:[%s18467_s19 + $0x160] sm:$0xff]  ;;  %v12524_v1 = vld [vmem:[%s18467_s19 + $0x168] sm:$0xff] }
0x1a0b   :  { %14341 = vmatprep.mubr.msk.f32.mxu1 %vm257_vm2, %v7962_v15  ;;  %v12536_v4 = vld [vmem:[%s18468_s20 + $0x148] sm:$0xff] }
0x1a0c   :  { %14342 = vmatmul.mubr.msk.f32.vlgmr.msra.gmra.mrb[76].mxu1 %vm257_vm2, %v7963_v19 }
0x1a0d   :  { %15447 = vmatpush3.bf16.msra.mxu1 %v15444_v49  ;;  %v12492_v49 = vld [vmem:[%s18465_s17 + $0x108] sm:$0xff] }
0x1a0e   :  { %15449 = vmatprep.subr.bf16.mxu1 %v15448_v60  ;;  %v15460_v51 = vpack.c.bf16 %v12492_v49, %v12491_v48  ;;  %v12515_v49 = vld [vmem:[%s18467_s19 + $0x120] sm:$0xff] }
0x1a10   :  { %15461 = vmatprep.subr.bf16.mxu0 %v15460_v51 }
0x1a11   :  { %15451 = vmatpush3.bf16.msra.mxu1 %v15448_v60  ;;  %15463 = vmatpush3.bf16.msra.mxu0 %v15460_v51  ;;  %v12527_v51 = vld [vmem:[%s18468_s20 + $0x100] sm:$0xff] }
0x1a12   :  { %15453 = vmatprep.subr.bf16.mxu1 %v15452_v13  ;;  %15465 = vmatprep.subr.bf16.mxu0 %v15464_v62  ;;  %v15524_v30 = vpack.c.bf16 %v12528_v52, %v12527_v51 }
0x1a15   :  { %15455 = vmatpush3.bf16.msra.mxu1 %v15452_v13  ;;  %15467 = vmatpush3.bf16.msra.mxu0 %v15464_v62  ;;  %v12529_v62 = vld [vmem:[%s18468_s20 + $0x110] sm:$0xff] }
0x1a16   :  { %15457 = vmatprep.subr.bf16.mxu1 %v15456_v17  ;;  %15469 = vmatprep.subr.bf16.mxu0 %v15468_v43  ;;  %v15528_v2 = vpack.c.bf16 %v12530_v38, %v12529_v62 }
0x1a19   :  { %15459 = vmatpush3.bf16.msra.mxu1 %v15456_v17  ;;  %v8182_v17 = vrot.slane %v16040_v6, %v8181_v16  ;;  %v12531_v6 = vld [vmem:[%s18468_s20 + $0x120] sm:$0xff] }
0x1a1a   :  { %15477 = vmatprep.subr.bf16.mxu1 %v15476_v57 }
0x1adf   :  { %v14343_v31 = vpop.f32.mrb[76].mxu1 }
0x1ae0   :  { %v8053_v26 = vadd.f32 %v14343_v31, %v12483_v20  ;;  %v8047_v42 = vpop.f32.mrb[77].mxu1 }
0x1ae1   :  { %v8048_v18 = vadd.f32 %v12483_v20, %v8047_v42 }
0x1ae2   :  { %v8057_v34 = vmax.f32 %v8053_v26, 0.0 }
0x1ae3   :  { %v8056_v24 = vmax.f32 %v8048_v18, 0.0  ;;  %v12488_v18 = vld [vmem:[%s18472_s24 + $0x8] ss:$0 sm:$0xff] }
0x1ae5   :  { %14360 = vmatprep.mubr.msk.f32.mxu1 %vm2103_vm6, %v8056_v24 }
0x1ae6   :  { %14361 = vmatmul.mubr.msk.f32.vlgmr.msra.gmra.mrb[78].mxu1 %vm2103_vm6, %v8057_v34 }
0x1ae7   :  { %15479 = vmatpush3.bf16.msra.mxu1 %v15476_v57  ;;  %v15500_v57 = vpack.c.bf16 %v12516_v50, %v12515_v49 }
0x1ae8   :  { %15481 = vmatprep.subr.bf16.mxu1 %v15480_v63 }
0x1aeb   :  { %15483 = vmatpush3.bf16.msra.mxu1 %v15480_v63  ;;  %v15504_v63 = vpack.c.bf16 %v12518_v61, %v12517_v14 }
0x1aec   :  { %15493 = vmatprep.subr.bf16.mxu1 %v15492_v5 }
0x1bb9   :  { %v14362_v22 = vpop.f32.mrb[78].mxu1 }
0x1bba   :  { %v8148_v23 = vadd.f32 %v14362_v22, %v8069_v33  ;;  %v8142_v25 = vpop.f32.mrb[79].mxu1  ;;  %v12498_v22 = vld [vmem:[%s18465_s17 + $0x138] sm:$0xff] }
0x1bbb   :  { %v8143_v27 = vadd.f32 %v8142_v25, %v8069_v33  ;;  %v12497_v33 = vld [vmem:[%s18465_s17 + $0x130] sm:$0xff]  ;;  %v12514_v25 = vld [vmem:[%s18467_s19 + $0x118] sm:$0xff] }
0x1bbc   :  { %v8152_v29 = vadd.f32 %v8148_v23, %v7963_v19  ;;  %v12513_v23 = vld [vmem:[%s18467_s19 + $0x110] sm:$0xff] }
0x1bbd   :  { %v8151_v59 = vadd.f32 %v8143_v27, %v7962_v15 }
0x1bbe   :  { %v8156_v37 = vsel %vm257_vm2, %v8152_v29, 0.0 }
0x1bbf   :  { %8157 = vadd.xlane.f32.xlu0 %v8156_v37  ;;  %v8153_v39 = vsel %vm257_vm2, %v8151_v59, 0.0  ;;  %v15472_v37 = vpack.c.bf16 %v12498_v22, %v12497_v33  ;;  %v12541_v22 = vld [vmem:[%s18468_s20 + $0x170] sm:$0xff] }
0x1bc0   :  { %8154 = vadd.xlane.f32.xlu1 %v8153_v39  ;;  %v15496_v39 = vpack.c.bf16 %v12514_v25, %v12513_v23  ;;  %v12542_v23 = vld [vmem:[%s18468_s20 + $0x178] sm:$0xff] }
0x1bc1   :  { %v15552_v25 = vpack.c.bf16 %v12542_v23, %v12541_v22  ;;  %v16042_v23 = vld [vmem:[%s18518_s12] sm:$0xff] }
0x1c4c   :  { %v8158_v40 = vpop.xlane.xlu0 %8157 }
0x1c4d   :  { %v8160_v58 = vmul.f32 0.03125, %v8158_v40  ;;  %v8155_v35 = vpop.xlane.xlu1 %8154  ;;  %v12504_v40 = vld [vmem:[%s18465_s17 + $0x168] sm:$0xff] }
0x1c4e   :  { %v8159_v41 = vmul.f32 0.03125, %v8155_v35  ;;  %v12520_v35 = vld [vmem:[%s18467_s19 + $0x148] sm:$0xff] }
0x1c4f   :  { %v8162_v32 = vsub.f32 %v8152_v29, %v8160_v58  ;;  %v12519_v58 = vld [vmem:[%s18467_s19 + $0x140] sm:$0xff] }
0x1c50   :  { %v8161_v28 = vsub.f32 %v8151_v59, %v8159_v41  ;;  %v12503_v59 = vld [vmem:[%s18465_s17 + $0x160] sm:$0xff] }
0x1c51   :  { %v8164_v44 = vmul.f32 %v8162_v32, %v8162_v32  ;;  %v15484_v41 = vpack.c.bf16 %v12504_v40, %v12503_v59  ;;  %v12543_v59 = vld [vmem:[%s18466_s18 + $0x8] ss:$0 sm:$0xff] }
0x1c52   :  { %v8163_v3 = vmul.f32 %v8161_v28, %v8161_v28 }
0x1c53   :  { %v8168_v46 = vsel %vm257_vm2, %v8164_v44, 0.0  ;;  %v12506_v44 = vld [vmem:[%s18465_s17 + $0x178] sm:$0xff] }
0x1c54   :  { %8169 = vadd.xlane.f32.xlu0 %v8168_v46  ;;  %v8165_v47 = vsel %vm257_vm2, %v8163_v3, 0.0  ;;  %v12521_v3 = vld [vmem:[%s18467_s19 + $0x150] sm:$0xff]  ;;  %v12522_v46 = vld [vmem:[%s18467_s19 + $0x158] sm:$0xff] }
0x1c55   :  { %8166 = vadd.xlane.f32.xlu1 %v8165_v47  ;;  %v15512_v48 = vpack.c.bf16 %v12522_v46, %v12521_v3 }
0x1ce1   :  { %v8170_v15 = vpop.xlane.xlu0 %8169 }
0x1ce2   :  { %v8172_v19 = vmul.f32 0.03125, %v8170_v15  ;;  %v8167_v60 = vpop.xlane.xlu1 %8166 }
0x1ce3   :  { %v8171_v7 = vmul.f32 0.03125, %v8167_v60  ;;  %v12526_v60 = vld [vmem:[%s18467_s19 + $0x178] sm:$0xff] }
0x1ce4   :  { %v8174_v8 = vadd.f32 1e-05, %v8172_v19  ;;  %v12525_v19 = vld [vmem:[%s18467_s19 + $0x170] sm:$0xff] }
0x1ce5   :  { %v8173_v13 = vadd.f32 1e-05, %v8171_v7  ;;  %v12537_v7 = vld [vmem:[%s18468_s20 + $0x150] sm:$0xff] }
0x1ce6   :  { %15959 = vrsqrt.f32 %v8174_v8  ;;  %v12538_v8 = vld [vmem:[%s18468_s20 + $0x158] sm:$0xff] }
0x1ce7   :  { %15961 = vrsqrt.f32 %v8173_v13  ;;  %v15520_v13 = vpack.c.bf16 %v12526_v60, %v12525_v19 }
0x1cf0   :  { %v15960_v20 = vpop.eup %15959 }
0x1cf1   :  { %v15962_v31 = vpop.eup %15961  ;;  %v8178_v26 = vmul.f32 %v15960_v20, %v8162_v32  ;;  %v15508_v32 = vpack.c.bf16 %v12520_v35, %v12519_v58  ;;  %v15544_v20 = vpack.c.bf16 %v12538_v8, %v12537_v7 }
0x1cf2   :  { %v8177_v42 = vmul.f32 %v15962_v31, %v8161_v28  ;;  %v12505_v28 = vld [vmem:[%s18465_s17 + $0x170] sm:$0xff] }
0x1cf3   :  { %v8184_v24 = vmul.f32 %v8182_v17, %v8178_v26  ;;  %v15488_v47 = vpack.c.bf16 %v12506_v44, %v12505_v28  ;;  %v12533_v26 = vld [vmem:[%s18468_s20 + $0x130] sm:$0xff] }
0x1cf4   :  { %v8183_v34 = vmul.f32 %v8182_v17, %v8177_v42  ;;  %v12532_v17 = vld [vmem:[%s18468_s20 + $0x128] sm:$0xff]  ;;  %v12534_v42 = vld [vmem:[%s18468_s20 + $0x138] sm:$0xff] }
0x1cf5   :  { %v17802_v29 = vadd.f32 %v12488_v18, %v8184_v24  ;;  %v15532_v31 = vpack.c.bf16 %v12532_v17, %v12531_v6  ;;  %v12539_v24 = vld [vmem:[%s18468_s20 + $0x160] sm:$0xff] }
0x1cf6   :  { %v17800_v27 = vadd.f32 %v12488_v18, %v8183_v34  ;;  %v15536_v18 = vpack.c.bf16 %v12534_v42, %v12533_v26  ;;  %v12540_v34 = vld [vmem:[%s18468_s20 + $0x168] sm:$0xff] }
0x1cf7   :  { %v15548_v33 = vpack.c.bf16 %v12540_v34, %v12539_v24  ;;  %v16041_v34 = vld [vmem:[%s18518_s12 + $0x8] sm:$0xff] }
0x1cf8   :  { %14371 = vmatprep.mubr.msk.f32.mxu0 %vm257_vm2, %v17800_v27  ;;  %14393 = vmatprep.mubr.msk.f32.mxu1 %vm257_vm2, %v17800_v27 }
0x1cf9   :  { %14372 = vmatmul.mubr.msk.f32.vlgmr.msra.gmra.mrb[74].mxu0 %vm257_vm2, %v17802_v29  ;;  %14394 = vmatmul.mubr.msk.f32.vlgmr.msra.gmra.mrb[80].mxu1 %vm257_vm2, %v17802_v29 }
0x1cfa   :  { %15471 = vmatpush3.bf16.msra.mxu0 %v15468_v43  ;;  %15495 = vmatpush3.bf16.msra.mxu1 %v15492_v5  ;;  %v12535_v43 = vld [vmem:[%s18468_s20 + $0x140] sm:$0xff]  ;;  %v15516_v5 = vpack.c.bf16 %v12524_v1, %v12523_v0 }
0x1cfb   :  { %14382 = vmatprep.mubr.msk.f32.mxu0 %vm257_vm2, %v17800_v27  ;;  %14415 = vmatprep.mubr.msk.f32.mxu1 %vm257_vm2, %v17800_v27  ;;  %v15540_v15 = vpack.c.bf16 %v12536_v4, %v12535_v43  ;;  %v12552_v4 = vld [vmem:[%s18466_s18 + $0xb] ss:$0 sm:$0xff] }
0x1cfc   :  { %15473 = vmatprep.subr.bf16.mxu0 %v15472_v37  ;;  %15497 = vmatprep.subr.bf16.mxu1 %v15496_v39 }
0x1cfe   :  { %15475 = vmatpush3.bf16.msra.mxu0 %v15472_v37  ;;  %15499 = vmatpush3.bf16.msra.mxu1 %v15496_v39 }
0x1cff   :  { %15485 = vmatprep.subr.bf16.mxu0 %v15484_v41  ;;  %15509 = vmatprep.subr.bf16.mxu1 %v15508_v32 }
0x1d01   :  { %14383 = vmatmul.mubr.msk.f32.vlgmr.msra.gmra.mrb[76].mxu0 %vm257_vm2, %v17802_v29  ;;  %14416 = vmatmul.mubr.msk.f32.vlgmr.msra.gmra.mrb[82].mxu1 %vm257_vm2, %v17802_v29 }
0x1d02   :  { %15487 = vmatpush3.bf16.msra.mxu0 %v15484_v41  ;;  %14404 = vmatprep.mubr.msk.f32.mxu0 %vm257_vm2, %v17800_v27  ;;  %v12546_v41 = vld [vmem:[%s18466_s18 + $0x9] ss:$0 sm:$0xff] }
0x1d03   :  { %15511 = vmatpush3.bf16.msra.mxu1 %v15508_v32  ;;  %14437 = vmatprep.mubr.msk.f32.mxu1 %vm257_vm2, %v17800_v27 }
0x1d04   :  { %15489 = vmatprep.subr.bf16.mxu0 %v15488_v47  ;;  %15513 = vmatprep.subr.bf16.mxu1 %v15512_v48 }
0x1d06   :  { %15491 = vmatpush3.bf16.msra.mxu0 %v15488_v47 }
0x1d07   :  { %15515 = vmatpush3.bf16.msra.mxu1 %v15512_v48  ;;  %15501 = vmatprep.subr.bf16.mxu0 %v15500_v57  ;;  %v12549_v48 = vld [vmem:[%s18466_s18 + $0xa] ss:$0 sm:$0xff] }
0x1d08   :  { %15525 = vmatprep.subr.bf16.mxu1 %v15524_v30 }
0x1d09   :  { %14405 = vmatmul.mubr.msk.f32.vlgmr.msra.gmra.mrb[78].mxu0 %vm257_vm2, %v17802_v29 }
0x1d0a   :  { %14438 = vmatmul.mubr.msk.f32.vlgmr.msra.gmra.mrb[84].mxu1 %vm257_vm2, %v17802_v29  ;;  %15503 = vmatpush3.bf16.msra.mxu0 %v15500_v57 }
0x1d0b   :  { %14426 = vmatprep.mubr.msk.f32.mxu0 %vm257_vm2, %v17800_v27  ;;  %15527 = vmatpush3.bf16.msra.mxu1 %v15524_v30 }
0x1d0c   :  { %14459 = vmatprep.mubr.msk.f32.mxu1 %vm257_vm2, %v17800_v27  ;;  %15505 = vmatprep.subr.bf16.mxu0 %v15504_v63 }
0x1d0d   :  { %15529 = vmatprep.subr.bf16.mxu1 %v15528_v2 }
0x1d0e   :  { %15507 = vmatpush3.bf16.msra.mxu0 %v15504_v63 }
0x1d0f   :  { %15531 = vmatpush3.bf16.msra.mxu1 %v15528_v2  ;;  %15517 = vmatprep.subr.bf16.mxu0 %v15516_v5 }
0x1d10   :  { %15541 = vmatprep.subr.bf16.mxu1 %v15540_v15 }
0x1d11   :  { %14427 = vmatmul.mubr.msk.f32.vlgmr.msra.gmra.mrb[80].mxu0 %vm257_vm2, %v17802_v29 }
0x1d12   :  { %14460 = vmatmul.mubr.msk.f32.vlgmr.msra.gmra.mrb[86].mxu1 %vm257_vm2, %v17802_v29  ;;  %15519 = vmatpush3.bf16.msra.mxu0 %v15516_v5 }
0x1d13   :  { %14448 = vmatprep.mubr.msk.f32.mxu0 %vm257_vm2, %v17800_v27  ;;  %15543 = vmatpush3.bf16.msra.mxu1 %v15540_v15 }
0x1d14   :  { %14481 = vmatprep.mubr.msk.f32.mxu1 %vm257_vm2, %v17800_v27  ;;  %15521 = vmatprep.subr.bf16.mxu0 %v15520_v13 }
0x1d15   :  { %15545 = vmatprep.subr.bf16.mxu1 %v15544_v20 }
0x1d16   :  { %15523 = vmatpush3.bf16.msra.mxu0 %v15520_v13 }
0x1d17   :  { %15547 = vmatpush3.bf16.msra.mxu1 %v15544_v20  ;;  %15533 = vmatprep.subr.bf16.mxu0 %v15532_v31 }
0x1d19   :  { %14449 = vmatmul.mubr.msk.f32.vlgmr.msra.gmra.mrb[82].mxu0 %vm257_vm2, %v17802_v29 }
0x1d1a   :  { %14482 = vmatmul.mubr.msk.f32.vlgmr.msra.gmra.mrb[88].mxu1 %vm257_vm2, %v17802_v29  ;;  %15535 = vmatpush3.bf16.msra.mxu0 %v15532_v31 }
0x1d1b   :  { %14470 = vmatprep.mubr.msk.f32.mxu0 %vm257_vm2, %v17800_v27  ;;  %15537 = vmatprep.subr.bf16.mxu0 %v15536_v18 }
0x1d1e   :  { %15539 = vmatpush3.bf16.msra.mxu0 %v15536_v18 }
0x1d1f   :  { %15549 = vmatprep.subr.bf16.mxu0 %v15548_v33 }
0x1d21   :  { %14471 = vmatmul.mubr.msk.f32.vlgmr.msra.gmra.mrb[84].mxu0 %vm257_vm2, %v17802_v29 }
0x1d22   :  { %15551 = vmatpush3.bf16.msra.mxu0 %v15548_v33  ;;  %14492 = vmatprep.mubr.msk.f32.mxu0 %vm257_vm2, %v17800_v27 }
0x1d23   :  { %15553 = vmatprep.subr.bf16.mxu0 %v15552_v25 }
0x1d26   :  { %15555 = vmatpush3.bf16.msra.mxu0 %v15552_v25 }
0x1d29   :  { %14493 = vmatmul.mubr.msk.f32.vlgmr.msra.gmra.mrb[86].mxu0 %vm257_vm2, %v17802_v29 }
0x1dcc   :  { %v14373_v37 = vpop.f32.mrb[74].mxu0  ;;  %v14395_v39 = vpop.f32.mrb[80].mxu1 }
0x1dcd   :  { %v8328_v40 = vpop.f32.mrb[75].mxu0  ;;  %v8490_v58 = vpop.f32.mrb[81].mxu1  ;;  %v8334_v52 = vadd.f32 %v14373_v37, %v12543_v59  ;;  %v8496_v1 = vadd.f32 %v14395_v39, %v12549_v48 }
0x1dce   :  { %v8329_v35 = vadd.f32 %v12543_v59, %v8328_v40  ;;  %v8491_v30 = vadd.f32 %v12549_v48, %v8490_v58 }
0x1dd0   :  { %14499 = vmatprep.mubr.msk.f32.mxu1 %vm1182_vm3, %v8329_v35 }
0x1dd4   :  { %v14384_v32 = vpop.f32.mrb[76].mxu0  ;;  %v14417_v28 = vpop.f32.mrb[82].mxu1 }
0x1dd5   :  { %v8409_v44 = vpop.f32.mrb[77].mxu0  ;;  %v8646_v3 = vpop.f32.mrb[83].mxu1  ;;  %v8415_v7 = vadd.f32 %v14384_v32, %v12546_v41 }
0x1dd6   :  { %v8410_v46 = vadd.f32 %v12546_v41, %v8409_v44  ;;  %v15556_v47 = vpack.c.bf16 %v14417_v28, %v8646_v3 }
0x1dd8   :  { %15558 = vmatprep.subr.msk.bf16.mxu1 %vm16488_vm4, %v15556_v47  ;;  %14506 = vmatprep.mubr.msk.f32.mxu0 %vm1182_vm3, %v8410_v46 }
0x1dd9   :  { %15561 = vmatpush3.bf16.xpose.msk.msra.mxu1 %vm16488_vm4, %v15556_v47 }
0x1ddc   :  { %v14406_v49 = vpop.f32.mrb[78].mxu0 }
0x1ddd   :  { %v14439_v50 = vpop.f32.mrb[84].mxu1  ;;  %v8571_v51 = vpop.f32.mrb[79].mxu0  ;;  %v8577_v31 = vadd.f32 %v14406_v49, %v12552_v4 }
0x1dde   :  { %v8796_v57 = vpop.f32.mrb[85].mxu1  ;;  %v8572_v13 = vadd.f32 %v12552_v4, %v8571_v51 }
0x1ddf   :  { %v15568_v14 = vpack.c.bf16 %v14439_v50, %v8796_v57 }
0x1de0   :  { %14500 = vmatmul.mubr.msk.f32.vlgmr.msra.gmra.mrb[90].mxu1 %vm1182_vm3, %v8334_v52 }
0x1de1   :  { %15570 = vmatprep.subr.msk.bf16.mxu1 %vm16488_vm4, %v15568_v14  ;;  %14513 = vmatprep.mubr.msk.f32.mxu1 %vm1182_vm3, %v8491_v30 }
0x1de2   :  { %15573 = vmatpush3.bf16.xpose.msk.msra.mxu1 %vm16488_vm4, %v15568_v14 }
0x1de4   :  { %v14428_v61 = vpop.f32.mrb[80].mxu0 }
0x1de5   :  { %v14461_v62 = vpop.f32.mrb[86].mxu1  ;;  %v8721_v38 = vpop.f32.mrb[81].mxu0 }
0x1de6   :  { %v15562_v63 = vpack.c.bf16 %v14428_v61, %v8721_v38  ;;  %v8946_v0 = vpop.f32.mrb[87].mxu1 }
0x1de7   :  { %v15580_v2 = vpack.c.bf16 %v14461_v62, %v8946_v0 }
0x1de8   :  { %15564 = vmatprep.subr.msk.bf16.mxu0 %vm16488_vm4, %v15562_v63 }
0x1de9   :  { %14514 = vmatmul.mubr.msk.f32.vlgmr.msra.gmra.mrb[92].mxu1 %vm1182_vm3, %v8496_v1  ;;  %15581 = vmatprep.subr.bf16.mxu1 %v15580_v2 }
0x1dea   :  { %15567 = vmatpush3.bf16.xpose.msk.msra.mxu0 %vm16488_vm4, %v15562_v63  ;;  %15583 = vmatpush3.bf16.msra.mxu1 %v15580_v2 }
0x1dec   :  { %v14450_v43 = vpop.f32.mrb[82].mxu0 }
0x1ded   :  { %v14483_v5 = vpop.f32.mrb[88].mxu1  ;;  %v8871_v15 = vpop.f32.mrb[83].mxu0 }
0x1dee   :  { %v15574_v19 = vpack.c.bf16 %v14450_v43, %v8871_v15  ;;  %v9096_v60 = vpop.f32.mrb[89].mxu1 }
0x1def   :  { %v17977_v8 = vpack.c.bf16 %v14483_v5, %v9096_v60 }
0x1df0   :  { %15576 = vmatprep.subr.msk.bf16.mxu0 %vm16488_vm4, %v15574_v19 }
0x1df1   :  { %14507 = vmatmul.mubr.msk.f32.vlgmr.msra.gmra.mrb[88].mxu0 %vm1182_vm3, %v8415_v7 }
0x1df2   :  { %15579 = vmatpush3.bf16.xpose.msk.msra.mxu0 %vm16488_vm4, %v15574_v19  ;;  %14520 = vmatprep.mubr.msk.f32.mxu0 %vm1182_vm3, %v8572_v13 }
0x1df4   :  { %v14472_v6 = vpop.f32.mrb[84].mxu0 }
0x1df5   :  { %v9021_v17 = vpop.f32.mrb[85].mxu0 }
0x1df6   :  { %v17985_v20 = vpack.c.bf16 %v14472_v6, %v9021_v17 }
0x1df8   :  { %15585 = vmatprep.subr.bf16.mxu1 %v17985_v20 }
0x1df9   :  { %14521 = vmatmul.mubr.msk.f32.vlgmr.msra.gmra.mrb[90].mxu0 %vm1182_vm3, %v8577_v31 }
0x1dfc   :  { %v14494_v26 = vpop.f32.mrb[86].mxu0 }
0x1dfd   :  { %v9171_v42 = vpop.f32.mrb[87].mxu0 }
0x1dfe   :  { %v17989_v18 = vpack.c.bf16 %v14494_v26, %v9171_v42 }
0x1eb3   :  { %v14501_v24 = vpop.f32.mrb[90].mxu1 }
0x1eb4   :  { %v9264_v33 = vadd.f32 %v16041_v34, %v14501_v24  ;;  %v9258_v22 = vpop.f32.mrb[91].mxu1 }
0x1eb5   :  { %v9259_v25 = vadd.f32 %v16042_v23, %v9258_v22 }
0x1eb6   :  { %v9531_v59 = vsel %vm1531_vm5, %v9264_v33, -inf }
0x1eb7   :  { %9532 = vmax.xlane.f32.xlu0 %v9531_v59  ;;  %v9528_v37 = vsel %vm1531_vm5, %v9259_v25, -inf }
0x1eb8   :  { %9529 = vmax.xlane.f32.xlu1 %v9528_v37 }
0x1ebc   :  { %v14515_v39 = vpop.f32.mrb[92].mxu1 }
0x1ebd   :  { %v9432_v40 = vpop.f32.mrb[93].mxu1  ;;  %v9438_v28 = vadd.f32 %v16041_v34, %v14515_v39 }
0x1ebe   :  { %v9433_v3 = vadd.f32 %v16042_v23, %v9432_v40 }
0x1ebf   :  { %v9543_v47 = vsel %vm1531_vm5, %v9438_v28, -inf }
0x1ec0   :  { %v9540_v49 = vsel %vm1531_vm5, %v9433_v3, -inf }
0x1ec4   :  { %v14508_v58 = vpop.f32.mrb[88].mxu0 }
0x1ec5   :  { %v9351_v35 = vadd.f32 %v16041_v34, %v14508_v58  ;;  %v9345_v41 = vpop.f32.mrb[89].mxu0 }
0x1ec6   :  { %v9346_v32 = vadd.f32 %v16042_v23, %v9345_v41 }
0x1ec7   :  { %v9537_v44 = vsel %vm1531_vm5, %v9351_v35, -inf }
0x1ec8   :  { %9538 = vmax.xlane.f32.xlu0 %v9537_v44  ;;  %v9534_v46 = vsel %vm1531_vm5, %v9346_v32, -inf }
0x1ec9   :  { %9535 = vmax.xlane.f32.xlu1 %v9534_v46 }
0x1ecc   :  { %v14522_v48 = vpop.f32.mrb[90].mxu0  ;;  %9544 = vmax.xlane.f32.xlu0 %v9543_v47 }
0x1ecd   :  { %v9525_v50 = vadd.f32 %v16041_v34, %v14522_v48  ;;  %v9519_v51 = vpop.f32.mrb[91].mxu0  ;;  %9541 = vmax.xlane.f32.xlu1 %v9540_v49 }
0x1ece   :  { %v9520_v52 = vadd.f32 %v16042_v23, %v9519_v51 }
0x1ecf   :  { %v9549_v57 = vsel %vm1531_vm5, %v9525_v50, -inf }
0x1ed0   :  { %9550 = vmax.xlane.f32.xlu0 %v9549_v57  ;;  %v9546_v30 = vsel %vm1531_vm5, %v9520_v52, -inf }
0x1ed1   :  { %9547 = vmax.xlane.f32.xlu1 %v9546_v30 }
0x1f44   :  { %v9533_v14 = vpop.xlane.xlu0 %9532 }
0x1f45   :  { %v9553_v61 = vsub.f32 %v9264_v33, %v9533_v14  ;;  %v9530_v62 = vpop.xlane.xlu1 %9529 }
0x1f46   :  { %v9552_v38 = vsub.f32 %v9259_v25, %v9530_v62 }
0x1f47   :  { %v9562_v63 = vmul.f32 1.442695, %v9553_v61 }
0x1f48   :  { %v9560_v0 = vmul.f32 1.442695, %v9552_v38 }
0x1f49   :  { %15963 = vpow2.f32 %v9562_v63 }
0x1f4a   :  { %15965 = vpow2.f32 %v9560_v0 }
0x1f53   :  { %v15964_v1 = vpop.eup %15963 }
0x1f54   :  { %v15966_v2 = vpop.eup %15965  ;;  %v9579_v43 = vsel %vm1531_vm5, %v15964_v1, 0.0 }
0x1f55   :  { %v9539_v4 = vpop.xlane.xlu0 %9538  ;;  %9580 = vadd.xlane.f32.xlu0 %v9579_v43  ;;  %v9576_v5 = vsel %vm1531_vm5, %v15966_v2, 0.0 }
0x1f56   :  { %v9555_v15 = vsub.f32 %v9351_v35, %v9539_v4  ;;  %v9536_v19 = vpop.xlane.xlu1 %9535  ;;  %9577 = vadd.xlane.f32.xlu1 %v9576_v5 }
0x1f57   :  { %v9554_v60 = vsub.f32 %v9346_v32, %v9536_v19 }
0x1f58   :  { %v9566_v7 = vmul.f32 1.442695, %v9555_v15 }
0x1f59   :  { %v9564_v13 = vmul.f32 1.442695, %v9554_v60  ;;  %v9545_v6 = vpop.xlane.xlu0 %9544 }
0x1f5a   :  { %15967 = vpow2.f32 %v9566_v7  ;;  %v9557_v17 = vsub.f32 %v9438_v28, %v9545_v6  ;;  %v9542_v31 = vpop.xlane.xlu1 %9541 }
0x1f5b   :  { %15969 = vpow2.f32 %v9564_v13  ;;  %v9556_v26 = vsub.f32 %v9433_v3, %v9542_v31 }
0x1f5c   :  { %v9570_v42 = vmul.f32 1.442695, %v9557_v17 }
0x1f5d   :  { %v9568_v24 = vmul.f32 1.442695, %v9556_v26  ;;  %v9551_v34 = vpop.xlane.xlu0 %9550 }
0x1f5e   :  { %15971 = vpow2.f32 %v9570_v42  ;;  %v9559_v33 = vsub.f32 %v9525_v50, %v9551_v34  ;;  %v9548_v22 = vpop.xlane.xlu1 %9547 }
0x1f5f   :  { %15973 = vpow2.f32 %v9568_v24  ;;  %v9558_v23 = vsub.f32 %v9520_v52, %v9548_v22 }
0x1f60   :  { %v9574_v25 = vmul.f32 1.442695, %v9559_v33 }
0x1f61   :  { %v9572_v59 = vmul.f32 1.442695, %v9558_v23 }
0x1f62   :  { %15975 = vpow2.f32 %v9574_v25 }
0x1f63   :  { %15977 = vpow2.f32 %v9572_v59 }
0x1f64   :  { %v15968_v37 = vpop.eup %15967 }
0x1f65   :  { %v15970_v39 = vpop.eup %15969  ;;  %v9585_v40 = vsel %vm1531_vm5, %v15968_v37, 0.0 }
0x1f66   :  { %9586 = vadd.xlane.f32.xlu0 %v9585_v40  ;;  %v9582_v58 = vsel %vm1531_vm5, %v15970_v39, 0.0 }
0x1f67   :  { %9583 = vadd.xlane.f32.xlu1 %v9582_v58 }
0x1f68   :  { %v15972_v35 = vpop.eup %15971 }
0x1f69   :  { %v15974_v41 = vpop.eup %15973  ;;  %v9591_v32 = vsel %vm1531_vm5, %v15972_v35, 0.0 }
0x1f6a   :  { %9592 = vadd.xlane.f32.xlu0 %v9591_v32  ;;  %v9588_v28 = vsel %vm1531_vm5, %v15974_v41, 0.0 }
0x1f6b   :  { %9589 = vadd.xlane.f32.xlu1 %v9588_v28  ;;  %v12604_v28 = vld [vmem:[%s18465_s17 + $0x1c8] sm:$0xff] }
0x1f6c   :  { %v15976_v44 = vpop.eup %15975 }
0x1f6d   :  { %v15978_v3 = vpop.eup %15977  ;;  %v9597_v46 = vsel %vm1531_vm5, %v15976_v44, 0.0 }
0x1f6e   :  { %9598 = vadd.xlane.f32.xlu0 %v9597_v46  ;;  %v9594_v47 = vsel %vm1531_vm5, %v15978_v3, 0.0  ;;  %v12598_v46 = vld [vmem:[%s18465_s17 + $0x198] sm:$0xff] }
0x1f6f   :  { %9595 = vadd.xlane.f32.xlu1 %v9594_v47  ;;  %v12605_v47 = vld [vmem:[%s18465_s17 + $0x1d0] sm:$0xff] }
0x1fe2   :  { %v9581_v48 = vpop.xlane.xlu0 %9580 }
0x1fe3   :  { %15979 = vrcp.f32 %v9581_v48  ;;  %v9578_v49 = vpop.xlane.xlu1 %9577 }
0x1fe4   :  { %15981 = vrcp.f32 %v9578_v49  ;;  %v12606_v49 = vld [vmem:[%s18465_s17 + $0x1d8] sm:$0xff] }
0x1fed   :  { %v15980_v50 = vpop.eup %15979 }
0x1fee   :  { %v15982_v51 = vpop.eup %15981  ;;  %v9609_v57 = vmul.f32 %v15980_v50, %v15964_v1  ;;  %v15616_v50 = vpack.c.bf16 %v12606_v49, %v12605_v47  ;;  %v12628_v49 = vld [vmem:[%s18467_s19 + $0x1e8] sm:$0xff] }
0x1fef   :  { %v9608_v52 = vmul.f32 %v15982_v51, %v15966_v2  ;;  %v12599_v51 = vld [vmem:[%s18465_s17 + $0x1a0] sm:$0xff] }
0x1ff1   :  { %14527 = vmatprep.mubr.msk.f32.mxu1 %vm1531_vm5, %v9608_v52  ;;  %v12600_v52 = vld [vmem:[%s18465_s17 + $0x1a8] sm:$0xff] }
0x1ff2   :  { %14528 = vmatmul.mubr.msk.f32.vlgmr.msra.gmra.mrb[94].mxu1 %vm1531_vm5, %v9609_v57  ;;  %v12615_v57 = vld [vmem:[%s18467_s19 + $0x180] sm:$0xff] }
0x1ff3   :  { %v9587_v30 = vpop.xlane.xlu0 %9586  ;;  %15587 = vmatpush3.bf16.msra.mxu1 %v17985_v20 }
0x1ff4   :  { %15983 = vrcp.f32 %v9587_v30  ;;  %15589 = vmatprep.subr.bf16.mxu1 %v17977_v8  ;;  %v9584_v14 = vpop.xlane.xlu1 %9583  ;;  %v15604_v30 = vpack.c.bf16 %v12600_v52, %v12599_v51  ;;  %v12639_v51 = vld [vmem:[%s18468_s20 + $0x1c0] sm:$0xff]  ;;  %v12640_v52 = vld [vmem:[%s18468_s20 + $0x1c8] sm:$0xff] }
0x1ff5   :  { %15985 = vrcp.f32 %v9584_v14  ;;  %v12616_v14 = vld [vmem:[%s18467_s19 + $0x188] sm:$0xff] }
0x1ff7   :  { %v9593_v62 = vpop.xlane.xlu0 %9592 }
0x1ff8   :  { %v9590_v61 = vpop.xlane.xlu1 %9589 }
0x1ff9   :  { %15987 = vrcp.f32 %v9590_v61  ;;  %v15628_v61 = vpack.c.bf16 %v12616_v14, %v12615_v57  ;;  %v12629_v14 = vld [vmem:[%s18467_s19 + $0x1f0] sm:$0xff] }
0x1ffa   :  { %15989 = vrcp.f32 %v9593_v62 }
0x1ffb   :  { %v9599_v43 = vpop.xlane.xlu0 %9598 }
0x1ffc   :  { %v9596_v38 = vpop.xlane.xlu1 %9595 }
0x1ffd   :  { %15991 = vrcp.f32 %v9596_v38 }
0x1ffe   :  { %v15984_v63 = vpop.eup %15983  ;;  %15993 = vrcp.f32 %v9599_v43 }
0x1fff   :  { %v15986_v0 = vpop.eup %15985  ;;  %v9611_v2 = vmul.f32 %v15984_v63, %v15968_v37 }
0x2000   :  { %v9610_v1 = vmul.f32 %v15986_v0, %v15970_v39 }
0x2002   :  { %14534 = vmatprep.mubr.msk.f32.mxu1 %vm1531_vm5, %v9610_v1 }
0x2003   :  { %v15988_v4 = vpop.eup %15987  ;;  %14535 = vmatmul.mubr.msk.f32.vlgmr.msra.gmra.mrb[94].mxu1 %vm1531_vm5, %v9611_v2 }
0x2004   :  { %15591 = vmatpush3.bf16.msra.mxu1 %v17977_v8  ;;  %v9612_v20 = vmul.f32 %v15988_v4, %v15974_v41  ;;  %v15990_v5 = vpop.eup %15989  ;;  %v18029_v8 = vld [vmem:[%s18472_s24 + $0x10] sm:$0xff]  ;;  %v12603_v41 = vld [vmem:[%s18465_s17 + $0x1c0] sm:$0xff] }
0x2005   :  { %15593 = vmatprep.subr.bf16.mxu1 %v17989_v18  ;;  %v9613_v19 = vmul.f32 %v15990_v5, %v15972_v35  ;;  %v9949_v6 = vrot.slane %v18029_v8, %v16579_v10  ;;  %v12596_v35 = vld [vmem:[%s18465_s17 + $0x188] sm:$0xff]  ;;  %v9983_v43 = vrot.slane %v18029_v8, %v16613_v53  ;;  %v12617_v53 = vld [vmem:[%s18467_s19 + $0x190] sm:$0xff] }
0x2006   :  { %14541 = vmatprep.mubr.msk.f32.mxu1 %vm1531_vm5, %v9612_v20 }
0x2007   :  { %v15992_v15 = vpop.eup %15991 }
0x2008   :  { %v9614_v60 = vmul.f32 %v15992_v15, %v15978_v3  ;;  %v15994_v7 = vpop.eup %15993  ;;  %v12597_v3 = vld [vmem:[%s18465_s17 + $0x190] sm:$0xff] }
0x2009   :  { %v9615_v13 = vmul.f32 %v15994_v7, %v15976_v44  ;;  %v15612_v44 = vpack.c.bf16 %v12604_v28, %v12603_v41  ;;  %v15600_v48 = vpack.c.bf16 %v12598_v46, %v12597_v3  ;;  %v12621_v28 = vld [vmem:[%s18467_s19 + $0x1b0] sm:$0xff]  ;;  %v12634_v46 = vld [vmem:[%s18468_s20 + $0x198] sm:$0xff] }
0x200a   :  { %v12633_v3 = vld [vmem:[%s18468_s20 + $0x190] sm:$0xff] }
0x200b   :  { %14542 = vmatmul.mubr.msk.f32.vlgmr.msra.gmra.mrb[94].mxu1 %vm1531_vm5, %v9613_v19  ;;  %v9989_v19 = vrot.slane %v18029_v8, %v16616_v55 }
0x200c   :  { %15595 = vmatpush3.bf16.msra.mxu1 %v17989_v18  ;;  %14548 = vmatprep.mubr.msk.f32.mxu1 %vm1531_vm5, %v9614_v60 }
0x200d   :  { %15613 = vmatprep.subr.bf16.mxu1 %v15612_v44 }
0x2013   :  { %14549 = vmatmul.mubr.msk.f32.vlgmr.msra.gmra.mrb[94].mxu1 %vm1531_vm5, %v9615_v13  ;;  %v12601_v13 = vld [vmem:[%s18465_s17 + $0x1b0] sm:$0xff] }
0x2014   :  { %15615 = vmatpush3.bf16.msra.mxu1 %v15612_v44  ;;  %v12622_v44 = vld [vmem:[%s18467_s19 + $0x1b8] sm:$0xff] }
0x2015   :  { %15617 = vmatprep.subr.bf16.mxu1 %v15616_v50  ;;  %v15640_v47 = vpack.c.bf16 %v12622_v44, %v12621_v28 }
0x2018   :  { %15619 = vmatpush3.bf16.msra.mxu1 %v15616_v50  ;;  %v15664_v50 = vpack.c.bf16 %v12634_v46, %v12633_v3 }
0x2019   :  { %15629 = vmatprep.subr.bf16.mxu1 %v15628_v61 }
0x20e6   :  { %v14550_v17 = vpop.f32.mrb[94].mxu1 }
0x20e7   :  { %v9951_v31 = vadd.f32 %v14550_v17, %v9949_v6  ;;  %v9931_v26 = vpop.f32.mrb[95].mxu1  ;;  %v12618_v17 = vld [vmem:[%s18467_s19 + $0x198] sm:$0xff] }
0x20e8   :  { %v9950_v42 = vadd.f32 %v9949_v6, %v9931_v26  ;;  %v12602_v6 = vld [vmem:[%s18465_s17 + $0x1b8] sm:$0xff]  ;;  %v12607_v26 = vld [vmem:[%s18465_s17 + $0x1e0] sm:$0xff] }
0x20e9   :  { %v9953_v18 = vadd.f32 %v9951_v31, %v17802_v29 }
0x20ea   :  { %v9952_v24 = vadd.f32 %v9950_v42, %v17800_v27  ;;  %v12595_v27 = vld [vmem:[%s18465_s17 + $0x180] sm:$0xff]  ;;  %v15608_v42 = vpack.c.bf16 %v12602_v6, %v12601_v13  ;;  %v12646_v13 = vld [vmem:[%s18468_s20 + $0x1f8] sm:$0xff] }
0x20eb   :  { %v9957_v34 = vsel %vm257_vm2, %v9953_v18, 0.0  ;;  %v15596_v32 = vpack.c.bf16 %v12596_v35, %v12595_v27  ;;  %v12631_v27 = vld [vmem:[%s18468_s20 + $0x180] sm:$0xff]  ;;  %v12632_v35 = vld [vmem:[%s18468_s20 + $0x188] sm:$0xff] }
0x20ec   :  { %9958 = vadd.xlane.f32.xlu0 %v9957_v34  ;;  %v9954_v33 = vsel %vm257_vm2, %v9952_v24, 0.0  ;;  %v12623_v34 = vld [vmem:[%s18467_s19 + $0x1c0] sm:$0xff] }
0x20ed   :  { %9955 = vadd.xlane.f32.xlu1 %v9954_v33  ;;  %15597 = vmatprep.subr.bf16.mxu0 %v15596_v32  ;;  %v12624_v33 = vld [vmem:[%s18467_s19 + $0x1c8] sm:$0xff] }
0x20ee   :  { %15599 = vmatpush3.bf16.msra.mxu0 %v15596_v32  ;;  %v15660_v32 = vpack.c.bf16 %v12632_v35, %v12631_v27 }
0x20ef   :  { %15601 = vmatprep.subr.bf16.mxu0 %v15600_v48 }
0x20f2   :  { %15603 = vmatpush3.bf16.msra.mxu0 %v15600_v48  ;;  %v12627_v48 = vld [vmem:[%s18467_s19 + $0x1e0] sm:$0xff] }
0x20f3   :  { %15605 = vmatprep.subr.bf16.mxu0 %v15604_v30  ;;  %v15652_v57 = vpack.c.bf16 %v12628_v49, %v12627_v48  ;;  %v12656_v48 = vld [vmem:[%s18466_s18 + $0xf] ss:$0 sm:$0xff] }
0x2179   :  { %v9959_v22 = vpop.xlane.xlu0 %9958 }
0x217a   :  { %v9961_v23 = vmul.f32 0.03125, %v9959_v22  ;;  %v9956_v25 = vpop.xlane.xlu1 %9955 }
0x217b   :  { %v9960_v59 = vmul.f32 0.03125, %v9956_v25  ;;  %v12609_v25 = vld [vmem:[%s18465_s17 + $0x1f0] sm:$0xff] }
0x217c   :  { %v9963_v37 = vsub.f32 %v9953_v18, %v9961_v23  ;;  %v15632_v18 = vpack.c.bf16 %v12618_v17, %v12617_v53  ;;  %v15644_v23 = vpack.c.bf16 %v12624_v33, %v12623_v34  ;;  %v12647_v53 = vld [vmem:[%s18466_s18 + $0xc] ss:$0 sm:$0xff] }
0x217d   :  { %v9962_v10 = vsub.f32 %v9952_v24, %v9960_v59  ;;  %v12608_v24 = vld [vmem:[%s18465_s17 + $0x1e8] sm:$0xff]  ;;  %v12610_v59 = vld [vmem:[%s18465_s17 + $0x1f8] sm:$0xff] }
0x217e   :  { %v9965_v39 = vmul.f32 %v9963_v37, %v9963_v37  ;;  %v15620_v22 = vpack.c.bf16 %v12608_v24, %v12607_v26 }
0x217f   :  { %v9964_v40 = vmul.f32 %v9962_v10, %v9962_v10 }
0x2180   :  { %v9969_v58 = vsel %vm257_vm2, %v9965_v39, 0.0  ;;  %v15624_v39 = vpack.c.bf16 %v12610_v59, %v12609_v25  ;;  %v12653_v59 = vld [vmem:[%s18466_s18 + $0xe] ss:$0 sm:$0xff] }
0x2181   :  { %9970 = vadd.xlane.f32.xlu0 %v9969_v58  ;;  %v9966_v29 = vsel %vm257_vm2, %v9964_v40, 0.0  ;;  %v12619_v58 = vld [vmem:[%s18467_s19 + $0x1a0] sm:$0xff] }
0x2182   :  { %9967 = vadd.xlane.f32.xlu1 %v9966_v29  ;;  %v12620_v29 = vld [vmem:[%s18467_s19 + $0x1a8] sm:$0xff] }
0x2183   :  { %v15636_v41 = vpack.c.bf16 %v12620_v29, %v12619_v58 }
0x220e   :  { %v9971_v62 = vpop.xlane.xlu0 %9970 }
0x220f   :  { %v9973_v38 = vmul.f32 0.03125, %v9971_v62  ;;  %v9968_v63 = vpop.xlane.xlu1 %9967  ;;  %v12641_v62 = vld [vmem:[%s18468_s20 + $0x1d0] sm:$0xff] }
0x2210   :  { %v9972_v0 = vmul.f32 0.03125, %v9968_v63 }
0x2211   :  { %v9975_v1 = vadd.f32 1e-05, %v9973_v38  ;;  %v12642_v38 = vld [vmem:[%s18468_s20 + $0x1d8] sm:$0xff] }
0x2212   :  { %v9974_v2 = vadd.f32 1e-05, %v9972_v0  ;;  %v12635_v0 = vld [vmem:[%s18468_s20 + $0x1a0] sm:$0xff] }
0x2213   :  { %15995 = vrsqrt.f32 %v9975_v1  ;;  %v12636_v1 = vld [vmem:[%s18468_s20 + $0x1a8] sm:$0xff] }
0x2214   :  { %15997 = vrsqrt.f32 %v9974_v2  ;;  %v15680_v2 = vpack.c.bf16 %v12642_v38, %v12641_v62 }
0x221d   :  { %v15996_v4 = vpop.eup %15995 }
0x221e   :  { %v15998_v20 = vpop.eup %15997  ;;  %v9979_v5 = vmul.f32 %v15996_v4, %v9963_v37  ;;  %v12625_v37 = vld [vmem:[%s18467_s19 + $0x1d0] sm:$0xff] }
0x221f   :  { %v9978_v15 = vmul.f32 %v15998_v20, %v9962_v10  ;;  %v12626_v10 = vld [vmem:[%s18467_s19 + $0x1d8] sm:$0xff]  ;;  %v12637_v4 = vld [vmem:[%s18468_s20 + $0x1b0] sm:$0xff] }
0x2220   :  { %v9985_v60 = vmul.f32 %v9983_v43, %v9979_v5  ;;  %v15648_v40 = vpack.c.bf16 %v12626_v10, %v12625_v37  ;;  %v12638_v20 = vld [vmem:[%s18468_s20 + $0x1b8] sm:$0xff] }
0x2221   :  { %v9984_v7 = vmul.f32 %v9983_v43, %v9978_v15  ;;  %v15668_v43 = vpack.c.bf16 %v12636_v1, %v12635_v0  ;;  %v15672_v5 = vpack.c.bf16 %v12638_v20, %v12637_v4  ;;  %v12643_v15 = vld [vmem:[%s18468_s20 + $0x1e0] sm:$0xff] }
0x2222   :  { %v18093_v55 = vadd.f32 %v9989_v19, %v9985_v60 }
0x2223   :  { %v18091_v31 = vadd.f32 %v9989_v19, %v9984_v7  ;;  %v12644_v19 = vld [vmem:[%s18468_s20 + $0x1e8] sm:$0xff]  ;;  %v12645_v7 = vld [vmem:[%s18468_s20 + $0x1f0] sm:$0xff] }
0x2224   :  { %v15684_v60 = vpack.c.bf16 %v12644_v19, %v12643_v15  ;;  %v15688_v6 = vpack.c.bf16 %v12646_v13, %v12645_v7 }
0x2225   :  { %14559 = vmatprep.mubr.msk.f32.mxu0 %vm257_vm2, %v18091_v31  ;;  %14581 = vmatprep.mubr.msk.f32.mxu1 %vm257_vm2, %v18091_v31 }
0x2226   :  { %14560 = vmatmul.mubr.msk.f32.vlgmr.msra.gmra.mrb[92].mxu0 %vm257_vm2, %v18093_v55  ;;  %14582 = vmatmul.mubr.msk.f32.vlgmr.msra.gmra.mrb[96].mxu1 %vm257_vm2, %v18093_v55 }
0x2227   :  { %15607 = vmatpush3.bf16.msra.mxu0 %v15604_v30  ;;  %15631 = vmatpush3.bf16.msra.mxu1 %v15628_v61  ;;  %v15676_v30 = vpack.c.bf16 %v12640_v52, %v12639_v51  ;;  %v12630_v61 = vld [vmem:[%s18467_s19 + $0x1f8] sm:$0xff] }
0x2228   :  { %14570 = vmatprep.mubr.msk.f32.mxu0 %vm257_vm2, %v18091_v31  ;;  %14603 = vmatprep.mubr.msk.f32.mxu1 %vm257_vm2, %v17474_v45  ;;  %v15656_v63 = vpack.c.bf16 %v12630_v61, %v12629_v14 }
0x2229   :  { %15609 = vmatprep.subr.bf16.mxu0 %v15608_v42  ;;  %15633 = vmatprep.subr.bf16.mxu1 %v15632_v18 }
0x222b   :  { %15611 = vmatpush3.bf16.msra.mxu0 %v15608_v42  ;;  %15635 = vmatpush3.bf16.msra.mxu1 %v15632_v18 }
0x222c   :  { %15621 = vmatprep.subr.bf16.mxu0 %v15620_v22  ;;  %15645 = vmatprep.subr.bf16.mxu1 %v15644_v23 }
0x222e   :  { %14571 = vmatmul.mubr.msk.f32.vlgmr.msra.gmra.mrb[94].mxu0 %vm257_vm2, %v18093_v55  ;;  %14604 = vmatmul.mubr.msk.f32.vlgmr.msra.gmra.mrb[98].mxu1 %vm257_vm2, %v17492_v56 }
0x222f   :  { %15623 = vmatpush3.bf16.msra.mxu0 %v15620_v22  ;;  %14592 = vmatprep.mubr.msk.f32.mxu0 %vm257_vm2, %v18091_v31 }
0x2230   :  { %15647 = vmatpush3.bf16.msra.mxu1 %v15644_v23  ;;  %14625 = vmatprep.mubr.msk.f32.mxu1 %vm257_vm2, %v17474_v45 }
0x2231   :  { %15625 = vmatprep.subr.bf16.mxu0 %v15624_v39  ;;  %15649 = vmatprep.subr.bf16.mxu1 %v15648_v40 }
0x2233   :  { %15627 = vmatpush3.bf16.msra.mxu0 %v15624_v39 }
0x2234   :  { %15651 = vmatpush3.bf16.msra.mxu1 %v15648_v40  ;;  %15637 = vmatprep.subr.bf16.mxu0 %v15636_v41 }
0x2235   :  { %15661 = vmatprep.subr.bf16.mxu1 %v15660_v32 }
0x2236   :  { %14593 = vmatmul.mubr.msk.f32.vlgmr.msra.gmra.mrb[96].mxu0 %vm257_vm2, %v18093_v55 }
0x2237   :  { %14626 = vmatmul.mubr.msk.f32.vlgmr.msra.gmra.mrb[100].mxu1 %vm257_vm2, %v17492_v56  ;;  %15639 = vmatpush3.bf16.msra.mxu0 %v15636_v41 }
0x2238   :  { %14614 = vmatprep.mubr.msk.f32.mxu0 %vm257_vm2, %v17474_v45  ;;  %15663 = vmatpush3.bf16.msra.mxu1 %v15660_v32 }
0x2239   :  { %14647 = vmatprep.mubr.msk.f32.mxu1 %vm257_vm2, %v17474_v45  ;;  %15641 = vmatprep.subr.bf16.mxu0 %v15640_v47 }
0x223a   :  { %15665 = vmatprep.subr.bf16.mxu1 %v15664_v50 }
0x223b   :  { %15643 = vmatpush3.bf16.msra.mxu0 %v15640_v47 }
0x223c   :  { %15667 = vmatpush3.bf16.msra.mxu1 %v15664_v50  ;;  %15653 = vmatprep.subr.bf16.mxu0 %v15652_v57 }
0x223d   :  { %15677 = vmatprep.subr.bf16.mxu1 %v15676_v30 }
0x223e   :  { %14615 = vmatmul.mubr.msk.f32.vlgmr.msra.gmra.mrb[98].mxu0 %vm257_vm2, %v17492_v56 }
0x223f   :  { %14648 = vmatmul.mubr.msk.f32.vlgmr.msra.gmra.mrb[102].mxu1 %vm257_vm2, %v17492_v56  ;;  %15655 = vmatpush3.bf16.msra.mxu0 %v15652_v57 }
0x2240   :  { %14636 = vmatprep.mubr.msk.f32.mxu0 %vm257_vm2, %v17474_v45  ;;  %15679 = vmatpush3.bf16.msra.mxu1 %v15676_v30 }
0x2241   :  { %14669 = vmatprep.mubr.msk.f32.mxu1 %vm257_vm2, %v17474_v45  ;;  %15657 = vmatprep.subr.bf16.mxu0 %v15656_v63 }
0x2242   :  { %15681 = vmatprep.subr.bf16.mxu1 %v15680_v2 }
0x2243   :  { %15659 = vmatpush3.bf16.msra.mxu0 %v15656_v63 }
0x2244   :  { %15683 = vmatpush3.bf16.msra.mxu1 %v15680_v2  ;;  %15669 = vmatprep.subr.bf16.mxu0 %v15668_v43 }
0x2246   :  { %14637 = vmatmul.mubr.msk.f32.vlgmr.msra.gmra.mrb[100].mxu0 %vm257_vm2, %v17492_v56 }
0x2247   :  { %14670 = vmatmul.mubr.msk.f32.vlgmr.msra.gmra.mrb[104].mxu1 %vm257_vm2, %v17492_v56  ;;  %15671 = vmatpush3.bf16.msra.mxu0 %v15668_v43 }
0x2248   :  { %14658 = vmatprep.mubr.msk.f32.mxu0 %vm257_vm2, %v17474_v45  ;;  %15673 = vmatprep.subr.bf16.mxu0 %v15672_v5 }
0x224b   :  { %15675 = vmatpush3.bf16.msra.mxu0 %v15672_v5  ;;  %v16044_v5 = vld [vmem:[%s18519_s11] sm:$0xff] }
0x224c   :  { %15685 = vmatprep.subr.bf16.mxu0 %v15684_v60 }
0x224e   :  { %14659 = vmatmul.mubr.msk.f32.vlgmr.msra.gmra.mrb[102].mxu0 %vm257_vm2, %v17492_v56 }
0x224f   :  { %15687 = vmatpush3.bf16.msra.mxu0 %v15684_v60  ;;  %14680 = vmatprep.mubr.msk.f32.mxu0 %vm257_vm2, %v17474_v45  ;;  %v12650_v45 = vld [vmem:[%s18466_s18 + $0xd] ss:$0 sm:$0xff] }
0x2250   :  { %15689 = vmatprep.subr.bf16.mxu0 %v15688_v6 }
0x2253   :  { %15691 = vmatpush3.bf16.msra.mxu0 %v15688_v6 }
0x2256   :  { %14681 = vmatmul.mubr.msk.f32.vlgmr.msra.gmra.mrb[104].mxu0 %vm257_vm2, %v17492_v56 }
0x22f9   :  { %v14561_v17 = vpop.f32.mrb[92].mxu0  ;;  %v14583_v26 = vpop.f32.mrb[96].mxu1 }
0x22fa   :  { %v10126_v42 = vpop.f32.mrb[93].mxu0  ;;  %v10288_v18 = vpop.f32.mrb[97].mxu1  ;;  %v10132_v40 = vadd.f32 %v14561_v17, %v12647_v53  ;;  %v10294_v3 = vadd.f32 %v14583_v26, %v12653_v59 }
0x22fb   :  { %v10127_v24 = vadd.f32 %v12647_v53, %v10126_v42  ;;  %v10289_v29 = vadd.f32 %v12653_v59, %v10288_v18 }
0x22fd   :  { %14687 = vmatprep.mubr.msk.f32.mxu1 %vm1182_vm3, %v10127_v24 }
0x2301   :  { %v14572_v34 = vpop.f32.mrb[94].mxu0  ;;  %v14605_v33 = vpop.f32.mrb[98].mxu1 }
0x2302   :  { %v10207_v22 = vpop.f32.mrb[95].mxu0  ;;  %v10444_v23 = vpop.f32.mrb[99].mxu1  ;;  %v10213_v57 = vadd.f32 %v14572_v34, %v12650_v45 }
0x2303   :  { %v10208_v56 = vadd.f32 %v12650_v45, %v10207_v22  ;;  %v15692_v25 = vpack.c.bf16 %v14605_v33, %v10444_v23 }
0x2305   :  { %15694 = vmatprep.subr.msk.bf16.mxu1 %vm16488_vm4, %v15692_v25  ;;  %14694 = vmatprep.mubr.msk.f32.mxu0 %vm1182_vm3, %v10208_v56 }
0x2306   :  { %15697 = vmatpush3.bf16.xpose.msk.msra.mxu1 %vm16488_vm4, %v15692_v25 }
0x2309   :  { %v14594_v37 = vpop.f32.mrb[96].mxu0 }
0x230a   :  { %v14627_v10 = vpop.f32.mrb[100].mxu1  ;;  %v10369_v39 = vpop.f32.mrb[97].mxu0  ;;  %v10375_v63 = vadd.f32 %v14594_v37, %v12656_v48 }
0x230b   :  { %v10594_v58 = vpop.f32.mrb[101].mxu1  ;;  %v10370_v14 = vadd.f32 %v12656_v48, %v10369_v39 }
0x230c   :  { %v15704_v27 = vpack.c.bf16 %v14627_v10, %v10594_v58 }
0x230d   :  { %14688 = vmatmul.mubr.msk.f32.vlgmr.msra.gmra.mrb[106].mxu1 %vm1182_vm3, %v10132_v40 }
0x230e   :  { %15706 = vmatprep.subr.msk.bf16.mxu1 %vm16488_vm4, %v15704_v27  ;;  %14701 = vmatprep.mubr.msk.f32.mxu1 %vm1182_vm3, %v10289_v29 }
0x230f   :  { %15709 = vmatpush3.bf16.xpose.msk.msra.mxu1 %vm16488_vm4, %v15704_v27 }
0x2311   :  { %v14616_v35 = vpop.f32.mrb[98].mxu0 }
0x2312   :  { %v14649_v41 = vpop.f32.mrb[102].mxu1  ;;  %v10519_v32 = vpop.f32.mrb[99].mxu0 }
0x2313   :  { %v15698_v28 = vpack.c.bf16 %v14616_v35, %v10519_v32  ;;  %v10744_v44 = vpop.f32.mrb[103].mxu1 }
0x2314   :  { %v15716_v46 = vpack.c.bf16 %v14649_v41, %v10744_v44 }
0x2315   :  { %15700 = vmatprep.subr.msk.bf16.mxu0 %vm16488_vm4, %v15698_v28 }
0x2316   :  { %14702 = vmatmul.mubr.msk.f32.vlgmr.msra.gmra.mrb[108].mxu1 %vm1182_vm3, %v10294_v3  ;;  %15717 = vmatprep.subr.bf16.mxu1 %v15716_v46 }
0x2317   :  { %15703 = vmatpush3.bf16.xpose.msk.msra.mxu0 %vm16488_vm4, %v15698_v28  ;;  %15719 = vmatpush3.bf16.msra.mxu1 %v15716_v46 }
0x2319   :  { %v14638_v47 = vpop.f32.mrb[100].mxu0 }
0x231a   :  { %v14671_v49 = vpop.f32.mrb[104].mxu1  ;;  %v10669_v50 = vpop.f32.mrb[101].mxu0 }
0x231b   :  { %v15710_v51 = vpack.c.bf16 %v14638_v47, %v10669_v50  ;;  %v10894_v52 = vpop.f32.mrb[105].mxu1 }
0x231c   :  { %v18268_v30 = vpack.c.bf16 %v14671_v49, %v10894_v52 }
0x231d   :  { %15712 = vmatprep.subr.msk.bf16.mxu0 %vm16488_vm4, %v15710_v51 }
0x231e   :  { %14695 = vmatmul.mubr.msk.f32.vlgmr.msra.gmra.mrb[106].mxu0 %vm1182_vm3, %v10213_v57 }
0x231f   :  { %15715 = vmatpush3.bf16.xpose.msk.msra.mxu0 %vm16488_vm4, %v15710_v51  ;;  %14708 = vmatprep.mubr.msk.f32.mxu0 %vm1182_vm3, %v10370_v14 }
0x2321   :  { %v14660_v61 = vpop.f32.mrb[102].mxu0 }
0x2322   :  { %v10819_v62 = vpop.f32.mrb[103].mxu0 }
0x2323   :  { %v18276_v38 = vpack.c.bf16 %v14660_v61, %v10819_v62 }
0x2325   :  { %15721 = vmatprep.subr.bf16.mxu1 %v18276_v38 }
0x2326   :  { %14709 = vmatmul.mubr.msk.f32.vlgmr.msra.gmra.mrb[108].mxu0 %vm1182_vm3, %v10375_v63 }
0x2329   :  { %v14682_v0 = vpop.f32.mrb[104].mxu0 }
0x232a   :  { %v10969_v1 = vpop.f32.mrb[105].mxu0 }
0x232b   :  { %v18280_v2 = vpack.c.bf16 %v14682_v0, %v10969_v1 }
0x23e0   :  { %v14689_v43 = vpop.f32.mrb[106].mxu1 }
0x23e1   :  { %v11062_v4 = vadd.f32 %v16043_v54, %v14689_v43  ;;  %v11056_v20 = vpop.f32.mrb[107].mxu1 }
0x23e2   :  { %v11057_v15 = vadd.f32 %v16044_v5, %v11056_v20 }
0x23e3   :  { %v11329_v19 = vsel %vm1531_vm5, %v11062_v4, -inf }
0x23e4   :  { %11330 = vmax.xlane.f32.xlu0 %v11329_v19  ;;  %v11326_v60 = vsel %vm1531_vm5, %v11057_v15, -inf }
0x23e5   :  { %11327 = vmax.xlane.f32.xlu1 %v11326_v60 }
0x23e9   :  { %v14703_v7 = vpop.f32.mrb[108].mxu1 }
0x23ea   :  { %v11230_v13 = vpop.f32.mrb[109].mxu1  ;;  %v11236_v42 = vadd.f32 %v16043_v54, %v14703_v7 }
0x23eb   :  { %v11231_v24 = vadd.f32 %v16044_v5, %v11230_v13 }
0x23ec   :  { %v11341_v34 = vsel %vm1531_vm5, %v11236_v42, -inf }
0x23ed   :  { %v11338_v22 = vsel %vm1531_vm5, %v11231_v24, -inf }
0x23f1   :  { %v14696_v6 = vpop.f32.mrb[106].mxu0 }
0x23f2   :  { %v11149_v53 = vadd.f32 %v16043_v54, %v14696_v6  ;;  %v11143_v17 = vpop.f32.mrb[107].mxu0 }
0x23f3   :  { %v11144_v26 = vadd.f32 %v16044_v5, %v11143_v17 }
0x23f4   :  { %v11335_v18 = vsel %vm1531_vm5, %v11149_v53, -inf }
0x23f5   :  { %11336 = vmax.xlane.f32.xlu0 %v11335_v18  ;;  %v11332_v45 = vsel %vm1531_vm5, %v11144_v26, -inf }
0x23f6   :  { %11333 = vmax.xlane.f32.xlu1 %v11332_v45 }
0x23f9   :  { %v14710_v33 = vpop.f32.mrb[108].mxu0  ;;  %11342 = vmax.xlane.f32.xlu0 %v11341_v34 }
0x23fa   :  { %v11323_v23 = vadd.f32 %v16043_v54, %v14710_v33  ;;  %v11317_v56 = vpop.f32.mrb[109].mxu0  ;;  %11339 = vmax.xlane.f32.xlu1 %v11338_v22 }
0x23fb   :  { %v11318_v25 = vadd.f32 %v16044_v5, %v11317_v56 }
0x23fc   :  { %v11347_v59 = vsel %vm1531_vm5, %v11323_v23, -inf }
0x23fd   :  { %11348 = vmax.xlane.f32.xlu0 %v11347_v59  ;;  %v11344_v37 = vsel %vm1531_vm5, %v11318_v25, -inf }
0x23fe   :  { %11345 = vmax.xlane.f32.xlu1 %v11344_v37 }
0x2471   :  { %v11331_v10 = vpop.xlane.xlu0 %11330 }
0x2472   :  { %v11351_v39 = vsub.f32 %v11062_v4, %v11331_v10  ;;  %v11328_v40 = vpop.xlane.xlu1 %11327 }
0x2473   :  { %v11350_v58 = vsub.f32 %v11057_v15, %v11328_v40 }
0x2474   :  { %v11360_v29 = vmul.f32 1.442695, %v11351_v39 }
0x2475   :  { %v11358_v27 = vmul.f32 1.442695, %v11350_v58 }
0x2476   :  { %15999 = vpow2.f32 %v11360_v29 }
0x2477   :  { %16001 = vpow2.f32 %v11358_v27 }
0x2480   :  { %v16000_v35 = vpop.eup %15999 }
0x2481   :  { %v16002_v41 = vpop.eup %16001  ;;  %v11377_v32 = vsel %vm1531_vm5, %v16000_v35, 0.0 }
0x2482   :  { %v11337_v28 = vpop.xlane.xlu0 %11336  ;;  %11378 = vadd.xlane.f32.xlu0 %v11377_v32  ;;  %v11374_v44 = vsel %vm1531_vm5, %v16002_v41, 0.0 }
0x2483   :  { %v11353_v3 = vsub.f32 %v11149_v53, %v11337_v28  ;;  %v11334_v46 = vpop.xlane.xlu1 %11333  ;;  %11375 = vadd.xlane.f32.xlu1 %v11374_v44 }
0x2484   :  { %v11352_v47 = vsub.f32 %v11144_v26, %v11334_v46 }
0x2485   :  { %v11364_v48 = vmul.f32 1.442695, %v11353_v3 }
0x2486   :  { %v11362_v49 = vmul.f32 1.442695, %v11352_v47  ;;  %v11343_v50 = vpop.xlane.xlu0 %11342 }
0x2487   :  { %16003 = vpow2.f32 %v11364_v48  ;;  %v11355_v51 = vsub.f32 %v11236_v42, %v11343_v50  ;;  %v11340_v52 = vpop.xlane.xlu1 %11339 }
0x2488   :  { %16005 = vpow2.f32 %v11362_v49  ;;  %v11354_v57 = vsub.f32 %v11231_v24, %v11340_v52 }
0x2489   :  { %v11368_v14 = vmul.f32 1.442695, %v11355_v51 }
0x248a   :  { %v11366_v61 = vmul.f32 1.442695, %v11354_v57  ;;  %v11349_v62 = vpop.xlane.xlu0 %11348 }
0x248b   :  { %16007 = vpow2.f32 %v11368_v14  ;;  %v11357_v63 = vsub.f32 %v11323_v23, %v11349_v62  ;;  %v11346_v0 = vpop.xlane.xlu1 %11345 }
0x248c   :  { %16009 = vpow2.f32 %v11366_v61  ;;  %v11356_v1 = vsub.f32 %v11318_v25, %v11346_v0 }
0x248d   :  { %v11372_v43 = vmul.f32 1.442695, %v11357_v63 }
0x248e   :  { %v11370_v54 = vmul.f32 1.442695, %v11356_v1 }
0x248f   :  { %16011 = vpow2.f32 %v11372_v43  ;;  %v12700_v43 = vld [vmem:[%s18469_s21 + $0x28] sm:$0xff] }
0x2490   :  { %16013 = vpow2.f32 %v11370_v54 }
0x2491   :  { %v16004_v4 = vpop.eup %16003 }
0x2492   :  { %v16006_v20 = vpop.eup %16005  ;;  %v11383_v5 = vsel %vm1531_vm5, %v16004_v4, 0.0 }
0x2493   :  { %11384 = vadd.xlane.f32.xlu0 %v11383_v5  ;;  %v11380_v15 = vsel %vm1531_vm5, %v16006_v20, 0.0 }
0x2494   :  { %11381 = vadd.xlane.f32.xlu1 %v11380_v15  ;;  %v12707_v15 = vld [vmem:[%s18471_s23 + $0x40] sm:$0xff] }
0x2495   :  { %v16008_v19 = vpop.eup %16007 }
0x2496   :  { %v16010_v60 = vpop.eup %16009  ;;  %v11389_v7 = vsel %vm1531_vm5, %v16008_v19, 0.0 }
0x2497   :  { %11390 = vadd.xlane.f32.xlu0 %v11389_v7  ;;  %v11386_v13 = vsel %vm1531_vm5, %v16010_v60, 0.0 }
0x2498   :  { %11387 = vadd.xlane.f32.xlu1 %v11386_v13 }
0x2499   :  { %v16012_v6 = vpop.eup %16011 }
0x249a   :  { %v16014_v53 = vpop.eup %16013  ;;  %v11395_v17 = vsel %vm1531_vm5, %v16012_v6, 0.0 }
0x249b   :  { %11396 = vadd.xlane.f32.xlu0 %v11395_v17  ;;  %v11392_v26 = vsel %vm1531_vm5, %v16014_v53, 0.0 }
0x249c   :  { %11393 = vadd.xlane.f32.xlu1 %v11392_v26 }
0x250f   :  { %v11379_v42 = vpop.xlane.xlu0 %11378 }
0x2510   :  { %16015 = vrcp.f32 %v11379_v42  ;;  %v11376_v18 = vpop.xlane.xlu1 %11375  ;;  %v11781_v42 = vrot.slane %v18029_v8, %v16693_v11 }
0x2511   :  { %16017 = vrcp.f32 %v11376_v18 }
0x251a   :  { %v16016_v24 = vpop.eup %16015 }
0x251b   :  { %v16018_v45 = vpop.eup %16017  ;;  %v11407_v34 = vmul.f32 %v16016_v24, %v16000_v35 }
0x251c   :  { %v11406_v33 = vmul.f32 %v16018_v45, %v16002_v41 }
0x251d   :  { %12116 = vst.msk [vmem:[%s18476_s28 + $0x8] sm:$0xff] %vm1531_vm5, %v11407_v34 }
0x251e   :  { %14715 = vmatprep.mubr.msk.f32.mxu1 %vm1531_vm5, %v11406_v33  ;;  %12115 = vst.msk [vmem:[%s18476_s28] sm:$0xff] %vm1531_vm5, %v11406_v33  ;;  %v11787_v33 = vrot.slane %v18029_v8, %v16696_v12  ;;  %v12712_v12 = vld [vmem:[%s18471_s23 + $0x68] sm:$0xff] }
0x251f   :  { %14716 = vmatmul.mubr.msk.f32.vlgmr.msra.gmra.mrb[110].mxu1 %vm1531_vm5, %v11407_v34 }
0x2520   :  { %v11385_v22 = vpop.xlane.xlu0 %11384  ;;  %15723 = vmatpush3.bf16.msra.mxu1 %v18276_v38 }
0x2521   :  { %16019 = vrcp.f32 %v11385_v22  ;;  %15725 = vmatprep.subr.bf16.mxu1 %v18268_v30  ;;  %v11382_v23 = vpop.xlane.xlu1 %11381 }
0x2522   :  { %16021 = vrcp.f32 %v11382_v23 }
0x2524   :  { %v11391_v56 = vpop.xlane.xlu0 %11390 }
0x2525   :  { %16023 = vrcp.f32 %v11391_v56  ;;  %v11388_v25 = vpop.xlane.xlu1 %11387  ;;  %v12709_v56 = vld [vmem:[%s18471_s23 + $0x50] sm:$0xff] }
0x2526   :  { %16025 = vrcp.f32 %v11388_v25  ;;  %v12710_v25 = vld [vmem:[%s18471_s23 + $0x58] sm:$0xff] }
0x2527   :  { %v15744_v11 = vpack.c.bf16 %v12710_v25, %v12709_v56 }
0x2528   :  { %v11397_v59 = vpop.xlane.xlu0 %11396 }
0x2529   :  { %16027 = vrcp.f32 %v11397_v59  ;;  %v11394_v37 = vpop.xlane.xlu1 %11393 }
0x252a   :  { %16029 = vrcp.f32 %v11394_v37 }
0x252b   :  { %v16020_v10 = vpop.eup %16019 }
0x252c   :  { %v16022_v39 = vpop.eup %16021  ;;  %v11409_v40 = vmul.f32 %v16020_v10, %v16004_v4  ;;  %v12701_v4 = vld [vmem:[%s18469_s21 + $0x30] sm:$0xff]  ;;  %v12711_v10 = vld [vmem:[%s18471_s23 + $0x60] sm:$0xff] }
0x252d   :  { %v11408_v58 = vmul.f32 %v16022_v39, %v16006_v20  ;;  %v12702_v20 = vld [vmem:[%s18469_s21 + $0x38] sm:$0xff]  ;;  %v15748_v39 = vpack.c.bf16 %v12712_v12, %v12711_v10 }
0x252e   :  { %12118 = vst.msk [vmem:[%s18476_s28 + $0x18] sm:$0xff] %vm1531_vm5, %v11409_v40  ;;  %v15736_v5 = vpack.c.bf16 %v12702_v20, %v12701_v4 }
0x252f   :  { %v16024_v38 = vpop.eup %16023  ;;  %14722 = vmatprep.mubr.msk.f32.mxu1 %vm1531_vm5, %v11408_v58  ;;  %12117 = vst.msk [vmem:[%s18476_s28 + $0x10] sm:$0xff] %vm1531_vm5, %v11408_v58  ;;  %v12714_v58 = vld [vmem:[%s18471_s23 + $0x78] sm:$0xff] }
0x2530   :  { %v16026_v29 = vpop.eup %16025  ;;  %v11411_v27 = vmul.f32 %v16024_v38, %v16008_v19  ;;  %14723 = vmatmul.mubr.msk.f32.vlgmr.msra.gmra.mrb[110].mxu1 %vm1531_vm5, %v11409_v40  ;;  %v12708_v19 = vld [vmem:[%s18471_s23 + $0x48] sm:$0xff]  ;;  %v12713_v40 = vld [vmem:[%s18471_s23 + $0x70] sm:$0xff] }
0x2531   :  { %15727 = vmatpush3.bf16.msra.mxu1 %v18268_v30  ;;  %v11410_v35 = vmul.f32 %v16026_v29, %v16010_v60  ;;  %v11747_v30 = vrot.slane %v18029_v8, %v16648_v21  ;;  %v15740_v60 = vpack.c.bf16 %v12708_v19, %v12707_v15  ;;  %v15752_v38 = vpack.c.bf16 %v12714_v58, %v12713_v40  ;;  %v12704_v29 = vld [vmem:[%s18520_s8 + $0x1] ss:$0 sm:$0xff] }
0x2532   :  { %12120 = vst.msk [vmem:[%s18476_s28 + $0x28] sm:$0xff] %vm1531_vm5, %v11411_v27  ;;  %15729 = vmatprep.subr.bf16.mxu1 %v18280_v2 }
0x2533   :  { %v16028_v41 = vpop.eup %16027  ;;  %14729 = vmatprep.mubr.msk.f32.mxu1 %vm1531_vm5, %v11410_v35  ;;  %12119 = vst.msk [vmem:[%s18476_s28 + $0x20] sm:$0xff] %vm1531_vm5, %v11410_v35 }
0x2534   :  { %v16030_v32 = vpop.eup %16029  ;;  %v11413_v28 = vmul.f32 %v16028_v41, %v16012_v6 }
0x2535   :  { %v11412_v44 = vmul.f32 %v16030_v32, %v16014_v53 }
0x2536   :  { %12122 = vst.msk [vmem:[%s18476_s28 + $0x38] sm:$0xff] %vm1531_vm5, %v11413_v28 }
0x2537   :  { %12121 = vst.msk [vmem:[%s18476_s28 + $0x30] sm:$0xff] %vm1531_vm5, %v11412_v44 }
0x2538   :  { %14730 = vmatmul.mubr.msk.f32.vlgmr.msra.gmra.mrb[110].mxu1 %vm1531_vm5, %v11411_v27 }
0x2539   :  { %15731 = vmatpush3.bf16.msra.mxu1 %v18280_v2  ;;  %14736 = vmatprep.mubr.msk.f32.mxu1 %vm1531_vm5, %v11412_v44 }
0x2540   :  { %14737 = vmatmul.mubr.msk.f32.vlgmr.msra.gmra.mrb[110].mxu1 %vm1531_vm5, %v11413_v28 }
0x2613   :  { %v14738_v3 = vpop.f32.mrb[110].mxu1 }
0x2614   :  { %v11749_v46 = vadd.f32 %v14738_v3, %v11747_v30  ;;  %v11729_v47 = vpop.f32.mrb[111].mxu1 }
0x2615   :  { %v11748_v48 = vadd.f32 %v11747_v30, %v11729_v47  ;;  %v11898_v30 = vrot.slane %v18029_v8, %v8068_v36 }
0x2616   :  { %v11751_v49 = vadd.f32 %v11749_v46, %v18093_v55 }
0x2617   :  { %v11750_v50 = vadd.f32 %v11748_v48, %v18091_v31  ;;  %v12699_v31 = vld [vmem:[%s18469_s21 + $0x20] sm:$0xff]  ;;  %s16072_s21 = smov [#allocation2]  }
0x2618   :  { %v11755_v51 = vsel %vm257_vm2, %v11751_v49, 0.0  ;;  %v15732_v54 = vpack.c.bf16 %v12700_v43, %v12699_v31  ;;  %v12022_v43 = vld [vmem:[%s18473_s25 + $0x10] sm:$0xff]  ;;  %s12128_s16 = sshll.u32 %s16072_s21, 4  ;;  %s12129_s16 = int_to_ptr.vmem [resolvable:$true] %s12128_s16 }
0x2619   :  { %11756 = vadd.xlane.f32.xlu0 %v11755_v51  ;;  %v11752_v2 = vsel %vm257_vm2, %v11750_v50, 0.0  ;;  %p16051_p1 = scmp.lt.s32.totalorder %s12129_s16, %s12129_s16 }
0x261a   :  { %11753 = vadd.xlane.f32.xlu1 %v11752_v2  ;;  %15733 = vmatprep.subr.bf16.mxu0 %v15732_v54 }
0x261b   :  { %15735 = vmatpush3.bf16.msra.mxu0 %v15732_v54  ;;  %v12023_v54 = vld [vmem:[%s18473_s25 + $0x18] sm:$0xff] }
0x261c   :  { %15737 = vmatprep.subr.bf16.mxu0 %v15736_v5  ;;  %v15760_v4 = vpack.c.bf16 %v12023_v54, %v12022_v43 }
0x261f   :  { %15739 = vmatpush3.bf16.msra.mxu0 %v15736_v5 }
0x2620   :  { %15741 = vmatprep.subr.bf16.mxu0 %v15740_v60 }
0x26a6   :  { %v11757_v52 = vpop.xlane.xlu0 %11756 }
0x26a7   :  { %v11759_v57 = vmul.f32 0.03125, %v11757_v52  ;;  %v11754_v14 = vpop.xlane.xlu1 %11753 }
0x26a8   :  { %v11758_v61 = vmul.f32 0.03125, %v11754_v14 }
0x26a9   :  { %v11761_v62 = vsub.f32 %v11751_v49, %v11759_v57 }
0x26aa   :  { %v11760_v21 = vsub.f32 %v11750_v50, %v11758_v61 }
0x26ab   :  { %v11763_v63 = vmul.f32 %v11761_v62, %v11761_v62 }
0x26ac   :  { %v11762_v0 = vmul.f32 %v11760_v21, %v11760_v21 }
0x26ad   :  { %v11767_v1 = vsel %vm257_vm2, %v11763_v63, 0.0 }
0x26ae   :  { %11768 = vadd.xlane.f32.xlu0 %v11767_v1  ;;  %v11764_v55 = vsel %vm257_vm2, %v11762_v0, 0.0  ;;  %v12020_v1 = vld [vmem:[%s18473_s25] sm:$0xff] }
0x26af   :  { %11765 = vadd.xlane.f32.xlu1 %v11764_v55  ;;  %v12021_v55 = vld [vmem:[%s18473_s25 + $0x8] sm:$0xff] }
0x26b0   :  { %v15756_v31 = vpack.c.bf16 %v12021_v55, %v12020_v1 }
0x26b2   :  { %15757 = vmatprep.subr.bf16.mxu1 %v15756_v31 }
0x26b3   :  { %15759 = vmatpush3.bf16.msra.mxu1 %v15756_v31 }
0x26b4   :  { %15761 = vmatprep.subr.bf16.mxu1 %v15760_v4 }
0x26b7   :  { %15763 = vmatpush3.bf16.msra.mxu1 %v15760_v4 }
0x273b   :  { %v11769_v7 = vpop.xlane.xlu0 %11768 }
0x273c   :  { %v11771_v13 = vmul.f32 0.03125, %v11769_v7  ;;  %v11766_v6 = vpop.xlane.xlu1 %11765 }
0x273d   :  { %v11770_v53 = vmul.f32 0.03125, %v11766_v6 }
0x273e   :  { %v11773_v17 = vadd.f32 1e-05, %v11771_v13  ;;  %v16045_v13 = vld [vmem:[%s18472_s24 + $0x10] sm:$0xff] }
0x273f   :  { %v11772_v26 = vadd.f32 1e-05, %v11770_v53  ;;  %v12011_v6 = vrot.slane %v16045_v13, %v8181_v16 }
0x2740   :  { %16031 = vrsqrt.f32 %v11773_v17 }
0x2741   :  { %16033 = vrsqrt.f32 %v11772_v26 }
0x274a   :  { %v16032_v18 = vpop.eup %16031 }
0x274b   :  { %v16034_v24 = vpop.eup %16033  ;;  %v11777_v45 = vmul.f32 %v16032_v18, %v11761_v62  ;;  %v12717_v18 = vld [vmem:[%s18472_s24 + $0x18] ss:$0 sm:$0xff]  ;;  %s16046_s24 = scalar_lea.vmem %s12129_s16, 256 }
0x274c   :  { %v11776_v34 = vmul.f32 %v16034_v24, %v11760_v21  ;;  %p16047_p0 = scmp.ne.s32.totalorder %s12129_s16, %s16046_s24  ;;  %p16052_p2 = scmp.lt.s32.totalorder %s16046_s24, %s16046_s24 }
0x274d   :  { %v11783_v22 = vmul.f32 %v11781_v42, %v11777_v45 }
0x274e   :  { %v11782_v23 = vmul.f32 %v11781_v42, %v11776_v34  ;;  %p16053_p3 = por %p16052_p2, %p16051_p1 }
0x274f   :  { %v11789_v37 = vadd.f32 %v11787_v33, %v11783_v22 }
0x2750   :  { %v11788_v59 = vadd.f32 %v11787_v33, %v11782_v23  ;;  %p16054_p4 = pnand %p16053_p3, %p16047_p0 }
0x2752   :  { %14747 = vmatprep.mubr.msk.f32.mxu0 %vm257_vm2, %v11788_v59 }
0x2753   :  { %14748 = vmatmul.mubr.msk.f32.vlgmr.msra.gmra.mrb[110].mxu0 %vm257_vm2, %v11789_v37 }
0x2754   :  { %15743 = vmatpush3.bf16.msra.mxu0 %v15740_v60 }
0x2755   :  { %15745 = vmatprep.subr.bf16.mxu0 %v15744_v11 }
0x2758   :  { %15747 = vmatpush3.bf16.msra.mxu0 %v15744_v11 }
0x2759   :  { %15749 = vmatprep.subr.bf16.mxu0 %v15748_v39 }
0x275c   :  { %15751 = vmatpush3.bf16.msra.mxu0 %v15748_v39 }
0x275d   :  { %15753 = vmatprep.subr.bf16.mxu0 %v15752_v38 }
0x2760   :  { %15755 = vmatpush3.bf16.msra.mxu0 %v15752_v38 }
0x2826   :  { %v14749_v27 = vpop.f32.mrb[110].mxu0 }
0x2827   :  { %v11881_v35 = vadd.f32 %v14749_v27, %v12704_v29  ;;  %v11875_v41 = vpop.f32.mrb[111].mxu0 }
0x2828   :  { %v11876_v32 = vadd.f32 %v12704_v29, %v11875_v41 }
0x2829   :  { %v11885_v44 = vmax.f32 %v11881_v35, 0.0 }
0x282a   :  { %v11884_v28 = vmax.f32 %v11876_v32, 0.0 }
0x282c   :  { %14766 = vmatprep.mubr.msk.f32.mxu0 %vm2103_vm6, %v11884_v28 }
0x282d   :  { %14767 = vmatmul.mubr.msk.f32.vlgmr.msra.gmra.mrb[112].mxu0 %vm2103_vm6, %v11885_v44 }
0x2900   :  { %v14768_v3 = vpop.f32.mrb[112].mxu0 }
0x2901   :  { %v11977_v46 = vadd.f32 %v14768_v3, %v11898_v30  ;;  %v11971_v47 = vpop.f32.mrb[113].mxu0 }
0x2902   :  { %v11972_v48 = vadd.f32 %v11971_v47, %v11898_v30 }
0x2903   :  { %v11981_v49 = vadd.f32 %v11977_v46, %v11789_v37 }
0x2904   :  { %v11980_v50 = vadd.f32 %v11972_v48, %v11788_v59 }
0x2905   :  { %v11985_v51 = vsel %vm257_vm2, %v11981_v49, 0.0 }
0x2906   :  { %11986 = vadd.xlane.f32.xlu0 %v11985_v51  ;;  %v11982_v2 = vsel %vm257_vm2, %v11980_v50, 0.0 }
0x2907   :  { %11983 = vadd.xlane.f32.xlu1 %v11982_v2 }
0x2993   :  { %v11987_v52 = vpop.xlane.xlu0 %11986 }
0x2994   :  { %v11989_v57 = vmul.f32 0.03125, %v11987_v52  ;;  %v11984_v14 = vpop.xlane.xlu1 %11983 }
0x2995   :  { %v11988_v61 = vmul.f32 0.03125, %v11984_v14 }
0x2996   :  { %v11991_v62 = vsub.f32 %v11981_v49, %v11989_v57 }
0x2997   :  { %v11990_v21 = vsub.f32 %v11980_v50, %v11988_v61 }
0x2998   :  { %v11993_v63 = vmul.f32 %v11991_v62, %v11991_v62 }
0x2999   :  { %v11992_v36 = vmul.f32 %v11990_v21, %v11990_v21 }
0x299a   :  { %v11997_v8 = vsel %vm257_vm2, %v11993_v63, 0.0 }
0x299b   :  { %11998 = vadd.xlane.f32.xlu0 %v11997_v8  ;;  %v11994_v0 = vsel %vm257_vm2, %v11992_v36, 0.0 }
0x299c   :  { %11995 = vadd.xlane.f32.xlu1 %v11994_v0 }
0x2a28   :  { %v11999_v20 = vpop.xlane.xlu0 %11998 }
0x2a29   :  { %v12001_v5 = vmul.f32 0.03125, %v11999_v20  ;;  %v11996_v15 = vpop.xlane.xlu1 %11995 }
0x2a2a   :  { %v12000_v19 = vmul.f32 0.03125, %v11996_v15 }
0x2a2b   :  { %v12003_v60 = vadd.f32 1e-05, %v12001_v5 }
0x2a2c   :  { %v12002_v7 = vadd.f32 1e-05, %v12000_v19 }
0x2a2d   :  { %16035 = vrsqrt.f32 %v12003_v60 }
0x2a2e   :  { %16037 = vrsqrt.f32 %v12002_v7 }
0x2a37   :  { %v16036_v53 = vpop.eup %16035 }
0x2a38   :  { %v16038_v17 = vpop.eup %16037  ;;  %v12007_v26 = vmul.f32 %v16036_v53, %v11991_v62 }
0x2a39   :  { %v12006_v42 = vmul.f32 %v16038_v17, %v11990_v21 }
0x2a3a   :  { %v12013_v24 = vmul.f32 %v12011_v6, %v12007_v26 }
0x2a3b   :  { %v12012_v45 = vmul.f32 %v12011_v6, %v12006_v42 }
0x2a3c   :  { %v12019_v33 = vadd.f32 %v12717_v18, %v12013_v24 }
0x2a3d   :  { %v12018_v34 = vadd.f32 %v12717_v18, %v12012_v45 }
0x2a3f   :  { %14777 = vmatprep.mubr.msk.f32.mxu1 %vm257_vm2, %v12018_v34 }
0x2a40   :  { %14778 = vmatmul.mubr.msk.f32.vlgmr.msra.gmra.mrb[112].mxu1 %vm257_vm2, %v12019_v33 }
0x2b13   :  { %v14779_v16 = vpop.f32.mrb[112].mxu1 }
0x2b14   :  { %v12109_v22 = vadd.f32 %v14779_v16, %v12718_v9  ;;  %v12103_v23 = vpop.f32.mrb[113].mxu1 }
0x2b15   :  { %v12104_v56 = vadd.f32 %v12718_v9, %v12103_v23 }
0x2b16   :  { %12114 = vst.msk [vmem:[#allocation2 + $0x8] sm:$0xff] %vm12112_vm9, %v12109_v22 }
0x2b17   :  { %12113 = vst.msk [vmem:[#allocation2] sm:$0xff] %vm12112_vm9, %v12104_v56 }
0x2b18   :  { %16057 = shalt.err (!%p16054_p4)
}
0x2b19   :  { %s16058_s26 = scalar_lea.hbm %s18475_s27, 256 }
0x2b1a   :  { %p16059_p5 = scmp.ne.s32.totalorder %s18475_s27, %s16058_s26  ;;  %p16062_p6 = scmp.lt.u32.totalorder %s16058_s26, %s18475_s27 }
0x2b1c   :  { %p16064_p7 = pnand %p16062_p6, %p16059_p5 }
0x2b1e   :  { %16067 = shalt.err (!%p16064_p7)
}
0x2b1f   :  { %s16073_s30 = smov 128   ;;  %s16074_s22 = smov 8  }
0x2b20   :  { %12134 = dma.vmem_to_hbm [thread:$0]  %s12129_s16, 256, %s18475_s27, [#allocation3], %s16073_s30, %s16073_s30, %s16074_s22  }
0x2b21   :  { %16068 = dma.done.wait [#allocation3], 256  }
0x2b22   :  { %16069 = vsyncadd [#allocation3], 4294967040 }
0x2b23   :  { %12142 = vsyncpa [#allocation3], 1 }

</bundles_post_ra>
